<compile_context>
chip_gen: v5e
topology: v5e:2x2
jax: 0.10.0
libtpu: 0.0.40
codegen_flags: <defaults>
</compile_context>

<pallas_src>
import functools

import jax
import jax.numpy as jnp
from jax.experimental import pallas as pl
from jax.experimental.pallas import tpu as pltpu


def _round_up(v, m):
    return (v + m - 1) // m * m


def gckan_kernel(x_ref, ea_ref, row_ref, col_ref,
                 weT_ref, be_ref, wnT_ref, bn_ref,
                 grid_ref, invd_ref, bwT_ref, sw_ref,
                 out_ref, xt_ref, agg_ref,
                 *, spline_order, grid_pts):
    f32 = jnp.float32
    e_step = pl.program_id(0)
    n_steps = pl.num_programs(0)
    Np = xt_ref.shape[0]           # padded node count (multiple of 8)
    te = ea_ref.shape[0]           # edge tile size

    # ---- step 0: node linear transform + zero the aggregation accumulator ----
    @pl.when(e_step == 0)
    def _init():
        xt_ref[...] = (jnp.dot(x_ref[...], wnT_ref[...],
                               preferred_element_type=f32) + bn_ref[...])
        agg_ref[...] = jnp.zeros_like(agg_ref)

    # ---- per edge tile: edge transform, gather, message, scatter-add ---------
    ea_t = (jnp.dot(ea_ref[...], weT_ref[...], preferred_element_type=f32)
            + be_ref[...])                                        # (te, Fp) f32

    # gather x_t[row] via one-hot matmul (exact row selection, f32 accumulate)
    row_ids = row_ref[...]                                        # (te, 1) int32
    iota_en = jax.lax.broadcasted_iota(jnp.int32, (te, Np), 1)    # node id on lanes
    oh_row = (iota_en == row_ids).astype(f32)                     # (te, Np)
    x_row = jnp.dot(oh_row, xt_ref[...], preferred_element_type=f32)   # (te, Fp)

    msgs = ea_t * x_row                                           # (te, Fp) f32

    # scatter-add over col (torch index_add_) — one-hot built node-major so the
    # contraction is a plain (Np, te) @ (te, Fp) matmul.  Padded edges carry
    # col = -1 and therefore scatter nowhere.
    col_ids = col_ref[...]                                        # (1, te) int32
    iota_ne = jax.lax.broadcasted_iota(jnp.int32, (Np, te), 0)    # node id on sublanes
    oh_colT = (iota_ne == col_ids).astype(f32)                    # (Np, te)
    agg_ref[...] += jnp.dot(oh_colT, msgs,
                            preferred_element_type=f32)           # (Np, Fp)

    # ---- last step: eKAN (KANLinear) readout on the aggregated messages ------
    @pl.when(e_step == n_steps - 1)
    def _finalize():
        agg = agg_ref[...]                                        # (Np, Fp) f32

        # base branch: SiLU(agg) @ base_weight.T
        base_out = jnp.dot(agg * jax.nn.sigmoid(agg), bwT_ref[...],
                           preferred_element_type=f32)

        # spline branch: Cox–de Boor recursion, divides replaced by precomputed
        # reciprocals; grid / reciprocal tables loaded once, sliced in-register.
        G = grid_ref[...]                                         # (grid_pts, Fp)
        INV = invd_ref[...]                                       # (so*grid_pts, Fp)
        g = [G[m:m + 1, :] for m in range(grid_pts)]
        bases = [jnp.logical_and(agg >= g[m], agg < g[m + 1]).astype(f32)
                 for m in range(grid_pts - 1)]
        for k in range(1, spline_order + 1):
            off = (k - 1) * grid_pts
            inv = [INV[off + m: off + m + 1, :] for m in range(grid_pts - k)]
            bases = [
                (agg - g[m]) * inv[m] * bases[m]
                + (g[m + k + 1] - agg) * inv[m + 1] * bases[m + 1]
                for m in range(len(bases) - 1)
            ]
        # single fused spline matmul: (Np, (G+k)*Fp) @ ((G+k)*Fp, Fp)
        bcat = jnp.concatenate(bases, axis=1)
        spline_out = jnp.dot(bcat, sw_ref[...], preferred_element_type=f32)

        out_ref[...] = base_out + spline_out


def gckan_forward(x, edge_index, edge_attr, params, *, grid_size=4,
                  spline_order=3, edge_tile=256, lane=128):
    f32 = jnp.float32
    N, in_feat = x.shape
    E, edge_dim = edge_attr.shape
    out_feat = params["node_w"].shape[0]
    grid_pts = grid_size + 2 * spline_order + 1
    gk = grid_size + spline_order

    Fp = _round_up(out_feat, lane)      # lane-dense feature width (128 multiple)
    Np = _round_up(N, 8)                # sublane-aligned node count

    # edge tile: multiple of 128 (so the (1, te) col block is lane-legal) unless
    # the whole (8-rounded) edge set fits in a single tile.
    et = max(128, _round_up(edge_tile, 128))
    Ep8 = _round_up(E, 8)
    te = Ep8 if Ep8 <= et else et
    Ep = _round_up(E, te)

    # ---- pad graph tensors ----------------------------------------------------
    x_p = jnp.zeros((Np, in_feat), f32).at[:N].set(x.astype(f32))
    ea_p = jnp.zeros((Ep, edge_dim), f32).at[:E].set(edge_attr.astype(f32))
    row = edge_index[0].astype(jnp.int32)
    col = edge_index[1].astype(jnp.int32)
    row_p = jnp.zeros((Ep, 1), jnp.int32).at[:E, 0].set(row)
    col_p = jnp.full((1, Ep), -1, jnp.int32).at[0, :E].set(col)   # -1 => masked

    # ---- pad / reshape parameters (zero-pad F_out to the lane width) ----------
    def pad_out_rows(w):     # (out_feat, ...) -> (Fp, ...)
        return jnp.zeros((Fp,) + w.shape[1:], f32).at[:out_feat].set(w.astype(f32))

    weT = pad_out_rows(params["edge_w"]).T                           # (edge_dim, Fp)
    be = pad_out_rows(params["edge_b"].reshape(out_feat, 1)).T       # (1, Fp)
    wnT = pad_out_rows(params["node_w"]).T                           # (in_feat, Fp)
    bn = pad_out_rows(params["node_b"].reshape(out_feat, 1)).T       # (1, Fp)

    bw_p = jnp.zeros((Fp, Fp), f32).at[:out_feat, :out_feat].set(
        params["kan_base_w"].astype(f32))
    bwT = bw_p.T                                                     # (Fp, Fp)

    # grid: edge-replicate along the padded feature axis (keeps diffs non-zero)
    grid_feat = params["kan_grid"].astype(f32)                       # (out, grid_pts)
    grid_p = jnp.concatenate(
        [grid_feat,
         jnp.broadcast_to(grid_feat[-1:], (Fp - out_feat, grid_pts))], axis=0)
    grid_t = grid_p.T                                                # (grid_pts, Fp)

    # precomputed reciprocals of grid differences: row (k-1)*grid_pts + m holds
    # 1 / (grid[m+k] - grid[m]); unused tail slots padded with 1.0
    inv_rows = []
    for k in range(1, spline_order + 1):
        diff = grid_p[:, k:] - grid_p[:, :-k]                        # (Fp, gp-k)
        inv = jnp.concatenate([1.0 / diff, jnp.ones((Fp, k), f32)], axis=1)
        inv_rows.append(inv.T)                                       # (grid_pts, Fp)
    invd = jnp.concatenate(inv_rows, axis=0)                         # (so*gp, Fp)

    # fused spline weight: ((G+k)*Fp_in, Fp_out), matching lane-concatenated bases
    scaled = (params["kan_spline_w"] *
              params["kan_spline_scaler"][:, :, None]).astype(f32)   # (out, out, gk)
    scaled_p = jnp.zeros((Fp, Fp, gk), f32).at[:out_feat, :out_feat].set(scaled)
    sw = jnp.transpose(scaled_p, (2, 1, 0)).reshape(gk * Fp, Fp)

    kernel = functools.partial(gckan_kernel, spline_order=spline_order,
                               grid_pts=grid_pts)

    def full(shape):
        return pl.BlockSpec(shape, lambda e, _z=(0,) * len(shape): _z)

    out = pl.pallas_call(
        kernel,
        grid=(Ep // te,),
        in_specs=[
            full((Np, in_feat)),                                  # x
            pl.BlockSpec((te, edge_dim), lambda e: (e, 0)),       # edge_attr tile
            pl.BlockSpec((te, 1), lambda e: (e, 0)),              # row tile
            pl.BlockSpec((1, te), lambda e: (0, e)),              # col tile
            full((edge_dim, Fp)), full((1, Fp)),                  # edge W^T, b
            full((in_feat, Fp)), full((1, Fp)),                   # node W^T, b
            full((grid_pts, Fp)),                                 # KAN grid
            full((spline_order * grid_pts, Fp)),                  # 1/grid-diffs
            full((Fp, Fp)),                                       # base W^T
            full((gk * Fp, Fp)),                                  # fused spline W
        ],
        out_specs=pl.BlockSpec((Np, Fp), lambda e: (0, 0)),
        out_shape=jax.ShapeDtypeStruct((Np, Fp), f32),
        scratch_shapes=[pltpu.VMEM((Np, Fp), f32),                # x_t (gather src)
                        pltpu.VMEM((Np, Fp), f32)],               # agg accumulator
        compiler_params=pltpu.CompilerParams(
            dimension_semantics=("arbitrary",)),                  # edge axis = reduction
    )(x_p, ea_p, row_p, col_p, weT, be, wnT, bn, grid_t, invd, bwT, sw)

    return out[:N, :out_feat]


def reference_forward(x, edge_index, edge_attr, params, *, grid_size=4, spline_order=3):
    """Pure-JAX reference mirroring the PyTorch module (efficient-kan KANLinear)."""
    row, col = edge_index
    ea_t = edge_attr @ params["edge_w"].T + params["edge_b"]
    x_t = x @ params["node_w"].T + params["node_b"]
    msgs = ea_t * x_t[row]
    agg = jnp.zeros_like(x_t).at[col].add(msgs)

    grid = params["kan_grid"]                                     # (F, grid_pts)
    xx = agg[:, :, None]
    bases = ((xx >= grid[:, :-1]) & (xx < grid[:, 1:])).astype(jnp.float32)
    for k in range(1, spline_order + 1):
        bases = ((xx - grid[:, : -(k + 1)]) / (grid[:, k:-1] - grid[:, : -(k + 1)])
                 * bases[:, :, :-1]
                 + (grid[:, k + 1:] - xx) / (grid[:, k + 1:] - grid[:, 1:-k])
                 * bases[:, :, 1:])

    base_out = jax.nn.silu(agg) @ params["kan_base_w"].T
    scaled = params["kan_spline_w"] * params["kan_spline_scaler"][:, :, None]
    spline_out = bases.reshape(agg.shape[0], -1) @ scaled.reshape(scaled.shape[0], -1).T
    return base_out + spline_out


if __name__ == "__main__":
    # Full f32 matmuls on both the kernel trace and the reference so the
    # comparison is apples-to-apples (TPU default may otherwise use bf16 passes).
    jax.config.update("jax_default_matmul_precision", "highest")

    N, E = 32, 256
    IN_FEAT, OUT_FEAT, EDGE_DIM = 16, 8, 384
    GRID_SIZE, SPLINE_ORDER = 4, 3
    GK = GRID_SIZE + SPLINE_ORDER
    GRID_PTS = GRID_SIZE + 2 * SPLINE_ORDER + 1

    keys = jax.random.split(jax.random.PRNGKey(0), 12)
    x = jax.random.normal(keys[0], (N, IN_FEAT), jnp.float32)
    edge_attr = jax.random.normal(keys[1], (E, EDGE_DIM), jnp.float32)
    row = jax.random.randint(keys[2], (E,), 0, N, jnp.int32)
    col = jax.random.randint(keys[3], (E,), 0, N, jnp.int32)
    edge_index = jnp.stack([row, col], axis=0)

    # KAN grid: arange(-k, G+k+1) * h + grid_range[0]  (efficient-kan default [-1, 1])
    h = 2.0 / GRID_SIZE
    grid_1d = (jnp.arange(-SPLINE_ORDER, GRID_SIZE + SPLINE_ORDER + 1,
                          dtype=jnp.float32) * h - 1.0)              # (GRID_PTS,)
    kan_grid = jnp.broadcast_to(grid_1d, (OUT_FEAT, GRID_PTS))

    params = {
        "edge_w": jax.random.normal(keys[4], (OUT_FEAT, EDGE_DIM), jnp.float32) * 0.05,
        "edge_b": jax.random.normal(keys[5], (OUT_FEAT,), jnp.float32) * 0.05,
        "node_w": jax.random.normal(keys[6], (OUT_FEAT, IN_FEAT), jnp.float32) * 0.1,
        "node_b": jax.random.normal(keys[7], (OUT_FEAT,), jnp.float32) * 0.1,
        "kan_base_w": jax.random.normal(keys[8], (OUT_FEAT, OUT_FEAT), jnp.float32) * 0.2,
        "kan_spline_w": jax.random.normal(keys[9], (OUT_FEAT, OUT_FEAT, GK),
                                          jnp.float32) * 0.1,
        "kan_spline_scaler": jax.random.normal(keys[10], (OUT_FEAT, OUT_FEAT),
                                               jnp.float32) * 0.3 + 1.0,
        "kan_grid": kan_grid,
    }

    out = gckan_forward(x, edge_index, edge_attr, params,
                        grid_size=GRID_SIZE, spline_order=SPLINE_ORDER,
                        edge_tile=128)
    out = jax.block_until_ready(out)

    ref = reference_forward(x, edge_index, edge_attr, params,
                            grid_size=GRID_SIZE, spline_order=SPLINE_ORDER)
    ref = jax.block_until_ready(ref)

    assert out.shape == (N, OUT_FEAT)
    # f32 one-hot gather/scatter is exact; residual differences are f32 matmul
    # accumulation order + reciprocal-vs-divide rounding in the spline recursion.
    assert jnp.allclose(out, ref, atol=2e-3, rtol=2e-3), "kernel/reference mismatch"
    print("KERNEL_OK")
</pallas_src>

<mosaic_0001>
module attributes {stable_mosaic.version = 11 : i64} {
  func.func @gckan_kernel(%arg0: i32, %arg1: memref<32x16xf32, #tpu.memory_space<vmem>>, %arg2: memref<128x384xf32, #tpu.memory_space<vmem>>, %arg3: memref<128x1xi32, #tpu.memory_space<vmem>>, %arg4: memref<1x128xi32, #tpu.memory_space<vmem>>, %arg5: memref<384x128xf32, #tpu.memory_space<vmem>>, %arg6: memref<1x128xf32, #tpu.memory_space<vmem>>, %arg7: memref<16x128xf32, #tpu.memory_space<vmem>>, %arg8: memref<1x128xf32, #tpu.memory_space<vmem>>, %arg9: memref<11x128xf32, #tpu.memory_space<vmem>>, %arg10: memref<33x128xf32, #tpu.memory_space<vmem>>, %arg11: memref<128x128xf32, #tpu.memory_space<vmem>>, %arg12: memref<896x128xf32, #tpu.memory_space<vmem>>, %arg13: memref<32x128xf32, #tpu.memory_space<vmem>>, %arg14: memref<32x128xf32, #tpu.memory_space<vmem>>, %arg15: memref<32x128xf32, #tpu.memory_space<vmem>>) attributes {dimension_semantics = [#tpu.dimension_semantics<arbitrary>], iteration_bounds = array<i64: 2>, scalar_prefetch = 0 : i64, scratch_operands = 2 : i64, tpu.core_type = #tpu.core_type<tc>, window_params = [{pipeline_mode = #tpu.pipeline_mode<synchronous>, transform_indices = @transform_0, window_bounds = array<i64: 32, 16>}, {transform_indices = @transform_1, window_bounds = array<i64: 128, 384>}, {transform_indices = @transform_2, window_bounds = array<i64: 128, 1>}, {transform_indices = @transform_3, window_bounds = array<i64: 1, 128>}, {pipeline_mode = #tpu.pipeline_mode<synchronous>, transform_indices = @transform_4, window_bounds = array<i64: 384, 128>}, {pipeline_mode = #tpu.pipeline_mode<synchronous>, transform_indices = @transform_5, window_bounds = array<i64: 1, 128>}, {pipeline_mode = #tpu.pipeline_mode<synchronous>, transform_indices = @transform_6, window_bounds = array<i64: 16, 128>}, {pipeline_mode = #tpu.pipeline_mode<synchronous>, transform_indices = @transform_7, window_bounds = array<i64: 1, 128>}, {pipeline_mode = #tpu.pipeline_mode<synchronous>, transform_indices = @transform_8, window_bounds = array<i64: 11, 128>}, {pipeline_mode = #tpu.pipeline_mode<synchronous>, transform_indices = @transform_9, window_bounds = array<i64: 33, 128>}, {pipeline_mode = #tpu.pipeline_mode<synchronous>, transform_indices = @transform_10, window_bounds = array<i64: 128, 128>}, {pipeline_mode = #tpu.pipeline_mode<synchronous>, transform_indices = @transform_11, window_bounds = array<i64: 896, 128>}, {pipeline_mode = #tpu.pipeline_mode<synchronous>, transform_indices = @transform_12, window_bounds = array<i64: 32, 128>}]} {
    %c0_i32 = arith.constant 0 : i32
    %0 = arith.cmpi eq, %arg0, %c0_i32 : i32
    %1 = arith.extui %0 : i1 to i32
    %c0_i32_0 = arith.constant 0 : i32
    %2 = arith.cmpi ne, %1, %c0_i32_0 : i32
    scf.if %2 {
      %c0_19 = arith.constant 0 : index
      %c0_20 = arith.constant 0 : index
      %31 = vector.load %arg1[%c0_19, %c0_20] : memref<32x16xf32, #tpu.memory_space<vmem>>, vector<32x16xf32>
      %c0_21 = arith.constant 0 : index
      %c0_22 = arith.constant 0 : index
      %32 = vector.load %arg7[%c0_21, %c0_22] : memref<16x128xf32, #tpu.memory_space<vmem>>, vector<16x128xf32>
      %cst_23 = arith.constant dense<0.000000e+00> : vector<32x128xf32>
      %33 = tpu.matmul %31, %32, %cst_23 {dimension_numbers = #tpu.dot_dimension_numbers<[1], [0], [0], [1], [0, 0, 1, 1], [], []>, precision = #tpu.contract_precision<fp32>} : vector<32x16xf32>, vector<16x128xf32>, vector<32x128xf32> -> vector<32x128xf32>
      %c0_24 = arith.constant 0 : index
      %c0_25 = arith.constant 0 : index
      %34 = vector.load %arg8[%c0_24, %c0_25] : memref<1x128xf32, #tpu.memory_space<vmem>>, vector<1x128xf32>
      %35 = vector.broadcast %34 : vector<1x128xf32> to vector<32x128xf32>
      %36 = arith.addf %33, %35 : vector<32x128xf32>
      %c0_26 = arith.constant 0 : index
      %c0_27 = arith.constant 0 : index
      %37 = vector.load %arg14[%c0_26, %c0_27] : memref<32x128xf32, #tpu.memory_space<vmem>>, vector<32x128xf32>
      tpu.vector_store %arg14[%c0_26, %c0_27], %36 {strides = array<i32>} : memref<32x128xf32, #tpu.memory_space<vmem>>, vector<32x128xf32>,
      %cst_28 = arith.constant 0.000000e+00 : f32
      %38 = vector.broadcast %cst_28 : f32 to vector<32x128xf32>
      %c0_29 = arith.constant 0 : index
      %c0_30 = arith.constant 0 : index
      %39 = vector.load %arg15[%c0_29, %c0_30] : memref<32x128xf32, #tpu.memory_space<vmem>>, vector<32x128xf32>
      tpu.vector_store %arg15[%c0_29, %c0_30], %38 {strides = array<i32>} : memref<32x128xf32, #tpu.memory_space<vmem>>, vector<32x128xf32>,
    } else {
    }
    %c0 = arith.constant 0 : index
    %c0_1 = arith.constant 0 : index
    %3 = vector.load %arg2[%c0, %c0_1] : memref<128x384xf32, #tpu.memory_space<vmem>>, vector<128x384xf32>
    %c0_2 = arith.constant 0 : index
    %c0_3 = arith.constant 0 : index
    %4 = vector.load %arg5[%c0_2, %c0_3] : memref<384x128xf32, #tpu.memory_space<vmem>>, vector<384x128xf32>
    %cst = arith.constant dense<0.000000e+00> : vector<128x128xf32>
    %5 = tpu.matmul %3, %4, %cst {dimension_numbers = #tpu.dot_dimension_numbers<[1], [0], [0], [1], [0, 0, 1, 1], [], []>, precision = #tpu.contract_precision<fp32>} : vector<128x384xf32>, vector<384x128xf32>, vector<128x128xf32> -> vector<128x128xf32>
    %c0_4 = arith.constant 0 : index
    %c0_5 = arith.constant 0 : index
    %6 = vector.load %arg6[%c0_4, %c0_5] : memref<1x128xf32, #tpu.memory_space<vmem>>, vector<1x128xf32>
    %7 = vector.broadcast %6 : vector<1x128xf32> to vector<128x128xf32>
    %8 = arith.addf %5, %7 : vector<128x128xf32>
    %c0_6 = arith.constant 0 : index
    %c0_7 = arith.constant 0 : index
    %9 = vector.load %arg3[%c0_6, %c0_7] : memref<128x1xi32, #tpu.memory_space<vmem>>, vector<128x1xi32>
    %10 = tpu.iota {dimensions = array<i32: 1>} : vector<128x32xi32>
    %11 = vector.broadcast %9 : vector<128x1xi32> to vector<128x32xi32>
    %12 = arith.cmpi eq, %10, %11 : vector<128x32xi32>
    %13 = arith.extui %12 : vector<128x32xi1> to vector<128x32xi32>
    %14 = arith.sitofp %13 : vector<128x32xi32> to vector<128x32xf32>
    %c0_8 = arith.constant 0 : index
    %c0_9 = arith.constant 0 : index
    %15 = vector.load %arg14[%c0_8, %c0_9] : memref<32x128xf32, #tpu.memory_space<vmem>>, vector<32x128xf32>
    %cst_10 = arith.constant dense<0.000000e+00> : vector<128x128xf32>
    %16 = tpu.matmul %14, %15, %cst_10 {dimension_numbers = #tpu.dot_dimension_numbers<[1], [0], [0], [1], [0, 0, 1, 1], [], []>, precision = #tpu.contract_precision<fp32>} : vector<128x32xf32>, vector<32x128xf32>, vector<128x128xf32> -> vector<128x128xf32>
    %17 = arith.mulf %8, %16 : vector<128x128xf32>
    %c0_11 = arith.constant 0 : index
    %c0_12 = arith.constant 0 : index
    %18 = vector.load %arg4[%c0_11, %c0_12] : memref<1x128xi32, #tpu.memory_space<vmem>>, vector<1x128xi32>
    %19 = tpu.iota {dimensions = array<i32: 0>} : vector<32x128xi32>
    %20 = vector.broadcast %18 : vector<1x128xi32> to vector<32x128xi32>
    %21 = arith.cmpi eq, %19, %20 : vector<32x128xi32>
    %22 = arith.extui %21 : vector<32x128xi1> to vector<32x128xi32>
    %23 = arith.sitofp %22 : vector<32x128xi32> to vector<32x128xf32>
    %c0_13 = arith.constant 0 : index
    %c0_14 = arith.constant 0 : index
    %24 = vector.load %arg15[%c0_13, %c0_14] : memref<32x128xf32, #tpu.memory_space<vmem>>, vector<32x128xf32>
    %cst_15 = arith.constant dense<0.000000e+00> : vector<32x128xf32>
    %25 = tpu.matmul %23, %17, %cst_15 {dimension_numbers = #tpu.dot_dimension_numbers<[1], [0], [0], [1], [0, 0, 1, 1], [], []>, precision = #tpu.contract_precision<fp32>} : vector<32x128xf32>, vector<128x128xf32>, vector<32x128xf32> -> vector<32x128xf32>
    %26 = arith.addf %24, %25 : vector<32x128xf32>
    %c0_16 = arith.constant 0 : index
    %c0_17 = arith.constant 0 : index
    %27 = vector.load %arg15[%c0_16, %c0_17] : memref<32x128xf32, #tpu.memory_space<vmem>>, vector<32x128xf32>
    tpu.vector_store %arg15[%c0_16, %c0_17], %26 {strides = array<i32>} : memref<32x128xf32, #tpu.memory_space<vmem>>, vector<32x128xf32>,
    %c1_i32 = arith.constant 1 : i32
    %28 = arith.cmpi eq, %arg0, %c1_i32 : i32
    %29 = arith.extui %28 : i1 to i32
    %c0_i32_18 = arith.constant 0 : i32
    %30 = arith.cmpi ne, %29, %c0_i32_18 : i32
    scf.if %30 {
      %c0_19 = arith.constant 0 : index
      %c0_20 = arith.constant 0 : index
      %31 = vector.load %arg15[%c0_19, %c0_20] : memref<32x128xf32, #tpu.memory_space<vmem>>, vector<32x128xf32>
      %32 = arith.negf %31 : vector<32x128xf32>
      %33 = math.exp %32 : vector<32x128xf32>
      %cst_21 = arith.constant 1.000000e+00 : f32
      %34 = vector.broadcast %cst_21 : f32 to vector<32x128xf32>
      %35 = arith.addf %34, %33 : vector<32x128xf32>
      %36 = arith.divf %34, %35 : vector<32x128xf32>
      %37 = arith.mulf %31, %36 : vector<32x128xf32>
      %c0_22 = arith.constant 0 : index
      %c0_23 = arith.constant 0 : index
      %38 = vector.load %arg11[%c0_22, %c0_23] : memref<128x128xf32, #tpu.memory_space<vmem>>, vector<128x128xf32>
      %cst_24 = arith.constant dense<0.000000e+00> : vector<32x128xf32>
      %39 = tpu.matmul %37, %38, %cst_24 {dimension_numbers = #tpu.dot_dimension_numbers<[1], [0], [0], [1], [0, 0, 1, 1], [], []>, precision = #tpu.contract_precision<fp32>} : vector<32x128xf32>, vector<128x128xf32>, vector<32x128xf32> -> vector<32x128xf32>
      %c0_25 = arith.constant 0 : index
      %c0_26 = arith.constant 0 : index
      %40 = vector.load %arg9[%c0_25, %c0_26] : memref<11x128xf32, #tpu.memory_space<vmem>>, vector<11x128xf32>
      %c0_27 = arith.constant 0 : index
      %c0_28 = arith.constant 0 : index
      %41 = vector.load %arg10[%c0_27, %c0_28] : memref<33x128xf32, #tpu.memory_space<vmem>>, vector<33x128xf32>
      %42 = vector.extract_strided_slice %40 {offsets = [0, 0], sizes = [1, 128], strides = [1, 1]} : vector<11x128xf32> to vector<1x128xf32>
      %43 = vector.extract_strided_slice %40 {offsets = [1, 0], sizes = [1, 128], strides = [1, 1]} : vector<11x128xf32> to vector<1x128xf32>
      %44 = vector.extract_strided_slice %40 {offsets = [2, 0], sizes = [1, 128], strides = [1, 1]} : vector<11x128xf32> to vector<1x128xf32>
      %45 = vector.extract_strided_slice %40 {offsets = [3, 0], sizes = [1, 128], strides = [1, 1]} : vector<11x128xf32> to vector<1x128xf32>
      %46 = vector.extract_strided_slice %40 {offsets = [4, 0], sizes = [1, 128], strides = [1, 1]} : vector<11x128xf32> to vector<1x128xf32>
      %47 = vector.extract_strided_slice %40 {offsets = [5, 0], sizes = [1, 128], strides = [1, 1]} : vector<11x128xf32> to vector<1x128xf32>
      %48 = vector.extract_strided_slice %40 {offsets = [6, 0], sizes = [1, 128], strides = [1, 1]} : vector<11x128xf32> to vector<1x128xf32>
      %49 = vector.extract_strided_slice %40 {offsets = [7, 0], sizes = [1, 128], strides = [1, 1]} : vector<11x128xf32> to vector<1x128xf32>
      %50 = vector.extract_strided_slice %40 {offsets = [8, 0], sizes = [1, 128], strides = [1, 1]} : vector<11x128xf32> to vector<1x128xf32>
      %51 = vector.extract_strided_slice %40 {offsets = [9, 0], sizes = [1, 128], strides = [1, 1]} : vector<11x128xf32> to vector<1x128xf32>
      %52 = vector.extract_strided_slice %40 {offsets = [10, 0], sizes = [1, 128], strides = [1, 1]} : vector<11x128xf32> to vector<1x128xf32>
      %53 = vector.broadcast %42 : vector<1x128xf32> to vector<32x128xf32>
      %54 = arith.cmpf oge, %31, %53 : vector<32x128xf32>
      %55 = vector.broadcast %43 : vector<1x128xf32> to vector<32x128xf32>
      %56 = arith.cmpf olt, %31, %55 : vector<32x128xf32>
      %57 = arith.andi %54, %56 : vector<32x128xi1>
      %58 = arith.extui %57 : vector<32x128xi1> to vector<32x128xi32>
      %59 = arith.sitofp %58 : vector<32x128xi32> to vector<32x128xf32>
      %60 = vector.broadcast %43 : vector<1x128xf32> to vector<32x128xf32>
      %61 = arith.cmpf oge, %31, %60 : vector<32x128xf32>
      %62 = vector.broadcast %44 : vector<1x128xf32> to vector<32x128xf32>
      %63 = arith.cmpf olt, %31, %62 : vector<32x128xf32>
      %64 = arith.andi %61, %63 : vector<32x128xi1>
      %65 = arith.extui %64 : vector<32x128xi1> to vector<32x128xi32>
      %66 = arith.sitofp %65 : vector<32x128xi32> to vector<32x128xf32>
      %67 = vector.broadcast %44 : vector<1x128xf32> to vector<32x128xf32>
      %68 = arith.cmpf oge, %31, %67 : vector<32x128xf32>
      %69 = vector.broadcast %45 : vector<1x128xf32> to vector<32x128xf32>
      %70 = arith.cmpf olt, %31, %69 : vector<32x128xf32>
      %71 = arith.andi %68, %70 : vector<32x128xi1>
      %72 = arith.extui %71 : vector<32x128xi1> to vector<32x128xi32>
      %73 = arith.sitofp %72 : vector<32x128xi32> to vector<32x128xf32>
      %74 = vector.broadcast %45 : vector<1x128xf32> to vector<32x128xf32>
      %75 = arith.cmpf oge, %31, %74 : vector<32x128xf32>
      %76 = vector.broadcast %46 : vector<1x128xf32> to vector<32x128xf32>
      %77 = arith.cmpf olt, %31, %76 : vector<32x128xf32>
      %78 = arith.andi %75, %77 : vector<32x128xi1>
      %79 = arith.extui %78 : vector<32x128xi1> to vector<32x128xi32>
      %80 = arith.sitofp %79 : vector<32x128xi32> to vector<32x128xf32>
      %81 = vector.broadcast %46 : vector<1x128xf32> to vector<32x128xf32>
      %82 = arith.cmpf oge, %31, %81 : vector<32x128xf32>
      %83 = vector.broadcast %47 : vector<1x128xf32> to vector<32x128xf32>
      %84 = arith.cmpf olt, %31, %83 : vector<32x128xf32>
      %85 = arith.andi %82, %84 : vector<32x128xi1>
      %86 = arith.extui %85 : vector<32x128xi1> to vector<32x128xi32>
      %87 = arith.sitofp %86 : vector<32x128xi32> to vector<32x128xf32>
      %88 = vector.broadcast %47 : vector<1x128xf32> to vector<32x128xf32>
      %89 = arith.cmpf oge, %31, %88 : vector<32x128xf32>
      %90 = vector.broadcast %48 : vector<1x128xf32> to vector<32x128xf32>
      %91 = arith.cmpf olt, %31, %90 : vector<32x128xf32>
      %92 = arith.andi %89, %91 : vector<32x128xi1>
      %93 = arith.extui %92 : vector<32x128xi1> to vector<32x128xi32>
      %94 = arith.sitofp %93 : vector<32x128xi32> to vector<32x128xf32>
      %95 = vector.broadcast %48 : vector<1x128xf32> to vector<32x128xf32>
      %96 = arith.cmpf oge, %31, %95 : vector<32x128xf32>
      %97 = vector.broadcast %49 : vector<1x128xf32> to vector<32x128xf32>
      %98 = arith.cmpf olt, %31, %97 : vector<32x128xf32>
      %99 = arith.andi %96, %98 : vector<32x128xi1>
      %100 = arith.extui %99 : vector<32x128xi1> to vector<32x128xi32>
      %101 = arith.sitofp %100 : vector<32x128xi32> to vector<32x128xf32>
      %102 = vector.broadcast %49 : vector<1x128xf32> to vector<32x128xf32>
      %103 = arith.cmpf oge, %31, %102 : vector<32x128xf32>
      %104 = vector.broadcast %50 : vector<1x128xf32> to vector<32x128xf32>
      %105 = arith.cmpf olt, %31, %104 : vector<32x128xf32>
      %106 = arith.andi %103, %105 : vector<32x128xi1>
      %107 = arith.extui %106 : vector<32x128xi1> to vector<32x128xi32>
      %108 = arith.sitofp %107 : vector<32x128xi32> to vector<32x128xf32>
      %109 = vector.broadcast %50 : vector<1x128xf32> to vector<32x128xf32>
      %110 = arith.cmpf oge, %31, %109 : vector<32x128xf32>
      %111 = vector.broadcast %51 : vector<1x128xf32> to vector<32x128xf32>
      %112 = arith.cmpf olt, %31, %111 : vector<32x128xf32>
      %113 = arith.andi %110, %112 : vector<32x128xi1>
      %114 = arith.extui %113 : vector<32x128xi1> to vector<32x128xi32>
      %115 = arith.sitofp %114 : vector<32x128xi32> to vector<32x128xf32>
      %116 = vector.broadcast %51 : vector<1x128xf32> to vector<32x128xf32>
      %117 = arith.cmpf oge, %31, %116 : vector<32x128xf32>
      %118 = vector.broadcast %52 : vector<1x128xf32> to vector<32x128xf32>
      %119 = arith.cmpf olt, %31, %118 : vector<32x128xf32>
      %120 = arith.andi %117, %119 : vector<32x128xi1>
      %121 = arith.extui %120 : vector<32x128xi1> to vector<32x128xi32>
      %122 = arith.sitofp %121 : vector<32x128xi32> to vector<32x128xf32>
      %123 = vector.extract_strided_slice %41 {offsets = [0, 0], sizes = [1, 128], strides = [1, 1]} : vector<33x128xf32> to vector<1x128xf32>
      %124 = vector.extract_strided_slice %41 {offsets = [1, 0], sizes = [1, 128], strides = [1, 1]} : vector<33x128xf32> to vector<1x128xf32>
      %125 = vector.extract_strided_slice %41 {offsets = [2, 0], sizes = [1, 128], strides = [1, 1]} : vector<33x128xf32> to vector<1x128xf32>
      %126 = vector.extract_strided_slice %41 {offsets = [3, 0], sizes = [1, 128], strides = [1, 1]} : vector<33x128xf32> to vector<1x128xf32>
      %127 = vector.extract_strided_slice %41 {offsets = [4, 0], sizes = [1, 128], strides = [1, 1]} : vector<33x128xf32> to vector<1x128xf32>
      %128 = vector.extract_strided_slice %41 {offsets = [5, 0], sizes = [1, 128], strides = [1, 1]} : vector<33x128xf32> to vector<1x128xf32>
      %129 = vector.extract_strided_slice %41 {offsets = [6, 0], sizes = [1, 128], strides = [1, 1]} : vector<33x128xf32> to vector<1x128xf32>
      %130 = vector.extract_strided_slice %41 {offsets = [7, 0], sizes = [1, 128], strides = [1, 1]} : vector<33x128xf32> to vector<1x128xf32>
      %131 = vector.extract_strided_slice %41 {offsets = [8, 0], sizes = [1, 128], strides = [1, 1]} : vector<33x128xf32> to vector<1x128xf32>
      %132 = vector.extract_strided_slice %41 {offsets = [9, 0], sizes = [1, 128], strides = [1, 1]} : vector<33x128xf32> to vector<1x128xf32>
      %133 = vector.broadcast %42 : vector<1x128xf32> to vector<32x128xf32>
      %134 = arith.subf %31, %133 : vector<32x128xf32>
      %135 = vector.broadcast %123 : vector<1x128xf32> to vector<32x128xf32>
      %136 = arith.mulf %134, %135 : vector<32x128xf32>
      %137 = arith.mulf %136, %59 : vector<32x128xf32>
      %138 = vector.broadcast %44 : vector<1x128xf32> to vector<32x128xf32>
      %139 = arith.subf %138, %31 : vector<32x128xf32>
      %140 = vector.broadcast %124 : vector<1x128xf32> to vector<32x128xf32>
      %141 = arith.mulf %139, %140 : vector<32x128xf32>
      %142 = arith.mulf %141, %66 : vector<32x128xf32>
      %143 = arith.addf %137, %142 : vector<32x128xf32>
      %144 = vector.broadcast %43 : vector<1x128xf32> to vector<32x128xf32>
      %145 = arith.subf %31, %144 : vector<32x128xf32>
      %146 = vector.broadcast %124 : vector<1x128xf32> to vector<32x128xf32>
      %147 = arith.mulf %145, %146 : vector<32x128xf32>
      %148 = arith.mulf %147, %66 : vector<32x128xf32>
      %149 = vector.broadcast %45 : vector<1x128xf32> to vector<32x128xf32>
      %150 = arith.subf %149, %31 : vector<32x128xf32>
      %151 = vector.broadcast %125 : vector<1x128xf32> to vector<32x128xf32>
      %152 = arith.mulf %150, %151 : vector<32x128xf32>
      %153 = arith.mulf %152, %73 : vector<32x128xf32>
      %154 = arith.addf %148, %153 : vector<32x128xf32>
      %155 = vector.broadcast %44 : vector<1x128xf32> to vector<32x128xf32>
      %156 = arith.subf %31, %155 : vector<32x128xf32>
      %157 = vector.broadcast %125 : vector<1x128xf32> to vector<32x128xf32>
      %158 = arith.mulf %156, %157 : vector<32x128xf32>
      %159 = arith.mulf %158, %73 : vector<32x128xf32>
      %160 = vector.broadcast %46 : vector<1x128xf32> to vector<32x128xf32>
      %161 = arith.subf %160, %31 : vector<32x128xf32>
      %162 = vector.broadcast %126 : vector<1x128xf32> to vector<32x128xf32>
      %163 = arith.mulf %161, %162 : vector<32x128xf32>
      %164 = arith.mulf %163, %80 : vector<32x128xf32>
      %165 = arith.addf %159, %164 : vector<32x128xf32>
      %166 = vector.broadcast %45 : vector<1x128xf32> to vector<32x128xf32>
      %167 = arith.subf %31, %166 : vector<32x128xf32>
      %168 = vector.broadcast %126 : vector<1x128xf32> to vector<32x128xf32>
      %169 = arith.mulf %167, %168 : vector<32x128xf32>
      %170 = arith.mulf %169, %80 : vector<32x128xf32>
      %171 = vector.broadcast %47 : vector<1x128xf32> to vector<32x128xf32>
      %172 = arith.subf %171, %31 : vector<32x128xf32>
      %173 = vector.broadcast %127 : vector<1x128xf32> to vector<32x128xf32>
      %174 = arith.mulf %172, %173 : vector<32x128xf32>
      %175 = arith.mulf %174, %87 : vector<32x128xf32>
      %176 = arith.addf %170, %175 : vector<32x128xf32>
      %177 = vector.broadcast %46 : vector<1x128xf32> to vector<32x128xf32>
      %178 = arith.subf %31, %177 : vector<32x128xf32>
      %179 = vector.broadcast %127 : vector<1x128xf32> to vector<32x128xf32>
      %180 = arith.mulf %178, %179 : vector<32x128xf32>
      %181 = arith.mulf %180, %87 : vector<32x128xf32>
      %182 = vector.broadcast %48 : vector<1x128xf32> to vector<32x128xf32>
      %183 = arith.subf %182, %31 : vector<32x128xf32>
      %184 = vector.broadcast %128 : vector<1x128xf32> to vector<32x128xf32>
      %185 = arith.mulf %183, %184 : vector<32x128xf32>
      %186 = arith.mulf %185, %94 : vector<32x128xf32>
      %187 = arith.addf %181, %186 : vector<32x128xf32>
      %188 = vector.broadcast %47 : vector<1x128xf32> to vector<32x128xf32>
      %189 = arith.subf %31, %188 : vector<32x128xf32>
      %190 = vector.broadcast %128 : vector<1x128xf32> to vector<32x128xf32>
      %191 = arith.mulf %189, %190 : vector<32x128xf32>
      %192 = arith.mulf %191, %94 : vector<32x128xf32>
      %193 = vector.broadcast %49 : vector<1x128xf32> to vector<32x128xf32>
      %194 = arith.subf %193, %31 : vector<32x128xf32>
      %195 = vector.broadcast %129 : vector<1x128xf32> to vector<32x128xf32>
      %196 = arith.mulf %194, %195 : vector<32x128xf32>
      %197 = arith.mulf %196, %101 : vector<32x128xf32>
      %198 = arith.addf %192, %197 : vector<32x128xf32>
      %199 = vector.broadcast %48 : vector<1x128xf32> to vector<32x128xf32>
      %200 = arith.subf %31, %199 : vector<32x128xf32>
      %201 = vector.broadcast %129 : vector<1x128xf32> to vector<32x128xf32>
      %202 = arith.mulf %200, %201 : vector<32x128xf32>
      %203 = arith.mulf %202, %101 : vector<32x128xf32>
      %204 = vector.broadcast %50 : vector<1x128xf32> to vector<32x128xf32>
      %205 = arith.subf %204, %31 : vector<32x128xf32>
      %206 = vector.broadcast %130 : vector<1x128xf32> to vector<32x128xf32>
      %207 = arith.mulf %205, %206 : vector<32x128xf32>
      %208 = arith.mulf %207, %108 : vector<32x128xf32>
      %209 = arith.addf %203, %208 : vector<32x128xf32>
      %210 = vector.broadcast %49 : vector<1x128xf32> to vector<32x128xf32>
      %211 = arith.subf %31, %210 : vector<32x128xf32>
      %212 = vector.broadcast %130 : vector<1x128xf32> to vector<32x128xf32>
      %213 = arith.mulf %211, %212 : vector<32x128xf32>
      %214 = arith.mulf %213, %108 : vector<32x128xf32>
      %215 = vector.broadcast %51 : vector<1x128xf32> to vector<32x128xf32>
      %216 = arith.subf %215, %31 : vector<32x128xf32>
      %217 = vector.broadcast %131 : vector<1x128xf32> to vector<32x128xf32>
      %218 = arith.mulf %216, %217 : vector<32x128xf32>
      %219 = arith.mulf %218, %115 : vector<32x128xf32>
      %220 = arith.addf %214, %219 : vector<32x128xf32>
      %221 = vector.broadcast %50 : vector<1x128xf32> to vector<32x128xf32>
      %222 = arith.subf %31, %221 : vector<32x128xf32>
      %223 = vector.broadcast %131 : vector<1x128xf32> to vector<32x128xf32>
      %224 = arith.mulf %222, %223 : vector<32x128xf32>
      %225 = arith.mulf %224, %115 : vector<32x128xf32>
      %226 = vector.broadcast %52 : vector<1x128xf32> to vector<32x128xf32>
      %227 = arith.subf %226, %31 : vector<32x128xf32>
      %228 = vector.broadcast %132 : vector<1x128xf32> to vector<32x128xf32>
      %229 = arith.mulf %227, %228 : vector<32x128xf32>
      %230 = arith.mulf %229, %122 : vector<32x128xf32>
      %231 = arith.addf %225, %230 : vector<32x128xf32>
      %232 = vector.extract_strided_slice %41 {offsets = [11, 0], sizes = [1, 128], strides = [1, 1]} : vector<33x128xf32> to vector<1x128xf32>
      %233 = vector.extract_strided_slice %41 {offsets = [12, 0], sizes = [1, 128], strides = [1, 1]} : vector<33x128xf32> to vector<1x128xf32>
      %234 = vector.extract_strided_slice %41 {offsets = [13, 0], sizes = [1, 128], strides = [1, 1]} : vector<33x128xf32> to vector<1x128xf32>
      %235 = vector.extract_strided_slice %41 {offsets = [14, 0], sizes = [1, 128], strides = [1, 1]} : vector<33x128xf32> to vector<1x128xf32>
      %236 = vector.extract_strided_slice %41 {offsets = [15, 0], sizes = [1, 128], strides = [1, 1]} : vector<33x128xf32> to vector<1x128xf32>
      %237 = vector.extract_strided_slice %41 {offsets = [16, 0], sizes = [1, 128], strides = [1, 1]} : vector<33x128xf32> to vector<1x128xf32>
      %238 = vector.extract_strided_slice %41 {offsets = [17, 0], sizes = [1, 128], strides = [1, 1]} : vector<33x128xf32> to vector<1x128xf32>
      %239 = vector.extract_strided_slice %41 {offsets = [18, 0], sizes = [1, 128], strides = [1, 1]} : vector<33x128xf32> to vector<1x128xf32>
      %240 = vector.extract_strided_slice %41 {offsets = [19, 0], sizes = [1, 128], strides = [1, 1]} : vector<33x128xf32> to vector<1x128xf32>
      %241 = vector.broadcast %42 : vector<1x128xf32> to vector<32x128xf32>
      %242 = arith.subf %31, %241 : vector<32x128xf32>
      %243 = vector.broadcast %232 : vector<1x128xf32> to vector<32x128xf32>
      %244 = arith.mulf %242, %243 : vector<32x128xf32>
      %245 = arith.mulf %244, %143 : vector<32x128xf32>
      %246 = vector.broadcast %45 : vector<1x128xf32> to vector<32x128xf32>
      %247 = arith.subf %246, %31 : vector<32x128xf32>
      %248 = vector.broadcast %233 : vector<1x128xf32> to vector<32x128xf32>
      %249 = arith.mulf %247, %248 : vector<32x128xf32>
      %250 = arith.mulf %249, %154 : vector<32x128xf32>
      %251 = arith.addf %245, %250 : vector<32x128xf32>
      %252 = vector.broadcast %43 : vector<1x128xf32> to vector<32x128xf32>
      %253 = arith.subf %31, %252 : vector<32x128xf32>
      %254 = vector.broadcast %233 : vector<1x128xf32> to vector<32x128xf32>
      %255 = arith.mulf %253, %254 : vector<32x128xf32>
      %256 = arith.mulf %255, %154 : vector<32x128xf32>
      %257 = vector.broadcast %46 : vector<1x128xf32> to vector<32x128xf32>
      %258 = arith.subf %257, %31 : vector<32x128xf32>
      %259 = vector.broadcast %234 : vector<1x128xf32> to vector<32x128xf32>
      %260 = arith.mulf %258, %259 : vector<32x128xf32>
      %261 = arith.mulf %260, %165 : vector<32x128xf32>
      %262 = arith.addf %256, %261 : vector<32x128xf32>
      %263 = vector.broadcast %44 : vector<1x128xf32> to vector<32x128xf32>
      %264 = arith.subf %31, %263 : vector<32x128xf32>
      %265 = vector.broadcast %234 : vector<1x128xf32> to vector<32x128xf32>
      %266 = arith.mulf %264, %265 : vector<32x128xf32>
      %267 = arith.mulf %266, %165 : vector<32x128xf32>
      %268 = vector.broadcast %47 : vector<1x128xf32> to vector<32x128xf32>
      %269 = arith.subf %268, %31 : vector<32x128xf32>
      %270 = vector.broadcast %235 : vector<1x128xf32> to vector<32x128xf32>
      %271 = arith.mulf %269, %270 : vector<32x128xf32>
      %272 = arith.mulf %271, %176 : vector<32x128xf32>
      %273 = arith.addf %267, %272 : vector<32x128xf32>
      %274 = vector.broadcast %45 : vector<1x128xf32> to vector<32x128xf32>
      %275 = arith.subf %31, %274 : vector<32x128xf32>
      %276 = vector.broadcast %235 : vector<1x128xf32> to vector<32x128xf32>
      %277 = arith.mulf %275, %276 : vector<32x128xf32>
      %278 = arith.mulf %277, %176 : vector<32x128xf32>
      %279 = vector.broadcast %48 : vector<1x128xf32> to vector<32x128xf32>
      %280 = arith.subf %279, %31 : vector<32x128xf32>
      %281 = vector.broadcast %236 : vector<1x128xf32> to vector<32x128xf32>
      %282 = arith.mulf %280, %281 : vector<32x128xf32>
      %283 = arith.mulf %282, %187 : vector<32x128xf32>
      %284 = arith.addf %278, %283 : vector<32x128xf32>
      %285 = vector.broadcast %46 : vector<1x128xf32> to vector<32x128xf32>
      %286 = arith.subf %31, %285 : vector<32x128xf32>
      %287 = vector.broadcast %236 : vector<1x128xf32> to vector<32x128xf32>
      %288 = arith.mulf %286, %287 : vector<32x128xf32>
      %289 = arith.mulf %288, %187 : vector<32x128xf32>
      %290 = vector.broadcast %49 : vector<1x128xf32> to vector<32x128xf32>
      %291 = arith.subf %290, %31 : vector<32x128xf32>
      %292 = vector.broadcast %237 : vector<1x128xf32> to vector<32x128xf32>
      %293 = arith.mulf %291, %292 : vector<32x128xf32>
      %294 = arith.mulf %293, %198 : vector<32x128xf32>
      %295 = arith.addf %289, %294 : vector<32x128xf32>
      %296 = vector.broadcast %47 : vector<1x128xf32> to vector<32x128xf32>
      %297 = arith.subf %31, %296 : vector<32x128xf32>
      %298 = vector.broadcast %237 : vector<1x128xf32> to vector<32x128xf32>
      %299 = arith.mulf %297, %298 : vector<32x128xf32>
      %300 = arith.mulf %299, %198 : vector<32x128xf32>
      %301 = vector.broadcast %50 : vector<1x128xf32> to vector<32x128xf32>
      %302 = arith.subf %301, %31 : vector<32x128xf32>
      %303 = vector.broadcast %238 : vector<1x128xf32> to vector<32x128xf32>
      %304 = arith.mulf %302, %303 : vector<32x128xf32>
      %305 = arith.mulf %304, %209 : vector<32x128xf32>
      %306 = arith.addf %300, %305 : vector<32x128xf32>
      %307 = vector.broadcast %48 : vector<1x128xf32> to vector<32x128xf32>
      %308 = arith.subf %31, %307 : vector<32x128xf32>
      %309 = vector.broadcast %238 : vector<1x128xf32> to vector<32x128xf32>
      %310 = arith.mulf %308, %309 : vector<32x128xf32>
      %311 = arith.mulf %310, %209 : vector<32x128xf32>
      %312 = vector.broadcast %51 : vector<1x128xf32> to vector<32x128xf32>
      %313 = arith.subf %312, %31 : vector<32x128xf32>
      %314 = vector.broadcast %239 : vector<1x128xf32> to vector<32x128xf32>
      %315 = arith.mulf %313, %314 : vector<32x128xf32>
      %316 = arith.mulf %315, %220 : vector<32x128xf32>
      %317 = arith.addf %311, %316 : vector<32x128xf32>
      %318 = vector.broadcast %49 : vector<1x128xf32> to vector<32x128xf32>
      %319 = arith.subf %31, %318 : vector<32x128xf32>
      %320 = vector.broadcast %239 : vector<1x128xf32> to vector<32x128xf32>
      %321 = arith.mulf %319, %320 : vector<32x128xf32>
      %322 = arith.mulf %321, %220 : vector<32x128xf32>
      %323 = vector.broadcast %52 : vector<1x128xf32> to vector<32x128xf32>
      %324 = arith.subf %323, %31 : vector<32x128xf32>
      %325 = vector.broadcast %240 : vector<1x128xf32> to vector<32x128xf32>
      %326 = arith.mulf %324, %325 : vector<32x128xf32>
      %327 = arith.mulf %326, %231 : vector<32x128xf32>
      %328 = arith.addf %322, %327 : vector<32x128xf32>
      %329 = vector.extract_strided_slice %41 {offsets = [22, 0], sizes = [1, 128], strides = [1, 1]} : vector<33x128xf32> to vector<1x128xf32>
      %330 = vector.extract_strided_slice %41 {offsets = [23, 0], sizes = [1, 128], strides = [1, 1]} : vector<33x128xf32> to vector<1x128xf32>
      %331 = vector.extract_strided_slice %41 {offsets = [24, 0], sizes = [1, 128], strides = [1, 1]} : vector<33x128xf32> to vector<1x128xf32>
      %332 = vector.extract_strided_slice %41 {offsets = [25, 0], sizes = [1, 128], strides = [1, 1]} : vector<33x128xf32> to vector<1x128xf32>
      %333 = vector.extract_strided_slice %41 {offsets = [26, 0], sizes = [1, 128], strides = [1, 1]} : vector<33x128xf32> to vector<1x128xf32>
      %334 = vector.extract_strided_slice %41 {offsets = [27, 0], sizes = [1, 128], strides = [1, 1]} : vector<33x128xf32> to vector<1x128xf32>
      %335 = vector.extract_strided_slice %41 {offsets = [28, 0], sizes = [1, 128], strides = [1, 1]} : vector<33x128xf32> to vector<1x128xf32>
      %336 = vector.extract_strided_slice %41 {offsets = [29, 0], sizes = [1, 128], strides = [1, 1]} : vector<33x128xf32> to vector<1x128xf32>
      %337 = vector.broadcast %42 : vector<1x128xf32> to vector<32x128xf32>
      %338 = arith.subf %31, %337 : vector<32x128xf32>
      %339 = vector.broadcast %329 : vector<1x128xf32> to vector<32x128xf32>
      %340 = arith.mulf %338, %339 : vector<32x128xf32>
      %341 = arith.mulf %340, %251 : vector<32x128xf32>
      %342 = vector.broadcast %46 : vector<1x128xf32> to vector<32x128xf32>
      %343 = arith.subf %342, %31 : vector<32x128xf32>
      %344 = vector.broadcast %330 : vector<1x128xf32> to vector<32x128xf32>
      %345 = arith.mulf %343, %344 : vector<32x128xf32>
      %346 = arith.mulf %345, %262 : vector<32x128xf32>
      %347 = arith.addf %341, %346 : vector<32x128xf32>
      %348 = vector.broadcast %43 : vector<1x128xf32> to vector<32x128xf32>
      %349 = arith.subf %31, %348 : vector<32x128xf32>
      %350 = vector.broadcast %330 : vector<1x128xf32> to vector<32x128xf32>
      %351 = arith.mulf %349, %350 : vector<32x128xf32>
      %352 = arith.mulf %351, %262 : vector<32x128xf32>
      %353 = vector.broadcast %47 : vector<1x128xf32> to vector<32x128xf32>
      %354 = arith.subf %353, %31 : vector<32x128xf32>
      %355 = vector.broadcast %331 : vector<1x128xf32> to vector<32x128xf32>
      %356 = arith.mulf %354, %355 : vector<32x128xf32>
      %357 = arith.mulf %356, %273 : vector<32x128xf32>
      %358 = arith.addf %352, %357 : vector<32x128xf32>
      %359 = vector.broadcast %44 : vector<1x128xf32> to vector<32x128xf32>
      %360 = arith.subf %31, %359 : vector<32x128xf32>
      %361 = vector.broadcast %331 : vector<1x128xf32> to vector<32x128xf32>
      %362 = arith.mulf %360, %361 : vector<32x128xf32>
      %363 = arith.mulf %362, %273 : vector<32x128xf32>
      %364 = vector.broadcast %48 : vector<1x128xf32> to vector<32x128xf32>
      %365 = arith.subf %364, %31 : vector<32x128xf32>
      %366 = vector.broadcast %332 : vector<1x128xf32> to vector<32x128xf32>
      %367 = arith.mulf %365, %366 : vector<32x128xf32>
      %368 = arith.mulf %367, %284 : vector<32x128xf32>
      %369 = arith.addf %363, %368 : vector<32x128xf32>
      %370 = vector.broadcast %45 : vector<1x128xf32> to vector<32x128xf32>
      %371 = arith.subf %31, %370 : vector<32x128xf32>
      %372 = vector.broadcast %332 : vector<1x128xf32> to vector<32x128xf32>
      %373 = arith.mulf %371, %372 : vector<32x128xf32>
      %374 = arith.mulf %373, %284 : vector<32x128xf32>
      %375 = vector.broadcast %49 : vector<1x128xf32> to vector<32x128xf32>
      %376 = arith.subf %375, %31 : vector<32x128xf32>
      %377 = vector.broadcast %333 : vector<1x128xf32> to vector<32x128xf32>
      %378 = arith.mulf %376, %377 : vector<32x128xf32>
      %379 = arith.mulf %378, %295 : vector<32x128xf32>
      %380 = arith.addf %374, %379 : vector<32x128xf32>
      %381 = vector.broadcast %46 : vector<1x128xf32> to vector<32x128xf32>
      %382 = arith.subf %31, %381 : vector<32x128xf32>
      %383 = vector.broadcast %333 : vector<1x128xf32> to vector<32x128xf32>
      %384 = arith.mulf %382, %383 : vector<32x128xf32>
      %385 = arith.mulf %384, %295 : vector<32x128xf32>
      %386 = vector.broadcast %50 : vector<1x128xf32> to vector<32x128xf32>
      %387 = arith.subf %386, %31 : vector<32x128xf32>
      %388 = vector.broadcast %334 : vector<1x128xf32> to vector<32x128xf32>
      %389 = arith.mulf %387, %388 : vector<32x128xf32>
      %390 = arith.mulf %389, %306 : vector<32x128xf32>
      %391 = arith.addf %385, %390 : vector<32x128xf32>
      %392 = vector.broadcast %47 : vector<1x128xf32> to vector<32x128xf32>
      %393 = arith.subf %31, %392 : vector<32x128xf32>
      %394 = vector.broadcast %334 : vector<1x128xf32> to vector<32x128xf32>
      %395 = arith.mulf %393, %394 : vector<32x128xf32>
      %396 = arith.mulf %395, %306 : vector<32x128xf32>
      %397 = vector.broadcast %51 : vector<1x128xf32> to vector<32x128xf32>
      %398 = arith.subf %397, %31 : vector<32x128xf32>
      %399 = vector.broadcast %335 : vector<1x128xf32> to vector<32x128xf32>
      %400 = arith.mulf %398, %399 : vector<32x128xf32>
      %401 = arith.mulf %400, %317 : vector<32x128xf32>
      %402 = arith.addf %396, %401 : vector<32x128xf32>
      %403 = vector.broadcast %48 : vector<1x128xf32> to vector<32x128xf32>
      %404 = arith.subf %31, %403 : vector<32x128xf32>
      %405 = vector.broadcast %335 : vector<1x128xf32> to vector<32x128xf32>
      %406 = arith.mulf %404, %405 : vector<32x128xf32>
      %407 = arith.mulf %406, %317 : vector<32x128xf32>
      %408 = vector.broadcast %52 : vector<1x128xf32> to vector<32x128xf32>
      %409 = arith.subf %408, %31 : vector<32x128xf32>
      %410 = vector.broadcast %336 : vector<1x128xf32> to vector<32x128xf32>
      %411 = arith.mulf %409, %410 : vector<32x128xf32>
      %412 = arith.mulf %411, %328 : vector<32x128xf32>
      %413 = arith.addf %407, %412 : vector<32x128xf32>
      %414 = tpu.concatenate %347, %358, %369, %380, %391, %402, %413 in 1 : vector<32x128xf32>, vector<32x128xf32>, vector<32x128xf32>, vector<32x128xf32>, vector<32x128xf32>, vector<32x128xf32>, vector<32x128xf32> -> vector<32x896xf32>
      %c0_29 = arith.constant 0 : index
      %c0_30 = arith.constant 0 : index
      %415 = vector.load %arg12[%c0_29, %c0_30] : memref<896x128xf32, #tpu.memory_space<vmem>>, vector<896x128xf32>
      %cst_31 = arith.constant dense<0.000000e+00> : vector<32x128xf32>
      %416 = tpu.matmul %414, %415, %cst_31 {dimension_numbers = #tpu.dot_dimension_numbers<[1], [0], [0], [1], [0, 0, 1, 1], [], []>, precision = #tpu.contract_precision<fp32>} : vector<32x896xf32>, vector<896x128xf32>, vector<32x128xf32> -> vector<32x128xf32>
      %417 = arith.addf %39, %416 : vector<32x128xf32>
      %c0_32 = arith.constant 0 : index
      %c0_33 = arith.constant 0 : index
      %418 = vector.load %arg13[%c0_32, %c0_33] : memref<32x128xf32, #tpu.memory_space<vmem>>, vector<32x128xf32>
      tpu.vector_store %arg13[%c0_32, %c0_33], %417 {strides = array<i32>} : memref<32x128xf32, #tpu.memory_space<vmem>>, vector<32x128xf32>,
    } else {
    }
    return
  }
  func.func @transform_0(%arg0: i32) -> (i32, i32) {
    %c0_i32 = arith.constant 0 : i32
    %c0_i32_0 = arith.constant 0 : i32
    %c0_i32_1 = arith.constant 0 : i32
    return %c0_i32, %c0_i32_0 : i32, i32
  }
  func.func @transform_1(%arg0: i32) -> (i32, i32) {
    %c0_i32 = arith.constant 0 : i32
    %c0_i32_0 = arith.constant 0 : i32
    return %arg0, %c0_i32 : i32, i32
  }
  func.func @transform_2(%arg0: i32) -> (i32, i32) {
    %c0_i32 = arith.constant 0 : i32
    %c0_i32_0 = arith.constant 0 : i32
    return %arg0, %c0_i32 : i32, i32
  }
  func.func @transform_3(%arg0: i32) -> (i32, i32) {
    %c0_i32 = arith.constant 0 : i32
    %c0_i32_0 = arith.constant 0 : i32
    return %c0_i32, %arg0 : i32, i32
  }
  func.func @transform_4(%arg0: i32) -> (i32, i32) {
    %c0_i32 = arith.constant 0 : i32
    %c0_i32_0 = arith.constant 0 : i32
    %c0_i32_1 = arith.constant 0 : i32
    return %c0_i32, %c0_i32_0 : i32, i32
  }
  func.func @transform_5(%arg0: i32) -> (i32, i32) {
    %c0_i32 = arith.constant 0 : i32
    %c0_i32_0 = arith.constant 0 : i32
    %c0_i32_1 = arith.constant 0 : i32
    return %c0_i32, %c0_i32_0 : i32, i32
  }
  func.func @transform_6(%arg0: i32) -> (i32, i32) {
    %c0_i32 = arith.constant 0 : i32
    %c0_i32_0 = arith.constant 0 : i32
    %c0_i32_1 = arith.constant 0 : i32
    return %c0_i32, %c0_i32_0 : i32, i32
  }
  func.func @transform_7(%arg0: i32) -> (i32, i32) {
    %c0_i32 = arith.constant 0 : i32
    %c0_i32_0 = arith.constant 0 : i32
    %c0_i32_1 = arith.constant 0 : i32
    return %c0_i32, %c0_i32_0 : i32, i32
  }
  func.func @transform_8(%arg0: i32) -> (i32, i32) {
    %c0_i32 = arith.constant 0 : i32
    %c0_i32_0 = arith.constant 0 : i32
    %c0_i32_1 = arith.constant 0 : i32
    return %c0_i32, %c0_i32_0 : i32, i32
  }
  func.func @transform_9(%arg0: i32) -> (i32, i32) {
    %c0_i32 = arith.constant 0 : i32
    %c0_i32_0 = arith.constant 0 : i32
    %c0_i32_1 = arith.constant 0 : i32
    return %c0_i32, %c0_i32_0 : i32, i32
  }
  func.func @transform_10(%arg0: i32) -> (i32, i32) {
    %c0_i32 = arith.constant 0 : i32
    %c0_i32_0 = arith.constant 0 : i32
    %c0_i32_1 = arith.constant 0 : i32
    return %c0_i32, %c0_i32_0 : i32, i32
  }
  func.func @transform_11(%arg0: i32) -> (i32, i32) {
    %c0_i32 = arith.constant 0 : i32
    %c0_i32_0 = arith.constant 0 : i32
    %c0_i32_1 = arith.constant 0 : i32
    return %c0_i32, %c0_i32_0 : i32, i32
  }
  func.func @transform_12(%arg0: i32) -> (i32, i32) {
    %c0_i32 = arith.constant 0 : i32
    %c0_i32_0 = arith.constant 0 : i32
    %c0_i32_1 = arith.constant 0 : i32
    return %c0_i32, %c0_i32_0 : i32, i32
  }
}

</mosaic_0001>

<bundles_post_ra>
// kernel: tpu_custom_call.1
= control target key start
LH: loop header
LB: loop body
LE: loop exit
PB: predicated region body
PF: predicated region fallthrough
CT: control target
= control target key end

     0   :  { %s16855_s0 = inlined_call_operand.vmem [shape: f32[32,16], index: 0, kind: input, shape index: {}]   ;;  %s16856_s1 = inlined_call_operand.hbm [shape: f32[256,384], index: 1, kind: input, shape index: {}]   ;;  %s16857_s2 = inlined_call_operand.vmem [shape: s32[256,1], index: 2, kind: input, shape index: {}]   ;;  %s16858_s3 = inlined_call_operand.vmem [shape: s32[1,256], index: 3, kind: input, shape index: {}]   ;;  %s16859_s4 = inlined_call_operand.hbm [shape: f32[384,128], index: 4, kind: input, shape index: {}]   ;;  %s16860_s5 = inlined_call_operand.vmem [shape: f32[1,128], index: 5, kind: input, shape index: {}]   ;;  %s16861_s6 = inlined_call_operand.vmem [shape: f32[16,128], index: 6, kind: input, shape index: {}]   ;;  %s16862_s7 = inlined_call_operand.vmem [shape: f32[1,128], index: 7, kind: input, shape index: {}]   ;;  %s16863_s8 = inlined_call_operand.vmem [shape: f32[11,128], index: 8, kind: input, shape index: {}]   ;;  %s16864_s9 = inlined_call_operand.vmem [shape: f32[33,128], index: 9, kind: input, shape index: {}]   ;;  %s16865_s10 = inlined_call_operand.vmem [shape: f32[128,128], index: 10, kind: input, shape index: {}]   ;;  %s16866_s11 = inlined_call_operand.hbm [shape: f32[896,128], index: 11, kind: input, shape index: {}]   ;;  %s16867_s12 = inlined_call_operand.hbm [shape: f32[32,128], index: 12, kind: output, shape index: {}]  }
   0x1   :  { %17358 = sst [smem:[#allocation130_spill]] %s16859_s4 }
   0x2   :  { %17359 = sst [smem:[#allocation131_spill]] %s16866_s11 }
   0x3   :  { %17 = vsyncpa [#allocation5], 0 }
   0x4   :  { %19 = vsyncpa [#allocation5 + $0x1], 0 }
   0x5   :  { %20 = vsyncpa [#allocation8], 0 }
   0x6   :  { %21 = vsyncpa [#allocation6], 0  ;;  %s9734_s21 = smov 0   ;;  %s9736_s22 = smov 0  }
   0x7   :  { %s9738_s23 = smov 0   ;;  %s9740_s24 = smov 0  }
   0x8 LB: > { %17360 = sst [smem:[#allocation14_spill]] %s9649_s23  ;;  %s9753_s25 = sadd.s32 4294967295, %s9653_s24   ;;  %s9653_s24 = sphi %s9740_s24, %s18438_s24   ;;  %s9649_s23 = sphi %s9738_s23, %s18435_s23   ;;  %s9645_s22 = sphi %s9736_s22, %s18437_s22   ;;  %s9641_s21 = sphi %s9734_s21, %s18436_s21  }
   0x9   : > { %p68_p0 = scmp.ne.s32.totalorder %s9645_s22, %s9641_s21  ;;  %p69_p1 = scmp.eq.s32.totalorder %s9753_s25, 0 }
   0xa   : > { %p9186_p2 = scmp.ge.s32.totalorder %s9653_s24, 1  ;;  %p320_p3 = scmp.lt.s32.totalorder %s9653_s24, 3 }
   0xb   : > { %p9187_p4 = scmp.ne.s32.totalorder %s9753_s25, 0  ;;  %p9762_p5 = por %p69_p1, %p68_p0 }
   0xc   : > { %s17362_s4 = sld [smem:[#allocation130_spill]]  ;;  %p9769_p6 = pnand %p9186_p2, %p320_p3 }
   0xd   : > { %s9655_s13 = smov [#allocation7]   ;;  %s17364_s11 = sld [smem:[#allocation131_spill]] }
   0xe   : > { %p9381_p7 = pneg %p9769_p6  ;;  %s336_s14 = sshll.u32 %s9655_s13, 4  ;;  %s337_s14 = int_to_ptr.vmem [resolvable:$true] %s336_s14 }
   0xf   : > { %s9656_s18 = smov 128   ;;  %s9657_s19 = smov 8  }
  0x10   : > { %p9382_p8 = pnand %p9381_p7, %p69_p1  ;;  %s9658_s20 = smov [#allocation9]  }
  0x11   : > { %s368_s21 = sshll.u32 %s9658_s20, 4  ;;  %s9781_s27 = sadd.s32 1, %s9653_s24   ;;  %s369_s21 = int_to_ptr.vmem [resolvable:$true] %s368_s21 }
  0x12   : > { %s334_s29 = sshll.u32 %s17362_s4, 4  ;;  %s55_s28 = sadd.s32 1, %s9649_s23  ;;  %s335_s29 = int_to_ptr.hbm [resolvable:$true] %s334_s29 }
  0x13   : > { %s366_s17 = sshll.u32 %s17364_s11, 4  ;;  %s52_s13 = ssub.s32 %s9653_s24, %s9781_s27  ;;  %s367_s17 = int_to_ptr.hbm [resolvable:$true] %s366_s17 }
  0x14   : > { %9384 = dma.hbm_to_vmem [thread:$0]  (!%p9382_p8), %s335_s29, 6144, %s337_s14, [#allocation8], %s9656_s18, %s9656_s18, %s9657_s19  }
  0x15   : > { %9387 = dma.hbm_to_vmem [thread:$0]  (!%p9382_p8), %s367_s17, 14336, %s369_s21, [#allocation8], %s9656_s18, %s9656_s18, %s9657_s19  }
  0x16   : > { %p62_p9 = scmp.ne.s32.totalorder %s9649_s23, %s9645_s22  ;;  %p53_p10 = scmp.eq.s32.totalorder %s52_s13, 0 }
  0x17   : > { %p63_p11 = scmp.eq.s32.totalorder %s9653_s24, 0  ;;  %p9394_p12 = scmp.lt.s32.totalorder %s9653_s24, 2 }
  0x18   : > { %s382_s15 = sand.u32 1, %s9649_s23   ;;  %s9365_s29 = smul.u32 384, %s9653_s24 }
  0x19   : > { %s9792_s16 = scalar_select %p53_p10, %s9649_s23, %s55_s28  }
  0x1a   : > { %p64_p13 = por %p63_p11, %p62_p9  ;;  %s9364_s4 = smul.u32 384, %s382_s15 }
  0x1b   : > { %17365 = sst [smem:[#allocation15_spill]] %s9792_s16  ;;  %s392_s19 = scalar_lea.hbm %s16856_s1, %s9365_s29 }
  0x1c   : > { %p9795_p0 = pnand %p9394_p12, %p64_p13  ;;  %s386_s20 = scalar_lea.vmem [#allocation4], %s9364_s4 }
  0x1d   : > { %s395_s21 = sshll.u32 %s386_s20, 4  ;;  %s393_s13 = sshll.u32 %s392_s19, 4  ;;  %s396_s21 = int_to_ptr.vmem [resolvable:$true] %s395_s21  ;;  %s394_s13 = int_to_ptr.hbm [resolvable:$true] %s393_s13 }
  0x1e   : > { %s383_s11 = scalar_lea.sflag [#allocation5], %s382_s15  ;;  %s9553_s28 = sshra.s32 %s394_s13, 4  ;;  %s9554_s28 = int_to_ptr.hbm [resolvable:$true] %s9553_s28 }
  0x1f   : > { %s9555_s16 = scalar_lea.hbm %s9554_s28, 384  ;;  %p9557_p3 = pneg %p9795_p0 }
  0x20   : > { %p9556_p2 = scmp.ne.s32.totalorder %s9554_s28, %s9555_s16  ;;  %s9560_s17 = scalar_lea.hbm %s16856_s1, 768 }
  0x21   : > { %p9561_p9 = scmp.lt.s32.totalorder %s9554_s28, %s16856_s1  ;;  %p9562_p10 = scmp.lt.s32.totalorder %s9560_s17, %s9555_s16 }
  0x22   : > { %p9558_p7 = pnand %p9557_p3, %p9556_p2 }
  0x23   : > { %p9563_p11 = por %p9562_p10, %p9561_p9 }
  0x24   : > { %p9559_p8 = pneg %p9558_p7 }
  0x26   : > { %p9564_p12 = pnand %p9563_p11, %p9559_p8 }
  0x28   : > { %9567 = shalt.err (!%p9564_p12)
}
  0x29   : > { %s9659_s4 = smov 384   ;;  %s9660_s15 = smov 24  }
  0x2a   : > { %9391 = dma.hbm_to_vmem [thread:$0]  (!%p9795_p0), %s394_s13, 6144, %s396_s21, %s383_s11, %s9659_s4, %s9659_s4, %s9660_s15  }
  0x2b   : > { %422 = sbr.rel (%p9769_p6) target bundleno = 2154 (0x86a), region = 68 }
  0x30   : > { %s424_s23 = sand.u32 1, %s9645_s22  }
  0x31   : > { %s9366_s19 = smul.u32 384, %s424_s23  ;;  %s425_s20 = scalar_lea.sflag [#allocation5], %s424_s23 }
  0x33   : > { %s9815_s24 = scalar_lea.vmem [#allocation4], %s9366_s19 }
  0x34   : > { %9628 = dma.done.wait (%p9762_p5), %s425_s20, 6144  }
  0x35   : > { %9630 = vsyncadd (%p9762_p5), %s425_s20, 4294961152 }
  0x36   : > { %9632 = dma.done.wait (%p69_p1), [#allocation8], 20480  }
  0x37   : > { %9634 = vsyncadd (%p69_p1), [#allocation8], 4294946816  ;;  %s9196_s11 = sshll.u32 %s9753_s25, 4  ;;  %p490_p6 = scmp.lt.s32.totalorder %s9753_s25, 1 }
  0x38   : > { %p485_p13 = scmp.lt.s32.totalorder %s9196_s11, 31  ;;  %496 = sbr.rel (%p9187_p4) target bundleno = 254 (0xfe), region = 84 }
  0x39   : > { %s9828_s30 = scalar_select %p490_p6, %s9753_s25, 1 }
  0x3a   : > { %s18440_s11 = smov (!%p485_p13, %s9196_s11), 31 }
  0x3b   : > { %s492_s26 = scalar_lea.vmem %s16858_s3, %s9828_s30  ;;  %s9197_s21 = sshll.u32 %s18440_s11, 3 }
  0x3c   : > { %s9837_s17 = scalar_lea.vmem %s16857_s2, %s9197_s21 }
  0x3d   : > { %v502_v0 = vld [vmem:[%s16861_s6 + $0x8] sm:$0xff]  ;;  %v501_v1 = vld [vmem:[%s16861_s6] sm:$0xff]  ;;  %v499_v2 = vld [vmem:[%s16855_s0 + $0x10] sm:$0xff]  ;;  %vm507_vm0 = vcmask 130048   ;;  %v9661_v55 = vmov 0.0  }
  0x3e   : > { %v534_v3 = vand.u32 4294901760, %v502_v0  ;;  %v536_v4 = vand.u32 4294901760, %v501_v1  ;;  %v515_v5 = vsel %vm507_vm0, %v499_v2, 0  ;;  %v500_v6 = vld [vmem:[%s16855_s0 + $0x18] sm:$0xff]  ;;  %v497_v7 = vld [vmem:[%s16855_s0] sm:$0xff]  ;;  %v498_v8 = vld [vmem:[%s16855_s0 + $0x8] sm:$0xff] }
  0x3f   : > { %v9859_v9 = vand.u32 4294901760, %v515_v5  ;;  %v518_v10 = vsel %vm507_vm0, %v500_v6, 0  ;;  %v509_v11 = vsel %vm507_vm0, %v497_v7, 0  ;;  %v512_v12 = vsel %vm507_vm0, %v498_v8, 0  ;;  %v9445_v47 = vld [vmem:[%s16862_s7] ss:$0 sm:$0xff] }
  0x40   : > { %9328 = vmatpush.msra.mxu2 %v534_v3  ;;  %v586_v13 = vsub.f32 %v502_v0, %v534_v3  ;;  %v592_v14 = vsub.f32 %v501_v1, %v536_v4  ;;  %535 = vmatpush.msra.mxu0 %v534_v3  ;;  %v562_v15 = vand.u32 4294901760, %v518_v10  ;;  %v538_v16 = vand.u32 4294901760, %v509_v11  ;;  %776 = vst [vmem:[#allocation3] sm:$0xff] %v9661_v55 }
  0x41   : > { %v555_v17 = vsub.f32 %v515_v5, %v9859_v9  ;;  %v546_v18 = vand.u32 4294901760, %v512_v12  ;;  %777 = vst [vmem:[#allocation3 + $0x18] sm:$0xff] %v9661_v55 }
  0x42   : > { %9329 = vmatpush.msra.mxu2 %v536_v4  ;;  %v587_v19 = vand.u32 4294901760, %v586_v13  ;;  %v593_v20 = vand.u32 4294901760, %v592_v14  ;;  %v563_v21 = vsub.f32 %v518_v10, %v562_v15  ;;  %537 = vmatpush.msra.mxu0 %v536_v4  ;;  %v539_v22 = vsub.f32 %v509_v11, %v538_v16  ;;  %778 = vst [vmem:[#allocation3 + $0x8] sm:$0xff] %v9661_v55 }
  0x43   : > { %v556_v23 = vand.u32 4294901760, %v555_v17  ;;  %v547_v24 = vsub.f32 %v512_v12, %v546_v18  ;;  %779 = vst [vmem:[#allocation3 + $0x10] sm:$0xff] %v9661_v55 }
  0x44   : > { %630 = vmatpush.msrb.mxu2 %v586_v13  ;;  %v588_v25 = vsub.f32 %v586_v13, %v587_v19  ;;  %v594_v26 = vsub.f32 %v592_v14, %v593_v20  ;;  %v540_v27 = vand.u32 4294901760, %v539_v22  ;;  %715 = vmatpush.msrb.mxu0 %v587_v19  ;;  %v564_v29 = vand.u32 4294901760, %v563_v21 }
  0x45   : > { %v557_v28 = vsub.f32 %v555_v17, %v556_v23  ;;  %v548_v33 = vand.u32 4294901760, %v547_v24 }
  0x46   : > { %633 = vmatpush.msrb.mxu2 %v592_v14  ;;  %v589_v30 = vand.u32 4294901760, %v588_v25  ;;  %v595_v31 = vand.u32 4294901760, %v594_v26  ;;  %v541_v32 = vsub.f32 %v539_v22, %v540_v27  ;;  %719 = vmatpush.msrb.mxu0 %v593_v20  ;;  %v565_v36 = vsub.f32 %v563_v21, %v564_v29 }
  0x47   : > { %v558_v34 = vand.u32 4294901760, %v557_v28  ;;  %v549_v37 = vsub.f32 %v547_v24, %v548_v33 }
  0x48   : > { %9330 = vmatpush.msra.mxu3 %v589_v30  ;;  %590 = vmatpush.msra.mxu1 %v589_v30  ;;  %v542_v35 = vand.u32 4294901760, %v541_v32  ;;  %v566_v38 = vand.u32 4294901760, %v565_v36 }
  0x49   : > { %559 = vmatmul.f32.vlgmr.msra.gmra.mxu2 %v558_v34  ;;  %v550_v39 = vand.u32 4294901760, %v549_v37 }
  0x4a   : > { %9331 = vmatpush.msra.mxu3 %v595_v31  ;;  %543 = vmatmul.f32.vlgmr.msra.gmra.mxu0 %v542_v35 }
  0x4b   : > { %606 = vmatmul.f32.vlgmr.msra.gmra.mxu3 %v9859_v9  ;;  %596 = vmatpush.msra.mxu1 %v595_v31 }
  0x4c   : > { %670 = vmatpush.msrb.mxu3 %v534_v3  ;;  %598 = vmatmul.f32.vlgmr.msra.gmra.mxu1 %v538_v16 }
  0x4d   : > { %752 = vmatpush.msrb.mxu1 %v534_v3 }
  0x4e   : > { %672 = vmatpush.msrb.mxu3 %v536_v4 }
  0x4f   : > { %754 = vmatpush.msrb.mxu1 %v536_v4 }
  0x51   : > { %567 = vmatmul.f32.gmra.mxu2 %v566_v38 }
  0x52   : > { %551 = vmatmul.f32.gmra.mxu0 %v550_v39 }
  0x53   : > { %610 = vmatmul.f32.gmra.mxu3 %v562_v15 }
  0x54   : > { %602 = vmatmul.f32.gmra.mxu1 %v546_v18 }
  0x59   : > { %636 = vmatmul.f32.vlgmr.msrb.gmra.mxu2 %v539_v22 }
  0x5a   : > { %721 = vmatmul.f32.vlgmr.msrb.gmra.mxu0 %v538_v16 }
  0x5b   : > { %676 = vmatmul.f32.vlgmr.msrb.gmra.mxu3 %v540_v27 }
  0x5c   : > { %756 = vmatmul.f32.vlgmr.msrb.gmra.mxu1 %v538_v16 }
  0x61   : > { %641 = vmatmul.f32.gmra.mxu2 %v547_v24 }
  0x62   : > { %725 = vmatmul.f32.gmra.mxu0 %v546_v18 }
  0x63   : > { %682 = vmatmul.f32.gmra.mxu3 %v548_v33 }
  0x64   : > { %760 = vmatmul.f32.gmra.mxu1 %v546_v18 }
  0x69   : > { %646 = vmatmul.f32.gmra.mxu2 %v555_v17 }
  0x6a   : > { %729 = vmatmul.f32.gmra.mxu0 %v9859_v9 }
  0x6b   : > { %688 = vmatmul.f32.gmra.mxu3 %v556_v23 }
  0x6c   : > { %764 = vmatmul.f32.gmra.mxu1 %v9859_v9 }
  0x71   : > { %651 = vmatmul.f32.gmra.mxu2 %v563_v21 }
  0x72   : > { %733 = vmatmul.f32.gmra.mxu0 %v562_v15 }
  0x73   : > { %694 = vmatmul.f32.gmra.mxu3 %v564_v29 }
  0x74   : > { %768 = vmatmul.f32.gmra.mxu1 %v562_v15 }
  0xc7   : > { %v544_v40 = vpop.f32.mrf.mxu0 }
  0xc8   : > { %v545_v49 = vadd.f32 %v9445_v47, %v544_v40 }
  0xc9   : > { %v599_v41 = vpop.f32.mrf.mxu1 }
  0xca   : > { %v600_v52 = vadd.f32 %v599_v41, %v545_v49 }
  0xcc   : > { %v560_v42 = vpop.f32.mrf.mxu2 }
  0xcd   : > { %v561_v3 = vadd.f32 %v9445_v47, %v560_v42 }
  0xce   : > { %v607_v43 = vpop.f32.mrf.mxu3 }
  0xcf   : > { %v552_v44 = vpop.f32.mrf.mxu0  ;;  %v608_v6 = vadd.f32 %v607_v43, %v561_v3 }
  0xd0   : > { %v553_v57 = vadd.f32 %v9445_v47, %v552_v44 }
  0xd1   : > { %v603_v45 = vpop.f32.mrf.mxu1 }
  0xd2   : > { %v604_v61 = vadd.f32 %v603_v45, %v553_v57 }
  0xd4   : > { %v568_v46 = vpop.f32.mrf.mxu2 }
  0xd5   : > { %v569_v13 = vadd.f32 %v9445_v47, %v568_v46 }
  0xd6   : > { %v611_v48 = vpop.f32.mrf.mxu3 }
  0xd7   : > { %v722_v50 = vpop.f32.mrf.mxu0  ;;  %v612_v16 = vadd.f32 %v611_v48, %v569_v13 }
  0xd9   : > { %v757_v51 = vpop.f32.mrf.mxu1 }
  0xdc   : > { %v637_v53 = vpop.f32.mrf.mxu2 }
  0xdd   : > { %v638_v54 = vadd.f32 %v637_v53, %v600_v52 }
  0xde   : > { %v677_v56 = vpop.f32.mrf.mxu3 }
  0xdf   : > { %v678_v58 = vadd.f32 %v677_v56, %v638_v54  ;;  %v726_v60 = vpop.f32.mrf.mxu0 }
  0xe1   : > { %v723_v59 = vadd.f32 %v722_v50, %v678_v58  ;;  %v761_v0 = vpop.f32.mrf.mxu1 }
  0xe3   : > { %v758_v62 = vadd.f32 %v757_v51, %v723_v59 }
  0xe4   : > { %v642_v63 = vpop.f32.mrf.mxu2 }
  0xe5   : > { %772 = vst [vmem:[#allocation2 + $0x10] sm:$0xff] %v758_v62  ;;  %v643_v1 = vadd.f32 %v642_v63, %v604_v61 }
  0xe6   : > { %v683_v2 = vpop.f32.mrf.mxu3 }
  0xe7   : > { %v684_v4 = vadd.f32 %v683_v2, %v643_v1  ;;  %v730_v9 = vpop.f32.mrf.mxu0 }
  0xe9   : > { %v727_v5 = vadd.f32 %v726_v60, %v684_v4  ;;  %v765_v12 = vpop.f32.mrf.mxu1 }
  0xeb   : > { %v762_v7 = vadd.f32 %v761_v0, %v727_v5 }
  0xec   : > { %v647_v8 = vpop.f32.mrf.mxu2 }
  0xed   : > { %773 = vst [vmem:[#allocation2] sm:$0xff] %v762_v7  ;;  %v648_v10 = vadd.f32 %v647_v8, %v608_v6 }
  0xee   : > { %v689_v11 = vpop.f32.mrf.mxu3 }
  0xef   : > { %v690_v14 = vadd.f32 %v689_v11, %v648_v10  ;;  %v734_v21 = vpop.f32.mrf.mxu0 }
  0xf1   : > { %v731_v15 = vadd.f32 %v730_v9, %v690_v14  ;;  %v769_v23 = vpop.f32.mrf.mxu1 }
  0xf3   : > { %v766_v17 = vadd.f32 %v765_v12, %v731_v15 }
  0xf4   : > { %v652_v18 = vpop.f32.mrf.mxu2 }
  0xf5   : > { %774 = vst [vmem:[#allocation2 + $0x18] sm:$0xff] %v766_v17  ;;  %v653_v19 = vadd.f32 %v652_v18, %v612_v16 }
  0xf6   : > { %v695_v20 = vpop.f32.mrf.mxu3 }
  0xf7   : > { %v696_v22 = vadd.f32 %v695_v20, %v653_v19 }
  0xf9   : > { %v735_v24 = vadd.f32 %v734_v21, %v696_v22 }
  0xfb   : > { %v770_v25 = vadd.f32 %v769_v23, %v735_v24 }
  0xfd   : > { %775 = vst [vmem:[#allocation2 + $0x8] sm:$0xff] %v770_v25 }
  0xfe PF: > { %v843_v26 = vld [vmem:[#allocation7 + $0x78] sm:$0xff]  ;;  %v842_v27 = vld [vmem:[#allocation7 + $0x70] sm:$0xff]  ;;  %v841_v28 = vld [vmem:[#allocation7 + $0x68] sm:$0xff]  ;;  %vm3416_vm2 = vcmask 261120   ;;  %p9279_p1 = scmp.ne.s32.totalorder %s9753_s25, 1 }
  0xff   : > { %v9868_v29 = vand.u32 4294901760, %v843_v26  ;;  %v9870_v30 = vand.u32 4294901760, %v842_v27  ;;  %v9872_v31 = vand.u32 4294901760, %v841_v28  ;;  %v840_v32 = vld [vmem:[#allocation7 + $0x60] sm:$0xff]  ;;  %v839_v33 = vld [vmem:[#allocation7 + $0x58] sm:$0xff]  ;;  %v838_v34 = vld [vmem:[#allocation7 + $0x50] sm:$0xff] }
 0x100   : > { %v9874_v35 = vand.u32 4294901760, %v840_v32  ;;  %v9876_v36 = vand.u32 4294901760, %v839_v33  ;;  %v9878_v37 = vand.u32 4294901760, %v838_v34  ;;  %v837_v38 = vld [vmem:[#allocation7 + $0x48] sm:$0xff]  ;;  %v836_v39 = vld [vmem:[#allocation7 + $0x40] sm:$0xff]  ;;  %v835_v48 = vld [vmem:[#allocation7 + $0x38] sm:$0xff] }
 0x101   : > { %881 = vmatpush.msra.mxu0 %v9868_v29  ;;  %1332 = vmatpush.msra.mxu3 %v9868_v29  ;;  %v9883_v40 = vsub.f32 %v843_v26, %v9868_v29  ;;  %v9886_v41 = vsub.f32 %v842_v27, %v9870_v30  ;;  %v9889_v42 = vsub.f32 %v841_v28, %v9872_v31  ;;  %v9891_v43 = vand.u32 4294901760, %v837_v38  ;;  %v834_v55 = vld [vmem:[#allocation7 + $0x30] sm:$0xff]  ;;  %v833_v62 = vld [vmem:[#allocation7 + $0x28] sm:$0xff]  ;;  %v832_v4 = vld [vmem:[#allocation7 + $0x20] sm:$0xff] }
 0x102   : > { %v9894_v44 = vsub.f32 %v840_v32, %v9874_v35  ;;  %v9897_v45 = vsub.f32 %v839_v33, %v9876_v36  ;;  %v9900_v46 = vsub.f32 %v838_v34, %v9878_v37  ;;  %v9902_v47 = vand.u32 4294901760, %v836_v39  ;;  %v831_v14 = vld [vmem:[#allocation7 + $0x18] sm:$0xff]  ;;  %v780_v15 = vld [vmem:[%s9815_s24] sm:$0xff]  ;;  %v830_v20 = vld [vmem:[#allocation7 + $0x10] sm:$0xff] }
 0x103   : > { %883 = vmatpush.msra.mxu0 %v9870_v30  ;;  %1204 = vmatpush.msra.mxu2 %v9883_v40  ;;  %v1043_v49 = vand.u32 4294901760, %v9883_v40  ;;  %v1049_v50 = vand.u32 4294901760, %v9886_v41  ;;  %v1055_v51 = vand.u32 4294901760, %v9889_v42  ;;  %v9912_v53 = vsub.f32 %v837_v38, %v9891_v43  ;;  %v829_v26 = vld [vmem:[#allocation7 + $0x8] sm:$0xff]  ;;  %v828_v38 = vld [vmem:[#allocation7] sm:$0xff] }
 0x104   : > { %1334 = vmatpush.msra.mxu3 %v9870_v30  ;;  %v1061_v52 = vand.u32 4294901760, %v9894_v44  ;;  %v1067_v54 = vand.u32 4294901760, %v9897_v45  ;;  %v9926_v59 = vand.u32 4294901760, %v835_v48  ;;  %v9930_v60 = vsub.f32 %v836_v39, %v9902_v47 }
 0x105   : > { %885 = vmatpush.msra.mxu0 %v9872_v31  ;;  %1207 = vmatpush.msra.mxu2 %v9886_v41  ;;  %v1044_v56 = vsub.f32 %v9883_v40, %v1043_v49  ;;  %v1050_v57 = vsub.f32 %v9886_v41, %v1049_v50  ;;  %v1056_v58 = vsub.f32 %v9889_v42, %v1055_v51  ;;  %v1073_v61 = vand.u32 4294901760, %v9900_v46 }
 0x106   : > { %1336 = vmatpush.msra.mxu3 %v9872_v31  ;;  %v1062_v1 = vsub.f32 %v9894_v44, %v1061_v52  ;;  %v9938_v2 = vand.u32 4294901760, %v834_v55  ;;  %v1068_v3 = vsub.f32 %v9897_v45, %v1067_v54  ;;  %v9946_v6 = vsub.f32 %v835_v48, %v9926_v59 }
 0x107   : > { %887 = vmatpush.msra.mxu0 %v9874_v35  ;;  %1210 = vmatpush.msra.mxu2 %v9889_v42  ;;  %v1045_v63 = vand.u32 4294901760, %v1044_v56  ;;  %v1051_v0 = vand.u32 4294901760, %v1050_v57  ;;  %v1057_v5 = vand.u32 4294901760, %v1056_v58  ;;  %v9948_v7 = vand.u32 4294901760, %v833_v62  ;;  %v783_v56 = vld [vmem:[%s9815_s24 + $0x18] sm:$0xff] }
 0x108   : > { %1338 = vmatpush.msra.mxu3 %v9874_v35  ;;  %v1079_v8 = vand.u32 4294901760, %v9912_v53  ;;  %v1074_v9 = vsub.f32 %v9900_v46, %v1073_v61  ;;  %v1063_v10 = vand.u32 4294901760, %v1062_v1  ;;  %v9958_v11 = vsub.f32 %v834_v55, %v9938_v2 }
 0x109   : > { %889 = vmatpush.msra.mxu0 %v9876_v36  ;;  %1046 = vmatpush.msra.mxu1 %v1045_v63  ;;  %v9960_v12 = vand.u32 4294901760, %v832_v4  ;;  %v1085_v13 = vand.u32 4294901760, %v9930_v60  ;;  %v1069_v16 = vand.u32 4294901760, %v1068_v3  ;;  %v9971_v18 = vsub.f32 %v833_v62, %v9948_v7 }
 0x10a   : > { %1213 = vmatpush.msra.mxu2 %v9894_v44  ;;  %1340 = vmatpush.msra.mxu3 %v9876_v36  ;;  %v1080_v17 = vsub.f32 %v9912_v53, %v1079_v8  ;;  %v1091_v19 = vand.u32 4294901760, %v9946_v6  ;;  %v1075_v21 = vand.u32 4294901760, %v1074_v9  ;;  %v9976_v22 = vand.u32 4294901760, %v831_v14 }
 0x10b   : > { %891 = vmatpush.msra.mxu0 %v9878_v37  ;;  %1052 = vmatpush.msra.mxu1 %v1051_v0  ;;  %v1086_v23 = vsub.f32 %v9930_v60, %v1085_v13  ;;  %v9983_v24 = vsub.f32 %v832_v4, %v9960_v12  ;;  %v1097_v25 = vand.u32 4294901760, %v9958_v11  ;;  %v9986_v27 = vand.u32 4294901760, %v780_v15 }
 0x10c   : > { %1216 = vmatpush.msra.mxu2 %v9897_v45  ;;  %1342 = vmatpush.msra.mxu3 %v9878_v37  ;;  %v9990_v28 = vand.u32 4294901760, %v830_v20  ;;  %v1081_v32 = vand.u32 4294901760, %v1080_v17  ;;  %v1092_v33 = vsub.f32 %v9946_v6, %v1091_v19  ;;  %v1103_v34 = vand.u32 4294901760, %v9971_v18  ;;  %v795_v45 = vld [vmem:[%s9815_s24 + $0x78] sm:$0xff] }
 0x10d   : > { %893 = vmatpush.msra.mxu0 %v9891_v43  ;;  %1058 = vmatpush.msra.mxu1 %v1057_v5  ;;  %v9998_v39 = vsub.f32 %v780_v15, %v9986_v27  ;;  %v10003_v48 = vsub.f32 %v831_v14, %v9976_v22  ;;  %v10005_v55 = vand.u32 4294901760, %v829_v26  ;;  %v1087_v57 = vand.u32 4294901760, %v1086_v23 }
 0x10e   : > { %1219 = vmatpush.msra.mxu2 %v9900_v46  ;;  %1344 = vmatpush.msra.mxu3 %v9891_v43  ;;  %v1098_v58 = vsub.f32 %v9958_v11, %v1097_v25  ;;  %v1109_v62 = vand.u32 4294901760, %v9983_v24  ;;  %v10016_v63 = vsub.f32 %v830_v20, %v9990_v28  ;;  %v10018_v0 = vand.u32 4294901760, %v828_v38 }
 0x10f   : > { %895 = vmatpush.msra.mxu0 %v9902_v47  ;;  %1064 = vmatpush.msra.mxu1 %v1063_v10  ;;  %v1093_v1 = vand.u32 4294901760, %v1092_v33  ;;  %v1104_v3 = vsub.f32 %v9971_v18, %v1103_v34  ;;  %v914_v4 = vand.u32 4294901760, %v9998_v39  ;;  %v10025_v5 = vand.u32 4294901760, %v783_v56  ;;  %v786_v33 = vld [vmem:[%s9815_s24 + $0x30] sm:$0xff] }
 0x110   : > { %1222 = vmatpush.msra.mxu2 %v9912_v53  ;;  %1346 = vmatpush.msra.mxu3 %v9902_v47  ;;  %v10030_v9 = vsub.f32 %v829_v26, %v10005_v55  ;;  %v16871_v10 = vand.u32 4294901760, %v10003_v48  ;;  %v1099_v14 = vand.u32 4294901760, %v1098_v58  ;;  %v1110_v15 = vsub.f32 %v9983_v24, %v1109_v62 }
 0x111   : > { %897 = vmatpush.msra.mxu0 %v9926_v59  ;;  %1070 = vmatpush.msra.mxu1 %v1069_v16  ;;  %v10040_v16 = vsub.f32 %v828_v38, %v10018_v0  ;;  %v16869_v17 = vand.u32 4294901760, %v10016_v63  ;;  %v1105_v20 = vand.u32 4294901760, %v1104_v3  ;;  %v921_v23 = vsub.f32 %v783_v56, %v10025_v5 }
 0x112   : > { %1225 = vmatpush.msra.mxu2 %v9930_v60  ;;  %1348 = vmatpush.msra.mxu3 %v9926_v59  ;;  %v1116_v26 = vsub.f32 %v10003_v48, %v16871_v10  ;;  %v1111_v38 = vand.u32 4294901760, %v1110_v15  ;;  %v10061_v3 = vand.u32 4294901760, %v786_v33  ;;  %v789_v10 = vld [vmem:[%s9815_s24 + $0x48] sm:$0xff]  ;;  %v10110_v46 = vand.u32 4294901760, %v795_v45 }
 0x113   : > { %899 = vmatpush.msra.mxu0 %v9938_v2  ;;  %1076 = vmatpush.msra.mxu1 %v1075_v21  ;;  %v915_v21 = vsub.f32 %v9998_v39, %v914_v4  ;;  %v1122_v56 = vsub.f32 %v10016_v63, %v16869_v17  ;;  %v17368_v60 = vand.u32 4294901760, %v10016_v63 }
 0x114   : > { %1228 = vmatpush.msra.mxu2 %v9946_v6  ;;  %1350 = vmatpush.msra.mxu3 %v9938_v2  ;;  %v17369_v6 = vand.u32 4294901760, %v10030_v9 }
 0x115   : > { %901 = vmatpush.msra.mxu0 %v9948_v7  ;;  %1082 = vmatpush.msra.mxu1 %v1081_v32  ;;  %v16870_v32 = vand.u32 4294901760, %v10030_v9  ;;  %v916_v58 = vand.u32 4294901760, %v915_v21 }
 0x116   : > { %1231 = vmatpush.msra.mxu2 %v9958_v11  ;;  %1352 = vmatpush.msra.mxu3 %v9948_v7 }
 0x117   : > { %903 = vmatpush.msra.mxu0 %v9960_v12  ;;  %1088 = vmatpush.msra.mxu1 %v1087_v57  ;;  %v16872_v57 = vand.u32 4294901760, %v10040_v16  ;;  %v1128_v15 = vsub.f32 %v10030_v9, %v16870_v32 }
 0x118   : > { %1234 = vmatpush.msra.mxu2 %v9971_v18  ;;  %1354 = vmatpush.msra.mxu3 %v9960_v12 }
 0x119   : > { %905 = vmatpush.msra.mxu0 %v9976_v22  ;;  %1094 = vmatpush.msra.mxu1 %v1093_v1  ;;  %v922_v1 = vand.u32 4294901760, %v921_v23  ;;  %v1134_v21 = vsub.f32 %v10040_v16, %v16872_v57  ;;  %v1129_v32 = vand.u32 4294901760, %v1128_v15 }
 0x11a   : > { %1237 = vmatpush.msra.mxu2 %v9983_v24  ;;  %1356 = vmatpush.msra.mxu3 %v9976_v22 }
 0x11b   : > { %907 = vmatpush.msra.mxu0 %v9990_v28  ;;  %1100 = vmatpush.msra.mxu1 %v1099_v14  ;;  %v1117_v14 = vand.u32 4294901760, %v1116_v26  ;;  %v923_v17 = vsub.f32 %v921_v23, %v922_v1  ;;  %v929_v26 = vsub.f32 %v786_v33, %v10061_v3  ;;  %v857_v33 = vld [vmem:[#allocation7 + $0xe8] sm:$0xff] }
 0x11c   : > { %1240 = vmatpush.msra.mxu2 %v10003_v48  ;;  %1358 = vmatpush.msra.mxu3 %v9990_v28  ;;  %v10179_v15 = vand.u32 4294901760, %v857_v33 }
 0x11d   : > { %909 = vmatpush.msra.mxu0 %v10005_v55  ;;  %1106 = vmatpush.msra.mxu1 %v1105_v20  ;;  %v1123_v20 = vand.u32 4294901760, %v1122_v56  ;;  %v924_v56 = vand.u32 4294901760, %v923_v17  ;;  %v930_v57 = vand.u32 4294901760, %v929_v26 }
 0x11e   : > { %1243 = vmatpush.msra.mxu2 %v10016_v63  ;;  %1360 = vmatpush.msra.mxu3 %v10005_v55  ;;  %v859_v63 = vld [vmem:[#allocation7 + $0xf8] sm:$0xff] }
 0x11f   : > { %911 = vmatpush.msra.mxu0 %v10018_v0  ;;  %1112 = vmatpush.msra.mxu1 %v1111_v38  ;;  %v1135_v38 = vand.u32 4294901760, %v1134_v21  ;;  %v931_v40 = vsub.f32 %v929_v26, %v930_v57 }
 0x120   : > { %1246 = vmatpush.msra.mxu2 %v10030_v9  ;;  %1362 = vmatpush.msra.mxu3 %v10018_v0  ;;  %v10163_v9 = vand.u32 4294901760, %v859_v63 }
 0x121   : > { %917 = vmatmul.f32.vlgmr.msra.gmra.mxu0 %v916_v58  ;;  %1366 = vmatmul.f32.vlgmr.msra.gmra.mxu3 %v914_v4  ;;  %v10080_v58 = vand.u32 4294901760, %v789_v10  ;;  %v932_v41 = vand.u32 4294901760, %v931_v40  ;;  %v810_v4 = vld [vmem:[%s9815_s24 + $0xf0] sm:$0xff] }
 0x122   : > { %1118 = vmatpush.msra.mxu1 %v1117_v14  ;;  %1249 = vmatpush.msra.mxu2 %v10040_v16 }
 0x123   : > { %1252 = vmatmul.f32.vlgmr.msra.gmra.mxu2 %v9998_v39  ;;  %1463 = vmatpush.msrb.mxu0 %v1043_v49  ;;  %v937_v49 = vsub.f32 %v789_v10, %v10080_v58  ;;  %v792_v39 = vld [vmem:[%s9815_s24 + $0x60] sm:$0xff]  ;;  %v858_v10 = vld [vmem:[#allocation7 + $0xf0] sm:$0xff] }
 0x124   : > { %1124 = vmatpush.msra.mxu1 %v1123_v20  ;;  %v10168_v17 = vand.u32 4294901760, %v858_v10  ;;  %1687 = vmatpush.msrb.mxu2 %v10163_v9  ;;  %v856_v20 = vld [vmem:[#allocation7 + $0xe0] sm:$0xff] }
 0x125   : > { %1467 = vmatpush.msrb.mxu0 %v1049_v50  ;;  %v938_v42 = vand.u32 4294901760, %v937_v49  ;;  %v10094_v50 = vand.u32 4294901760, %v792_v39 }
 0x126   : > { %1130 = vmatpush.msra.mxu1 %v1129_v32  ;;  %v10172_v32 = vand.u32 4294901760, %v810_v4  ;;  %v10177_v14 = vsub.f32 %v858_v10, %v10168_v17  ;;  %1689 = vmatpush.msrb.mxu2 %v10168_v17 }
 0x127   : > { %1471 = vmatpush.msrb.mxu0 %v1055_v51  ;;  %v945_v44 = vsub.f32 %v792_v39, %v10094_v50  ;;  %v953_v51 = vsub.f32 %v795_v45, %v10110_v46  ;;  %v855_v39 = vld [vmem:[#allocation7 + $0xd8] sm:$0xff] }
 0x128   : > { %1136 = vmatpush.msra.mxu1 %v1135_v38  ;;  %v10189_v38 = vsub.f32 %v857_v33, %v10179_v15  ;;  %1691 = vmatpush.msrb.mxu2 %v10179_v15 }
 0x129   : > { %925 = vmatmul.f32.gmra.mxu0 %v924_v56  ;;  %1138 = vmatmul.f32.vlgmr.msra.gmra.mxu1 %v9986_v27  ;;  %v10191_v56 = vand.u32 4294901760, %v856_v20 }
 0x12a   : > { %1372 = vmatmul.f32.gmra.mxu3 %v922_v1  ;;  %1475 = vmatpush.msrb.mxu0 %v1061_v52  ;;  %v798_v52 = vld [vmem:[%s9815_s24 + $0x90] sm:$0xff] }
 0x12b   : > { %1257 = vmatmul.f32.gmra.mxu2 %v921_v23  ;;  %1590 = vmatpush.msrb.mxu1 %v9868_v29  ;;  %v939_v29 = vsub.f32 %v937_v49, %v938_v42  ;;  %v10125_v53 = vand.u32 4294901760, %v798_v52  ;;  %v10209_v45 = vsub.f32 %v856_v20, %v10191_v56 }
 0x12c   : > { %1479 = vmatpush.msrb.mxu0 %v1067_v54  ;;  %v17367_v54 = vand.u32 4294901760, %v10003_v48  ;;  %1693 = vmatpush.msrb.mxu2 %v10191_v56 }
 0x12d   : > { %1592 = vmatpush.msrb.mxu1 %v9870_v30  ;;  %v940_v30 = vand.u32 4294901760, %v939_v29 }
 0x12e   : > { %1483 = vmatpush.msrb.mxu0 %v1073_v61  ;;  %v801_v61 = vld [vmem:[%s9815_s24 + $0xa8] sm:$0xff] }
 0x12f   : > { %1594 = vmatpush.msrb.mxu1 %v9872_v31  ;;  %v946_v31 = vand.u32 4294901760, %v945_v44  ;;  %v10141_v11 = vand.u32 4294901760, %v801_v61 }
 0x130   : > { %1487 = vmatpush.msrb.mxu0 %v1079_v8 }
 0x131   : > { %933 = vmatmul.f32.gmra.mxu0 %v932_v41  ;;  %1142 = vmatmul.f32.gmra.mxu1 %v10025_v5  ;;  %v969_v18 = vsub.f32 %v801_v61, %v10141_v11  ;;  %v813_v41 = vld [vmem:[%s9815_s24 + $0x108] sm:$0xff] }
 0x132   : > { %1378 = vmatmul.f32.gmra.mxu3 %v930_v57  ;;  %1491 = vmatpush.msrb.mxu0 %v1085_v13 }
 0x133   : > { %1262 = vmatmul.f32.gmra.mxu2 %v929_v26  ;;  %1596 = vmatpush.msrb.mxu1 %v9874_v35  ;;  %v947_v35 = vsub.f32 %v945_v44, %v946_v31  ;;  %v970_v24 = vand.u32 4294901760, %v969_v18  ;;  %v16883_v26 = vand.u32 4294901760, %v10177_v14 }
 0x134   : > { %1495 = vmatpush.msrb.mxu0 %v1091_v19 }
 0x135   : > { %1598 = vmatpush.msrb.mxu1 %v9876_v36  ;;  %v948_v36 = vand.u32 4294901760, %v947_v35  ;;  %v1856_v29 = vsub.f32 %v10177_v14, %v16883_v26 }
 0x136   : > { %1499 = vmatpush.msrb.mxu0 %v1097_v25 }
 0x137   : > { %1600 = vmatpush.msrb.mxu1 %v9878_v37  ;;  %v954_v37 = vand.u32 4294901760, %v953_v51  ;;  %v1857_v35 = vand.u32 4294901760, %v1856_v29 }
 0x138   : > { %1503 = vmatpush.msrb.mxu0 %v1103_v34  ;;  %v807_v34 = vld [vmem:[%s9815_s24 + $0xd8] sm:$0xff] }
 0x139   : > { %941 = vmatmul.f32.gmra.mxu0 %v940_v30  ;;  %1146 = vmatmul.f32.gmra.mxu1 %v10061_v3  ;;  %v10212_v30 = vand.u32 4294901760, %v855_v39 }
 0x13a   : > { %1384 = vmatmul.f32.gmra.mxu3 %v938_v42  ;;  %1602 = vmatpush.msrb.mxu1 %v9891_v43  ;;  %v955_v43 = vsub.f32 %v953_v51, %v954_v37 }
 0x13b   : > { %1267 = vmatmul.f32.gmra.mxu2 %v937_v49  ;;  %1507 = vmatpush.msrb.mxu0 %v1109_v62  ;;  %v10199_v49 = vsub.f32 %v810_v4, %v10172_v32 }
 0x13c   : > { %1604 = vmatpush.msrb.mxu1 %v9902_v47  ;;  %v961_v47 = vsub.f32 %v798_v52, %v10125_v53  ;;  %v956_v8 = vand.u32 4294901760, %v955_v43  ;;  %v16881_v52 = vand.u32 4294901760, %v10209_v45  ;;  %v10224_v43 = vsub.f32 %v855_v39, %v10212_v30  ;;  %1695 = vmatpush.msrb.mxu2 %v10212_v30 }
 0x13d   : > { %1511 = vmatpush.msrb.mxu0 %v17367_v54  ;;  %v994_v54 = vand.u32 4294901760, %v10199_v49 }
 0x13e   : > { %1606 = vmatpush.msrb.mxu1 %v9926_v59  ;;  %v17370_v59 = vand.u32 4294901760, %v10040_v16  ;;  %v10166_v16 = vsub.f32 %v859_v63, %v10163_v9 }
 0x13f   : > { %1515 = vmatpush.msrb.mxu0 %v17368_v60  ;;  %v10221_v60 = vand.u32 4294901760, %v813_v41 }
 0x140   : > { %1608 = vmatpush.msrb.mxu1 %v9938_v2  ;;  %v962_v2 = vand.u32 4294901760, %v961_v47  ;;  %v1849_v1 = vand.u32 4294901760, %v10166_v16 }
 0x141   : > { %949 = vmatmul.f32.gmra.mxu0 %v948_v36  ;;  %1150 = vmatmul.f32.gmra.mxu1 %v10080_v58 }
 0x142   : > { %1390 = vmatmul.f32.gmra.mxu3 %v946_v31  ;;  %1519 = vmatpush.msrb.mxu0 %v17369_v6  ;;  %v963_v13 = vsub.f32 %v961_v47, %v962_v2  ;;  %v1850_v21 = vsub.f32 %v10166_v16, %v1849_v1  ;;  %v854_v31 = vld [vmem:[#allocation7 + $0xd0] sm:$0xff]  ;;  %v1868_v6 = vsub.f32 %v10209_v45, %v16881_v52 }
 0x143   : > { %1272 = vmatmul.f32.gmra.mxu2 %v945_v44  ;;  %1610 = vmatpush.msrb.mxu1 %v9948_v7  ;;  %v804_v7 = vld [vmem:[%s9815_s24 + $0xc0] sm:$0xff]  ;;  %v16882_v44 = vand.u32 4294901760, %v10189_v38  ;;  %v10218_v36 = vand.u32 4294901760, %v854_v31 }
 0x144   : > { %1523 = vmatpush.msrb.mxu0 %v17370_v59  ;;  %v964_v19 = vand.u32 4294901760, %v963_v13  ;;  %v10150_v25 = vand.u32 4294901760, %v804_v7  ;;  %v1851_v42 = vand.u32 4294901760, %v1850_v21  ;;  %v852_v13 = vld [vmem:[#allocation7 + $0xc0] sm:$0xff] }
 0x145   : > { %1612 = vmatpush.msrb.mxu1 %v9960_v12  ;;  %v971_v12 = vsub.f32 %v969_v18, %v970_v24  ;;  %v10232_v59 = vsub.f32 %v854_v31, %v10218_v36  ;;  %1697 = vmatpush.msrb.mxu2 %v10218_v36 }
 0x146   : > { %2010 = vmatpush.msra.mxu0 %v10166_v16  ;;  %1852 = vmatpush.msrb.mxu3 %v1851_v42 }
 0x147   : > { %1614 = vmatpush.msrb.mxu1 %v9976_v22  ;;  %v977_v22 = vsub.f32 %v804_v7, %v10150_v25  ;;  %v972_v48 = vand.u32 4294901760, %v971_v12  ;;  %v16877_v7 = vand.u32 4294901760, %v10232_v59  ;;  %v995_v12 = vsub.f32 %v10199_v49, %v994_v54 }
 0x148   : > { %2013 = vmatpush.msra.mxu0 %v10177_v14  ;;  %1858 = vmatpush.msrb.mxu3 %v1857_v35 }
 0x149   : > { %957 = vmatmul.f32.gmra.mxu0 %v956_v8  ;;  %1154 = vmatmul.f32.gmra.mxu1 %v10094_v50  ;;  %v1880_v63 = vsub.f32 %v10232_v59, %v16877_v7  ;;  %v996_v29 = vand.u32 4294901760, %v995_v12 }
 0x14a   : > { %1396 = vmatmul.f32.gmra.mxu3 %v954_v37  ;;  %1616 = vmatpush.msrb.mxu1 %v9990_v28  ;;  %v10156_v28 = vand.u32 4294901760, %v807_v34 }
 0x14b   : > { %1277 = vmatmul.f32.gmra.mxu2 %v953_v51  ;;  %v1862_v51 = vsub.f32 %v10189_v38, %v16882_v44  ;;  %2016 = vmatpush.msra.mxu0 %v10189_v38  ;;  %v1881_v20 = vand.u32 4294901760, %v1880_v63  ;;  %v847_v63 = vld [vmem:[#allocation7 + $0x98] sm:$0xff]  ;;  %v822_v44 = vld [vmem:[%s9815_s24 + $0x150] sm:$0xff] }
 0x14c   : > { %1618 = vmatpush.msrb.mxu1 %v10005_v55  ;;  %v978_v55 = vand.u32 4294901760, %v977_v22  ;;  %v10159_v62 = vsub.f32 %v807_v34, %v10156_v28  ;;  %v10385_v52 = vand.u32 4294901760, %v822_v44 }
 0x14d   : > { %v1863_v61 = vand.u32 4294901760, %v1862_v51  ;;  %2019 = vmatpush.msra.mxu0 %v10209_v45 }
 0x14e   : > { %1620 = vmatpush.msrb.mxu1 %v10018_v0  ;;  %v979_v0 = vsub.f32 %v977_v22, %v978_v55  ;;  %v986_v23 = vand.u32 4294901760, %v10159_v62 }
 0x14f   : > { %1864 = vmatpush.msrb.mxu3 %v1863_v61  ;;  %2022 = vmatpush.msra.mxu0 %v10224_v43 }
 0x150   : > { %2138 = vmatpush.msra.mxu1 %v10163_v9  ;;  %v980_v57 = vand.u32 4294901760, %v979_v0  ;;  %v987_v40 = vsub.f32 %v10159_v62, %v986_v23 }
 0x151   : > { %965 = vmatmul.f32.gmra.mxu0 %v964_v19  ;;  %1158 = vmatmul.f32.gmra.mxu1 %v10110_v46 }
 0x152   : > { %1402 = vmatmul.f32.gmra.mxu3 %v962_v2  ;;  %2140 = vmatpush.msra.mxu1 %v10168_v17  ;;  %v988_v37 = vand.u32 4294901760, %v987_v40  ;;  %v16879_v2 = vand.u32 4294901760, %v10224_v43 }
 0x153   : > { %1282 = vmatmul.f32.gmra.mxu2 %v961_v47  ;;  %v853_v47 = vld [vmem:[#allocation7 + $0xc8] sm:$0xff]  ;;  %2025 = vmatpush.msra.mxu0 %v10232_v59 }
 0x154   : > { %2142 = vmatpush.msra.mxu1 %v10179_v15  ;;  %v10234_v8 = vand.u32 4294901760, %v853_v47  ;;  %v1874_v34 = vsub.f32 %v10224_v43, %v16879_v2 }
 0x156   : > { %2144 = vmatpush.msra.mxu1 %v10191_v56  ;;  %v10242_v19 = vsub.f32 %v853_v47, %v10234_v8  ;;  %1699 = vmatpush.msrb.mxu2 %v10234_v8  ;;  %v1875_v33 = vand.u32 4294901760, %v1874_v34  ;;  %v848_v47 = vld [vmem:[#allocation7 + $0xa0] sm:$0xff] }
 0x158   : > { %2146 = vmatpush.msra.mxu1 %v10212_v30  ;;  %v16876_v0 = vand.u32 4294901760, %v10242_v19  ;;  %2028 = vmatpush.msra.mxu0 %v10242_v19 }
 0x159   : > { %973 = vmatmul.f32.gmra.mxu0 %v972_v48  ;;  %1162 = vmatmul.f32.gmra.mxu1 %v10125_v53  ;;  %v851_v48 = vld [vmem:[#allocation7 + $0xb8] sm:$0xff] }
 0x15a   : > { %1408 = vmatmul.f32.gmra.mxu3 %v970_v24  ;;  %v10244_v24 = vand.u32 4294901760, %v852_v13  ;;  %v10267_v10 = vand.u32 4294901760, %v851_v48  ;;  %v1886_v21 = vsub.f32 %v10242_v19, %v16876_v0  ;;  %2148 = vmatpush.msra.mxu1 %v10218_v36  ;;  %v844_v0 = vld [vmem:[#allocation7 + $0x80] sm:$0xff] }
 0x15b   : > { %1287 = vmatmul.f32.gmra.mxu2 %v969_v18  ;;  %v1869_v18 = vand.u32 4294901760, %v1868_v6 }
 0x15c   : > { %v10265_v4 = vsub.f32 %v852_v13, %v10244_v24  ;;  %1701 = vmatpush.msrb.mxu2 %v10244_v24  ;;  %v10278_v39 = vsub.f32 %v851_v48, %v10267_v10  ;;  %v1887_v61 = vand.u32 4294901760, %v1886_v21  ;;  %2150 = vmatpush.msra.mxu1 %v10234_v8  ;;  %v10322_v21 = vand.u32 4294901760, %v847_v63 }
 0x15d   : > { %1870 = vmatpush.msrb.mxu3 %v1869_v18  ;;  %v10305_v18 = vand.u32 4294901760, %v848_v47 }
 0x15e   : > { %v16874_v40 = vand.u32 4294901760, %v10265_v4  ;;  %1703 = vmatpush.msrb.mxu2 %v10267_v10  ;;  %v16873_v35 = vand.u32 4294901760, %v10278_v39  ;;  %2031 = vmatpush.msra.mxu0 %v10265_v4 }
 0x15f   : > { %1876 = vmatpush.msrb.mxu3 %v1875_v33  ;;  %2152 = vmatpush.msra.mxu1 %v10244_v24 }
 0x160   : > { %v1892_v31 = vsub.f32 %v10265_v4, %v16874_v40  ;;  %v1898_v6 = vsub.f32 %v10278_v39, %v16873_v35  ;;  %v846_v35 = vld [vmem:[#allocation7 + $0x90] sm:$0xff]  ;;  %2034 = vmatpush.msra.mxu0 %v10278_v39 }
 0x161   : > { %981 = vmatmul.f32.gmra.mxu0 %v980_v57  ;;  %1166 = vmatmul.f32.gmra.mxu1 %v10141_v11  ;;  %v850_v57 = vld [vmem:[#allocation7 + $0xb0] sm:$0xff]  ;;  %v10336_v40 = vand.u32 4294901760, %v846_v35 }
 0x162   : > { %1414 = vmatmul.f32.gmra.mxu3 %v978_v55  ;;  %v816_v55 = vld [vmem:[%s9815_s24 + $0x120] sm:$0xff]  ;;  %v10284_v42 = vand.u32 4294901760, %v850_v57  ;;  %v1893_v33 = vand.u32 4294901760, %v1892_v31  ;;  %2154 = vmatpush.msra.mxu1 %v10267_v10 }
 0x163   : > { %1292 = vmatmul.f32.gmra.mxu2 %v977_v22  ;;  %v10251_v22 = vsub.f32 %v813_v41, %v10221_v60  ;;  %1882 = vmatpush.msrb.mxu3 %v1881_v20  ;;  %v10320_v20 = vsub.f32 %v848_v47, %v10305_v18  ;;  %v10334_v47 = vsub.f32 %v847_v63, %v10322_v21 }
 0x164   : > { %1705 = vmatpush.msrb.mxu2 %v10284_v42  ;;  %v10347_v63 = vsub.f32 %v846_v35, %v10336_v40  ;;  %v10358_v35 = vand.u32 4294901760, %v844_v0  ;;  %2156 = vmatpush.msra.mxu1 %v10284_v42 }
 0x165   : > { %v1002_v41 = vand.u32 4294901760, %v10251_v22  ;;  %1888 = vmatpush.msrb.mxu3 %v1887_v61  ;;  %v16880_v31 = vand.u32 4294901760, %v10320_v20 }
 0x167   : > { %v1003_v12 = vsub.f32 %v10251_v22, %v1002_v41  ;;  %1894 = vmatpush.msrb.mxu3 %v1893_v33  ;;  %v1916_v33 = vsub.f32 %v10320_v20, %v16880_v31 }
 0x169   : > { %989 = vmatmul.f32.gmra.mxu0 %v988_v37  ;;  %1170 = vmatmul.f32.gmra.mxu1 %v10150_v25  ;;  %v10295_v37 = vsub.f32 %v850_v57, %v10284_v42 }
 0x16a   : > { %1420 = vmatmul.f32.gmra.mxu3 %v986_v23  ;;  %v10281_v23 = vand.u32 4294901760, %v816_v55 }
 0x16b   : > { %1297 = vmatmul.f32.gmra.mxu2 %v10159_v62  ;;  %v849_v62 = vld [vmem:[#allocation7 + $0xa8] sm:$0xff]  ;;  %v16875_v48 = vand.u32 4294901760, %v10295_v37  ;;  %2037 = vmatpush.msra.mxu0 %v10295_v37 }
 0x16c   : > { %v10291_v51 = vand.u32 4294901760, %v849_v62  ;;  %v10312_v34 = vsub.f32 %v816_v55, %v10281_v23  ;;  %v819_v55 = vld [vmem:[%s9815_s24 + $0x138] sm:$0xff] }
 0x16d   : > { %v10341_v61 = vand.u32 4294901760, %v819_v55 }
 0x16e   : > { %v10303_v13 = vsub.f32 %v849_v62, %v10291_v51  ;;  %1707 = vmatpush.msrb.mxu2 %v10291_v51  ;;  %v1899_v62 = vand.u32 4294901760, %v1898_v6  ;;  %v845_v6 = vld [vmem:[#allocation7 + $0x88] sm:$0xff]  ;;  %2158 = vmatpush.msra.mxu1 %v10291_v51 }
 0x170   : > { %v16878_v57 = vand.u32 4294901760, %v10303_v13  ;;  %1709 = vmatpush.msrb.mxu2 %v10305_v18  ;;  %1900 = vmatpush.msrb.mxu3 %v1899_v62 }
 0x171   : > { %997 = vmatmul.f32.gmra.mxu0 %v996_v29  ;;  %1174 = vmatmul.f32.gmra.mxu1 %v10156_v28  ;;  %v1904_v29 = vsub.f32 %v10295_v37, %v16875_v48 }
 0x172   : > { %1426 = vmatmul.f32.gmra.mxu3 %v994_v54  ;;  %v1004_v54 = vand.u32 4294901760, %v1003_v12  ;;  %1711 = vmatpush.msrb.mxu2 %v10322_v21  ;;  %v1910_v48 = vsub.f32 %v10303_v13, %v16878_v57  ;;  %v10351_v12 = vand.u32 4294901760, %v845_v6  ;;  %v1921_v57 = vand.u32 4294901760, %v10334_v47 }
 0x173   : > { %1302 = vmatmul.f32.gmra.mxu2 %v10199_v49  ;;  %v1010_v49 = vand.u32 4294901760, %v10312_v34  ;;  %v1905_v7 = vand.u32 4294901760, %v1904_v29  ;;  %2040 = vmatpush.msra.mxu0 %v10303_v13  ;;  %v1017_v29 = vsub.f32 %v819_v55, %v10341_v61 }
 0x174   : > { %1713 = vmatpush.msrb.mxu2 %v10336_v40  ;;  %v10362_v2 = vsub.f32 %v845_v6, %v10351_v12  ;;  %v1911_v31 = vand.u32 4294901760, %v1910_v48  ;;  %v1917_v6 = vand.u32 4294901760, %v1916_v33  ;;  %v10380_v48 = vsub.f32 %v844_v0, %v10358_v35  ;;  %2160 = vmatpush.msra.mxu1 %v10305_v18 }
 0x175   : > { %v1011_v62 = vsub.f32 %v10312_v34, %v1010_v49  ;;  %1906 = vmatpush.msrb.mxu3 %v1905_v7  ;;  %2043 = vmatpush.msra.mxu0 %v10320_v20  ;;  %v1018_v55 = vand.u32 4294901760, %v1017_v29  ;;  %v17371_v7 = vand.u32 4294901760, %v10347_v63  ;;  %v17372_v33 = vand.u32 4294901760, %v10177_v14 }
 0x176   : > { %1715 = vmatpush.msrb.mxu2 %v10351_v12  ;;  %v1933_v26 = vand.u32 4294901760, %v10362_v2  ;;  %v1939_v0 = vand.u32 4294901760, %v10380_v48  ;;  %2162 = vmatpush.msra.mxu1 %v10322_v21 }
 0x177   : > { %1912 = vmatpush.msrb.mxu3 %v1911_v31  ;;  %2046 = vmatpush.msra.mxu0 %v10334_v47  ;;  %v17373_v31 = vand.u32 4294901760, %v10189_v38  ;;  %v1019_v14 = vsub.f32 %v1017_v29, %v1018_v55 }
 0x178   : > { %1717 = vmatpush.msrb.mxu2 %v10358_v35  ;;  %v1940_v38 = vsub.f32 %v10380_v48, %v1939_v0  ;;  %2164 = vmatpush.msra.mxu1 %v10336_v40 }
 0x179   : > { %1005 = vmatmul.f32.gmra.mxu0 %v1004_v54  ;;  %1178 = vmatmul.f32.gmra.mxu1 %v10172_v32  ;;  %v1922_v54 = vsub.f32 %v10334_v47, %v1921_v57 }
 0x17a   : > { %1432 = vmatmul.f32.gmra.mxu3 %v1002_v41  ;;  %2269 = vmatpush.msra.mxu2 %v1849_v1  ;;  %v1012_v41 = vand.u32 4294901760, %v1011_v62  ;;  %v1934_v1 = vsub.f32 %v10362_v2, %v1933_v26  ;;  %v1025_v62 = vsub.f32 %v822_v44, %v10385_v52  ;;  %v1020_v44 = vand.u32 4294901760, %v1019_v14 }
 0x17b   : > { %1307 = vmatmul.f32.gmra.mxu2 %v10251_v22  ;;  %v1928_v22 = vsub.f32 %v10347_v63, %v17371_v7  ;;  %1918 = vmatpush.msrb.mxu3 %v1917_v6  ;;  %v1923_v16 = vand.u32 4294901760, %v1922_v54  ;;  %v825_v54 = vld [vmem:[%s9815_s24 + $0x168] sm:$0xff]  ;;  %v17374_v7 = vand.u32 4294901760, %v10209_v45  ;;  %v17376_v45 = vand.u32 4294901760, %v10232_v59 }
 0x17c   : > { %2273 = vmatpush.msra.mxu2 %v17372_v33  ;;  %2049 = vmatpush.msra.mxu0 %v10347_v63  ;;  %v1935_v33 = vand.u32 4294901760, %v1934_v1  ;;  %v781_v59 = vld [vmem:[%s9815_s24 + $0x8] sm:$0xff]  ;;  %v17379_v14 = vand.u32 4294901760, %v10278_v39 }
 0x17d   : > { %v1929_v6 = vand.u32 4294901760, %v1928_v22  ;;  %1924 = vmatpush.msrb.mxu3 %v1923_v16  ;;  %v1026_v22 = vand.u32 4294901760, %v1025_v62  ;;  %2166 = vmatpush.msra.mxu1 %v10351_v12 }
 0x17e   : > { %2277 = vmatpush.msra.mxu2 %v17373_v31  ;;  %2052 = vmatpush.msra.mxu0 %v10362_v2  ;;  %v17378_v31 = vand.u32 4294901760, %v10265_v4  ;;  %v10435_v4 = vand.u32 4294901760, %v781_v59  ;;  %v10476_v2 = vld [vmem:[%s16860_s5] ss:$0 sm:$0xff] }
 0x17f   : > { %1930 = vmatpush.msrb.mxu3 %v1929_v6  ;;  %v1027_v16 = vsub.f32 %v1025_v62, %v1026_v22  ;;  %2168 = vmatpush.msra.mxu1 %v10358_v35 }
 0x180   : > { %2281 = vmatpush.msra.mxu2 %v17374_v7  ;;  %2055 = vmatpush.msra.mxu0 %v10380_v48 }
 0x181   : > { %1013 = vmatmul.f32.gmra.mxu0 %v1012_v41  ;;  %1182 = vmatmul.f32.gmra.mxu1 %v10221_v60  ;;  %v17375_v41 = vand.u32 4294901760, %v10224_v43  ;;  %v17377_v43 = vand.u32 4294901760, %v10242_v19  ;;  %v1028_v19 = vand.u32 4294901760, %v1027_v16 }
 0x182   : > { %1438 = vmatmul.f32.gmra.mxu3 %v1010_v49  ;;  %v10414_v49 = vand.u32 4294901760, %v825_v54 }
 0x183   : > { %1312 = vmatmul.f32.gmra.mxu2 %v10312_v34  ;;  %1936 = vmatpush.msrb.mxu3 %v1935_v33  ;;  %v1941_v34 = vand.u32 4294901760, %v1940_v38 }
 0x184   : > { %2285 = vmatpush.msra.mxu2 %v17375_v41  ;;  %v1033_v1 = vsub.f32 %v825_v54, %v10414_v49 }
 0x185   : > { %1942 = vmatpush.msrb.mxu3 %v1941_v34 }
 0x186   : > { %2289 = vmatpush.msra.mxu2 %v17376_v45  ;;  %v1034_v6 = vand.u32 4294901760, %v1033_v1 }
 0x187   : > { %2396 = vmatpush.msra.mxu3 %v10163_v9  ;;  %v17381_v9 = vand.u32 4294901760, %v10303_v13  ;;  %v17383_v13 = vand.u32 4294901760, %v10347_v63 }
 0x188   : > { %2293 = vmatpush.msra.mxu2 %v17377_v43  ;;  %v1035_v39 = vsub.f32 %v1033_v1, %v1034_v6  ;;  %v793_v43 = vld [vmem:[%s9815_s24 + $0x68] sm:$0xff] }
 0x189   : > { %1021 = vmatmul.f32.gmra.mxu0 %v1020_v44  ;;  %1186 = vmatmul.f32.gmra.mxu1 %v10281_v23 }
 0x18a   : > { %1444 = vmatmul.f32.gmra.mxu3 %v1018_v55  ;;  %2297 = vmatpush.msra.mxu2 %v17378_v31  ;;  %v17380_v55 = vand.u32 4294901760, %v10295_v37  ;;  %v784_v37 = vld [vmem:[%s9815_s24 + $0x20] sm:$0xff] }
 0x18b   : > { %1317 = vmatmul.f32.gmra.mxu2 %v1017_v29  ;;  %2398 = vmatpush.msra.mxu3 %v10168_v17  ;;  %v17382_v29 = vand.u32 4294901760, %v10320_v20  ;;  %v10445_v17 = vsub.f32 %v781_v59, %v10435_v4 }
 0x18c   : > { %2301 = vmatpush.msra.mxu2 %v17379_v14 }
 0x18d   : > { %2400 = vmatpush.msra.mxu3 %v10179_v15  ;;  %v1036_v15 = vand.u32 4294901760, %v1035_v39  ;;  %v16897_v20 = vand.u32 4294901760, %v10445_v17  ;;  %v796_v39 = vld [vmem:[%s9815_s24 + $0x80] sm:$0xff] }
 0x18e   : > { %2305 = vmatpush.msra.mxu2 %v17380_v55 }
 0x18f   : > { %2402 = vmatpush.msra.mxu3 %v10191_v56  ;;  %v1721_v56 = vsub.f32 %v10445_v17, %v16897_v20 }
 0x190   : > { %2309 = vmatpush.msra.mxu2 %v17381_v9 }
 0x191   : > { %1029 = vmatmul.f32.gmra.mxu0 %v1028_v19  ;;  %1190 = vmatmul.f32.gmra.mxu1 %v10341_v61 }
 0x192   : > { %1450 = vmatmul.f32.gmra.mxu3 %v1026_v22  ;;  %2313 = vmatpush.msra.mxu2 %v17382_v29 }
 0x193   : > { %1322 = vmatmul.f32.gmra.mxu2 %v1025_v62  ;;  %2404 = vmatpush.msra.mxu3 %v10212_v30  ;;  %v10456_v62 = vand.u32 4294901760, %v784_v37 }
 0x194   : > { %2317 = vmatpush.msra.mxu2 %v1921_v57  ;;  %v1722_v57 = vand.u32 4294901760, %v1721_v56 }
 0x195   : > { %2406 = vmatpush.msra.mxu3 %v10218_v36  ;;  %v10468_v30 = vsub.f32 %v784_v37, %v10456_v62  ;;  %v787_v36 = vld [vmem:[%s9815_s24 + $0x38] sm:$0xff] }
 0x196   : > { %2321 = vmatpush.msra.mxu2 %v17383_v13  ;;  %v10479_v63 = vand.u32 4294901760, %v787_v36 }
 0x197   : > { %2408 = vmatpush.msra.mxu3 %v10234_v8  ;;  %v16895_v47 = vand.u32 4294901760, %v10468_v30 }
 0x198   : > { %2325 = vmatpush.msra.mxu2 %v1933_v26  ;;  %v10490_v48 = vsub.f32 %v787_v36, %v10479_v63 }
 0x199   : > { %1037 = vmatmul.f32.gmra.mxu0 %v1036_v15  ;;  %1194 = vmatmul.f32.gmra.mxu1 %v10385_v52 }
 0x19a   : > { %1456 = vmatmul.f32.gmra.mxu3 %v1034_v6  ;;  %2329 = vmatpush.msra.mxu2 %v1939_v0  ;;  %v790_v0 = vld [vmem:[%s9815_s24 + $0x50] sm:$0xff]  ;;  %v16894_v22 = vand.u32 4294901760, %v10490_v48  ;;  %v10515_v6 = vand.u32 4294901760, %v793_v43 }
 0x19b   : > { %1327 = vmatmul.f32.gmra.mxu2 %v1033_v1  ;;  %2410 = vmatpush.msra.mxu3 %v10244_v24  ;;  %v1729_v24 = vsub.f32 %v10468_v30, %v16895_v47  ;;  %v10495_v33 = vand.u32 4294901760, %v790_v0 }
 0x19c   : > { %v1737_v34 = vsub.f32 %v10490_v48, %v16894_v22  ;;  %v10526_v9 = vsub.f32 %v793_v43, %v10515_v6 }
 0x19d   : > { %2412 = vmatpush.msra.mxu3 %v10267_v10  ;;  %v1730_v44 = vand.u32 4294901760, %v1729_v24 }
 0x19e   : > { %v918_v26 = vpop.f32.mrf.mxu0  ;;  %v1738_v19 = vand.u32 4294901760, %v1737_v34  ;;  %v16891_v36 = vand.u32 4294901760, %v10526_v9 }
 0x19f   : > { %v919_v8 = vadd.f32 %v10476_v2, %v918_v26  ;;  %2414 = vmatpush.msra.mxu3 %v10284_v42  ;;  %v10503_v42 = vsub.f32 %v790_v0, %v10495_v33  ;;  %v10533_v26 = vand.u32 4294901760, %v796_v39 }
 0x1a1   : > { %1198 = vmatmul.f32.gmra.mxu1 %v10414_v49  ;;  %1525 = vmatmul.f32.vlgmr.msrb.gmra.mxu0 %v9986_v27  ;;  %v16892_v31 = vand.u32 4294901760, %v10503_v42  ;;  %v10543_v24 = vsub.f32 %v796_v39, %v10533_v26 }
 0x1a2   : > { %1944 = vmatmul.f32.vlgmr.msrb.gmra.mxu3 %v10435_v4 }
 0x1a3   : > { %1723 = vmatmul.f32.vlgmr.msrb.gmra.mxu2 %v1722_v57  ;;  %2416 = vmatpush.msra.mxu3 %v10291_v51 }
 0x1a4   : > { %v1367_v10 = vpop.f32.mrf.mxu3 }
 0x1a5   : > { %2418 = vmatpush.msra.mxu3 %v10305_v18 }
 0x1a6   : > { %v926_v54 = vpop.f32.mrf.mxu0  ;;  %v1139_v7 = vpop.f32.mrf.mxu1 }
 0x1a7   : > { %v1140_v38 = vadd.f32 %v1139_v7, %v919_v8  ;;  %v1253_v41 = vpop.f32.mrf.mxu2  ;;  %v927_v51 = vadd.f32 %v10476_v2, %v926_v54  ;;  %2420 = vmatpush.msra.mxu3 %v10322_v21  ;;  %v1753_v8 = vsub.f32 %v10526_v9, %v16891_v36 }
 0x1a9   : > { %v1254_v45 = vadd.f32 %v1253_v41, %v1140_v38  ;;  %1529 = vmatmul.f32.gmra.mxu0 %v10025_v5  ;;  %1622 = vmatmul.f32.vlgmr.msrb.gmra.mxu1 %v9986_v27 }
 0x1aa   : > { %1948 = vmatmul.f32.gmra.mxu3 %v10456_v62 }
 0x1ab   : > { %1731 = vmatmul.f32.gmra.mxu2 %v1730_v44  ;;  %v10510_v18 = vadd.f32 %v1367_v10, %v1254_v45  ;;  %2422 = vmatpush.msra.mxu3 %v10336_v40  ;;  %v1745_v40 = vsub.f32 %v10503_v42, %v16892_v31  ;;  %v799_v10 = vld [vmem:[%s9815_s24 + $0x98] sm:$0xff]  ;;  %v1754_v44 = vand.u32 4294901760, %v1753_v8  ;;  %v16889_v45 = vand.u32 4294901760, %v10543_v24 }
 0x1ad   : > { %v1373_v16 = vpop.f32.mrf.mxu3  ;;  %2424 = vmatpush.msra.mxu3 %v10351_v12  ;;  %v1746_v56 = vand.u32 4294901760, %v1745_v40 }
 0x1ae   : > { %v934_v27 = vpop.f32.mrf.mxu0  ;;  %v1143_v1 = vpop.f32.mrf.mxu1 }
 0x1af   : > { %v1144_v59 = vadd.f32 %v1143_v1, %v927_v51  ;;  %v1258_v14 = vpop.f32.mrf.mxu2  ;;  %v935_v21 = vadd.f32 %v10476_v2, %v934_v27  ;;  %2426 = vmatpush.msra.mxu3 %v10358_v35  ;;  %v10549_v51 = vand.u32 4294901760, %v799_v10 }
 0x1b1   : > { %v1259_v55 = vadd.f32 %v1258_v14, %v1144_v59  ;;  %1533 = vmatmul.f32.gmra.mxu0 %v10061_v3  ;;  %1626 = vmatmul.f32.gmra.mxu1 %v10025_v5  ;;  %v10559_v27 = vsub.f32 %v799_v10, %v10549_v51  ;;  %v802_v59 = vld [vmem:[%s9815_s24 + $0xb0] sm:$0xff] }
 0x1b2   : > { %1952 = vmatmul.f32.gmra.mxu3 %v10479_v63 }
 0x1b3   : > { %1739 = vmatmul.f32.gmra.mxu2 %v1738_v19  ;;  %v10529_v12 = vadd.f32 %v1373_v16, %v1259_v55  ;;  %v1761_v16 = vsub.f32 %v10543_v24, %v16889_v45  ;;  %v16888_v39 = vand.u32 4294901760, %v10559_v27 }
 0x1b5   : > { %v1379_v29 = vpop.f32.mrf.mxu3 }
 0x1b6   : > { %v942_v37 = vpop.f32.mrf.mxu0  ;;  %v1147_v5 = vpop.f32.mrf.mxu1 }
 0x1b7   : > { %v1148_v15 = vadd.f32 %v1147_v5, %v935_v21  ;;  %v1263_v13 = vpop.f32.mrf.mxu2  ;;  %v943_v35 = vadd.f32 %v10476_v2, %v942_v37  ;;  %v1762_v21 = vand.u32 4294901760, %v1761_v16 }
 0x1b9   : > { %v1264_v57 = vadd.f32 %v1263_v13, %v1148_v15  ;;  %1537 = vmatmul.f32.gmra.mxu0 %v10080_v58  ;;  %1630 = vmatmul.f32.gmra.mxu1 %v10061_v3  ;;  %v1769_v15 = vsub.f32 %v10559_v27, %v16888_v39 }
 0x1ba   : > { %1956 = vmatmul.f32.gmra.mxu3 %v10495_v33 }
 0x1bb   : > { %1747 = vmatmul.f32.gmra.mxu2 %v1746_v56  ;;  %v10545_v0 = vadd.f32 %v1379_v29, %v1264_v57  ;;  %v10565_v29 = vand.u32 4294901760, %v802_v59  ;;  %v805_v57 = vld [vmem:[%s9815_s24 + $0xc8] sm:$0xff] }
 0x1bd   : > { %v1385_v54 = vpop.f32.mrf.mxu3  ;;  %v10575_v13 = vsub.f32 %v802_v59, %v10565_v29  ;;  %v808_v59 = vld [vmem:[%s9815_s24 + $0xe0] sm:$0xff] }
 0x1be   : > { %v950_v7 = vpop.f32.mrf.mxu0  ;;  %v1151_v38 = vpop.f32.mrf.mxu1 }
 0x1bf   : > { %v1152_v3 = vadd.f32 %v1151_v38, %v943_v35  ;;  %v1268_v41 = vpop.f32.mrf.mxu2  ;;  %v951_v43 = vadd.f32 %v10476_v2, %v950_v7  ;;  %v1770_v7 = vand.u32 4294901760, %v1769_v15  ;;  %v16886_v38 = vand.u32 4294901760, %v10575_v13 }
 0x1c1   : > { %v1269_v34 = vadd.f32 %v1268_v41, %v1152_v3  ;;  %1541 = vmatmul.f32.gmra.mxu0 %v10094_v50  ;;  %1634 = vmatmul.f32.gmra.mxu1 %v10080_v58  ;;  %v10581_v3 = vand.u32 4294901760, %v805_v57 }
 0x1c2   : > { %1960 = vmatmul.f32.gmra.mxu3 %v10515_v6 }
 0x1c3   : > { %1755 = vmatmul.f32.gmra.mxu2 %v1754_v44  ;;  %v10561_v1 = vadd.f32 %v1385_v54, %v1269_v34  ;;  %v1777_v34 = vsub.f32 %v10575_v13, %v16886_v38 }
 0x1c5   : > { %v1391_v14 = vpop.f32.mrf.mxu3 }
 0x1c6   : > { %v958_v19 = vpop.f32.mrf.mxu0  ;;  %v1155_v55 = vpop.f32.mrf.mxu1 }
 0x1c7   : > { %v1156_v58 = vadd.f32 %v1155_v55, %v951_v43  ;;  %v1273_v40 = vpop.f32.mrf.mxu2  ;;  %v959_v5 = vadd.f32 %v10476_v2, %v958_v19  ;;  %v10591_v43 = vsub.f32 %v805_v57, %v10581_v3 }
 0x1c9   : > { %v1274_v37 = vadd.f32 %v1273_v40, %v1156_v58  ;;  %1545 = vmatmul.f32.gmra.mxu0 %v10110_v46  ;;  %1638 = vmatmul.f32.gmra.mxu1 %v10094_v50  ;;  %v1778_v40 = vand.u32 4294901760, %v1777_v34 }
 0x1ca   : > { %1964 = vmatmul.f32.gmra.mxu3 %v10533_v26 }
 0x1cb   : > { %1763 = vmatmul.f32.gmra.mxu2 %v1762_v21  ;;  %v10577_v56 = vadd.f32 %v1391_v14, %v1274_v37  ;;  %v16885_v21 = vand.u32 4294901760, %v10591_v43  ;;  %v10597_v37 = vand.u32 4294901760, %v808_v59 }
 0x1cd   : > { %v1397_v35 = vpop.f32.mrf.mxu3  ;;  %v1785_v57 = vsub.f32 %v10591_v43, %v16885_v21 }
 0x1ce   : > { %v966_v8 = vpop.f32.mrf.mxu0  ;;  %v1159_v10 = vpop.f32.mrf.mxu1 }
 0x1cf   : > { %v1160_v50 = vadd.f32 %v1159_v10, %v959_v5  ;;  %v1278_v54 = vpop.f32.mrf.mxu2  ;;  %v967_v44 = vadd.f32 %v10476_v2, %v966_v8  ;;  %v811_v10 = vld [vmem:[%s9815_s24 + $0xf8] sm:$0xff] }
 0x1d1   : > { %v1279_v41 = vadd.f32 %v1278_v54, %v1160_v50  ;;  %1549 = vmatmul.f32.gmra.mxu0 %v10125_v53  ;;  %1642 = vmatmul.f32.gmra.mxu1 %v10110_v46 }
 0x1d2   : > { %1968 = vmatmul.f32.gmra.mxu3 %v10549_v51 }
 0x1d3   : > { %1771 = vmatmul.f32.gmra.mxu2 %v1770_v7  ;;  %v10593_v16 = vadd.f32 %v1397_v35, %v1279_v41  ;;  %v10607_v35 = vsub.f32 %v808_v59, %v10597_v37 }
 0x1d5   : > { %v1403_v14 = vpop.f32.mrf.mxu3  ;;  %v16884_v34 = vand.u32 4294901760, %v10607_v35 }
 0x1d6   : > { %v974_v19 = vpop.f32.mrf.mxu0  ;;  %v1163_v55 = vpop.f32.mrf.mxu1 }
 0x1d7   : > { %v1164_v46 = vadd.f32 %v1163_v55, %v967_v44  ;;  %v1283_v58 = vpop.f32.mrf.mxu2  ;;  %v975_v15 = vadd.f32 %v10476_v2, %v974_v19  ;;  %v1786_v44 = vand.u32 4294901760, %v1785_v57  ;;  %v10613_v19 = vand.u32 4294901760, %v811_v10 }
 0x1d9   : > { %v1284_v5 = vadd.f32 %v1283_v58, %v1164_v46  ;;  %1553 = vmatmul.f32.gmra.mxu0 %v10141_v11  ;;  %1646 = vmatmul.f32.gmra.mxu1 %v10125_v53  ;;  %v10623_v46 = vsub.f32 %v811_v10, %v10613_v19 }
 0x1da   : > { %1972 = vmatmul.f32.gmra.mxu3 %v10565_v29 }
 0x1db   : > { %1779 = vmatmul.f32.gmra.mxu2 %v1778_v40  ;;  %v10609_v8 = vadd.f32 %v1403_v14, %v1284_v5  ;;  %v1793_v14 = vsub.f32 %v10607_v35, %v16884_v34  ;;  %v814_v40 = vld [vmem:[%s9815_s24 + $0x110] sm:$0xff] }
 0x1dd   : > { %v1409_v50 = vpop.f32.mrf.mxu3 }
 0x1de   : > { %v982_v54 = vpop.f32.mrf.mxu0  ;;  %v1167_v7 = vpop.f32.mrf.mxu1 }
 0x1df   : > { %v1168_v53 = vadd.f32 %v1167_v7, %v975_v15  ;;  %v1288_v41 = vpop.f32.mrf.mxu2  ;;  %v983_v59 = vadd.f32 %v10476_v2, %v982_v54  ;;  %v16887_v54 = vand.u32 4294901760, %v10623_v46 }
 0x1e1   : > { %v1289_v55 = vadd.f32 %v1288_v41, %v1168_v53  ;;  %1557 = vmatmul.f32.gmra.mxu0 %v10150_v25  ;;  %1650 = vmatmul.f32.gmra.mxu1 %v10141_v11  ;;  %v1794_v53 = vand.u32 4294901760, %v1793_v14  ;;  %v10629_v41 = vand.u32 4294901760, %v814_v40  ;;  %v817_v14 = vld [vmem:[%s9815_s24 + $0x128] sm:$0xff] }
 0x1e2   : > { %1976 = vmatmul.f32.gmra.mxu3 %v10581_v3 }
 0x1e3   : > { %1787 = vmatmul.f32.gmra.mxu2 %v1786_v44  ;;  %v10625_v58 = vadd.f32 %v1409_v50, %v1289_v55  ;;  %v1801_v50 = vsub.f32 %v10623_v46, %v16887_v54  ;;  %v10639_v55 = vsub.f32 %v814_v40, %v10629_v41 }
 0x1e5   : > { %v1415_v5 = vpop.f32.mrf.mxu3  ;;  %v1802_v21 = vand.u32 4294901760, %v1801_v50  ;;  %v820_v50 = vld [vmem:[%s9815_s24 + $0x140] sm:$0xff] }
 0x1e6   : > { %v990_v15 = vpop.f32.mrf.mxu0  ;;  %v1171_v57 = vpop.f32.mrf.mxu1 }
 0x1e7   : > { %v1172_v11 = vadd.f32 %v1171_v57, %v983_v59  ;;  %v1293_v7 = vpop.f32.mrf.mxu2  ;;  %v991_v10 = vadd.f32 %v10476_v2, %v990_v15  ;;  %v16890_v15 = vand.u32 4294901760, %v10639_v55 }
 0x1e9   : > { %v1294_v44 = vadd.f32 %v1293_v7, %v1172_v11  ;;  %1561 = vmatmul.f32.gmra.mxu0 %v10156_v28  ;;  %1654 = vmatmul.f32.gmra.mxu1 %v10150_v25 }
 0x1ea   : > { %1980 = vmatmul.f32.gmra.mxu3 %v10597_v37 }
 0x1eb   : > { %1795 = vmatmul.f32.gmra.mxu2 %v1794_v53  ;;  %v10641_v59 = vadd.f32 %v1415_v5, %v1294_v44  ;;  %v10645_v53 = vand.u32 4294901760, %v817_v14  ;;  %v1809_v5 = vsub.f32 %v10639_v55, %v16890_v15 }
 0x1ed   : > { %v1421_v57 = vpop.f32.mrf.mxu3  ;;  %v10655_v44 = vsub.f32 %v817_v14, %v10645_v53  ;;  %v1810_v39 = vand.u32 4294901760, %v1809_v5  ;;  %v823_v5 = vld [vmem:[%s9815_s24 + $0x158] sm:$0xff] }
 0x1ee   : > { %v998_v11 = vpop.f32.mrf.mxu0  ;;  %v1175_v7 = vpop.f32.mrf.mxu1 }
 0x1ef   : > { %v1176_v25 = vadd.f32 %v1175_v7, %v991_v10  ;;  %v1298_v34 = vpop.f32.mrf.mxu2  ;;  %v999_v40 = vadd.f32 %v10476_v2, %v998_v11  ;;  %v16893_v11 = vand.u32 4294901760, %v10655_v44 }
 0x1f1   : > { %v1299_v38 = vadd.f32 %v1298_v34, %v1176_v25  ;;  %1565 = vmatmul.f32.gmra.mxu0 %v10172_v32  ;;  %1658 = vmatmul.f32.gmra.mxu1 %v10156_v28  ;;  %v1817_v14 = vsub.f32 %v10655_v44, %v16893_v11 }
 0x1f2   : > { %1984 = vmatmul.f32.gmra.mxu3 %v10613_v19 }
 0x1f3   : > { %1803 = vmatmul.f32.gmra.mxu2 %v1802_v21  ;;  %v10657_v10 = vadd.f32 %v1421_v57, %v1299_v38  ;;  %v10661_v21 = vand.u32 4294901760, %v820_v50  ;;  %v1818_v36 = vand.u32 4294901760, %v1817_v14  ;;  %v826_v14 = vld [vmem:[%s9815_s24 + $0x170] sm:$0xff] }
 0x1f5   : > { %v1427_v34 = vpop.f32.mrf.mxu3  ;;  %17384 = vst [vmem:[#allocation16_spill] sm:$0xff] %v10661_v21  ;;  %v10671_v57 = vsub.f32 %v820_v50, %v10661_v21 }
 0x1f6   : > { %v1006_v7 = vpop.f32.mrf.mxu0  ;;  %v1179_v25 = vpop.f32.mrf.mxu1 }
 0x1f7   : > { %v1180_v28 = vadd.f32 %v1179_v25, %v999_v40  ;;  %v1303_v54 = vpop.f32.mrf.mxu2  ;;  %v1007_v38 = vadd.f32 %v10476_v2, %v1006_v7  ;;  %v16896_v7 = vand.u32 4294901760, %v10671_v57 }
 0x1f9   : > { %v1304_v45 = vadd.f32 %v1303_v54, %v1180_v28  ;;  %1569 = vmatmul.f32.gmra.mxu0 %v10221_v60  ;;  %1662 = vmatmul.f32.gmra.mxu1 %v10172_v32  ;;  %v1825_v50 = vsub.f32 %v10671_v57, %v16896_v7 }
 0x1fa   : > { %1988 = vmatmul.f32.gmra.mxu3 %v10629_v41 }
 0x1fb   : > { %1811 = vmatmul.f32.gmra.mxu2 %v1810_v39  ;;  %v10673_v40 = vadd.f32 %v1427_v34, %v1304_v45  ;;  %v10677_v39 = vand.u32 4294901760, %v823_v5  ;;  %v1826_v22 = vand.u32 4294901760, %v1825_v50 }
 0x1fd   : > { %v1433_v54 = vpop.f32.mrf.mxu3  ;;  %v10687_v34 = vsub.f32 %v823_v5, %v10677_v39 }
 0x1fe   : > { %v1014_v25 = vpop.f32.mrf.mxu0  ;;  %v1183_v28 = vpop.f32.mrf.mxu1 }
 0x1ff   : > { %v1184_v32 = vadd.f32 %v1183_v28, %v1007_v38  ;;  %v1308_v15 = vpop.f32.mrf.mxu2  ;;  %v1015_v45 = vadd.f32 %v10476_v2, %v1014_v25  ;;  %v16901_v47 = vand.u32 4294901760, %v10687_v34  ;;  %v10693_v25 = vand.u32 4294901760, %v826_v14 }
 0x201   : > { %v1309_v31 = vadd.f32 %v1308_v15, %v1184_v32  ;;  %1573 = vmatmul.f32.gmra.mxu0 %v10281_v23  ;;  %1666 = vmatmul.f32.gmra.mxu1 %v10221_v60  ;;  %v1833_v5 = vsub.f32 %v10687_v34, %v16901_v47 }
 0x202   : > { %1992 = vmatmul.f32.gmra.mxu3 %v10645_v53 }
 0x203   : > { %1819 = vmatmul.f32.gmra.mxu2 %v1818_v36  ;;  %v10689_v38 = vadd.f32 %v1433_v54, %v1309_v31  ;;  %v10703_v54 = vsub.f32 %v826_v14, %v10693_v25 }
 0x205   : > { %v1439_v15 = vpop.f32.mrf.mxu3  ;;  %v16900_v20 = vand.u32 4294901760, %v10703_v54 }
 0x206   : > { %v1022_v28 = vpop.f32.mrf.mxu0  ;;  %v1187_v32 = vpop.f32.mrf.mxu1 }
 0x207   : > { %v1188_v11 = vadd.f32 %v1187_v32, %v1015_v45  ;;  %v1313_v60 = vpop.f32.mrf.mxu2  ;;  %v1023_v31 = vadd.f32 %v10476_v2, %v1022_v28  ;;  %v1841_v14 = vsub.f32 %v10703_v54, %v16900_v20 }
 0x209   : > { %v1314_v36 = vadd.f32 %v1313_v60, %v1188_v11  ;;  %1577 = vmatmul.f32.gmra.mxu0 %v10341_v61  ;;  %1670 = vmatmul.f32.gmra.mxu1 %v10281_v23  ;;  %v1834_v23 = vand.u32 4294901760, %v1833_v5 }
 0x20a   : > { %1996 = vmatmul.f32.gmra.mxu3 %v10661_v21 }
 0x20b   : > { %1827 = vmatmul.f32.gmra.mxu2 %v1826_v22  ;;  %v10705_v45 = vadd.f32 %v1439_v15, %v1314_v36 }
 0x20d   : > { %v1445_v50 = vpop.f32.mrf.mxu3 }
 0x20e   : > { %v1030_v11 = vpop.f32.mrf.mxu0  ;;  %v1191_v32 = vpop.f32.mrf.mxu1 }
 0x20f   : > { %v1192_v60 = vadd.f32 %v1191_v32, %v1023_v31  ;;  %v1318_v7 = vpop.f32.mrf.mxu2  ;;  %v1031_v22 = vadd.f32 %v10476_v2, %v1030_v11  ;;  %v1842_v32 = vand.u32 4294901760, %v1841_v14 }
 0x211   : > { %v1319_v21 = vadd.f32 %v1318_v7, %v1192_v60  ;;  %1581 = vmatmul.f32.gmra.mxu0 %v10385_v52  ;;  %1674 = vmatmul.f32.gmra.mxu1 %v10341_v61 }
 0x212   : > { %2000 = vmatmul.f32.gmra.mxu3 %v10677_v39 }
 0x213   : > { %1835 = vmatmul.f32.gmra.mxu2 %v1834_v23  ;;  %v10715_v15 = vadd.f32 %v1445_v50, %v1319_v21 }
 0x215   : > { %v1451_v28 = vpop.f32.mrf.mxu3 }
 0x216   : > { %v1038_v36 = vpop.f32.mrf.mxu0  ;;  %v1195_v31 = vpop.f32.mrf.mxu1 }
 0x217   : > { %v1196_v5 = vadd.f32 %v1195_v31, %v1031_v22  ;;  %v1323_v7 = vpop.f32.mrf.mxu2  ;;  %v1039_v61 = vadd.f32 %v10476_v2, %v1038_v36 }
 0x219   : > { %v1324_v60 = vadd.f32 %v1323_v7, %v1196_v5  ;;  %1585 = vmatmul.f32.gmra.mxu0 %v10414_v49  ;;  %1678 = vmatmul.f32.gmra.mxu1 %v10385_v52 }
 0x21a   : > { %2004 = vmatmul.f32.gmra.mxu3 %v10693_v25 }
 0x21b   : > { %1843 = vmatmul.f32.gmra.mxu2 %v1842_v32  ;;  %v10721_v11 = vadd.f32 %v1451_v28, %v1324_v60 }
 0x21d   : > { %v1457_v21 = vpop.f32.mrf.mxu3 }
 0x21e   : > { %v1199_v50 = vpop.f32.mrf.mxu1  ;;  %v1526_v23 = vpop.f32.mrf.mxu0 }
 0x21f   : > { %v1200_v20 = vadd.f32 %v1199_v50, %v1039_v61  ;;  %v1328_v47 = vpop.f32.mrf.mxu2  ;;  %v1527_v2 = vadd.f32 %v1526_v23, %v10510_v18  ;;  %v17386_v50 = vand.u32 4294901760, %v10468_v30 }
 0x221   : > { %v1329_v22 = vadd.f32 %v1328_v47, %v1200_v20  ;;  %1682 = vmatmul.f32.gmra.mxu1 %v10414_v49  ;;  %2058 = vmatmul.f32.vlgmr.msra.gmra.mxu0 %v10445_v17  ;;  %v17385_v49 = vand.u32 4294901760, %v10445_v17 }
 0x222   : > { %2428 = vmatmul.f32.vlgmr.msra.gmra.mxu3 %v10435_v4 }
 0x223   : > { %2331 = vmatmul.f32.vlgmr.msra.gmra.mxu2 %v10435_v4  ;;  %v10727_v52 = vadd.f32 %v1457_v21, %v1329_v22 }
 0x225   : > { %v1945_v14 = vpop.f32.mrf.mxu3 }
 0x226   : > { %v1530_v28 = vpop.f32.mrf.mxu0  ;;  %v1623_v36 = vpop.f32.mrf.mxu1 }
 0x227   : > { %v1624_v31 = vadd.f32 %v1623_v36, %v1527_v2  ;;  %v1724_v5 = vpop.f32.mrf.mxu2  ;;  %v1531_v20 = vadd.f32 %v1530_v28, %v10529_v12  ;;  %v17387_v36 = vand.u32 4294901760, %v10490_v48 }
 0x229   : > { %v1725_v7 = vadd.f32 %v1724_v5, %v1624_v31  ;;  %2063 = vmatmul.f32.gmra.mxu0 %v10468_v30  ;;  %2172 = vmatmul.f32.vlgmr.msra.gmra.mxu1 %v17385_v49 }
 0x22a   : > { %2432 = vmatmul.f32.gmra.mxu3 %v10456_v62 }
 0x22b   : > { %2335 = vmatmul.f32.gmra.mxu2 %v10456_v62  ;;  %v10735_v4 = vadd.f32 %v1945_v14, %v1725_v7 }
 0x22d   : > { %v1949_v47 = vpop.f32.mrf.mxu3 }
 0x22e   : > { %v1534_v18 = vpop.f32.mrf.mxu0  ;;  %v1627_v32 = vpop.f32.mrf.mxu1 }
 0x22f   : > { %v1628_v60 = vadd.f32 %v1627_v32, %v1531_v20  ;;  %v1732_v61 = vpop.f32.mrf.mxu2  ;;  %v1535_v62 = vadd.f32 %v1534_v18, %v10545_v0 }
 0x231   : > { %v1733_v21 = vadd.f32 %v1732_v61, %v1628_v60  ;;  %2068 = vmatmul.f32.gmra.mxu0 %v10490_v48  ;;  %2178 = vmatmul.f32.gmra.mxu1 %v17386_v50  ;;  %v17389_v50 = vand.u32 4294901760, %v10526_v9 }
 0x232   : > { %2436 = vmatmul.f32.gmra.mxu3 %v10479_v63 }
 0x233   : > { %2339 = vmatmul.f32.gmra.mxu2 %v10479_v63  ;;  %v10743_v17 = vadd.f32 %v1949_v47, %v1733_v21  ;;  %v17388_v47 = vand.u32 4294901760, %v10503_v42 }
 0x235   : > { %v1953_v12 = vpop.f32.mrf.mxu3 }
 0x236   : > { %v1538_v23 = vpop.f32.mrf.mxu0  ;;  %v1631_v22 = vpop.f32.mrf.mxu1 }
 0x237   : > { %v1632_v2 = vadd.f32 %v1631_v22, %v1535_v62  ;;  %v1740_v14 = vpop.f32.mrf.mxu2  ;;  %v1539_v63 = vadd.f32 %v1538_v23, %v10561_v1 }
 0x239   : > { %v1741_v28 = vadd.f32 %v1740_v14, %v1632_v2  ;;  %2073 = vmatmul.f32.gmra.mxu0 %v10503_v42  ;;  %2184 = vmatmul.f32.gmra.mxu1 %v17387_v36  ;;  %v17391_v14 = vand.u32 4294901760, %v10543_v24 }
 0x23a   : > { %2440 = vmatmul.f32.gmra.mxu3 %v10495_v33 }
 0x23b   : > { %2343 = vmatmul.f32.gmra.mxu2 %v10495_v33  ;;  %v10751_v30 = vadd.f32 %v1953_v12, %v1741_v28 }
 0x23d   : > { %v1957_v0 = vpop.f32.mrf.mxu3 }
 0x23e   : > { %v1542_v31 = vpop.f32.mrf.mxu0  ;;  %v1635_v5 = vpop.f32.mrf.mxu1 }
 0x23f   : > { %v1636_v7 = vadd.f32 %v1635_v5, %v1539_v63  ;;  %v1748_v49 = vpop.f32.mrf.mxu2  ;;  %v1543_v33 = vadd.f32 %v1542_v31, %v10577_v56  ;;  %v17393_v5 = vand.u32 4294901760, %v10559_v27 }
 0x241   : > { %v1749_v20 = vadd.f32 %v1748_v49, %v1636_v7  ;;  %2078 = vmatmul.f32.gmra.mxu0 %v10526_v9  ;;  %2190 = vmatmul.f32.gmra.mxu1 %v17388_v47 }
 0x242   : > { %2444 = vmatmul.f32.gmra.mxu3 %v10515_v6 }
 0x243   : > { %2347 = vmatmul.f32.gmra.mxu2 %v10515_v6  ;;  %v10759_v48 = vadd.f32 %v1957_v0, %v1749_v20 }
 0x245   : > { %v1961_v1 = vpop.f32.mrf.mxu3 }
 0x246   : > { %v1546_v18 = vpop.f32.mrf.mxu0  ;;  %v1639_v32 = vpop.f32.mrf.mxu1 }
 0x247   : > { %v1640_v60 = vadd.f32 %v1639_v32, %v1543_v33  ;;  %v1756_v61 = vpop.f32.mrf.mxu2  ;;  %v1547_v6 = vadd.f32 %v1546_v18, %v10593_v16  ;;  %v875_v33 = vld [vmem:[#allocation7 + $0x178] sm:$0xff] }
 0x248   : > { %v10789_v18 = vand.u32 4294901760, %v875_v33 }
 0x249   : > { %v1757_v21 = vadd.f32 %v1756_v61, %v1640_v60  ;;  %2083 = vmatmul.f32.gmra.mxu0 %v10543_v24  ;;  %2196 = vmatmul.f32.gmra.mxu1 %v17389_v50  ;;  %v873_v61 = vld [vmem:[#allocation7 + $0x168] sm:$0xff] }
 0x24a   : > { %2448 = vmatmul.f32.gmra.mxu3 %v10533_v26  ;;  %2493 = vmatpush.msrb.mxu0 %v10789_v18  ;;  %v2654_v32 = vsub.f32 %v875_v33, %v10789_v18 }
 0x24b   : > { %2351 = vmatmul.f32.gmra.mxu2 %v10533_v26  ;;  %v10767_v42 = vadd.f32 %v1961_v1, %v1757_v21  ;;  %2944 = vmatpush.msrb.mxu3 %v10789_v18 }
 0x24c   : > { %v10802_v50 = vand.u32 4294901760, %v2654_v32  ;;  %2816 = vmatpush.msrb.mxu2 %v2654_v32 }
 0x24d   : > { %17390 = vst [vmem:[#allocation17_spill] sm:$0xff] %v10767_v42  ;;  %v1965_v56 = vpop.f32.mrf.mxu3 }
 0x24e   : > { %v1550_v62 = vpop.f32.mrf.mxu0  ;;  %v1643_v12 = vpop.f32.mrf.mxu1 }
 0x24f   : > { %v1644_v23 = vadd.f32 %v1643_v12, %v1547_v6  ;;  %v1764_v22 = vpop.f32.mrf.mxu2  ;;  %v1551_v26 = vadd.f32 %v1550_v62, %v10609_v8  ;;  %v872_v12 = vld [vmem:[#allocation7 + $0x160] sm:$0xff] }
 0x251   : > { %v1765_v2 = vadd.f32 %v1764_v22, %v1644_v23  ;;  %2088 = vmatmul.f32.gmra.mxu0 %v10559_v27  ;;  %2202 = vmatmul.f32.gmra.mxu1 %v17391_v14  ;;  %v17395_v27 = vand.u32 4294901760, %v10575_v13 }
 0x252   : > { %2452 = vmatmul.f32.gmra.mxu3 %v10549_v51 }
 0x253   : > { %2355 = vmatmul.f32.gmra.mxu2 %v10549_v51  ;;  %v10775_v9 = vadd.f32 %v1965_v56, %v1765_v2  ;;  %v10811_v2 = vand.u32 4294901760, %v872_v12 }
 0x255   : > { %17392 = vst [vmem:[#allocation18_spill] sm:$0xff] %v10775_v9  ;;  %v1969_v16 = vpop.f32.mrf.mxu3 }
 0x256   : > { %v1554_v28 = vpop.f32.mrf.mxu0  ;;  %v1647_v36 = vpop.f32.mrf.mxu1 }
 0x257   : > { %v1648_v63 = vadd.f32 %v1647_v36, %v1551_v26  ;;  %v1772_v0 = vpop.f32.mrf.mxu2  ;;  %v1555_v51 = vadd.f32 %v1554_v28, %v10625_v58  ;;  %v871_v26 = vld [vmem:[#allocation7 + $0x158] sm:$0xff]  ;;  %v17397_v36 = vand.u32 4294901760, %v10591_v43 }
 0x259   : > { %v1773_v31 = vadd.f32 %v1772_v0, %v1648_v63  ;;  %2093 = vmatmul.f32.gmra.mxu0 %v10575_v13  ;;  %2208 = vmatmul.f32.gmra.mxu1 %v17393_v5  ;;  %v10819_v63 = vand.u32 4294901760, %v871_v26  ;;  %v2672_v0 = vsub.f32 %v872_v12, %v10811_v2 }
 0x25a   : > { %2456 = vmatmul.f32.gmra.mxu3 %v10565_v29 }
 0x25b   : > { %2359 = vmatmul.f32.gmra.mxu2 %v10565_v29  ;;  %v10783_v24 = vadd.f32 %v1969_v16, %v1773_v31  ;;  %v874_v29 = vld [vmem:[#allocation7 + $0x170] sm:$0xff]  ;;  %v2656_v16 = vsub.f32 %v2654_v32, %v10802_v50 }
 0x25c   : > { %v10794_v58 = vand.u32 4294901760, %v874_v29 }
 0x25d   : > { %17394 = vst [vmem:[#allocation19_spill] sm:$0xff] %v10783_v24  ;;  %v1973_v8 = vpop.f32.mrf.mxu3 }
 0x25e   : > { %v1558_v7 = vpop.f32.mrf.mxu0  ;;  %v1651_v49 = vpop.f32.mrf.mxu1  ;;  %2495 = vmatpush.msrb.mxu0 %v10794_v58  ;;  %v2660_v6 = vsub.f32 %v874_v29, %v10794_v58  ;;  %2946 = vmatpush.msrb.mxu3 %v10794_v58 }
 0x25f   : > { %v1652_v20 = vadd.f32 %v1651_v49, %v1555_v51  ;;  %v1780_v47 = vpop.f32.mrf.mxu2  ;;  %v1559_v13 = vadd.f32 %v1558_v7, %v10641_v59  ;;  %v2657_v51 = vand.u32 4294901760, %v2656_v16  ;;  %v2678_v49 = vsub.f32 %v871_v26, %v10819_v63 }
 0x260   : > { %v10809_v59 = vand.u32 4294901760, %v2660_v6  ;;  %2819 = vmatpush.msrb.mxu2 %v2660_v6 }
 0x261   : > { %v1781_v1 = vadd.f32 %v1780_v47, %v1652_v20  ;;  %2098 = vmatmul.f32.gmra.mxu0 %v10591_v43  ;;  %2214 = vmatmul.f32.gmra.mxu1 %v17395_v27  ;;  %v10829_v43 = vand.u32 4294901760, %v2672_v0  ;;  %v16902_v20 = vmov 0   ;;  %v3298_v47 = vld [vmem:[%s9837_s17] sm:$0xff] }
 0x262   : > { %2460 = vmatmul.f32.gmra.mxu3 %v10581_v3  ;;  %v2662_v31 = vsub.f32 %v2660_v6, %v10809_v59  ;;  %9446 = vset.pattern.permute.xlu0 %v16902_v20 }
 0x263   : > { %2363 = vmatmul.f32.gmra.mxu2 %v10581_v3  ;;  %v10797_v60 = vadd.f32 %v1973_v8, %v1781_v1  ;;  %v10804_v3 = vand.u32 4294901760, %v873_v61  ;;  %v870_v8 = vld [vmem:[#allocation7 + $0x150] sm:$0xff]  ;;  %v869_v1 = vld [vmem:[#allocation7 + $0x148] sm:$0xff]  ;;  %2658 = vmatpush.msrb.mxu1 %v2657_v51 }
 0x264   : > { %v10831_v7 = vand.u32 4294901760, %v870_v8  ;;  %v2663_v33 = vand.u32 4294901760, %v2662_v31  ;;  %3317 = vperm.xlu0 %9446, %v3298_v47  }
 0x265   : > { %17396 = vst [vmem:[#allocation20_spill] sm:$0xff] %v10797_v60  ;;  %v1977_v21 = vpop.f32.mrf.mxu3  ;;  %2497 = vmatpush.msrb.mxu0 %v10804_v3  ;;  %2948 = vmatpush.msrb.mxu3 %v10804_v3  ;;  %v2666_v14 = vsub.f32 %v873_v61, %v10804_v3  ;;  %v10841_v61 = vand.u32 4294901760, %v2678_v49 }
 0x266   : > { %v1562_v56 = vpop.f32.mrf.mxu0  ;;  %v1655_v62 = vpop.f32.mrf.mxu1  ;;  %v2684_v6 = vsub.f32 %v870_v8, %v10831_v7  ;;  %2664 = vmatpush.msrb.mxu1 %v2663_v33 }
 0x267   : > { %v1656_v23 = vadd.f32 %v1655_v62, %v1559_v13  ;;  %v1788_v22 = vpop.f32.mrf.mxu2  ;;  %2499 = vmatpush.msrb.mxu0 %v10811_v2  ;;  %v10825_v5 = vand.u32 4294901760, %v2666_v14  ;;  %2950 = vmatpush.msrb.mxu3 %v10811_v2  ;;  %v10843_v13 = vand.u32 4294901760, %v869_v1 }
 0x268   : > { %2822 = vmatpush.msrb.mxu2 %v2666_v14 }
 0x269   : > { %v1789_v28 = vadd.f32 %v1788_v22, %v1656_v23  ;;  %2103 = vmatmul.f32.gmra.mxu0 %v10607_v35  ;;  %2220 = vmatmul.f32.gmra.mxu1 %v17397_v36  ;;  %v2668_v27 = vsub.f32 %v2666_v14, %v10825_v5  ;;  %v868_v23 = vld [vmem:[#allocation7 + $0x140] sm:$0xff]  ;;  %v2690_v16 = vsub.f32 %v869_v1, %v10843_v13  ;;  %v866_v1 = vld [vmem:[#allocation7 + $0x130] sm:$0xff] }
 0x26a   : > { %2464 = vmatmul.f32.gmra.mxu3 %v10597_v37  ;;  %2501 = vmatpush.msrb.mxu0 %v10819_v63  ;;  %v10851_v14 = vand.u32 4294901760, %v868_v23  ;;  %v2680_v36 = vsub.f32 %v2678_v49, %v10841_v61 }
 0x26b   : > { %2367 = vmatmul.f32.gmra.mxu2 %v10597_v37  ;;  %v10837_v29 = vadd.f32 %v1977_v21, %v1789_v28  ;;  %v1563_v37 = vadd.f32 %v1562_v56, %v10657_v10  ;;  %2952 = vmatpush.msrb.mxu3 %v10819_v63  ;;  %v2674_v21 = vsub.f32 %v2672_v0, %v10829_v43  ;;  %v10849_v56 = vand.u32 4294901760, %v2684_v6  ;;  %v867_v28 = vld [vmem:[#allocation7 + $0x138] sm:$0xff] }
 0x26c   : > { %2825 = vmatpush.msrb.mxu2 %v2672_v0  ;;  %2503 = vmatpush.msrb.mxu0 %v10831_v7  ;;  %v2669_v26 = vand.u32 4294901760, %v2668_v27  ;;  %v17399_v0 = vand.u32 4294901760, %v10607_v35  ;;  %v10858_v51 = vand.u32 4294901760, %v867_v28  ;;  %v2696_v8 = vsub.f32 %v868_v23, %v10851_v14  ;;  %v865_v23 = vld [vmem:[#allocation7 + $0x128] sm:$0xff] }
 0x26d   : > { %17398 = vst [vmem:[#allocation21_spill] sm:$0xff] %v10837_v29  ;;  %v1981_v32 = vpop.f32.mrf.mxu3  ;;  %v2675_v47 = vand.u32 4294901760, %v2674_v21  ;;  %v10863_v33 = vand.u32 4294901760, %v2690_v16  ;;  %2954 = vmatpush.msrb.mxu3 %v10831_v7  ;;  %v2686_v35 = vsub.f32 %v2684_v6, %v10849_v56  ;;  %v2681_v27 = vand.u32 4294901760, %v2680_v36  ;;  %v864_v36 = vld [vmem:[#allocation7 + $0x120] sm:$0xff] }
 0x26e   : > { %v1566_v62 = vpop.f32.mrf.mxu0  ;;  %v1659_v12 = vpop.f32.mrf.mxu1  ;;  %2828 = vmatpush.msrb.mxu2 %v2678_v49  ;;  %2505 = vmatpush.msrb.mxu0 %v10843_v13  ;;  %v10867_v49 = vand.u32 4294901760, %v866_v1 }
 0x26f   : > { %v1660_v22 = vadd.f32 %v1659_v12, %v1563_v37  ;;  %v1796_v10 = vpop.f32.mrf.mxu2  ;;  %2670 = vmatpush.msrb.mxu1 %v2669_v26  ;;  %v10870_v37 = vand.u32 4294901760, %v2696_v8  ;;  %v10873_v12 = vsub.f32 %v867_v28, %v10858_v51  ;;  %2956 = vmatpush.msrb.mxu3 %v10843_v13  ;;  %v2692_v28 = vsub.f32 %v2690_v16, %v10863_v33 }
 0x270   : > { %2831 = vmatpush.msrb.mxu2 %v2684_v6  ;;  %2507 = vmatpush.msrb.mxu0 %v10851_v14  ;;  %v10880_v6 = vand.u32 4294901760, %v865_v23 }
 0x271   : > { %v1797_v31 = vadd.f32 %v1796_v10, %v1660_v22  ;;  %2108 = vmatmul.f32.gmra.mxu0 %v10623_v46  ;;  %2226 = vmatmul.f32.gmra.mxu1 %v17399_v0  ;;  %v2698_v20 = vsub.f32 %v2696_v8, %v10870_v37 }
 0x272   : > { %2468 = vmatmul.f32.gmra.mxu3 %v10613_v19  ;;  %2676 = vmatpush.msrb.mxu1 %v2675_v47  ;;  %v10888_v47 = vand.u32 4294901760, %v10873_v12 }
 0x273   : > { %2371 = vmatmul.f32.gmra.mxu2 %v10613_v19  ;;  %v10875_v21 = vadd.f32 %v1981_v32, %v1797_v31  ;;  %v1567_v19 = vadd.f32 %v1566_v62, %v10673_v40  ;;  %2958 = vmatpush.msrb.mxu3 %v10851_v14  ;;  %v3299_v40 = vld [vmem:[%s9837_s17 + $0x8] sm:$0xff]  ;;  %v2708_v62 = vsub.f32 %v866_v1, %v10867_v49  ;;  %v2687_v31 = vand.u32 4294901760, %v2686_v35 }
 0x274   : > { %2834 = vmatpush.msrb.mxu2 %v2690_v16  ;;  %2509 = vmatpush.msrb.mxu0 %v10858_v51  ;;  %v2693_v1 = vand.u32 4294901760, %v2692_v28  ;;  %v2714_v35 = vsub.f32 %v865_v23, %v10880_v6 }
 0x275   : > { %17400 = vst [vmem:[#allocation22_spill] sm:$0xff] %v10875_v21  ;;  %v1985_v22 = vpop.f32.mrf.mxu3  ;;  %2682 = vmatpush.msrb.mxu1 %v2681_v27  ;;  %v863_v21 = vld [vmem:[#allocation7 + $0x118] sm:$0xff]  ;;  %3320 = vperm.xlu0 %9446, %v3299_v40  }
 0x276   : > { %v1570_v10 = vpop.f32.mrf.mxu0  ;;  %v1663_v26 = vpop.f32.mrf.mxu1  ;;  %2837 = vmatpush.msrb.mxu2 %v2696_v8  ;;  %2960 = vmatpush.msrb.mxu3 %v10858_v51  ;;  %v10900_v8 = vand.u32 4294901760, %v2708_v62  ;;  %v10902_v27 = vand.u32 4294901760, %v863_v21 }
 0x277   : > { %v1664_v0 = vadd.f32 %v1663_v26, %v1567_v19  ;;  %v1804_v32 = vpop.f32.mrf.mxu2  ;;  %v17401_v19 = vand.u32 4294901760, %v10623_v46  ;;  %v10894_v26 = vand.u32 4294901760, %v864_v36  ;;  %2511 = vmatpush.msrb.mxu0 %v10867_v49  ;;  %2688 = vmatpush.msrb.mxu1 %v2687_v31  ;;  %v2699_v46 = vand.u32 4294901760, %v2698_v20 }
 0x278   : > { %v1571_v23 = vadd.f32 %v1570_v10, %v10689_v38  ;;  %2840 = vmatpush.msrb.mxu2 %v10873_v12  ;;  %2962 = vmatpush.msrb.mxu3 %v10867_v49  ;;  %v10914_v20 = vand.u32 4294901760, %v2714_v35  ;;  %v2710_v38 = vsub.f32 %v2708_v62, %v10900_v8  ;;  %v860_v10 = vld [vmem:[#allocation7 + $0x100] sm:$0xff] }
 0x279   : > { %v1805_v16 = vadd.f32 %v1804_v32, %v1664_v0  ;;  %2113 = vmatmul.f32.gmra.mxu0 %v10639_v55  ;;  %2232 = vmatmul.f32.gmra.mxu1 %v17401_v19  ;;  %v862_v0 = vld [vmem:[#allocation7 + $0x110] sm:$0xff]  ;;  %v2704_v32 = vsub.f32 %v10873_v12, %v10888_v47  ;;  %v861_v19 = vld [vmem:[#allocation7 + $0x108] sm:$0xff]  ;;  %v2726_v12 = vsub.f32 %v863_v21, %v10902_v27  ;;  %v10932_v24 = vand.u32 4294901760, %v860_v10 }
 0x27a   : > { %2472 = vmatmul.f32.gmra.mxu3 %v10629_v41  ;;  %2513 = vmatpush.msrb.mxu0 %v10880_v6  ;;  %v10916_v31 = vand.u32 4294901760, %v862_v0  ;;  %v2716_v21 = vsub.f32 %v2714_v35, %v10914_v20 }
 0x27b   : > { %2375 = vmatmul.f32.gmra.mxu2 %v10629_v41  ;;  %v10907_v40 = vadd.f32 %v1985_v22, %v1805_v16  ;;  %v2720_v41 = vsub.f32 %v864_v36, %v10894_v26  ;;  %2694 = vmatpush.msrb.mxu1 %v2693_v1  ;;  %v2705_v36 = vand.u32 4294901760, %v2704_v32  ;;  %v10922_v1 = vand.u32 4294901760, %v861_v19 }
 0x27c   : > { %2843 = vmatpush.msrb.mxu2 %v2708_v62  ;;  %2964 = vmatpush.msrb.mxu3 %v10880_v6  ;;  %v2732_v62 = vsub.f32 %v862_v0, %v10916_v31  ;;  %v2711_v32 = vand.u32 4294901760, %v2710_v38  ;;  %v2744_v38 = vsub.f32 %v860_v10, %v10932_v24 }
 0x27d   : > { %17402 = vst [vmem:[#allocation23_spill] sm:$0xff] %v10907_v40  ;;  %v1989_v28 = vpop.f32.mrf.mxu3  ;;  %2515 = vmatpush.msrb.mxu0 %v10894_v26  ;;  %2700 = vmatpush.msrb.mxu1 %v2699_v46  ;;  %v3304_v46 = vld [vmem:[%s9837_s17 + $0x30] sm:$0xff] }
 0x27e   : > { %v1574_v29 = vpop.f32.mrf.mxu0  ;;  %v1667_v60 = vpop.f32.mrf.mxu1  ;;  %2846 = vmatpush.msrb.mxu2 %v2714_v35  ;;  %2966 = vmatpush.msrb.mxu3 %v10894_v26 }
 0x27f   : > { %v1668_v22 = vadd.f32 %v1667_v60, %v1571_v23  ;;  %v1812_v16 = vpop.f32.mrf.mxu2  ;;  %v17403_v60 = vand.u32 4294901760, %v10639_v55  ;;  %v10927_v23 = vand.u32 4294901760, %v2720_v41  ;;  %2517 = vmatpush.msrb.mxu0 %v10902_v27  ;;  %2706 = vmatpush.msrb.mxu1 %v2705_v36  ;;  %v1575_v35 = vadd.f32 %v1574_v29, %v10705_v45 }
 0x280   : > { %2849 = vmatpush.msrb.mxu2 %v2720_v41  ;;  %2968 = vmatpush.msrb.mxu3 %v10902_v27 }
 0x281   : > { %v1813_v40 = vadd.f32 %v1812_v16, %v1668_v22  ;;  %2118 = vmatmul.f32.gmra.mxu0 %v10655_v44  ;;  %2238 = vmatmul.f32.gmra.mxu1 %v17403_v60  ;;  %v10937_v22 = vand.u32 4294901760, %v2726_v12  ;;  %v2738_v16 = vsub.f32 %v861_v19, %v10922_v1 }
 0x282   : > { %2476 = vmatmul.f32.gmra.mxu3 %v10645_v53  ;;  %3335 = vperm.xlu0 %9446, %v3304_v46   ;;  %v782_v46 = vld [vmem:[%s9815_s24 + $0x10] sm:$0xff] }
 0x283   : > { %2379 = vmatmul.f32.gmra.mxu2 %v10645_v53  ;;  %v10939_v55 = vadd.f32 %v1989_v28, %v1813_v40  ;;  %v2722_v53 = vsub.f32 %v2720_v41, %v10927_v23  ;;  %2519 = vmatpush.msrb.mxu0 %v10916_v31  ;;  %v2717_v40 = vand.u32 4294901760, %v2716_v21  ;;  %v10947_v28 = vand.u32 4294901760, %v2732_v62 }
 0x284   : > { %2712 = vmatpush.msrb.mxu1 %v2711_v32  ;;  %2852 = vmatpush.msrb.mxu2 %v2726_v12  ;;  %v2728_v45 = vsub.f32 %v2726_v12, %v10937_v22  ;;  %v10953_v29 = vand.u32 4294901760, %v2738_v16  ;;  %v17405_v21 = vand.u32 4294901760, %v10655_v44  ;;  %v10960_v12 = vand.u32 4294901760, %v2744_v38  ;;  %v3300_v44 = vld [vmem:[%s9837_s17 + $0x10] sm:$0xff] }
 0x285   : > { %17404 = vst [vmem:[#allocation24_spill] sm:$0xff] %v10939_v55  ;;  %v1993_v0 = vpop.f32.mrf.mxu3  ;;  %2970 = vmatpush.msrb.mxu3 %v10916_v31  ;;  %2521 = vmatpush.msrb.mxu0 %v10922_v1  ;;  %v2723_v10 = vand.u32 4294901760, %v2722_v53  ;;  %v2734_v32 = vsub.f32 %v2732_v62, %v10947_v28 }
 0x286   : > { %v1578_v60 = vpop.f32.mrf.mxu0  ;;  %v1671_v9 = vpop.f32.mrf.mxu1  ;;  %2718 = vmatpush.msrb.mxu1 %v2717_v40  ;;  %2855 = vmatpush.msrb.mxu2 %v2732_v62  ;;  %v2740_v53 = vsub.f32 %v2738_v16, %v10953_v29 }
 0x287   : > { %v1672_v19 = vadd.f32 %v1671_v9, %v1575_v35  ;;  %v1820_v36 = vpop.f32.mrf.mxu2  ;;  %v17406_v9 = vld [vmem:[#allocation16_spill] sm:$0xff]  ;;  %2972 = vmatpush.msrb.mxu3 %v10922_v1  ;;  %v2729_v35 = vand.u32 4294901760, %v2728_v45  ;;  %2523 = vmatpush.msrb.mxu0 %v10932_v24  ;;  %v1579_v40 = vadd.f32 %v1578_v60, %v10715_v15  ;;  %v2735_v62 = vand.u32 4294901760, %v2734_v32  ;;  %v785_v32 = vld [vmem:[%s9815_s24 + $0x28] sm:$0xff] }
 0x288   : > { %2724 = vmatpush.msrb.mxu1 %v2723_v10  ;;  %2858 = vmatpush.msrb.mxu2 %v2738_v16  ;;  %v2746_v45 = vsub.f32 %v2744_v38, %v10960_v12  ;;  %v2741_v15 = vand.u32 4294901760, %v2740_v53  ;;  %v17409_v10 = vand.u32 4294901760, %v10671_v57  ;;  %v3310_v53 = vld [vmem:[%s9837_s17 + $0x60] sm:$0xff] }
 0x289   : > { %v1821_v41 = vadd.f32 %v1820_v36, %v1672_v19  ;;  %2123 = vmatmul.f32.gmra.mxu0 %v10671_v57  ;;  %2244 = vmatmul.f32.gmra.mxu1 %v17405_v21  ;;  %v10972_v21 = vand.u32 4294901760, %v782_v46 }
 0x28a   : > { %2480 = vmatmul.f32.gmra.mxu3 %v17406_v9  ;;  %2730 = vmatpush.msrb.mxu1 %v2729_v35  ;;  %v3301_v35 = vld [vmem:[%s9837_s17 + $0x18] sm:$0xff] }
 0x28b   : > { %2383 = vmatmul.f32.gmra.mxu2 %v17406_v9  ;;  %v10965_v19 = vadd.f32 %v1993_v0, %v1821_v41  ;;  %2974 = vmatpush.msrb.mxu3 %v10932_v24  ;;  %v3307_v9 = vld [vmem:[%s9837_s17 + $0x48] sm:$0xff]  ;;  %v17408_v0 = vmov 0   ;;  %v10981_v16 = vsub.f32 %v782_v46, %v10972_v21 }
 0x28c   : > { %9447 = vset.pattern.permute.xlu1 %v17408_v0  ;;  %2861 = vmatpush.msrb.mxu2 %v2744_v38 }
 0x28d   : > { %17407 = vst [vmem:[#allocation16_spill] sm:$0xff] %v10965_v19  ;;  %v1997_v36 = vpop.f32.mrf.mxu3  ;;  %3323 = vperm.xlu1 %9447, %v3300_v44   ;;  %3344 = vperm.xlu0 %9446, %v3307_v9   ;;  %v2526_v46 = vand.u32 4294901760, %v10981_v16  ;;  %v10993_v44 = vand.u32 4294901760, %v785_v32 }
 0x28e   : > { %v1582_v55 = vpop.f32.mrf.mxu0  ;;  %v1675_v42 = vpop.f32.mrf.mxu1  ;;  %2736 = vmatpush.msrb.mxu1 %v2735_v62  ;;  %9448 = vset.pattern.permute.xlu2 %v17408_v0  ;;  %v788_v62 = vld [vmem:[%s9815_s24 + $0x40] sm:$0xff] }
 0x28f   : > { %v1676_v41 = vadd.f32 %v1675_v42, %v1579_v40  ;;  %v1828_v19 = vpop.f32.mrf.mxu2  ;;  %v2747_v42 = vand.u32 4294901760, %v2746_v45  ;;  %3075 = vmatpush.msra.mxu0 %v10802_v50  ;;  %v1583_v57 = vadd.f32 %v1582_v55, %v10721_v11  ;;  %9348 = vmatpush.msra.mxu3 %v10789_v18  ;;  %v2527_v55 = vsub.f32 %v10981_v16, %v2526_v46  ;;  %v3305_v45 = vld [vmem:[%s9837_s17 + $0x38] sm:$0xff] }
 0x290   : > { %2742 = vmatpush.msrb.mxu1 %v2741_v15  ;;  %9332 = vmatpush.msra.mxu2 %v10802_v50  ;;  %v17410_v50 = vand.u32 4294901760, %v10687_v34  ;;  %v11006_v0 = vsub.f32 %v785_v32, %v10993_v44 }
 0x291   : > { %v1829_v60 = vadd.f32 %v1828_v19, %v1676_v41  ;;  %2128 = vmatmul.f32.gmra.mxu0 %v10687_v34  ;;  %2250 = vmatmul.f32.gmra.mxu1 %v17409_v10  ;;  %v2528_v15 = vand.u32 4294901760, %v2527_v55  ;;  %v11020_v10 = vand.u32 4294901760, %v788_v62  ;;  %v3311_v55 = vld [vmem:[%s9837_s17 + $0x68] sm:$0xff] }
 0x292   : > { %2484 = vmatmul.f32.gmra.mxu3 %v10677_v39  ;;  %2748 = vmatpush.msrb.mxu1 %v2747_v42  ;;  %v3313_v42 = vld [vmem:[%s9837_s17 + $0x78] sm:$0xff] }
 0x293   : > { %2387 = vmatmul.f32.gmra.mxu2 %v10677_v39  ;;  %v10987_v38 = vadd.f32 %v1997_v36, %v1829_v60  ;;  %3079 = vmatpush.msra.mxu0 %v10809_v59  ;;  %v2534_v60 = vand.u32 4294901760, %v11006_v0 }
 0x294   : > { %9349 = vmatpush.msra.mxu3 %v10794_v58  ;;  %9333 = vmatpush.msra.mxu2 %v10809_v59 }
 0x295   : > { %v2001_v19 = vpop.f32.mrf.mxu3  ;;  %3326 = vperm.xlu1 %9447, %v3301_v35   ;;  %3353 = vperm.xlu0 %9446, %v3310_v53  }
 0x296   : > { %v1586_v39 = vpop.f32.mrf.mxu0  ;;  %v1679_v40 = vpop.f32.mrf.mxu1  ;;  %3083 = vmatpush.msra.mxu0 %v10825_v5  ;;  %9350 = vmatpush.msra.mxu3 %v10804_v3 }
 0x297   : > { %v1680_v36 = vadd.f32 %v1679_v40, %v1583_v57  ;;  %v1836_v9 = vpop.f32.mrf.mxu2  ;;  %9334 = vmatpush.msra.mxu2 %v10825_v5  ;;  %v1587_v34 = vadd.f32 %v1586_v39, %v10727_v52  ;;  %3202 = vmatpush.msra.mxu1 %v10789_v18  ;;  %v17411_v57 = vand.u32 4294901760, %v10703_v54  ;;  %v2535_v18 = vsub.f32 %v11006_v0, %v2534_v60 }
 0x298   : > { %3087 = vmatpush.msra.mxu0 %v10829_v43  ;;  %9351 = vmatpush.msra.mxu3 %v10811_v2 }
 0x299   : > { %v1837_v11 = vadd.f32 %v1836_v9, %v1680_v36  ;;  %2133 = vmatmul.f32.gmra.mxu0 %v10703_v54  ;;  %2256 = vmatmul.f32.gmra.mxu1 %v17410_v50  ;;  %v2536_v40 = vand.u32 4294901760, %v2535_v18  ;;  %v3302_v50 = vld [vmem:[%s9837_s17 + $0x20] sm:$0xff] }
 0x29a   : > { %2488 = vmatmul.f32.gmra.mxu3 %v10693_v25  ;;  %9335 = vmatpush.msra.mxu2 %v10829_v43  ;;  %v11033_v43 = vsub.f32 %v788_v62, %v11020_v10 }
 0x29b   : > { %2391 = vmatmul.f32.gmra.mxu2 %v10693_v25  ;;  %v11013_v59 = vadd.f32 %v2001_v19, %v1837_v11  ;;  %3091 = vmatpush.msra.mxu0 %v10841_v61  ;;  %v791_v19 = vld [vmem:[%s9815_s24 + $0x58] sm:$0xff] }
 0x29c   : > { %9352 = vmatpush.msra.mxu3 %v10819_v63  ;;  %9336 = vmatpush.msra.mxu2 %v10841_v61  ;;  %v3308_v61 = vld [vmem:[%s9837_s17 + $0x50] sm:$0xff]  ;;  %v11046_v36 = vand.u32 4294901760, %v791_v19 }
 0x29d   : > { %v2005_v41 = vpop.f32.mrf.mxu3  ;;  %3338 = vperm.xlu1 %9447, %v3305_v45   ;;  %3362 = vperm.xlu0 %9446, %v3313_v42  }
 0x29e   : > { %v1683_v25 = vpop.f32.mrf.mxu1  ;;  %v2059_v32 = vpop.f32.mrf.mxu0  ;;  %3095 = vmatpush.msra.mxu0 %v10849_v56  ;;  %3204 = vmatpush.msra.mxu1 %v10794_v58  ;;  %v11058_v11 = vsub.f32 %v791_v19, %v11046_v36 }
 0x29f   : > { %v1684_v5 = vadd.f32 %v1683_v25, %v1587_v34  ;;  %v1844_v52 = vpop.f32.mrf.mxu2  ;;  %9353 = vmatpush.msra.mxu3 %v10831_v7  ;;  %9337 = vmatpush.msra.mxu2 %v10849_v56  ;;  %v2060_v54 = vadd.f32 %v2059_v32, %v10735_v4  ;;  %v3303_v25 = vld [vmem:[%s9837_s17 + $0x28] sm:$0xff] }
 0x2a0   : > { %3099 = vmatpush.msra.mxu0 %v10863_v33  ;;  %3206 = vmatpush.msra.mxu1 %v10804_v3 }
 0x2a1   : > { %v1845_v35 = vadd.f32 %v1844_v52, %v1684_v5  ;;  %2262 = vmatmul.f32.gmra.mxu1 %v17411_v57  ;;  %2529 = vmatmul.f32.vlgmr.msrb.gmra.mxu0 %v2528_v15 }
 0x2a2   : > { %2978 = vmatmul.f32.vlgmr.msrb.gmra.mxu3 %v2526_v46  ;;  %v2542_v46 = vand.u32 4294901760, %v11033_v43  ;;  %9338 = vmatpush.msra.mxu2 %v10863_v33  ;;  %v794_v33 = vld [vmem:[%s9815_s24 + $0x70] sm:$0xff] }
 0x2a3   : > { %2864 = vmatmul.f32.vlgmr.msrb.gmra.mxu2 %v10981_v16  ;;  %v11039_v53 = vadd.f32 %v2005_v41, %v1845_v35  ;;  %9354 = vmatpush.msra.mxu3 %v10843_v13  ;;  %v2550_v41 = vand.u32 4294901760, %v11058_v11  ;;  %v11071_v15 = vand.u32 4294901760, %v794_v33 }
 0x2a4   : > { %3103 = vmatpush.msra.mxu0 %v10870_v37  ;;  %3208 = vmatpush.msra.mxu1 %v10811_v2  ;;  %v2543_v3 = vsub.f32 %v11033_v43, %v2542_v46 }
 0x2a5   : > { %v2429_v39 = vpop.f32.mrf.mxu3  ;;  %3347 = vperm.xlu1 %9447, %v3308_v61   ;;  %9355 = vmatpush.msra.mxu3 %v10851_v14  ;;  %v11083_v42 = vsub.f32 %v794_v33, %v11071_v15  ;;  %v3306_v61 = vld [vmem:[%s9837_s17 + $0x40] sm:$0xff] }
 0x2a6   : > { %v2064_v58 = vpop.f32.mrf.mxu0  ;;  %v2173_v16 = vpop.f32.mrf.mxu1  ;;  %9339 = vmatpush.msra.mxu2 %v10870_v37  ;;  %3329 = vperm.xlu2 %9448, %v3302_v50   ;;  %v2544_v34 = vand.u32 4294901760, %v2543_v3 }
 0x2a7   : > { %v2174_v56 = vadd.f32 %v2173_v16, %v2060_v54  ;;  %v2332_v4 = vpop.f32.mrf.mxu2  ;;  %3107 = vmatpush.msra.mxu0 %v10888_v47  ;;  %3210 = vmatpush.msra.mxu1 %v10819_v63  ;;  %v2065_v62 = vadd.f32 %v2064_v58, %v10743_v17  ;;  %v2558_v35 = vand.u32 4294901760, %v11083_v42 }
 0x2a8   : > { %9356 = vmatpush.msra.mxu3 %v10858_v51  ;;  %9340 = vmatpush.msra.mxu2 %v10888_v47  ;;  %v2551_v47 = vsub.f32 %v11058_v11, %v2550_v41 }
 0x2a9   : > { %v2333_v9 = vadd.f32 %v2332_v4, %v2174_v56  ;;  %2537 = vmatmul.f32.gmra.mxu0 %v2536_v40  ;;  %2750 = vmatmul.f32.vlgmr.msrb.gmra.mxu1 %v10972_v21 }
 0x2aa   : > { %2984 = vmatmul.f32.gmra.mxu3 %v2534_v60  ;;  %3111 = vmatpush.msra.mxu0 %v10900_v8  ;;  %v2552_v52 = vand.u32 4294901760, %v2551_v47 }
 0x2ab   : > { %2869 = vmatmul.f32.gmra.mxu2 %v11006_v0  ;;  %v11064_v2 = vadd.f32 %v2429_v39, %v2333_v9  ;;  %3212 = vmatpush.msra.mxu1 %v10831_v7  ;;  %v797_v7 = vld [vmem:[%s9815_s24 + $0x88] sm:$0xff]  ;;  %v3309_v9 = vld [vmem:[%s9837_s17 + $0x58] sm:$0xff] }
 0x2ac   : > { %9357 = vmatpush.msra.mxu3 %v10867_v49  ;;  %9341 = vmatpush.msra.mxu2 %v10900_v8  ;;  %v11095_v57 = vand.u32 4294901760, %v797_v7 }
 0x2ad   : > { %v2433_v45 = vpop.f32.mrf.mxu3  ;;  %3356 = vperm.xlu1 %9447, %v3311_v55   ;;  %3115 = vmatpush.msra.mxu0 %v10914_v20 }
 0x2ae   : > { %v2069_v37 = vpop.f32.mrf.mxu0  ;;  %v2179_v0 = vpop.f32.mrf.mxu1  ;;  %3214 = vmatpush.msra.mxu1 %v10843_v13  ;;  %3332 = vperm.xlu2 %9448, %v3303_v25   ;;  %v2565_v19 = vsub.f32 %v797_v7, %v11095_v57 }
 0x2af   : > { %v2180_v63 = vadd.f32 %v2179_v0, %v2065_v62  ;;  %v2336_v17 = vpop.f32.mrf.mxu2  ;;  %9358 = vmatpush.msra.mxu3 %v10880_v6  ;;  %9342 = vmatpush.msra.mxu2 %v10914_v20  ;;  %v2070_v32 = vadd.f32 %v2069_v37, %v10751_v30  ;;  %v806_v0 = vld [vmem:[%s9815_s24 + $0xd0] sm:$0xff] }
 0x2b0   : > { %3119 = vmatpush.msra.mxu0 %v10927_v23  ;;  %3216 = vmatpush.msra.mxu1 %v10851_v14  ;;  %v2559_v14 = vsub.f32 %v11083_v42, %v2558_v35  ;;  %v2566_v40 = vand.u32 4294901760, %v2565_v19  ;;  %v11149_v7 = vand.u32 4294901760, %v806_v0 }
 0x2b1   : > { %v2337_v60 = vadd.f32 %v2336_v17, %v2180_v63  ;;  %2545 = vmatmul.f32.gmra.mxu0 %v2544_v34  ;;  %2754 = vmatmul.f32.gmra.mxu1 %v10993_v44  ;;  %v3312_v63 = vld [vmem:[%s9837_s17 + $0x70] sm:$0xff] }
 0x2b2   : > { %2990 = vmatmul.f32.gmra.mxu3 %v2542_v46  ;;  %9343 = vmatpush.msra.mxu2 %v10927_v23  ;;  %v800_v23 = vld [vmem:[%s9815_s24 + $0xa0] sm:$0xff]  ;;  %v2560_v39 = vand.u32 4294901760, %v2559_v14 }
 0x2b3   : > { %2874 = vmatmul.f32.gmra.mxu2 %v11033_v43  ;;  %v11089_v8 = vadd.f32 %v2433_v45, %v2337_v60  ;;  %9359 = vmatpush.msra.mxu3 %v10894_v26  ;;  %v11117_v46 = vand.u32 4294901760, %v800_v23 }
 0x2b4   : > { %3123 = vmatpush.msra.mxu0 %v10937_v22  ;;  %3218 = vmatpush.msra.mxu1 %v10858_v51 }
 0x2b5   : > { %v2437_v5 = vpop.f32.mrf.mxu3  ;;  %9360 = vmatpush.msra.mxu3 %v10902_v27  ;;  %9344 = vmatpush.msra.mxu2 %v10937_v22  ;;  %v2573_v4 = vsub.f32 %v800_v23, %v11117_v46 }
 0x2b6   : > { %v2074_v13 = vpop.f32.mrf.mxu0  ;;  %v2185_v18 = vpop.f32.mrf.mxu1  ;;  %3127 = vmatpush.msra.mxu0 %v10947_v28  ;;  %3341 = vperm.xlu2 %9448, %v3306_v61  }
 0x2b7   : > { %v2186_v20 = vadd.f32 %v2185_v18, %v2070_v32  ;;  %v2340_v30 = vpop.f32.mrf.mxu2  ;;  %3220 = vmatpush.msra.mxu1 %v10867_v49  ;;  %9361 = vmatpush.msra.mxu3 %v10916_v31  ;;  %v2075_v22 = vadd.f32 %v2074_v13, %v10759_v48  ;;  %v2574_v50 = vand.u32 4294901760, %v2573_v4  ;;  %v2589_v13 = vsub.f32 %v806_v0, %v11149_v7  ;;  %v809_v18 = vld [vmem:[%s9815_s24 + $0xe8] sm:$0xff] }
 0x2b8   : > { %9345 = vmatpush.msra.mxu2 %v10947_v28  ;;  %3131 = vmatpush.msra.mxu0 %v10953_v29  ;;  %v2567_v28 = vsub.f32 %v2565_v19, %v2566_v40  ;;  %v11157_v61 = vand.u32 4294901760, %v809_v18 }
 0x2b9   : > { %v2341_v43 = vadd.f32 %v2340_v30, %v2186_v20  ;;  %2553 = vmatmul.f32.gmra.mxu0 %v2552_v52  ;;  %2758 = vmatmul.f32.gmra.mxu1 %v11020_v10  ;;  %v17414_v30 = vld [vmem:[#allocation19_spill] sm:$0xff]  ;;  %v2590_v23 = vand.u32 4294901760, %v2589_v13 }
 0x2ba   : > { %2996 = vmatmul.f32.gmra.mxu3 %v2550_v41  ;;  %3222 = vmatpush.msra.mxu1 %v10880_v6  ;;  %v803_v6 = vld [vmem:[%s9815_s24 + $0xb8] sm:$0xff]  ;;  %v2568_v33 = vand.u32 4294901760, %v2567_v28  ;;  %v17415_v28 = vld [vmem:[#allocation20_spill] sm:$0xff] }
 0x2bb   : > { %2879 = vmatmul.f32.gmra.mxu2 %v11058_v11  ;;  %v11112_v51 = vadd.f32 %v2437_v5, %v2341_v43  ;;  %9362 = vmatpush.msra.mxu3 %v10922_v1  ;;  %v11137_v55 = vand.u32 4294901760, %v803_v6 }
 0x2bc   : > { %9346 = vmatpush.msra.mxu2 %v10953_v29  ;;  %3135 = vmatpush.msra.mxu0 %v10960_v12 }
 0x2bd   : > { %v2441_v54 = vpop.f32.mrf.mxu3  ;;  %3224 = vmatpush.msra.mxu1 %v10894_v26  ;;  %9363 = vmatpush.msra.mxu3 %v10932_v24  ;;  %v17412_v26 = vld [vmem:[#allocation17_spill] sm:$0xff]  ;;  %v2581_v37 = vsub.f32 %v803_v6, %v11137_v55 }
 0x2be   : > { %v2079_v58 = vpop.f32.mrf.mxu0  ;;  %v2191_v16 = vpop.f32.mrf.mxu1  ;;  %9347 = vmatpush.msra.mxu2 %v10960_v12  ;;  %3350 = vperm.xlu2 %9448, %v3309_v9  }
 0x2bf   : > { %v2192_v49 = vadd.f32 %v2191_v16, %v2075_v22  ;;  %v2344_v56 = vpop.f32.mrf.mxu2  ;;  %3226 = vmatpush.msra.mxu1 %v10902_v27  ;;  %v2080_v3 = vadd.f32 %v2079_v58, %v17412_v26  ;;  %v2575_v27 = vsub.f32 %v2573_v4, %v2574_v50  ;;  %v2591_v16 = vsub.f32 %v2589_v13, %v2590_v23 }
 0x2c1   : > { %v2345_v48 = vadd.f32 %v2344_v56, %v2192_v49  ;;  %2561 = vmatmul.f32.gmra.mxu0 %v2560_v39  ;;  %2762 = vmatmul.f32.gmra.mxu1 %v11046_v36  ;;  %v2576_v47 = vand.u32 4294901760, %v2575_v27  ;;  %v2597_v49 = vsub.f32 %v809_v18, %v11157_v61  ;;  %v812_v56 = vld [vmem:[%s9815_s24 + $0x100] sm:$0xff]  ;;  %v2592_v9 = vand.u32 4294901760, %v2591_v16  ;;  %v17417_v18 = vld [vmem:[#allocation22_spill] sm:$0xff] }
 0x2c2   : > { %3002 = vmatmul.f32.gmra.mxu3 %v2558_v35  ;;  %3228 = vmatpush.msra.mxu1 %v10916_v31  ;;  %v17413_v31 = vld [vmem:[#allocation18_spill] sm:$0xff] }
 0x2c3   : > { %2884 = vmatmul.f32.gmra.mxu2 %v11083_v42  ;;  %v11133_v29 = vadd.f32 %v2441_v54, %v2345_v48  ;;  %v2582_v42 = vand.u32 4294901760, %v2581_v37  ;;  %v2598_v26 = vand.u32 4294901760, %v2597_v49 }
 0x2c4   : > { %3230 = vmatpush.msra.mxu1 %v10922_v1 }
 0x2c5   : > { %v2445_v11 = vpop.f32.mrf.mxu3 }
 0x2c6   : > { %v2084_v62 = vpop.f32.mrf.mxu0  ;;  %v2197_v45 = vpop.f32.mrf.mxu1  ;;  %3232 = vmatpush.msra.mxu1 %v10932_v24  ;;  %3359 = vperm.xlu2 %9448, %v3312_v63   ;;  %v2583_v24 = vsub.f32 %v2581_v37, %v2582_v42 }
 0x2c7   : > { %v2198_v12 = vadd.f32 %v2197_v45, %v2080_v3  ;;  %v2348_v34 = vpop.f32.mrf.mxu2  ;;  %v2085_v60 = vadd.f32 %v2084_v62, %v17413_v31  ;;  %v11165_v3 = vand.u32 4294901760, %v812_v56 }
 0x2c9   : > { %v2349_v41 = vadd.f32 %v2348_v34, %v2198_v12  ;;  %2569 = vmatmul.f32.gmra.mxu0 %v2568_v33  ;;  %2766 = vmatmul.f32.gmra.mxu1 %v11071_v15  ;;  %v2599_v12 = vsub.f32 %v2597_v49, %v2598_v26  ;;  %v2605_v34 = vsub.f32 %v812_v56, %v11165_v3  ;;  %v821_v56 = vld [vmem:[%s9815_s24 + $0x148] sm:$0xff] }
 0x2ca   : > { %3008 = vmatmul.f32.gmra.mxu3 %v2566_v40 }
 0x2cb   : > { %2889 = vmatmul.f32.gmra.mxu2 %v2565_v19  ;;  %v11146_v17 = vadd.f32 %v2445_v11, %v2349_v41  ;;  %v2584_v19 = vand.u32 4294901760, %v2583_v24  ;;  %v815_v41 = vld [vmem:[%s9815_s24 + $0x118] sm:$0xff]  ;;  %v2600_v31 = vand.u32 4294901760, %v2599_v12  ;;  %v818_v24 = vld [vmem:[%s9815_s24 + $0x130] sm:$0xff] }
 0x2cd   : > { %v2449_v1 = vpop.f32.mrf.mxu3 }
 0x2ce   : > { %v2089_v25 = vpop.f32.mrf.mxu0  ;;  %v2203_v32 = vpop.f32.mrf.mxu1 }
 0x2cf   : > { %v2204_v5 = vadd.f32 %v2203_v32, %v2085_v60  ;;  %v2352_v52 = vpop.f32.mrf.mxu2  ;;  %v2090_v43 = vadd.f32 %v2089_v25, %v17414_v30  ;;  %v2606_v60 = vand.u32 4294901760, %v2605_v34 }
 0x2d1   : > { %v2353_v35 = vadd.f32 %v2352_v52, %v2204_v5  ;;  %2577 = vmatmul.f32.gmra.mxu0 %v2576_v47  ;;  %2770 = vmatmul.f32.gmra.mxu1 %v11095_v57  ;;  %v2607_v52 = vsub.f32 %v2605_v34, %v2606_v60 }
 0x2d2   : > { %3014 = vmatmul.f32.gmra.mxu3 %v2574_v50 }
 0x2d3   : > { %2894 = vmatmul.f32.gmra.mxu2 %v2573_v4  ;;  %v11154_v20 = vadd.f32 %v2449_v1, %v2353_v35  ;;  %v11173_v1 = vand.u32 4294901760, %v815_v41 }
 0x2d5   : > { %v2453_v14 = vpop.f32.mrf.mxu3  ;;  %v2613_v35 = vsub.f32 %v815_v41, %v11173_v1 }
 0x2d6   : > { %v2094_v22 = vpop.f32.mrf.mxu0  ;;  %v2209_v54 = vpop.f32.mrf.mxu1 }
 0x2d7   : > { %v2210_v39 = vadd.f32 %v2209_v54, %v2090_v43  ;;  %v2356_v40 = vpop.f32.mrf.mxu2  ;;  %v2095_v4 = vadd.f32 %v2094_v22, %v17415_v28 }
 0x2d9   : > { %v2357_v58 = vadd.f32 %v2356_v40, %v2210_v39  ;;  %2585 = vmatmul.f32.gmra.mxu0 %v2584_v19  ;;  %2774 = vmatmul.f32.gmra.mxu1 %v11117_v46  ;;  %v2614_v19 = vand.u32 4294901760, %v2613_v35 }
 0x2da   : > { %3020 = vmatmul.f32.gmra.mxu3 %v2582_v42 }
 0x2db   : > { %2899 = vmatmul.f32.gmra.mxu2 %v2581_v37  ;;  %v11162_v48 = vadd.f32 %v2453_v14, %v2357_v58  ;;  %v17416_v37 = vld [vmem:[#allocation21_spill] sm:$0xff]  ;;  %v2608_v14 = vand.u32 4294901760, %v2607_v52  ;;  %v2615_v16 = vsub.f32 %v2613_v35, %v2614_v19 }
 0x2dd   : > { %v2457_v6 = vpop.f32.mrf.mxu3 }
 0x2de   : > { %v2099_v11 = vpop.f32.mrf.mxu0  ;;  %v2215_v33 = vpop.f32.mrf.mxu1 }
 0x2df   : > { %v2216_v50 = vadd.f32 %v2215_v33, %v2095_v4  ;;  %v2360_v62 = vpop.f32.mrf.mxu2  ;;  %v2100_v0 = vadd.f32 %v2099_v11, %v17416_v37  ;;  %v11188_v4 = vand.u32 4294901760, %v821_v56  ;;  %v2616_v11 = vand.u32 4294901760, %v2615_v16 }
 0x2e1   : > { %v2361_v45 = vadd.f32 %v2360_v62, %v2216_v50  ;;  %2593 = vmatmul.f32.gmra.mxu0 %v2592_v9  ;;  %2778 = vmatmul.f32.gmra.mxu1 %v11137_v55  ;;  %v11192_v41 = vsub.f32 %v821_v56, %v11188_v4  ;;  %v3413_v56 = vld [vmem:[#allocation2] sm:$0xff] }
 0x2e2   : > { %3026 = vmatmul.f32.gmra.mxu3 %v2590_v23  ;;  %v11181_v23 = vand.u32 4294901760, %v818_v24 }
 0x2e3   : > { %2904 = vmatmul.f32.gmra.mxu2 %v2589_v13  ;;  %v11170_v27 = vadd.f32 %v2457_v6, %v2361_v45  ;;  %v17418_v6 = vld [vmem:[#allocation23_spill] sm:$0xff] }
 0x2e5   : > { %v2461_v63 = vpop.f32.mrf.mxu3 }
 0x2e6   : > { %v2104_v47 = vpop.f32.mrf.mxu0  ;;  %v2221_v42 = vpop.f32.mrf.mxu1 }
 0x2e7   : > { %v2222_v25 = vadd.f32 %v2221_v42, %v2100_v0  ;;  %v2364_v32 = vpop.f32.mrf.mxu2  ;;  %v2105_v30 = vadd.f32 %v2104_v47, %v17417_v18  ;;  %v824_v0 = vld [vmem:[%s9815_s24 + $0x160] sm:$0xff] }
 0x2e8   : > { %v17419_v47 = vld [vmem:[#allocation24_spill] sm:$0xff] }
 0x2e9   : > { %v2365_v5 = vadd.f32 %v2364_v32, %v2222_v25  ;;  %2601 = vmatmul.f32.gmra.mxu0 %v2600_v31  ;;  %2782 = vmatmul.f32.gmra.mxu1 %v11149_v7  ;;  %v2630_v31 = vand.u32 4294901760, %v11192_v41 }
 0x2ea   : > { %3032 = vmatmul.f32.gmra.mxu3 %v2598_v26 }
 0x2eb   : > { %2909 = vmatmul.f32.gmra.mxu2 %v2597_v49  ;;  %v11178_v13 = vadd.f32 %v2461_v63, %v2365_v5  ;;  %v2621_v49 = vsub.f32 %v818_v24, %v11181_v23 }
 0x2ed   : > { %v2465_v43 = vpop.f32.mrf.mxu3  ;;  %v2622_v33 = vand.u32 4294901760, %v2621_v49 }
 0x2ee   : > { %v2109_v22 = vpop.f32.mrf.mxu0  ;;  %v2227_v54 = vpop.f32.mrf.mxu1 }
 0x2ef   : > { %v2228_v39 = vadd.f32 %v2227_v54, %v2105_v30  ;;  %v2368_v40 = vpop.f32.mrf.mxu2  ;;  %v2110_v9 = vadd.f32 %v2109_v22, %v17418_v6  ;;  %v2631_v30 = vsub.f32 %v11192_v41, %v2630_v31  ;;  %v827_v22 = vld [vmem:[%s9815_s24 + $0x178] sm:$0xff] }
 0x2f0   : > { %v3414_v54 = vld [vmem:[#allocation2 + $0x18] sm:$0xff] }
 0x2f1   : > { %v2369_v58 = vadd.f32 %v2368_v40, %v2228_v39  ;;  %2609 = vmatmul.f32.gmra.mxu0 %v2608_v14  ;;  %2786 = vmatmul.f32.gmra.mxu1 %v11157_v61  ;;  %v11213_v40 = vand.u32 4294901760, %v3414_v54 }
 0x2f2   : > { %3038 = vmatmul.f32.gmra.mxu3 %v2606_v60  ;;  %v11199_v60 = vand.u32 4294901760, %v824_v0 }
 0x2f3   : > { %2914 = vmatmul.f32.gmra.mxu2 %v2605_v34  ;;  %v11186_v28 = vadd.f32 %v2465_v43, %v2369_v58  ;;  %v2623_v34 = vsub.f32 %v2621_v49, %v2622_v33  ;;  %v2632_v58 = vand.u32 4294901760, %v2631_v30 }
 0x2f4   : > { %v11204_v43 = vsub.f32 %v824_v0, %v11199_v60 }
 0x2f5   : > { %v2469_v26 = vpop.f32.mrf.mxu3  ;;  %v2624_v32 = vand.u32 4294901760, %v2623_v34 }
 0x2f6   : > { %v2114_v50 = vpop.f32.mrf.mxu0  ;;  %v2233_v62 = vpop.f32.mrf.mxu1  ;;  %v2638_v16 = vand.u32 4294901760, %v11204_v43 }
 0x2f7   : > { %v2234_v45 = vadd.f32 %v2233_v62, %v2110_v9  ;;  %v2372_v12 = vpop.f32.mrf.mxu2  ;;  %v2115_v42 = vadd.f32 %v2114_v50, %v17419_v47  ;;  %v17420_v9 = vld [vmem:[#allocation16_spill] sm:$0xff]  ;;  %v11225_v50 = vsub.f32 %v3414_v54, %v11213_v40 }
 0x2f9   : > { %v2373_v37 = vadd.f32 %v2372_v12, %v2234_v45  ;;  %2617 = vmatmul.f32.gmra.mxu0 %v2616_v11  ;;  %2790 = vmatmul.f32.gmra.mxu1 %v11165_v3  ;;  %v11230_v12 = vand.u32 4294901760, %v3413_v56 }
 0x2fa   : > { %3044 = vmatmul.f32.gmra.mxu3 %v2614_v19 }
 0x2fb   : > { %2919 = vmatmul.f32.gmra.mxu2 %v2613_v35  ;;  %v11196_v63 = vadd.f32 %v2469_v26, %v2373_v37  ;;  %v3415_v35 = vld [vmem:[#allocation2 + $0x8] sm:$0xff]  ;;  %v3412_v37 = vld [vmem:[#allocation2 + $0x10] sm:$0xff] }
 0x2fc   : > { %v11207_v19 = vand.u32 4294901760, %v3415_v35 }
 0x2fd   : > { %v2473_v25 = vpop.f32.mrf.mxu3 }
 0x2fe   : > { %v2119_v5 = vpop.f32.mrf.mxu0  ;;  %v2239_v52 = vpop.f32.mrf.mxu1  ;;  %v11211_v39 = vsub.f32 %v3415_v35, %v11207_v19  ;;  %3833 = vmatpush.msrb.mxu1 %v11207_v19  ;;  %3478 = vmatpush.msrb.mxu2 %v11207_v19 }
 0x2ff   : > { %v2240_v24 = vadd.f32 %v2239_v52, %v2115_v42  ;;  %v2376_v18 = vpop.f32.mrf.mxu2  ;;  %v2120_v26 = vadd.f32 %v2119_v5, %v17420_v9  ;;  %v3634_v42 = vand.u32 4294901760, %v11225_v50  ;;  %v2639_v52 = vsub.f32 %v11204_v43, %v2638_v16 }
 0x300   : > { %3729 = vmatpush.msrb.mxu0 %v11211_v39  ;;  %3835 = vmatpush.msrb.mxu1 %v11213_v40 }
 0x301   : > { %v2377_v14 = vadd.f32 %v2376_v18, %v2240_v24  ;;  %2625 = vmatmul.f32.gmra.mxu0 %v2624_v32  ;;  %2794 = vmatmul.f32.gmra.mxu1 %v11173_v1  ;;  %v11241_v32 = vand.u32 4294901760, %v3412_v37  ;;  %v3635_v30 = vsub.f32 %v11225_v50, %v3634_v42  ;;  %v2640_v9 = vand.u32 4294901760, %v2639_v52 }
 0x302   : > { %3050 = vmatmul.f32.gmra.mxu3 %v2622_v33  ;;  %v11221_v33 = vand.u32 4294901760, %v827_v22  ;;  %3480 = vmatpush.msrb.mxu2 %v11213_v40 }
 0x303   : > { %2924 = vmatmul.f32.gmra.mxu2 %v2621_v49  ;;  %v11218_v6 = vadd.f32 %v2473_v25, %v2377_v14  ;;  %v3628_v49 = vand.u32 4294901760, %v11211_v39  ;;  %3732 = vmatpush.msrb.mxu0 %v11225_v50  ;;  %v11238_v25 = vsub.f32 %v3413_v56, %v11230_v12  ;;  %v11252_v14 = vsub.f32 %v3412_v37, %v11241_v32 }
 0x304   : > { %3482 = vmatpush.msrb.mxu2 %v11230_v12  ;;  %3837 = vmatpush.msrb.mxu1 %v11230_v12  ;;  %v2645_v24 = vsub.f32 %v827_v22, %v11221_v33 }
 0x305   : > { %v2477_v11 = vpop.f32.mrf.mxu3  ;;  %v3629_v47 = vsub.f32 %v11211_v39, %v3628_v49  ;;  %v3640_v35 = vand.u32 4294901760, %v11238_v25  ;;  %3735 = vmatpush.msrb.mxu0 %v11238_v25  ;;  %v3324_v39 = vpop.permute.xlu1 %3323 }
 0x306   : > { %v2124_v62 = vpop.f32.mrf.mxu0  ;;  %v2245_v45 = vpop.f32.mrf.mxu1  ;;  %3484 = vmatpush.msrb.mxu2 %v11241_v32  ;;  %3839 = vmatpush.msrb.mxu1 %v11241_v32 }
 0x307   : > { %v2246_v34 = vadd.f32 %v2245_v45, %v2120_v26  ;;  %v2380_v0 = vpop.f32.mrf.mxu2  ;;  %v3630_v18 = vand.u32 4294901760, %v3629_v47  ;;  %v2125_v22 = vadd.f32 %v2124_v62, %v10987_v38  ;;  %v2646_v26 = vand.u32 4294901760, %v2645_v24  ;;  %3738 = vmatpush.msrb.mxu0 %v11252_v14 }
 0x308   : > { %v3646_v45 = vand.u32 4294901760, %v11252_v14 }
 0x309   : > { %v2381_v5 = vadd.f32 %v2380_v0, %v2246_v34  ;;  %2633 = vmatmul.f32.gmra.mxu0 %v2632_v58  ;;  %2798 = vmatmul.f32.gmra.mxu1 %v11181_v23  ;;  %v3636_v58 = vand.u32 4294901760, %v3635_v30  ;;  %v2647_v38 = vsub.f32 %v2645_v24, %v2646_v26 }
 0x30a   : > { %3056 = vmatmul.f32.gmra.mxu3 %v2630_v31  ;;  %v3641_v31 = vsub.f32 %v11238_v25, %v3640_v35  ;;  %v3647_v47 = vsub.f32 %v11252_v14, %v3646_v45 }
 0x30b   : > { %2929 = vmatmul.f32.gmra.mxu2 %v11192_v41  ;;  %3631 = vmatpush.msrb.mxu3 %v3630_v18  ;;  %v11256_v54 = vadd.f32 %v2477_v11, %v2381_v5  ;;  %v16904_v18 = vlaneseq }
 0x30c   : > { %v3642_v11 = vand.u32 4294901760, %v3641_v31  ;;  %v3648_v62 = vand.u32 4294901760, %v3647_v47  ;;  %v2648_v31 = vand.u32 4294901760, %v2647_v38 }
 0x30d   : > { %v2481_v56 = vpop.f32.mrf.mxu3  ;;  %3637 = vmatpush.msrb.mxu3 %v3636_v58 }
 0x30e   : > { %v2129_v41 = vpop.f32.mrf.mxu0  ;;  %v2251_v37 = vpop.f32.mrf.mxu1 }
 0x30f   : > { %v2252_v34 = vadd.f32 %v2251_v37, %v2125_v22  ;;  %v2384_v0 = vpop.f32.mrf.mxu2  ;;  %3643 = vmatpush.msrb.mxu3 %v3642_v11  ;;  %v2130_v30 = vadd.f32 %v2129_v41, %v11013_v59 }
 0x311   : > { %v2385_v5 = vadd.f32 %v2384_v0, %v2252_v34  ;;  %2641 = vmatmul.f32.gmra.mxu0 %v2640_v9  ;;  %2802 = vmatmul.f32.gmra.mxu1 %v11188_v4  ;;  %v11275_v9 = vand.u32 127, %v16904_v18  ;;  %v3318_v0 = vpop.permute.xlu0 %3317 }
 0x312   : > { %3062 = vmatmul.f32.gmra.mxu3 %v2638_v16 }
 0x313   : > { %2934 = vmatmul.f32.gmra.mxu2 %v11204_v43  ;;  %3649 = vmatpush.msrb.mxu3 %v3648_v62  ;;  %v11271_v52 = vadd.f32 %v2481_v56, %v2385_v5  ;;  %vm3364_vm1 = vcmp.eq.s32.totalorder %v11275_v9, %v3318_v0  ;;  %v16916_v5 = vmov 0.0   ;;  %vm3366_vm4 = vcmp.eq.s32.totalorder %v11275_v9, %v3324_v39 }
 0x314   : > { %v11283_v38 = vsel %vm3364_vm1, 1.0, %v16916_v5 }
 0x315   : > { %v2485_v58 = vpop.f32.mrf.mxu3 }
 0x316   : > { %v2134_v22 = vpop.f32.mrf.mxu0  ;;  %v2257_v37 = vpop.f32.mrf.mxu1 }
 0x317   : > { %v2258_v11 = vadd.f32 %v2257_v37, %v2130_v30  ;;  %v2388_v34 = vpop.f32.mrf.mxu2  ;;  %v2135_v59 = vadd.f32 %v2134_v22, %v11039_v53 }
 0x319   : > { %v2389_v47 = vadd.f32 %v2388_v34, %v2258_v11  ;;  %2649 = vmatmul.f32.gmra.mxu0 %v2648_v31  ;;  %2806 = vmatmul.f32.gmra.mxu1 %v11199_v60  ;;  %v3321_v53 = vpop.permute.xlu0 %3320 }
 0x31a   : > { %3068 = vmatmul.f32.gmra.mxu3 %v2646_v26  ;;  %vm3365_vm3 = vcmp.eq.s32.totalorder %v11275_v9, %v3321_v53 }
 0x31b   : > { %2939 = vmatmul.f32.gmra.mxu2 %v2645_v24  ;;  %v11278_v43 = vadd.f32 %v2485_v58, %v2389_v47  ;;  %v3418_v24 = vsel %vm3416_vm2, %v11283_v38, 0 }
 0x31c   : > { %v11297_v58 = vsub.f32 %v3418_v24, %v3418_v24 }
 0x31d   : > { %v2489_v16 = vpop.f32.mrf.mxu3 }
 0x31e   : > { %v2263_v56 = vpop.f32.mrf.mxu1  ;;  %v2530_v41 = vpop.f32.mrf.mxu0 }
 0x31f   : > { %v2264_v62 = vadd.f32 %v2263_v56, %v2135_v59  ;;  %v2392_v30 = vpop.f32.mrf.mxu2  ;;  %v2531_v22 = vadd.f32 %v2530_v41, %v11064_v2  ;;  %v3487_v2 = vand.u32 4294901760, %v11297_v58 }
 0x321   : > { %v2393_v31 = vadd.f32 %v2392_v30, %v2264_v62  ;;  %2810 = vmatmul.f32.gmra.mxu1 %v11221_v33  ;;  %3137 = vmatmul.f32.vlgmr.msra.gmra.mxu0 %v10972_v21 }
 0x322   : > { %3290 = vmatmul.f32.vlgmr.msra.gmra.mxu3 %v11199_v60 }
 0x323   : > { %3193 = vmatmul.f32.vlgmr.msra.gmra.mxu2 %v11199_v60  ;;  %v11291_v26 = vadd.f32 %v2489_v16, %v2393_v31  ;;  %4043 = vmatpush.msra.mxu3 %v11207_v19  ;;  %v11304_v60 = vsel %vm3365_vm3, 1.0, %v16916_v5 }
 0x324   : > { %3952 = vmatpush.msra.mxu2 %v3628_v49 }
 0x325   : > { %v2979_v37 = vpop.f32.mrf.mxu3  ;;  %4045 = vmatpush.msra.mxu3 %v11213_v40  ;;  %v3421_v40 = vsel %vm3416_vm2, %v11304_v60, 0 }
 0x326   : > { %v2538_v11 = vpop.f32.mrf.mxu0  ;;  %v2751_v34 = vpop.f32.mrf.mxu1  ;;  %3956 = vmatpush.msra.mxu2 %v3634_v42 }
 0x327   : > { %v2752_v19 = vadd.f32 %v2751_v34, %v2531_v22  ;;  %v2865_v0 = vpop.f32.mrf.mxu2  ;;  %4047 = vmatpush.msra.mxu3 %v11230_v12  ;;  %v11325_v12 = vsub.f32 %v3421_v40, %v3421_v40  ;;  %v2539_v42 = vadd.f32 %v2538_v11, %v11089_v8  ;;  %v3327_v8 = vpop.permute.xlu1 %3326 }
 0x328   : > { %3960 = vmatpush.msra.mxu2 %v3640_v35  ;;  %vm3367_vm5 = vcmp.eq.s32.totalorder %v11275_v9, %v3327_v8  ;;  %v3330_v34 = vpop.permute.xlu2 %3329 }
 0x329   : > { %v2866_v49 = vadd.f32 %v2865_v0, %v2752_v19  ;;  %3141 = vmatmul.f32.gmra.mxu0 %v10993_v44  ;;  %3234 = vmatmul.f32.vlgmr.msra.gmra.mxu1 %v10972_v21  ;;  %v3488_v21 = vsub.f32 %v11297_v58, %v3487_v2  ;;  %v3495_v16 = vand.u32 4294901760, %v11325_v12  ;;  %v11348_v22 = vsel %vm3367_vm5, 1.0, %v16916_v5 }
 0x32a   : > { %3294 = vmatmul.f32.gmra.mxu3 %v11221_v33  ;;  %3964 = vmatpush.msra.mxu2 %v3646_v45  ;;  %v11329_v45 = vsel %vm3366_vm4, 1.0, %v16916_v5  ;;  %v3427_v39 = vsel %vm3416_vm2, %v11348_v22, 0  ;;  %vm3368_vm6 = vcmp.eq.s32.totalorder %v11275_v9, %v3330_v34 }
 0x32b   : > { %3197 = vmatmul.f32.gmra.mxu2 %v11221_v33  ;;  %v11318_v50 = vadd.f32 %v2979_v37, %v2866_v49  ;;  %4049 = vmatpush.msra.mxu3 %v11241_v32  ;;  %v3489_v59 = vand.u32 4294901760, %v3488_v21  ;;  %v3424_v56 = vsel %vm3416_vm2, %v11329_v45, 0  ;;  %v11360_v40 = vsub.f32 %v3427_v39, %v3427_v39 }
 0x32c   : > { %v11341_v62 = vsub.f32 %v3424_v56, %v3424_v56 }
 0x32d   : > { %v2985_v25 = vpop.f32.mrf.mxu3 }
 0x32e   : > { %v2546_v35 = vpop.f32.mrf.mxu0  ;;  %v2755_v14 = vpop.f32.mrf.mxu1 }
 0x32f   : > { %v2756_v33 = vadd.f32 %v2755_v14, %v2539_v42  ;;  %v2870_v47 = vpop.f32.mrf.mxu2  ;;  %v2547_v30 = vadd.f32 %v2546_v35, %v11112_v51  ;;  %v16915_v51 = vand.u32 4294901760, %v11341_v62  ;;  %v11367_v14 = vsel %vm3368_vm6, 1.0, %v16916_v5 }
 0x330   : > { %v3430_v56 = vsel %vm3416_vm2, %v11367_v14, 0  ;;  %v3333_v8 = vpop.permute.xlu2 %3332 }
 0x331   : > { %v2871_v32 = vadd.f32 %v2870_v47, %v2756_v33  ;;  %3145 = vmatmul.f32.gmra.mxu0 %v11020_v10  ;;  %3238 = vmatmul.f32.gmra.mxu1 %v10993_v44  ;;  %v3496_v44 = vsub.f32 %v11325_v12, %v3495_v16  ;;  %vm3369_vm7 = vcmp.eq.s32.totalorder %v11275_v9, %v3333_v8 }
 0x332   : > { %9215 = vmatmul.msk.f32.vlgmr.msrb.gmra.mxu3 %vm3416_vm2, %v11283_v38 }
 0x333   : > { %3490 = vmatmul.f32.vlgmr.msrb.gmra.mxu2 %v3489_v59  ;;  %v11338_v41 = vadd.f32 %v2985_v25, %v2871_v32  ;;  %v3497_v0 = vand.u32 4294901760, %v3496_v44 }
 0x335   : > { %v2991_v31 = vpop.f32.mrf.mxu3 }
 0x336   : > { %v2554_v24 = vpop.f32.mrf.mxu0  ;;  %v2759_v53 = vpop.f32.mrf.mxu1 }
 0x337   : > { %v2760_v37 = vadd.f32 %v2759_v53, %v2547_v30  ;;  %v2875_v11 = vpop.f32.mrf.mxu2  ;;  %v2555_v21 = vadd.f32 %v2554_v24, %v11133_v29  ;;  %v16913_v29 = vand.u32 4294901760, %v11360_v40 }
 0x339   : > { %v2876_v19 = vadd.f32 %v2875_v11, %v2760_v37  ;;  %3149 = vmatmul.f32.gmra.mxu0 %v11046_v36  ;;  %3242 = vmatmul.f32.gmra.mxu1 %v11020_v10  ;;  %v3504_v10 = vsub.f32 %v11341_v62, %v16915_v51  ;;  %v3512_v24 = vsub.f32 %v11360_v40, %v16913_v29  ;;  %v11386_v11 = vsel %vm3369_vm7, 1.0, %v16916_v5 }
 0x33a   : > { %9216 = vmatmul.msk.f32.gmra.mxu3 %vm3416_vm2, %v11304_v60 }
 0x33b   : > { %3498 = vmatmul.f32.gmra.mxu2 %v3497_v0  ;;  %v11357_v49 = vadd.f32 %v2991_v31, %v2876_v19  ;;  %v3505_v32 = vand.u32 4294901760, %v3504_v10  ;;  %v11379_v31 = vsub.f32 %v3430_v56, %v3430_v56  ;;  %v3513_v39 = vand.u32 4294901760, %v3512_v24 }
 0x33d   : > { %v2997_v42 = vpop.f32.mrf.mxu3 }
 0x33e   : > { %v2562_v25 = vpop.f32.mrf.mxu0  ;;  %v2763_v35 = vpop.f32.mrf.mxu1 }
 0x33f   : > { %v2764_v33 = vadd.f32 %v2763_v35, %v2555_v21  ;;  %v2880_v47 = vpop.f32.mrf.mxu2  ;;  %v2563_v44 = vadd.f32 %v2562_v25, %v11146_v17  ;;  %v16911_v17 = vand.u32 4294901760, %v11379_v31  ;;  %v3433_v21 = vsel %vm3416_vm2, %v11386_v11, 0 }
 0x340   : > { %v11398_v25 = vsub.f32 %v3433_v21, %v3433_v21 }
 0x341   : > { %v2881_v59 = vadd.f32 %v2880_v47, %v2764_v33  ;;  %3153 = vmatmul.f32.gmra.mxu0 %v11071_v15  ;;  %3246 = vmatmul.f32.gmra.mxu1 %v11046_v36  ;;  %v3520_v33 = vsub.f32 %v11379_v31, %v16911_v17 }
 0x342   : > { %9217 = vmatmul.msk.f32.gmra.mxu3 %vm3416_vm2, %v11329_v45 }
 0x343   : > { %3506 = vmatmul.f32.gmra.mxu2 %v3505_v32  ;;  %v11376_v30 = vadd.f32 %v2997_v42, %v2881_v59  ;;  %v3336_v42 = vpop.permute.xlu0 %3335 }
 0x344   : > { %vm3370_vm8 = vcmp.eq.s32.totalorder %v11275_v9, %v3336_v42 }
 0x345   : > { %v3003_v36 = vpop.f32.mrf.mxu3  ;;  %v11405_v32 = vsel %vm3370_vm8, 1.0, %v16916_v5 }
 0x346   : > { %v2570_v53 = vpop.f32.mrf.mxu0  ;;  %v2767_v37 = vpop.f32.mrf.mxu1  ;;  %v3436_v24 = vsel %vm3416_vm2, %v11405_v32, 0 }
 0x347   : > { %v2768_v34 = vadd.f32 %v2767_v37, %v2563_v44  ;;  %v2885_v19 = vpop.f32.mrf.mxu2  ;;  %v2571_v35 = vadd.f32 %v2570_v53, %v11154_v20  ;;  %v16909_v20 = vand.u32 4294901760, %v11398_v25  ;;  %v3339_v53 = vpop.permute.xlu1 %3338 }
 0x348   : > { %vm3371_vm9 = vcmp.eq.s32.totalorder %v11275_v9, %v3339_v53 }
 0x349   : > { %v2886_v0 = vadd.f32 %v2885_v19, %v2768_v34  ;;  %3157 = vmatmul.f32.gmra.mxu0 %v11095_v57  ;;  %3250 = vmatmul.f32.gmra.mxu1 %v11071_v15  ;;  %v11417_v34 = vsub.f32 %v3436_v24, %v3436_v24  ;;  %v11424_v42 = vsel %vm3371_vm9, 1.0, %v16916_v5 }
 0x34a   : > { %9218 = vmatmul.msk.f32.gmra.mxu3 %vm3416_vm2, %v11348_v22 }
 0x34b   : > { %3514 = vmatmul.f32.gmra.mxu2 %v3513_v39  ;;  %v11395_v10 = vadd.f32 %v3003_v36, %v2886_v0  ;;  %v3521_v36 = vand.u32 4294901760, %v3520_v33  ;;  %v3528_v0 = vsub.f32 %v11398_v25, %v16909_v20 }
 0x34d   : > { %v3009_v15 = vpop.f32.mrf.mxu3 }
 0x34e   : > { %v2578_v47 = vpop.f32.mrf.mxu0  ;;  %v2771_v59 = vpop.f32.mrf.mxu1 }
 0x34f   : > { %v2772_v56 = vadd.f32 %v2771_v59, %v2571_v35  ;;  %v2890_v8 = vpop.f32.mrf.mxu2  ;;  %v2579_v19 = vadd.f32 %v2578_v47, %v11162_v48  ;;  %v3529_v59 = vand.u32 4294901760, %v3528_v0  ;;  %v16907_v48 = vand.u32 4294901760, %v11417_v34 }
 0x350   : > { %v3439_v47 = vsel %vm3416_vm2, %v11424_v42, 0 }
 0x351   : > { %v2891_v44 = vadd.f32 %v2890_v8, %v2772_v56  ;;  %3161 = vmatmul.f32.gmra.mxu0 %v11117_v46  ;;  %3254 = vmatmul.f32.gmra.mxu1 %v11095_v57  ;;  %v3342_v56 = vpop.permute.xlu2 %3341  ;;  %v3536_v24 = vsub.f32 %v11417_v34, %v16907_v48 }
 0x352   : > { %9219 = vmatmul.msk.f32.gmra.mxu3 %vm3416_vm2, %v11367_v14  ;;  %vm3372_vm10 = vcmp.eq.s32.totalorder %v11275_v9, %v3342_v56 }
 0x353   : > { %3522 = vmatmul.f32.gmra.mxu2 %v3521_v36  ;;  %v11414_v37 = vadd.f32 %v3009_v15, %v2891_v44  ;;  %v11436_v44 = vsub.f32 %v3439_v47, %v3439_v47  ;;  %v11443_v0 = vsel %vm3372_vm10, 1.0, %v16916_v5 }
 0x355   : > { %v3015_v57 = vpop.f32.mrf.mxu3 }
 0x356   : > { %v2586_v39 = vpop.f32.mrf.mxu0  ;;  %v2775_v21 = vpop.f32.mrf.mxu1 }
 0x357   : > { %v2776_v35 = vadd.f32 %v2775_v21, %v2579_v19  ;;  %v2895_v33 = vpop.f32.mrf.mxu2  ;;  %v2587_v36 = vadd.f32 %v2586_v39, %v11170_v27  ;;  %v16905_v27 = vand.u32 4294901760, %v11436_v44  ;;  %v3442_v39 = vsel %vm3416_vm2, %v11443_v0, 0 }
 0x358   : > { %v11455_v47 = vsub.f32 %v3442_v39, %v3442_v39  ;;  %v3348_v39 = vpop.permute.xlu1 %3347 }
 0x359   : > { %v2896_v15 = vadd.f32 %v2895_v33, %v2776_v35  ;;  %3165 = vmatmul.f32.gmra.mxu0 %v11137_v55  ;;  %3258 = vmatmul.f32.gmra.mxu1 %v11117_v46  ;;  %v3537_v33 = vand.u32 4294901760, %v3536_v24  ;;  %vm3374_vm12 = vcmp.eq.s32.totalorder %v11275_v9, %v3348_v39 }
 0x35a   : > { %9220 = vmatmul.msk.f32.gmra.mxu3 %vm3416_vm2, %v11386_v11  ;;  %v11481_v18 = vsel %vm3374_vm12, 1.0, %v16916_v5 }
 0x35b   : > { %3530 = vmatmul.f32.gmra.mxu2 %v3529_v59  ;;  %v11433_v8 = vadd.f32 %v3015_v57, %v2896_v15  ;;  %v3345_v15 = vpop.permute.xlu0 %3344 }
 0x35c   : > { %vm3373_vm11 = vcmp.eq.s32.totalorder %v11275_v9, %v3345_v15 }
 0x35d   : > { %v3021_v46 = vpop.f32.mrf.mxu3 }
 0x35e   : > { %v2594_v53 = vpop.f32.mrf.mxu0  ;;  %v2779_v19 = vpop.f32.mrf.mxu1 }
 0x35f   : > { %v2780_v21 = vadd.f32 %v2779_v19, %v2587_v36  ;;  %v2900_v35 = vpop.f32.mrf.mxu2  ;;  %v2595_v56 = vadd.f32 %v2594_v53, %v11178_v13  ;;  %v3544_v36 = vsub.f32 %v11436_v44, %v16905_v27  ;;  %v16906_v13 = vand.u32 4294901760, %v11455_v47 }
 0x361   : > { %v2901_v57 = vadd.f32 %v2900_v35, %v2780_v21  ;;  %3169 = vmatmul.f32.gmra.mxu0 %v11149_v7  ;;  %3262 = vmatmul.f32.gmra.mxu1 %v11137_v55  ;;  %v11462_v21 = vsel %vm3373_vm11, 1.0, %v16916_v5 }
 0x362   : > { %9221 = vmatmul.msk.f32.gmra.mxu3 %vm3416_vm2, %v11405_v32  ;;  %v3445_v53 = vsel %vm3416_vm2, %v11462_v21, 0 }
 0x363   : > { %3538 = vmatmul.f32.gmra.mxu2 %v3537_v33  ;;  %v11452_v59 = vadd.f32 %v3021_v46, %v2901_v57  ;;  %v3545_v57 = vand.u32 4294901760, %v3544_v36  ;;  %v3552_v36 = vsub.f32 %v11455_v47, %v16906_v13 }
 0x365   : > { %v3027_v55 = vpop.f32.mrf.mxu3 }
 0x366   : > { %v2602_v24 = vpop.f32.mrf.mxu0  ;;  %v2783_v19 = vpop.f32.mrf.mxu1 }
 0x367   : > { %v2784_v35 = vadd.f32 %v2783_v19, %v2595_v56  ;;  %v2905_v33 = vpop.f32.mrf.mxu2  ;;  %v11474_v56 = vsub.f32 %v3445_v53, %v3445_v53  ;;  %v2603_v19 = vadd.f32 %v2602_v24, %v11186_v28  ;;  %v3448_v24 = vsel %vm3416_vm2, %v11481_v18, 0  ;;  %v3351_v53 = vpop.permute.xlu2 %3350 }
 0x368   : > { %vm3375_vm13 = vcmp.eq.s32.totalorder %v11275_v9, %v3351_v53 }
 0x369   : > { %v2906_v46 = vadd.f32 %v2905_v33, %v2784_v35  ;;  %3173 = vmatmul.f32.gmra.mxu0 %v11157_v61  ;;  %3266 = vmatmul.f32.gmra.mxu1 %v11149_v7  ;;  %v16908_v28 = vand.u32 4294901760, %v11474_v56  ;;  %v11500_v13 = vsel %vm3375_vm13, 1.0, %v16916_v5 }
 0x36a   : > { %9222 = vmatmul.msk.f32.gmra.mxu3 %vm3416_vm2, %v11424_v42 }
 0x36b   : > { %3546 = vmatmul.f32.gmra.mxu2 %v3545_v57  ;;  %v11471_v15 = vadd.f32 %v3027_v55, %v2906_v46  ;;  %v3553_v46 = vand.u32 4294901760, %v3552_v36  ;;  %v3560_v36 = vsub.f32 %v11474_v56, %v16908_v28 }
 0x36d   : > { %v3033_v7 = vpop.f32.mrf.mxu3 }
 0x36e   : > { %v2610_v35 = vpop.f32.mrf.mxu0  ;;  %v2787_v33 = vpop.f32.mrf.mxu1 }
 0x36f   : > { %v2788_v27 = vadd.f32 %v2787_v33, %v2603_v19  ;;  %v2910_v57 = vpop.f32.mrf.mxu2  ;;  %v2611_v19 = vadd.f32 %v2610_v35, %v11196_v63  ;;  %v3451_v35 = vsel %vm3416_vm2, %v11500_v13, 0 }
 0x371   : > { %v2911_v55 = vadd.f32 %v2910_v57, %v2788_v27  ;;  %3177 = vmatmul.f32.gmra.mxu0 %v11165_v3  ;;  %3270 = vmatmul.f32.gmra.mxu1 %v11157_v61  ;;  %v11493_v27 = vsub.f32 %v3448_v24, %v3448_v24  ;;  %v3354_v24 = vpop.permute.xlu0 %3353 }
 0x372   : > { %9223 = vmatmul.msk.f32.gmra.mxu3 %vm3416_vm2, %v11443_v0  ;;  %vm3376_vm14 = vcmp.eq.s32.totalorder %v11275_v9, %v3354_v24 }
 0x373   : > { %3554 = vmatmul.f32.gmra.mxu2 %v3553_v46  ;;  %v11490_v39 = vadd.f32 %v3033_v7, %v2911_v55  ;;  %v3561_v55 = vand.u32 4294901760, %v3560_v36  ;;  %v16910_v63 = vand.u32 4294901760, %v11493_v27  ;;  %v11519_v28 = vsel %vm3376_vm14, 1.0, %v16916_v5 }
 0x375   : > { %17421 = vst [vmem:[#allocation17_spill] sm:$0xff] %v11490_v39  ;;  %v3039_v61 = vpop.f32.mrf.mxu3  ;;  %v3568_v36 = vsub.f32 %v11493_v27, %v16910_v63 }
 0x376   : > { %v2618_v33 = vpop.f32.mrf.mxu0  ;;  %v2791_v57 = vpop.f32.mrf.mxu1 }
 0x377   : > { %v2792_v48 = vadd.f32 %v2791_v57, %v2611_v19  ;;  %v2915_v46 = vpop.f32.mrf.mxu2  ;;  %v2619_v19 = vadd.f32 %v2618_v33, %v11218_v6  ;;  %v3454_v33 = vsel %vm3416_vm2, %v11519_v28, 0 }
 0x379   : > { %v2916_v7 = vadd.f32 %v2915_v46, %v2792_v48  ;;  %3181 = vmatmul.f32.gmra.mxu0 %v11173_v1  ;;  %3274 = vmatmul.f32.gmra.mxu1 %v11165_v3  ;;  %v11512_v48 = vsub.f32 %v3451_v35, %v3451_v35  ;;  %v3569_v35 = vand.u32 4294901760, %v3568_v36 }
 0x37a   : > { %9224 = vmatmul.msk.f32.gmra.mxu3 %vm3416_vm2, %v11462_v21 }
 0x37b   : > { %3562 = vmatmul.f32.gmra.mxu2 %v3561_v55  ;;  %v11509_v53 = vadd.f32 %v3039_v61, %v2916_v7  ;;  %v3357_v61 = vpop.permute.xlu1 %3356  ;;  %v16912_v6 = vand.u32 4294901760, %v11512_v48 }
 0x37c   : > { %vm3377_vm15 = vcmp.eq.s32.totalorder %v11275_v9, %v3357_v61 }
 0x37d   : > { %17422 = vst [vmem:[#allocation18_spill] sm:$0xff] %v11509_v53  ;;  %v3045_v3 = vpop.f32.mrf.mxu3  ;;  %v11538_v63 = vsel %vm3377_vm15, 1.0, %v16916_v5 }
 0x37e   : > { %v2626_v57 = vpop.f32.mrf.mxu0  ;;  %v2795_v46 = vpop.f32.mrf.mxu1 }
 0x37f   : > { %v2796_v20 = vadd.f32 %v2795_v46, %v2619_v19  ;;  %v2920_v55 = vpop.f32.mrf.mxu2  ;;  %v11531_v19 = vsub.f32 %v3454_v33, %v3454_v33 }
 0x381   : > { %v2921_v7 = vadd.f32 %v2920_v55, %v2796_v20  ;;  %3185 = vmatmul.f32.gmra.mxu0 %v11181_v23  ;;  %3278 = vmatmul.f32.gmra.mxu1 %v11173_v1  ;;  %v2627_v20 = vadd.f32 %v2626_v57, %v11256_v54  ;;  %v3576_v1 = vsub.f32 %v11512_v48, %v16912_v6  ;;  %v16914_v54 = vand.u32 4294901760, %v11531_v19 }
 0x382   : > { %9225 = vmatmul.msk.f32.gmra.mxu3 %vm3416_vm2, %v11481_v18  ;;  %v3457_v57 = vsel %vm3416_vm2, %v11538_v63, 0 }
 0x383   : > { %3570 = vmatmul.f32.gmra.mxu2 %v3569_v35  ;;  %v11528_v24 = vadd.f32 %v3045_v3, %v2921_v7  ;;  %v3360_v3 = vpop.permute.xlu2 %3359  ;;  %v3577_v61 = vand.u32 4294901760, %v3576_v1 }
 0x384   : > { %vm3378_vm0 = vcmp.eq.s32.totalorder %v11275_v9, %v3360_v3 }
 0x385   : > { %17423 = vst [vmem:[#allocation19_spill] sm:$0xff] %v11528_v24  ;;  %v3051_v46 = vpop.f32.mrf.mxu3  ;;  %v11557_v6 = vsel %vm3378_vm0, 1.0, %v16916_v5 }
 0x386   : > { %v2634_v36 = vpop.f32.mrf.mxu0  ;;  %v2799_v55 = vpop.f32.mrf.mxu1 }
 0x387   : > { %v2800_v17 = vadd.f32 %v2799_v55, %v2627_v20  ;;  %v2925_v35 = vpop.f32.mrf.mxu2  ;;  %v11550_v20 = vsub.f32 %v3457_v57, %v3457_v57 }
 0x389   : > { %v2926_v7 = vadd.f32 %v2925_v35, %v2800_v17  ;;  %3189 = vmatmul.f32.gmra.mxu0 %v11188_v4  ;;  %3282 = vmatmul.f32.gmra.mxu1 %v11181_v23  ;;  %v2635_v17 = vadd.f32 %v2634_v36, %v11271_v52  ;;  %v3584_v23 = vsub.f32 %v11531_v19, %v16914_v54  ;;  %v16920_v52 = vand.u32 4294901760, %v11550_v20 }
 0x38a   : > { %9226 = vmatmul.msk.f32.gmra.mxu3 %vm3416_vm2, %v11500_v13  ;;  %v3460_v36 = vsel %vm3416_vm2, %v11557_v6, 0 }
 0x38b   : > { %3578 = vmatmul.f32.gmra.mxu2 %v3577_v61  ;;  %v11547_v33 = vadd.f32 %v3051_v46, %v2926_v7  ;;  %v3363_v46 = vpop.permute.xlu0 %3362  ;;  %v3585_v3 = vand.u32 4294901760, %v3584_v23  ;;  %v3592_v23 = vsub.f32 %v11550_v20, %v16920_v52 }
 0x38c   : > { %vm3379_vm1 = vcmp.eq.s32.totalorder %v11275_v9, %v3363_v46 }
 0x38d   : > { %v3057_v55 = vpop.f32.mrf.mxu3  ;;  %v11576_v54 = vsel %vm3379_vm1, 1.0, %v16916_v5  ;;  %v3593_v9 = vand.u32 4294901760, %v3592_v23 }
 0x38e   : > { %v2642_v1 = vpop.f32.mrf.mxu0  ;;  %v2803_v35 = vpop.f32.mrf.mxu1 }
 0x38f   : > { %v2804_v29 = vadd.f32 %v2803_v35, %v2635_v17  ;;  %v2930_v61 = vpop.f32.mrf.mxu2  ;;  %v11569_v17 = vsub.f32 %v3460_v36, %v3460_v36 }
 0x391   : > { %v2931_v7 = vadd.f32 %v2930_v61, %v2804_v29  ;;  %3286 = vmatmul.f32.gmra.mxu1 %v11188_v4  ;;  %3741 = vmatmul.f32.vlgmr.msrb.gmra.mxu0 %v11297_v58  ;;  %v2643_v4 = vadd.f32 %v2642_v1, %v11278_v43  ;;  %v16919_v43 = vand.u32 4294901760, %v11569_v17  ;;  %v3463_v1 = vsel %vm3416_vm2, %v11576_v54, 0 }
 0x392   : > { %9227 = vmatmul.msk.f32.gmra.mxu3 %vm3416_vm2, %v11519_v28 }
 0x393   : > { %3586 = vmatmul.f32.gmra.mxu2 %v3585_v3  ;;  %v11566_v57 = vadd.f32 %v3057_v55, %v2931_v7  ;;  %v11586_v7 = vsub.f32 %v3463_v1, %v3463_v1  ;;  %v3600_v58 = vsub.f32 %v11569_v17, %v16919_v43 }
 0x395   : > { %v3063_v29 = vpop.f32.mrf.mxu3 }
 0x396   : > { %v2650_v35 = vpop.f32.mrf.mxu0  ;;  %v2807_v61 = vpop.f32.mrf.mxu1 }
 0x397   : > { %v2808_v51 = vadd.f32 %v2807_v61, %v2643_v4  ;;  %v2935_v3 = vpop.f32.mrf.mxu2 }
 0x399   : > { %v2936_v55 = vadd.f32 %v2935_v3, %v2808_v51  ;;  %3746 = vmatmul.f32.gmra.mxu0 %v11325_v12  ;;  %3843 = vmatmul.f32.vlgmr.msrb.gmra.mxu1 %v3487_v2  ;;  %v2651_v51 = vadd.f32 %v2650_v35, %v11291_v26 }
 0x39a   : > { %9228 = vmatmul.msk.f32.gmra.mxu3 %vm3416_vm2, %v11538_v63 }
 0x39b   : > { %3594 = vmatmul.f32.gmra.mxu2 %v3593_v9  ;;  %v3064_v46 = vadd.f32 %v3063_v29, %v2936_v55  ;;  %v3601_v29 = vand.u32 4294901760, %v3600_v58  ;;  %v16918_v55 = vand.u32 4294901760, %v11586_v7 }
 0x39d   : > { %v3069_v36 = vpop.f32.mrf.mxu3  ;;  %v3608_v9 = vsub.f32 %v11586_v7, %v16918_v55 }
 0x39e   : > { %v2811_v2 = vpop.f32.mrf.mxu1  ;;  %v11592_v4 = vpop.f32.mrf.mxu0 }
 0x39f   : > { %v2812_v23 = vadd.f32 %v2811_v2, %v2651_v51  ;;  %v2940_v61 = vpop.f32.mrf.mxu2  ;;  %v3609_v58 = vand.u32 4294901760, %v3608_v9 }
 0x3a1   : > { %v2941_v3 = vadd.f32 %v2940_v61, %v2812_v23  ;;  %3751 = vmatmul.f32.gmra.mxu0 %v11341_v62  ;;  %3849 = vmatmul.f32.gmra.mxu1 %v3495_v16  ;;  %v17424_v16 = vand.u32 4294901760, %v11341_v62 }
 0x3a2   : > { %9229 = vmatmul.msk.f32.gmra.mxu3 %vm3416_vm2, %v11557_v6 }
 0x3a3   : > { %3602 = vmatmul.f32.gmra.mxu2 %v3601_v29  ;;  %v3070_v26 = vadd.f32 %v3069_v36, %v2941_v3 }
 0x3a5   : > { %v3291_v35 = vpop.f32.mrf.mxu3 }
 0x3a6   : > { %v11603_v1 = vpop.f32.mrf.mxu0  ;;  %v11605_v51 = vpop.f32.mrf.mxu1 }
 0x3a7   : > { %v3194_v2 = vpop.f32.mrf.mxu2 }
 0x3a8   : > { %v3195_v12 = vadd.f32 %v3194_v2, %v3064_v46  ;;  %v17426_v46 = vand.u32 4294901760, %v11360_v40 }
 0x3a9   : > { %3756 = vmatmul.f32.gmra.mxu0 %v11360_v40  ;;  %3855 = vmatmul.f32.gmra.mxu1 %v17424_v16  ;;  %v17428_v40 = vand.u32 4294901760, %v11379_v31 }
 0x3aa   : > { %v11610_v23 = vadd.f32 %v3291_v35, %v3195_v12  ;;  %9230 = vmatmul.msk.f32.gmra.mxu3 %vm3416_vm2, %v11576_v54 }
 0x3ab   : > { %3610 = vmatmul.f32.gmra.mxu2 %v3609_v58 }
 0x3ac   : > { %17425 = vst [vmem:[#allocation20_spill] sm:$0xff] %v11610_v23 }
 0x3ad   : > { %v3295_v36 = vpop.f32.mrf.mxu3 }
 0x3ae   : > { %v11614_v61 = vpop.f32.mrf.mxu0  ;;  %v11616_v3 = vpop.f32.mrf.mxu1 }
 0x3af   : > { %v3198_v29 = vpop.f32.mrf.mxu2 }
 0x3b0   : > { %v3199_v5 = vadd.f32 %v3198_v29, %v3070_v26  ;;  %v17429_v29 = vand.u32 4294901760, %v11398_v25 }
 0x3b1   : > { %3761 = vmatmul.f32.gmra.mxu0 %v11379_v31  ;;  %3861 = vmatmul.f32.gmra.mxu1 %v17426_v46 }
 0x3b2   : > { %v11621_v62 = vadd.f32 %v3295_v36, %v3199_v5  ;;  %9247 = vmatmul.msk.f32.vlgmr.msra.gmra.mxu3 %vm3416_vm2, %v11283_v38 }
 0x3b3   : > { %9231 = vmatmul.msk.f32.vlgmr.msra.gmra.mxu2 %vm3416_vm2, %v11283_v38 }
 0x3b4   : > { %17427 = vst [vmem:[#allocation21_spill] sm:$0xff] %v11621_v62 }
 0x3b5   : > { %v3652_v35 = vpop.f32.mrf.mxu3 }
 0x3b6   : > { %v11627_v9 = vpop.f32.mrf.mxu0  ;;  %v11629_v2 = vpop.f32.mrf.mxu1 }
 0x3b7   : > { %v3491_v12 = vpop.f32.mrf.mxu2 }
 0x3b8   : > { %v11631_v26 = vadd.f32 %v3652_v35, %v3491_v12 }
 0x3b9   : > { %3766 = vmatmul.f32.gmra.mxu0 %v11398_v25  ;;  %3867 = vmatmul.f32.gmra.mxu1 %v17428_v40  ;;  %v17430_v40 = vand.u32 4294901760, %v11417_v34 }
 0x3ba   : > { %9248 = vmatmul.msk.f32.gmra.mxu3 %vm3416_vm2, %v11304_v60 }
 0x3bb   : > { %9232 = vmatmul.msk.f32.gmra.mxu2 %vm3416_vm2, %v11304_v60 }
 0x3bd   : > { %v3656_v5 = vpop.f32.mrf.mxu3 }
 0x3be   : > { %v11640_v38 = vpop.f32.mrf.mxu0  ;;  %v11642_v16 = vpop.f32.mrf.mxu1 }
 0x3bf   : > { %v3499_v58 = vpop.f32.mrf.mxu2 }
 0x3c0   : > { %v11644_v36 = vadd.f32 %v3656_v5, %v3499_v58 }
 0x3c1   : > { %3771 = vmatmul.f32.gmra.mxu0 %v11417_v34  ;;  %3873 = vmatmul.f32.gmra.mxu1 %v17429_v29 }
 0x3c2   : > { %9249 = vmatmul.msk.f32.gmra.mxu3 %vm3416_vm2, %v11329_v45 }
 0x3c3   : > { %9233 = vmatmul.msk.f32.gmra.mxu2 %vm3416_vm2, %v11329_v45 }
 0x3c5   : > { %v3660_v60 = vpop.f32.mrf.mxu3 }
 0x3c6   : > { %v11653_v31 = vpop.f32.mrf.mxu0  ;;  %v11655_v46 = vpop.f32.mrf.mxu1 }
 0x3c7   : > { %v3507_v35 = vpop.f32.mrf.mxu2 }
 0x3c8   : > { %v11657_v12 = vadd.f32 %v3660_v60, %v3507_v35  ;;  %v17431_v60 = vand.u32 4294901760, %v11436_v44 }
 0x3c9   : > { %3776 = vmatmul.f32.gmra.mxu0 %v11436_v44  ;;  %3879 = vmatmul.f32.gmra.mxu1 %v17430_v40 }
 0x3ca   : > { %9250 = vmatmul.msk.f32.gmra.mxu3 %vm3416_vm2, %v11348_v22 }
 0x3cb   : > { %9234 = vmatmul.msk.f32.gmra.mxu2 %vm3416_vm2, %v11348_v22 }
 0x3cd   : > { %v3664_v45 = vpop.f32.mrf.mxu3 }
 0x3ce   : > { %v11666_v25 = vpop.f32.mrf.mxu0  ;;  %v11668_v5 = vpop.f32.mrf.mxu1 }
 0x3cf   : > { %v3515_v58 = vpop.f32.mrf.mxu2 }
 0x3d0   : > { %v11670_v29 = vadd.f32 %v3664_v45, %v3515_v58  ;;  %v17432_v45 = vand.u32 4294901760, %v11455_v47 }
 0x3d1   : > { %3781 = vmatmul.f32.gmra.mxu0 %v11455_v47  ;;  %3885 = vmatmul.f32.gmra.mxu1 %v17431_v60 }
 0x3d2   : > { %9251 = vmatmul.msk.f32.gmra.mxu3 %vm3416_vm2, %v11367_v14 }
 0x3d3   : > { %9235 = vmatmul.msk.f32.gmra.mxu2 %vm3416_vm2, %v11367_v14 }
 0x3d5   : > { %v3668_v22 = vpop.f32.mrf.mxu3 }
 0x3d6   : > { %v11679_v34 = vpop.f32.mrf.mxu0  ;;  %v11681_v35 = vpop.f32.mrf.mxu1 }
 0x3d7   : > { %v3523_v40 = vpop.f32.mrf.mxu2 }
 0x3d8   : > { %v11683_v55 = vadd.f32 %v3668_v22, %v3523_v40  ;;  %v17433_v22 = vand.u32 4294901760, %v11474_v56 }
 0x3d9   : > { %3786 = vmatmul.f32.gmra.mxu0 %v11474_v56  ;;  %3891 = vmatmul.f32.gmra.mxu1 %v17432_v45 }
 0x3da   : > { %9252 = vmatmul.msk.f32.gmra.mxu3 %vm3416_vm2, %v11386_v11 }
 0x3db   : > { %9236 = vmatmul.msk.f32.gmra.mxu2 %vm3416_vm2, %v11386_v11 }
 0x3dd   : > { %v3672_v14 = vpop.f32.mrf.mxu3 }
 0x3de   : > { %v11692_v44 = vpop.f32.mrf.mxu0  ;;  %v11694_v58 = vpop.f32.mrf.mxu1 }
 0x3df   : > { %v3531_v60 = vpop.f32.mrf.mxu2 }
 0x3e0   : > { %v11696_v43 = vadd.f32 %v3672_v14, %v3531_v60  ;;  %v17435_v14 = vand.u32 4294901760, %v11493_v27 }
 0x3e1   : > { %3791 = vmatmul.f32.gmra.mxu0 %v11493_v27  ;;  %3897 = vmatmul.f32.gmra.mxu1 %v17433_v22 }
 0x3e2   : > { %9253 = vmatmul.msk.f32.gmra.mxu3 %vm3416_vm2, %v11405_v32 }
 0x3e3   : > { %9237 = vmatmul.msk.f32.gmra.mxu2 %vm3416_vm2, %v11405_v32 }
 0x3e5   : > { %v3676_v11 = vpop.f32.mrf.mxu3 }
 0x3e6   : > { %v11705_v47 = vpop.f32.mrf.mxu0  ;;  %v11707_v40 = vpop.f32.mrf.mxu1 }
 0x3e7   : > { %17434 = vst [vmem:[#allocation22_spill] sm:$0xff] %v11705_v47  ;;  %v3539_v45 = vpop.f32.mrf.mxu2  ;;  %v17448_v47 = vand.u32 4294901760, %v11569_v17 }
 0x3e8   : > { %v11709_v52 = vadd.f32 %v3676_v11, %v3539_v45  ;;  %v17438_v11 = vand.u32 4294901760, %v11512_v48 }
 0x3e9   : > { %3796 = vmatmul.f32.gmra.mxu0 %v11512_v48  ;;  %3903 = vmatmul.f32.gmra.mxu1 %v17435_v14 }
 0x3ea   : > { %9254 = vmatmul.msk.f32.gmra.mxu3 %vm3416_vm2, %v11424_v42 }
 0x3eb   : > { %9238 = vmatmul.msk.f32.gmra.mxu2 %vm3416_vm2, %v11424_v42 }
 0x3ed   : > { %v3680_v32 = vpop.f32.mrf.mxu3 }
 0x3ee   : > { %v11718_v56 = vpop.f32.mrf.mxu0  ;;  %v11720_v60 = vpop.f32.mrf.mxu1 }
 0x3ef   : > { %17436 = vst [vmem:[#allocation23_spill] sm:$0xff] %v11718_v56  ;;  %v3547_v22 = vpop.f32.mrf.mxu2  ;;  %v17450_v56 = vand.u32 4294901760, %v11586_v7 }
 0x3f0   : > { %17437 = vst [vmem:[#allocation24_spill] sm:$0xff] %v11720_v60  ;;  %v11722_v62 = vadd.f32 %v3680_v32, %v3547_v22  ;;  %v17441_v32 = vand.u32 4294901760, %v11531_v19  ;;  %v17445_v60 = vand.u32 4294901760, %v11550_v20 }
 0x3f1   : > { %3801 = vmatmul.f32.gmra.mxu0 %v11531_v19  ;;  %3909 = vmatmul.f32.gmra.mxu1 %v17438_v11 }
 0x3f2   : > { %9255 = vmatmul.msk.f32.gmra.mxu3 %vm3416_vm2, %v11443_v0 }
 0x3f3   : > { %9239 = vmatmul.msk.f32.gmra.mxu2 %vm3416_vm2, %v11443_v0 }
 0x3f5   : > { %v11731_v42 = vpop.f32.mrf.mxu3 }
 0x3f6   : > { %v11733_v27 = vpop.f32.mrf.mxu0  ;;  %v11735_v45 = vpop.f32.mrf.mxu1 }
 0x3f7   : > { %17439 = vst [vmem:[#allocation16_spill] sm:$0xff] %v11733_v27  ;;  %v11737_v14 = vpop.f32.mrf.mxu2 }
 0x3f8   : > { %17440 = vst [vmem:[#allocation25_spill] sm:$0xff] %v11735_v45 }
 0x3f9   : > { %3806 = vmatmul.f32.gmra.mxu0 %v11550_v20  ;;  %3915 = vmatmul.f32.gmra.mxu1 %v17441_v32 }
 0x3fa   : > { %9256 = vmatmul.msk.f32.gmra.mxu3 %vm3416_vm2, %v11462_v21 }
 0x3fb   : > { %9240 = vmatmul.msk.f32.gmra.mxu2 %vm3416_vm2, %v11462_v21 }
 0x3fd   : > { %v11746_v0 = vpop.f32.mrf.mxu3 }
 0x3fe   : > { %17442 = vst [vmem:[#allocation26_spill] sm:$0xff] %v11746_v0  ;;  %v11748_v48 = vpop.f32.mrf.mxu0  ;;  %v11750_v22 = vpop.f32.mrf.mxu1 }
 0x3ff   : > { %17443 = vst [vmem:[#allocation27_spill] sm:$0xff] %v11750_v22  ;;  %v11752_v11 = vpop.f32.mrf.mxu2 }
 0x400   : > { %17444 = vst [vmem:[#allocation28_spill] sm:$0xff] %v11752_v11 }
 0x401   : > { %3811 = vmatmul.f32.gmra.mxu0 %v11569_v17  ;;  %3921 = vmatmul.f32.gmra.mxu1 %v17445_v60 }
 0x402   : > { %9257 = vmatmul.msk.f32.gmra.mxu3 %vm3416_vm2, %v11481_v18 }
 0x403   : > { %9241 = vmatmul.msk.f32.gmra.mxu2 %vm3416_vm2, %v11481_v18 }
 0x405   : > { %v11761_v21 = vpop.f32.mrf.mxu3 }
 0x406   : > { %17446 = vst [vmem:[#allocation29_spill] sm:$0xff] %v11761_v21  ;;  %v11763_v19 = vpop.f32.mrf.mxu0  ;;  %v11765_v32 = vpop.f32.mrf.mxu1 }
 0x407   : > { %v11767_v45 = vpop.f32.mrf.mxu2 }
 0x408   : > { %17447 = vst [vmem:[#allocation30_spill] sm:$0xff] %v11767_v45 }
 0x409   : > { %3816 = vmatmul.f32.gmra.mxu0 %v11586_v7  ;;  %3927 = vmatmul.f32.gmra.mxu1 %v17448_v47 }
 0x40a   : > { %9258 = vmatmul.msk.f32.gmra.mxu3 %vm3416_vm2, %v11500_v13 }
 0x40b   : > { %9242 = vmatmul.msk.f32.gmra.mxu2 %vm3416_vm2, %v11500_v13 }
 0x40d   : > { %v11776_v18 = vpop.f32.mrf.mxu3 }
 0x40e   : > { %17449 = vst [vmem:[#allocation31_spill] sm:$0xff] %v11776_v18  ;;  %v11778_v20 = vpop.f32.mrf.mxu1  ;;  %v3742_v60 = vpop.f32.mrf.mxu0 }
 0x40f   : > { %v11780_v39 = vpop.f32.mrf.mxu2  ;;  %v3743_v22 = vadd.f32 %v3742_v60, %v11631_v26 }
 0x411   : > { %3933 = vmatmul.f32.gmra.mxu1 %v17450_v56 }
 0x412   : > { %9259 = vmatmul.msk.f32.gmra.mxu3 %vm3416_vm2, %v11519_v28 }
 0x413   : > { %9243 = vmatmul.msk.f32.gmra.mxu2 %vm3416_vm2, %v11519_v28 }
 0x415   : > { %v3700_v17 = vpop.f32.mrf.mxu3 }
 0x416   : > { %v3747_v13 = vpop.f32.mrf.mxu0  ;;  %v3844_v47 = vpop.f32.mrf.mxu1 }
 0x417   : > { %v3587_v53 = vpop.f32.mrf.mxu2  ;;  %v3748_v27 = vadd.f32 %v3747_v13, %v11644_v36  ;;  %v3845_v24 = vadd.f32 %v3844_v47, %v3743_v22 }
 0x418   : > { %v11790_v23 = vadd.f32 %v3700_v17, %v3587_v53 }
 0x41a   : > { %9260 = vmatmul.msk.f32.gmra.mxu3 %vm3416_vm2, %v11538_v63 }
 0x41b   : > { %9244 = vmatmul.msk.f32.gmra.mxu2 %vm3416_vm2, %v11538_v63 }
 0x41d   : > { %v3704_v7 = vpop.f32.mrf.mxu3 }
 0x41e   : > { %v3752_v26 = vpop.f32.mrf.mxu0  ;;  %v3850_v56 = vpop.f32.mrf.mxu1 }
 0x41f   : > { %v3595_v60 = vpop.f32.mrf.mxu2  ;;  %v3753_v28 = vadd.f32 %v3752_v26, %v11657_v12  ;;  %v3851_v0 = vadd.f32 %v3850_v56, %v3748_v27 }
 0x420   : > { %v11797_v11 = vadd.f32 %v3704_v7, %v3595_v60 }
 0x422   : > { %9261 = vmatmul.msk.f32.gmra.mxu3 %vm3416_vm2, %v11557_v6 }
 0x423   : > { %9245 = vmatmul.msk.f32.gmra.mxu2 %vm3416_vm2, %v11557_v6 }
 0x425   : > { %v3708_v53 = vpop.f32.mrf.mxu3 }
 0x426   : > { %v3757_v36 = vpop.f32.mrf.mxu0  ;;  %v3856_v22 = vpop.f32.mrf.mxu1 }
 0x427   : > { %v3603_v17 = vpop.f32.mrf.mxu2  ;;  %v3758_v63 = vadd.f32 %v3757_v36, %v11670_v29  ;;  %v3857_v13 = vadd.f32 %v3856_v22, %v3753_v28 }
 0x428   : > { %v11804_v47 = vadd.f32 %v3708_v53, %v3603_v17  ;;  %v3139_v17 = vadd.f32 %v11592_v4, %v11318_v50 }
 0x42a   : > { %17451 = vst [vmem:[#allocation32_spill] sm:$0xff] %v11804_v47  ;;  %9262 = vmatmul.msk.f32.gmra.mxu3 %vm3416_vm2, %v11576_v54  ;;  %v3236_v45 = vadd.f32 %v11605_v51, %v3139_v17 }
 0x42b   : > { %9246 = vmatmul.msk.f32.gmra.mxu2 %vm3416_vm2, %v11576_v54 }
 0x42d   : > { %v3712_v12 = vpop.f32.mrf.mxu3 }
 0x42e   : > { %v3762_v27 = vpop.f32.mrf.mxu0  ;;  %v3862_v7 = vpop.f32.mrf.mxu1 }
 0x42f   : > { %v3611_v26 = vpop.f32.mrf.mxu2  ;;  %v3763_v6 = vadd.f32 %v3762_v27, %v11683_v55  ;;  %v3863_v56 = vadd.f32 %v3862_v7, %v3758_v63 }
 0x430   : > { %v11811_v60 = vadd.f32 %v3712_v12, %v3611_v26 }
 0x435   : > { %v4052_v21 = vpop.f32.mrf.mxu3 }
 0x436   : > { %v3767_v29 = vpop.f32.mrf.mxu0  ;;  %v3868_v28 = vpop.f32.mrf.mxu1 }
 0x437   : > { %v3768_v53 = vadd.f32 %v3767_v29, %v11696_v43  ;;  %v3869_v36 = vadd.f32 %v3868_v28, %v3763_v6  ;;  %v3967_v22 = vpop.f32.mrf.mxu2  ;;  %v3143_v43 = vadd.f32 %v11603_v1, %v11338_v41 }
 0x438   : > { %v3968_v54 = vadd.f32 %v3967_v22, %v3845_v24 }
 0x439   : > { %v3240_v29 = vadd.f32 %v11616_v3, %v3143_v43 }
 0x43a   : > { %v4053_v47 = vadd.f32 %v4052_v21, %v3968_v54 }
 0x43c   : > { %v11817_v18 = vmul.f32 %v4053_v47, %v3236_v45 }
 0x43d   : > { %v4056_v55 = vpop.f32.mrf.mxu3 }
 0x43e   : > { %v3772_v63 = vpop.f32.mrf.mxu0  ;;  %v3874_v12 = vpop.f32.mrf.mxu1 }
 0x43f   : > { %v3773_v27 = vadd.f32 %v3772_v63, %v11709_v52  ;;  %v3875_v7 = vadd.f32 %v3874_v12, %v3768_v53  ;;  %v3971_v26 = vpop.f32.mrf.mxu2  ;;  %v3147_v52 = vadd.f32 %v11614_v61, %v11357_v49  ;;  %v3685_v49 = vadd.f32 %v11731_v42, %v11737_v14 }
 0x440   : > { %v3972_v6 = vadd.f32 %v3971_v26, %v3851_v0  ;;  %v3159_v42 = vadd.f32 %v11653_v31, %v11414_v37 }
 0x441   : > { %v3244_v22 = vadd.f32 %v11629_v2, %v3147_v52 }
 0x442   : > { %v4057_v50 = vadd.f32 %v4056_v55, %v3972_v6  ;;  %v3151_v55 = vadd.f32 %v11627_v9, %v11376_v30 }
 0x444   : > { %v11823_v24 = vmul.f32 %v4057_v50, %v3240_v29  ;;  %v3155_v29 = vadd.f32 %v11640_v38, %v11395_v10  ;;  %v3163_v10 = vadd.f32 %v11666_v25, %v11433_v8 }
 0x445   : > { %v4060_v4 = vpop.f32.mrf.mxu3 }
 0x446   : > { %v3777_v51 = vpop.f32.mrf.mxu0  ;;  %v3880_v45 = vpop.f32.mrf.mxu1  ;;  %v3252_v30 = vadd.f32 %v11655_v46, %v3155_v29  ;;  %v3260_v46 = vadd.f32 %v11681_v35, %v3163_v10 }
 0x447   : > { %v3778_v21 = vadd.f32 %v3777_v51, %v11722_v62  ;;  %v3881_v47 = vadd.f32 %v3880_v45, %v3773_v27  ;;  %v3975_v28 = vpop.f32.mrf.mxu2  ;;  %v3248_v62 = vadd.f32 %v11642_v16, %v3151_v55  ;;  %v3256_v51 = vadd.f32 %v11668_v5, %v3159_v42 }
 0x448   : > { %v3976_v53 = vadd.f32 %v3975_v28, %v3857_v13  ;;  %v3167_v5 = vadd.f32 %v11679_v34, %v11452_v59 }
 0x44a   : > { %v4061_v41 = vadd.f32 %v4060_v4, %v3976_v53 }
 0x44c   : > { %v11829_v1 = vmul.f32 %v4061_v41, %v3244_v22 }
 0x44d   : > { %v4064_v3 = vpop.f32.mrf.mxu3 }
 0x44e   : > { %v3886_v0 = vpop.f32.mrf.mxu1  ;;  %v3782_v12 = vpop.f32.mrf.mxu0 }
 0x44f   : > { %v3887_v17 = vadd.f32 %v3886_v0, %v3778_v21  ;;  %v3979_v54 = vpop.f32.mrf.mxu2  ;;  %v3783_v2 = vadd.f32 %v3782_v12, %v3685_v49 }
 0x450   : > { %v3980_v63 = vadd.f32 %v3979_v54, %v3863_v56 }
 0x452   : > { %v4065_v27 = vadd.f32 %v4064_v3, %v3980_v63  ;;  %v3264_v3 = vadd.f32 %v11694_v58, %v3167_v5 }
 0x454   : > { %v11836_v61 = vmul.f32 %v4065_v27, %v3248_v62 }
 0x455   : > { %v4068_v13 = vpop.f32.mrf.mxu3 }
 0x456   : > { %v3892_v26 = vpop.f32.mrf.mxu1  ;;  %v3787_v22 = vpop.f32.mrf.mxu0 }
 0x457   : > { %v3893_v43 = vadd.f32 %v3892_v26, %v3783_v2  ;;  %v3983_v6 = vpop.f32.mrf.mxu2 }
 0x458   : > { %v3984_v50 = vadd.f32 %v3983_v6, %v3869_v36 }
 0x45a   : > { %v4069_v9 = vadd.f32 %v4068_v13, %v3984_v50 }
 0x45c   : > { %v11841_v16 = vmul.f32 %v4069_v9, %v3252_v30  ;;  %v3187_v9 = vadd.f32 %v11748_v48, %v11547_v33  ;;  %v17452_v33 = vld [vmem:[#allocation31_spill] sm:$0xff] }
 0x45d   : > { %v4072_v56 = vpop.f32.mrf.mxu3  ;;  %v3697_v48 = vadd.f32 %v17452_v33, %v11780_v39 }
 0x45e   : > { %v11853_v37 = vpop.f32.mrf.mxu1  ;;  %v3792_v25 = vpop.f32.mrf.mxu0 }
 0x45f   : > { %v3987_v4 = vpop.f32.mrf.mxu2 }
 0x460   : > { %v3988_v14 = vadd.f32 %v3987_v4, %v3875_v7  ;;  %v3284_v4 = vadd.f32 %v11765_v32, %v3187_v9  ;;  %v17453_v32 = vld [vmem:[#allocation32_spill] sm:$0xff] }
 0x462   : > { %v4073_v45 = vadd.f32 %v4072_v56, %v3988_v14 }
 0x464   : > { %v11846_v21 = vmul.f32 %v4073_v45, %v3256_v51 }
 0x465   : > { %v4076_v28 = vpop.f32.mrf.mxu3 }
 0x466   : > { %v3904_v63 = vpop.f32.mrf.mxu1  ;;  %v3797_v58 = vpop.f32.mrf.mxu0 }
 0x467   : > { %v3991_v52 = vpop.f32.mrf.mxu2 }
 0x468   : > { %v3992_v38 = vadd.f32 %v3991_v52, %v3881_v47  ;;  %v3171_v47 = vadd.f32 %v11692_v44, %v11471_v15 }
 0x46a   : > { %v4077_v36 = vadd.f32 %v4076_v28, %v3992_v38  ;;  %v3268_v62 = vadd.f32 %v11707_v40, %v3171_v47 }
 0x46c   : > { %v11851_v53 = vmul.f32 %v4077_v36, %v3260_v46 }
 0x46d   : > { %v4080_v41 = vpop.f32.mrf.mxu3 }
 0x46e   : > { %v3802_v13 = vpop.f32.mrf.mxu0 }
 0x46f   : > { %v3995_v31 = vpop.f32.mrf.mxu2  ;;  %v3803_v15 = vadd.f32 %v3802_v13, %v11790_v23  ;;  %v3191_v23 = vadd.f32 %v11763_v19, %v11566_v57  ;;  %v17457_v57 = vld [vmem:[#allocation26_spill] sm:$0xff] }
 0x470   : > { %v3996_v7 = vadd.f32 %v3995_v31, %v3887_v17  ;;  %v3910_v17 = vpop.f32.mrf.mxu1 }
 0x471   : > { %v3288_v36 = vadd.f32 %v11778_v20, %v3191_v23 }
 0x472   : > { %v4081_v0 = vadd.f32 %v4080_v41, %v3996_v7  ;;  %v17455_v7 = vld [vmem:[#allocation29_spill] sm:$0xff] }
 0x474   : > { %v11858_v54 = vmul.f32 %v4081_v0, %v3264_v3  ;;  %v3798_v0 = vadd.f32 %v3797_v58, %v3697_v48 }
 0x475   : > { %v4084_v8 = vpop.f32.mrf.mxu3 }
 0x476   : > { %v3807_v44 = vpop.f32.mrf.mxu0 }
 0x477   : > { %v3999_v35 = vpop.f32.mrf.mxu2  ;;  %v3808_v14 = vadd.f32 %v3807_v44, %v11797_v11  ;;  %v17454_v11 = vld [vmem:[#allocation30_spill] sm:$0xff] }
 0x478   : > { %v4000_v55 = vadd.f32 %v3999_v35, %v3893_v43  ;;  %v3916_v26 = vpop.f32.mrf.mxu1  ;;  %v3693_v3 = vadd.f32 %v17455_v7, %v17454_v11 }
 0x479   : > { %v3917_v50 = vadd.f32 %v3916_v26, %v3803_v15 }
 0x47a   : > { %v4085_v12 = vadd.f32 %v4084_v8, %v4000_v55  ;;  %v17456_v55 = vld [vmem:[#allocation28_spill] sm:$0xff] }
 0x47b   : > { %v3689_v19 = vadd.f32 %v17457_v57, %v17456_v55 }
 0x47c   : > { %v11863_v27 = vmul.f32 %v4085_v12, %v3268_v62  ;;  %v3793_v62 = vadd.f32 %v3792_v25, %v3693_v3  ;;  %v3911_v12 = vadd.f32 %v3910_v17, %v3798_v0 }
 0x47d   : > { %v11865_v59 = vpop.f32.mrf.mxu3  ;;  %v3788_v26 = vadd.f32 %v3787_v22, %v3689_v19 }
 0x47e   : > { %v3812_v52 = vpop.f32.mrf.mxu0  ;;  %v3905_v15 = vadd.f32 %v3904_v63, %v3793_v62 }
 0x47f   : > { %v4003_v34 = vpop.f32.mrf.mxu2  ;;  %v3813_v31 = vadd.f32 %v3812_v52, %v17453_v32  ;;  %v17467_v32 = vld [vmem:[#allocation24_spill] sm:$0xff] }
 0x480   : > { %v3922_v40 = vpop.f32.mrf.mxu1 }
 0x481   : > { %v3923_v28 = vadd.f32 %v3922_v40, %v3808_v14 }
 0x485   : > { %v4092_v49 = vpop.f32.mrf.mxu3 }
 0x486   : > { %v3817_v13 = vpop.f32.mrf.mxu0 }
 0x487   : > { %v4007_v2 = vpop.f32.mrf.mxu2  ;;  %v3818_v40 = vadd.f32 %v3817_v13, %v11811_v60  ;;  %v17464_v60 = vld [vmem:[#allocation17_spill] sm:$0xff] }
 0x488   : > { %v3928_v46 = vpop.f32.mrf.mxu1  ;;  %v4008_v58 = vadd.f32 %v4007_v2, %v3905_v15  ;;  %v17465_v2 = vld [vmem:[#allocation22_spill] sm:$0xff] }
 0x489   : > { %v3929_v8 = vadd.f32 %v3928_v46, %v3813_v31  ;;  %v17466_v46 = vld [vmem:[#allocation25_spill] sm:$0xff] }
 0x48d   : > { %v4096_v6 = vpop.f32.mrf.mxu3 }
 0x48f   : > { %v4011_v29 = vpop.f32.mrf.mxu2 }
 0x490   : > { %v4012_v39 = vadd.f32 %v4011_v29, %v3911_v12  ;;  %v17463_v29 = vld [vmem:[#allocation27_spill] sm:$0xff] }
 0x492   : > { %v4097_v17 = vadd.f32 %v4096_v6, %v4012_v39 }
 0x495   : > { %v4100_v43 = vpop.f32.mrf.mxu3 }
 0x497   : > { %v4015_v30 = vpop.f32.mrf.mxu2 }
 0x498   : > { %v4016_v56 = vadd.f32 %v4015_v30, %v3917_v50  ;;  %v3899_v50 = vadd.f32 %v11853_v37, %v3788_v26  ;;  %v17458_v30 = vld [vmem:[#allocation20_spill] sm:$0xff]  ;;  %v11933_v26 = vand.u32 4294901760, %v11863_v27 }
 0x49a   : > { %v4101_v42 = vadd.f32 %v4100_v43, %v4016_v56  ;;  %v3934_v43 = vpop.f32.mrf.mxu1  ;;  %v17459_v56 = vld [vmem:[#allocation19_spill] sm:$0xff]  ;;  %v4004_v14 = vadd.f32 %v4003_v34, %v3899_v50 }
 0x49b   : > { %v3935_v25 = vadd.f32 %v3934_v43, %v3818_v40  ;;  %v11949_v43 = vand.u32 4294901760, %v11858_v54 }
 0x49c   : > { %v4127_v51 = vmul.f32 %v4101_v42, %v3284_v4  ;;  %v17460_v4 = vld [vmem:[#allocation16_spill] sm:$0xff]  ;;  %v4089_v34 = vadd.f32 %v11865_v59, %v4004_v14 }
 0x49d   : > { %v4104_v45 = vpop.f32.mrf.mxu3  ;;  %v3183_v42 = vadd.f32 %v17460_v4, %v17459_v56  ;;  %v17469_v56 = vlaneseq }
 0x49e   : > { %v11899_v7 = vand.u32 4294901760, %v4127_v51 }
 0x49f   : > { %v4019_v10 = vpop.f32.mrf.mxu2  ;;  %v3280_v52 = vadd.f32 %v17463_v29, %v3183_v42  ;;  %v11966_v4 = vshrl.u32 %v17469_v56, 7  ;;  %v11973_v42 = vld [vmem:[%s492_s26] ss:$0 sm:$0xff] }
 0x4a0   : > { %v4020_v38 = vadd.f32 %v4019_v10, %v3923_v28  ;;  %v17462_v28 = vld [vmem:[#allocation23_spill] sm:$0xff]  ;;  %v4093_v10 = vadd.f32 %v4092_v49, %v4008_v58  ;;  %v17468_v49 = vld [vmem:[#allocation21_spill] sm:$0xff]  ;;  %v11920_v19 = vsub.f32 %v4127_v51, %v11899_v7 }
 0x4a1   : > { %v4126_v33 = vmul.f32 %v4097_v17, %v3280_v52  ;;  %v11981_v17 = vsub.f32 %v11863_v27, %v11933_v26  ;;  %v11995_v27 = vsub.f32 %v11858_v54, %v11949_v43  ;;  %v11999_v52 = vand.u32 4294901760, %v11841_v16 }
 0x4a2   : > { %v4105_v41 = vadd.f32 %v4104_v45, %v4020_v38  ;;  %v17461_v45 = vld [vmem:[#allocation18_spill] sm:$0xff]  ;;  %v3175_v38 = vadd.f32 %v17465_v2, %v17464_v60  ;;  %vm4138_vm2 = vcmp.eq.s32.totalorder %v11966_v4, %v11973_v42  ;;  %v12015_v2 = vand.u32 4294901760, %v11836_v61 }
 0x4a3   : > { %v3179_v22 = vadd.f32 %v17462_v28, %v17461_v45  ;;  %v11985_v28 = vand.u32 4294901760, %v11846_v21  ;;  %v4263_v60 = vand.u32 4294901760, %v11981_v17 }
 0x4a4   : > { %v4128_v5 = vmul.f32 %v4105_v41, %v3288_v36  ;;  %v3272_v31 = vadd.f32 %v17467_v32, %v3175_v38 }
 0x4a5   : > { %v4108_v35 = vpop.f32.mrf.mxu3  ;;  %v3276_v36 = vadd.f32 %v17466_v46, %v3179_v22  ;;  %v12021_v38 = vsub.f32 %v11846_v21, %v11985_v28  ;;  %v12038_v21 = vadd.s32 8, %v11966_v4  ;;  %v4264_v32 = vsub.f32 %v11981_v17, %v4263_v60 }
 0x4a6   : > { %v11896_v6 = vand.u32 4294901760, %v4128_v5 }
 0x4a7   : > { %v4023_v47 = vpop.f32.mrf.mxu2  ;;  %v4125_v11 = vmul.f32 %v4093_v10, %v3276_v36  ;;  %v4269_v36 = vand.u32 4294901760, %v11995_v27  ;;  %vm4139_vm3 = vcmp.eq.s32.totalorder %v12038_v21, %v11973_v42 }
 0x4a8   : > { %v4024_v20 = vadd.f32 %v4023_v47, %v3929_v8  ;;  %v4124_v8 = vmul.f32 %v4089_v34, %v3272_v31  ;;  %v11910_v59 = vsub.f32 %v4128_v5, %v11896_v6  ;;  %v12046_v31 = vsub.f32 %v11841_v16, %v11999_v52 }
 0x4a9   : > { %v11912_v55 = vand.u32 4294901760, %v4125_v11  ;;  %v4270_v16 = vsub.f32 %v11995_v27, %v4269_v36 }
 0x4aa   : > { %v4109_v44 = vadd.f32 %v4108_v35, %v4024_v20  ;;  %v11905_v35 = vand.u32 4294901760, %v4126_v33  ;;  %v11923_v12 = vand.u32 4294901760, %v4124_v8  ;;  %v4233_v13 = vand.u32 4294901760, %v11910_v59 }
 0x4ab   : > { %v11945_v39 = vsub.f32 %v4125_v11, %v11912_v55 }
 0x4ac   : > { %v4129_v9 = vmul.f32 %v4109_v44, %v17458_v30  ;;  %v11929_v20 = vsub.f32 %v4126_v33, %v11905_v35  ;;  %v4239_v44 = vand.u32 4294901760, %v11920_v19  ;;  %v4234_v40 = vsub.f32 %v11910_v59, %v4233_v13 }
 0x4ad   : > { %v4112_v41 = vpop.f32.mrf.mxu3  ;;  %v11958_v58 = vsub.f32 %v4124_v8, %v11923_v12  ;;  %v4251_v45 = vand.u32 4294901760, %v11945_v39  ;;  %v12033_v33 = vand.u32 4294901760, %v11829_v1 }
 0x4ae   : > { %v11890_v23 = vand.u32 4294901760, %v4129_v9  ;;  %v4245_v30 = vand.u32 4294901760, %v11929_v20  ;;  %v4235_v22 = vand.u32 4294901760, %v4234_v40  ;;  %v4265_v40 = vand.u32 4294901760, %v4264_v32 }
 0x4af   : > { %v4027_v63 = vpop.f32.mrf.mxu2  ;;  %v4257_v29 = vand.u32 4294901760, %v11958_v58  ;;  %v4252_v54 = vsub.f32 %v11945_v39, %v4251_v45  ;;  %v12078_v56 = vsub.f32 %v11829_v1, %v12033_v33 }
 0x4b0   : > { %v4028_v37 = vadd.f32 %v4027_v63, %v3935_v25  ;;  %v11903_v0 = vsub.f32 %v4129_v9, %v11890_v23  ;;  %v11962_v9 = vand.u32 4294901760, %v11851_v53  ;;  %v4240_v25 = vsub.f32 %v11920_v19, %v4239_v44 }
 0x4b1   : > { %v4246_v63 = vsub.f32 %v11929_v20, %v4245_v30 }
 0x4b2   : > { %v4113_v48 = vadd.f32 %v4112_v41, %v4028_v37  ;;  %v4227_v62 = vand.u32 4294901760, %v11903_v0  ;;  %v4241_v10 = vand.u32 4294901760, %v4240_v25  ;;  %v12011_v37 = vsub.f32 %v11851_v53, %v11962_v9 }
 0x4b3   : > { %v4247_v46 = vand.u32 4294901760, %v4246_v63  ;;  %v4258_v53 = vsub.f32 %v11958_v58, %v4257_v29  ;;  %v17470_v41 = vmov 0.0   ;;  %v4271_v63 = vand.u32 4294901760, %v4270_v16 }
 0x4b4   : > { %v4130_v3 = vmul.f32 %v4113_v48, %v17468_v49  ;;  %v4228_v15 = vsub.f32 %v11903_v0, %v4227_v62  ;;  %v9263_v34 = vsel %vm4138_vm2, 1.0, %v17470_v41  ;;  %v4253_v48 = vand.u32 4294901760, %v4252_v54 }
 0x4b5   : > { %v4275_v11 = vand.u32 4294901760, %v12011_v37  ;;  %v12050_v49 = vand.u32 4294901760, %v11823_v24  ;;  %v4259_v8 = vand.u32 4294901760, %v4258_v53  ;;  %v9264_v54 = vsel %vm4139_vm3, 1.0, %v17470_v41 }
 0x4b6   : > { %v11907_v47 = vand.u32 4294901760, %v4130_v3  ;;  %v4229_v14 = vand.u32 4294901760, %v4228_v15  ;;  %v4281_v15 = vand.u32 4294901760, %v12021_v38 }
 0x4b7   : > { %v12085_v25 = vsub.f32 %v11823_v24, %v12050_v49  ;;  %v12100_v24 = vadd.s32 16, %v11966_v4 }
 0x4b8   : > { %v11915_v57 = vsub.f32 %v4130_v3, %v11907_v47  ;;  %4155 = vmatpush.msra.mxu0 %v11907_v47  ;;  %4402 = vmatpush.msrb.mxu3 %v11907_v47  ;;  %v12054_v3 = vsub.f32 %v9263_v34, %v9263_v34  ;;  %v4282_v1 = vsub.f32 %v12021_v38, %v4281_v15 }
 0x4b9   : > { %vm4140_vm4 = vcmp.eq.s32.totalorder %v12100_v24, %v11973_v42 }
 0x4ba   : > { %4157 = vmatpush.msra.mxu0 %v11890_v23  ;;  %4334 = vmatpush.msrb.mxu2 %v11915_v57  ;;  %v4221_v5 = vand.u32 4294901760, %v11915_v57  ;;  %v4283_v16 = vand.u32 4294901760, %v4282_v1 }
 0x4bb   : > { %4404 = vmatpush.msrb.mxu3 %v11890_v23 }
 0x4bc   : > { %4159 = vmatpush.msra.mxu0 %v11896_v6  ;;  %4337 = vmatpush.msrb.mxu2 %v11903_v0  ;;  %v4222_v51 = vsub.f32 %v11915_v57, %v4221_v5 }
 0x4bd   : > { %4406 = vmatpush.msrb.mxu3 %v11896_v6 }
 0x4be   : > { %4161 = vmatpush.msra.mxu0 %v11899_v7  ;;  %4340 = vmatpush.msrb.mxu2 %v11910_v59  ;;  %v4223_v50 = vand.u32 4294901760, %v4222_v51  ;;  %v12062_v51 = vsub.f32 %v11836_v61, %v12015_v2  ;;  %v4276_v61 = vsub.f32 %v12011_v37, %v4275_v11  ;;  %v9664_v59 = vmov 1.0  }
 0x4bf   : > { %4408 = vmatpush.msrb.mxu3 %v11899_v7 }
 0x4c0   : > { %4163 = vmatpush.msra.mxu0 %v11905_v35  ;;  %4224 = vmatpush.msra.mxu1 %v4223_v50  ;;  %v12066_v50 = vand.u32 4294901760, %v11817_v18 }
 0x4c1   : > { %4343 = vmatpush.msrb.mxu2 %v11920_v19  ;;  %4410 = vmatpush.msrb.mxu3 %v11905_v35 }
 0x4c2   : > { %4165 = vmatpush.msra.mxu0 %v11912_v55  ;;  %4230 = vmatpush.msra.mxu1 %v4229_v14  ;;  %v16924_v14 = vand.u32 4294901760, %v12046_v31  ;;  %v12108_v34 = vsub.f32 %v11817_v18, %v12066_v50  ;;  %v16922_v18 = vand.u32 4294901760, %v12085_v25 }
 0x4c3   : > { %4346 = vmatpush.msrb.mxu2 %v11929_v20  ;;  %4412 = vmatpush.msrb.mxu3 %v11912_v55 }
 0x4c4   : > { %4167 = vmatpush.msra.mxu0 %v11923_v12  ;;  %4236 = vmatpush.msra.mxu1 %v4235_v22  ;;  %v4188_v22 = vand.u32 4294901760, %v12054_v3  ;;  %v4288_v53 = vsub.f32 %v12046_v31, %v16924_v14  ;;  %v4311_v1 = vand.u32 4294901760, %v12108_v34 }
 0x4c5   : > { %4349 = vmatpush.msrb.mxu2 %v11945_v39  ;;  %4414 = vmatpush.msrb.mxu3 %v11923_v12 }
 0x4c6   : > { %4169 = vmatpush.msra.mxu0 %v11933_v26  ;;  %4242 = vmatpush.msra.mxu1 %v4241_v10  ;;  %v16921_v10 = vand.u32 4294901760, %v12062_v51  ;;  %v4189_v32 = vsub.f32 %v12054_v3, %v4188_v22 }
 0x4c7   : > { %4352 = vmatpush.msrb.mxu2 %v11958_v58  ;;  %4416 = vmatpush.msrb.mxu3 %v11933_v26 }
 0x4c8   : > { %4171 = vmatpush.msra.mxu0 %v11949_v43  ;;  %4248 = vmatpush.msra.mxu1 %v4247_v46  ;;  %v4277_v46 = vand.u32 4294901760, %v4276_v61  ;;  %v4289_v61 = vand.u32 4294901760, %v4288_v53  ;;  %v4306_v53 = vsub.f32 %v12085_v25, %v16922_v18 }
 0x4c9   : > { %4355 = vmatpush.msrb.mxu2 %v11981_v17  ;;  %4418 = vmatpush.msrb.mxu3 %v11949_v43 }
 0x4ca   : > { %4173 = vmatpush.msra.mxu0 %v11962_v9  ;;  %4254 = vmatpush.msra.mxu1 %v4253_v48  ;;  %v16923_v48 = vand.u32 4294901760, %v12078_v56  ;;  %v4307_v14 = vand.u32 4294901760, %v4306_v53 }
 0x4cb   : > { %4358 = vmatpush.msrb.mxu2 %v11995_v27  ;;  %4420 = vmatpush.msrb.mxu3 %v11962_v9 }
 0x4cc   : > { %4175 = vmatpush.msra.mxu0 %v11985_v28  ;;  %4260 = vmatpush.msra.mxu1 %v4259_v8  ;;  %v4195_v8 = vsub.f32 %v9264_v54, %v9264_v54  ;;  %v4190_v54 = vand.u32 4294901760, %v4189_v32  ;;  %v12141_v32 = vadd.s32 24, %v11966_v4 }
 0x4cd   : > { %4361 = vmatpush.msrb.mxu2 %v12011_v37  ;;  %4422 = vmatpush.msrb.mxu3 %v11985_v28 }
 0x4ce   : > { %4177 = vmatpush.msra.mxu0 %v11999_v52  ;;  %4266 = vmatpush.msra.mxu1 %v4265_v40  ;;  %v4294_v40 = vsub.f32 %v12062_v51, %v16921_v10  ;;  %vm4141_vm5 = vcmp.eq.s32.totalorder %v12141_v32, %v11973_v42  ;;  %v4150_v42 = vld [vmem:[#allocation3] sm:$0xff] }
 0x4cf   : > { %4364 = vmatpush.msrb.mxu2 %v12021_v38  ;;  %4424 = vmatpush.msrb.mxu3 %v11999_v52  ;;  %v9266_v0 = vsel %vm4141_vm5, 1.0, %v17470_v41 }
 0x4d0   : > { %4179 = vmatpush.msra.mxu0 %v12015_v2  ;;  %4272 = vmatpush.msra.mxu1 %v4271_v63  ;;  %v4300_v63 = vsub.f32 %v12078_v56, %v16923_v48  ;;  %v4295_v10 = vand.u32 4294901760, %v4294_v40 }
 0x4d1   : > { %4367 = vmatpush.msrb.mxu2 %v12046_v31  ;;  %4426 = vmatpush.msrb.mxu3 %v12015_v2 }
 0x4d2   : > { %4181 = vmatpush.msra.mxu0 %v12033_v33  ;;  %4278 = vmatpush.msra.mxu1 %v4277_v46  ;;  %v4196_v46 = vand.u32 4294901760, %v4195_v8  ;;  %v4301_v40 = vand.u32 4294901760, %v4300_v63 }
 0x4d3   : > { %4370 = vmatpush.msrb.mxu2 %v12062_v51  ;;  %4428 = vmatpush.msrb.mxu3 %v12033_v33 }
 0x4d4   : > { %4183 = vmatpush.msra.mxu0 %v12050_v49  ;;  %4284 = vmatpush.msra.mxu1 %v4283_v16  ;;  %v9265_v16 = vsel %vm4140_vm4, 1.0, %v17470_v41  ;;  %v4197_v18 = vsub.f32 %v4195_v8, %v4196_v46 }
 0x4d5   : > { %4373 = vmatpush.msrb.mxu2 %v12078_v56  ;;  %4430 = vmatpush.msrb.mxu3 %v12050_v49  ;;  %v4203_v48 = vsub.f32 %v9265_v16, %v9265_v16 }
 0x4d6   : > { %4185 = vmatpush.msra.mxu0 %v12066_v50  ;;  %4290 = vmatpush.msra.mxu1 %v4289_v61  ;;  %v4312_v61 = vsub.f32 %v12108_v34, %v4311_v1 }
 0x4d7   : > { %4376 = vmatpush.msrb.mxu2 %v12085_v25  ;;  %4432 = vmatpush.msrb.mxu3 %v12066_v50 }
 0x4d8   : > { %4461 = vmatpush.msrb.mxu0 %v4221_v5  ;;  %4296 = vmatpush.msra.mxu1 %v4295_v10  ;;  %v4313_v57 = vand.u32 4294901760, %v4312_v61  ;;  %v4198_v5 = vand.u32 4294901760, %v4197_v18  ;;  %v4204_v10 = vand.u32 4294901760, %v4203_v48  ;;  %v4152_v18 = vld [vmem:[#allocation3 + $0x8] sm:$0xff]  ;;  %v4153_v61 = vld [vmem:[#allocation3 + $0x10] sm:$0xff] }
 0x4d9   : > { %4379 = vmatpush.msrb.mxu2 %v12108_v34  ;;  %4191 = vmatmul.f32.vlgmr.msra.gmra.mxu0 %v4190_v54 }
 0x4da   : > { %4465 = vmatpush.msrb.mxu0 %v4227_v62  ;;  %4302 = vmatpush.msra.mxu1 %v4301_v40  ;;  %v4205_v19 = vsub.f32 %v4203_v48, %v4204_v10  ;;  %v4211_v62 = vsub.f32 %v9266_v0, %v9266_v0 }
 0x4db   : > { %4382 = vmatmul.f32.vlgmr.msrb.gmra.mxu2 %v12054_v3  ;;  %4436 = vmatmul.f32.vlgmr.msrb.gmra.mxu3 %v4188_v22 }
 0x4dc   : > { %4469 = vmatpush.msrb.mxu0 %v4233_v13  ;;  %4308 = vmatpush.msra.mxu1 %v4307_v14  ;;  %v4212_v20 = vand.u32 4294901760, %v4211_v62 }
 0x4de   : > { %4473 = vmatpush.msrb.mxu0 %v4239_v44  ;;  %4314 = vmatpush.msra.mxu1 %v4313_v57 }
 0x4df   : > { %9267 = vmatmul.msk.f32.vlgmr.msra.gmra.mxu1 %vm4138_vm2, %v9664_v59 }
 0x4e0   : > { %4540 = vmatpush.msrb.mxu1 %v11907_v47  ;;  %4477 = vmatpush.msrb.mxu0 %v4245_v30  ;;  %v4206_v47 = vand.u32 4294901760, %v4205_v19 }
 0x4e1   : > { %4199 = vmatmul.f32.gmra.mxu0 %v4198_v5 }
 0x4e2   : > { %4542 = vmatpush.msrb.mxu1 %v11890_v23  ;;  %4481 = vmatpush.msrb.mxu0 %v4251_v45  ;;  %v4213_v23 = vsub.f32 %v4211_v62, %v4212_v20 }
 0x4e3   : > { %4387 = vmatmul.f32.gmra.mxu2 %v4195_v8  ;;  %4442 = vmatmul.f32.gmra.mxu3 %v4196_v46 }
 0x4e4   : > { %4544 = vmatpush.msrb.mxu1 %v11896_v6  ;;  %4485 = vmatpush.msrb.mxu0 %v4257_v29  ;;  %v4214_v6 = vand.u32 4294901760, %v4213_v23 }
 0x4e6   : > { %4546 = vmatpush.msrb.mxu1 %v11899_v7  ;;  %4489 = vmatpush.msrb.mxu0 %v4263_v60  ;;  %v17471_v7 = vand.u32 4294901760, %v12046_v31 }
 0x4e7   : > { %9268 = vmatmul.msk.f32.gmra.mxu1 %vm4139_vm3, %v9664_v59 }
 0x4e8   : > { %4548 = vmatpush.msrb.mxu1 %v11905_v35  ;;  %4493 = vmatpush.msrb.mxu0 %v4269_v36  ;;  %v17472_v35 = vand.u32 4294901760, %v12062_v51  ;;  %v4151_v51 = vld [vmem:[#allocation3 + $0x18] sm:$0xff] }
 0x4e9   : > { %4207 = vmatmul.f32.gmra.mxu0 %v4206_v47 }
 0x4ea   : > { %4550 = vmatpush.msrb.mxu1 %v11912_v55  ;;  %4497 = vmatpush.msrb.mxu0 %v4275_v11  ;;  %v17473_v55 = vand.u32 4294901760, %v12078_v56 }
 0x4eb   : > { %4392 = vmatmul.f32.gmra.mxu2 %v4203_v48  ;;  %4448 = vmatmul.f32.gmra.mxu3 %v4204_v10 }
 0x4ec   : > { %4552 = vmatpush.msrb.mxu1 %v11923_v12  ;;  %4501 = vmatpush.msrb.mxu0 %v4281_v15  ;;  %v17474_v12 = vand.u32 4294901760, %v12085_v25 }
 0x4ee   : > { %4554 = vmatpush.msrb.mxu1 %v11933_v26  ;;  %4505 = vmatpush.msrb.mxu0 %v17471_v7 }
 0x4ef   : > { %9269 = vmatmul.msk.f32.gmra.mxu1 %vm4140_vm4, %v9664_v59 }
 0x4f0   : > { %4556 = vmatpush.msrb.mxu1 %v11949_v43  ;;  %4509 = vmatpush.msrb.mxu0 %v17472_v35 }
 0x4f1   : > { %4215 = vmatmul.f32.gmra.mxu0 %v4214_v6 }
 0x4f2   : > { %4558 = vmatpush.msrb.mxu1 %v11962_v9  ;;  %4513 = vmatpush.msrb.mxu0 %v17473_v55 }
 0x4f3   : > { %4397 = vmatmul.f32.gmra.mxu2 %v4211_v62  ;;  %4454 = vmatmul.f32.gmra.mxu3 %v4212_v20 }
 0x4f4   : > { %4560 = vmatpush.msrb.mxu1 %v11985_v28  ;;  %4517 = vmatpush.msrb.mxu0 %v17474_v12 }
 0x4f6   : > { %4562 = vmatpush.msrb.mxu1 %v11999_v52  ;;  %4521 = vmatpush.msrb.mxu0 %v4311_v1 }
 0x4f7   : > { %9270 = vmatmul.msk.f32.gmra.mxu1 %vm4141_vm5, %v9664_v59 }
 0x4f8   : > { %4564 = vmatpush.msrb.mxu1 %v12015_v2 }
 0x4f9   : > { %9271 = vmatmul.msk.f32.vlgmr.msrb.gmra.mxu0 %vm4138_vm2, %v9664_v59 }
 0x4fa   : > { %4566 = vmatpush.msrb.mxu1 %v12033_v33 }
 0x4fc   : > { %4568 = vmatpush.msrb.mxu1 %v12050_v49 }
 0x4fe   : > { %4570 = vmatpush.msrb.mxu1 %v12066_v50 }
 0x4ff   : > { %9275 = vmatmul.msk.f32.vlgmr.msrb.gmra.mxu1 %vm4138_vm2, %v9664_v59 }
 0x501   : > { %9272 = vmatmul.msk.f32.gmra.mxu0 %vm4139_vm3, %v9664_v59 }
 0x507   : > { %9276 = vmatmul.msk.f32.gmra.mxu1 %vm4139_vm3, %v9664_v59 }
 0x509   : > { %9273 = vmatmul.msk.f32.gmra.mxu0 %vm4140_vm4, %v9664_v59 }
 0x50f   : > { %9277 = vmatmul.msk.f32.gmra.mxu1 %vm4140_vm4, %v9664_v59 }
 0x511   : > { %9274 = vmatmul.msk.f32.gmra.mxu0 %vm4141_vm5, %v9664_v59 }
 0x517   : > { %9278 = vmatmul.msk.f32.gmra.mxu1 %vm4141_vm5, %v9664_v59 }
 0x556   : > { %v4192_v13 = vpop.f32.mrf.mxu0 }
 0x55c   : > { %v4317_v26 = vpop.f32.mrf.mxu1 }
 0x55d   : > { %v4318_v17 = vadd.f32 %v4317_v26, %v4192_v13 }
 0x55e   : > { %v4200_v39 = vpop.f32.mrf.mxu0  ;;  %v4383_v30 = vpop.f32.mrf.mxu2 }
 0x55f   : > { %v4437_v4 = vpop.f32.mrf.mxu3  ;;  %v4384_v28 = vadd.f32 %v4383_v30, %v4318_v17 }
 0x561   : > { %v4438_v37 = vadd.f32 %v4437_v4, %v4384_v28 }
 0x564   : > { %v4321_v44 = vpop.f32.mrf.mxu1 }
 0x565   : > { %v4322_v52 = vadd.f32 %v4321_v44, %v4200_v39 }
 0x566   : > { %v4208_v43 = vpop.f32.mrf.mxu0  ;;  %v4388_v29 = vpop.f32.mrf.mxu2 }
 0x567   : > { %v4443_v60 = vpop.f32.mrf.mxu3  ;;  %v4389_v41 = vadd.f32 %v4388_v29, %v4322_v52 }
 0x569   : > { %v4444_v49 = vadd.f32 %v4443_v60, %v4389_v41 }
 0x56c   : > { %v4325_v58 = vpop.f32.mrf.mxu1 }
 0x56d   : > { %v4326_v11 = vadd.f32 %v4325_v58, %v4208_v43 }
 0x56e   : > { %v4216_v9 = vpop.f32.mrf.mxu0  ;;  %v4393_v31 = vpop.f32.mrf.mxu2 }
 0x56f   : > { %v4449_v50 = vpop.f32.mrf.mxu3  ;;  %v4394_v14 = vadd.f32 %v4393_v31, %v4326_v11 }
 0x571   : > { %v4450_v34 = vadd.f32 %v4449_v50, %v4394_v14 }
 0x574   : > { %v4329_v45 = vpop.f32.mrf.mxu1 }
 0x575   : > { %v4330_v24 = vadd.f32 %v4329_v45, %v4216_v9 }
 0x576   : > { %v4524_v27 = vpop.f32.mrf.mxu0  ;;  %v4398_v48 = vpop.f32.mrf.mxu2 }
 0x577   : > { %v4525_v2 = vadd.f32 %v4524_v27, %v4438_v37  ;;  %v4399_v54 = vadd.f32 %v4398_v48, %v4330_v24  ;;  %v4455_v46 = vpop.f32.mrf.mxu3 }
 0x579   : > { %v4456_v32 = vadd.f32 %v4455_v46, %v4399_v54 }
 0x57c   : > { %v4573_v38 = vpop.f32.mrf.mxu1 }
 0x57d   : > { %v4574_v36 = vadd.f32 %v4573_v38, %v4525_v2 }
 0x57e   : > { %v4528_v33 = vpop.f32.mrf.mxu0 }
 0x57f   : > { %v4588_v21 = vadd.f32 %v4574_v36, %v4150_v42  ;;  %v4529_v3 = vadd.f32 %v4528_v33, %v4444_v49 }
 0x581   : > { %4592 = vst [vmem:[#allocation3] sm:$0xff] %v4588_v21 }
 0x584   : > { %v4577_v15 = vpop.f32.mrf.mxu1 }
 0x585   : > { %v4578_v56 = vadd.f32 %v4577_v15, %v4529_v3 }
 0x586   : > { %v4532_v25 = vpop.f32.mrf.mxu0 }
 0x587   : > { %v4589_v22 = vadd.f32 %v4578_v56, %v4151_v51  ;;  %v4533_v8 = vadd.f32 %v4532_v25, %v4450_v34 }
 0x589   : > { %4593 = vst [vmem:[#allocation3 + $0x18] sm:$0xff] %v4589_v22 }
 0x58c   : > { %v4581_v63 = vpop.f32.mrf.mxu1 }
 0x58d   : > { %v4582_v1 = vadd.f32 %v4581_v63, %v4533_v8 }
 0x58e   : > { %v4536_v16 = vpop.f32.mrf.mxu0 }
 0x58f   : > { %v4590_v53 = vadd.f32 %v4582_v1, %v4152_v18  ;;  %v4537_v40 = vadd.f32 %v4536_v16, %v4456_v32 }
 0x591   : > { %4594 = vst [vmem:[#allocation3 + $0x8] sm:$0xff] %v4590_v53 }
 0x594   : > { %v4585_v57 = vpop.f32.mrf.mxu1 }
 0x595   : > { %v4586_v5 = vadd.f32 %v4585_v57, %v4537_v40  ;;  %4599 = sbr.rel (%p9279_p1) target bundleno = 2148 (0x864), region = 88 }
 0x597   : > { %v4591_v10 = vadd.f32 %v4586_v5, %v4153_v61 }
 0x599   : > { %4595 = vst [vmem:[#allocation3 + $0x10] sm:$0xff] %v4591_v10 }
 0x59a   : > { %v5511_v0 = vld [vmem:[#allocation9 + $0x78] sm:$0xff]  ;;  %v5510_v59 = vld [vmem:[#allocation9 + $0x70] sm:$0xff]  ;;  %v5509_v19 = vld [vmem:[#allocation9 + $0x68] sm:$0xff] }
 0x59b   : > { %v12239_v62 = vand.u32 4294901760, %v5511_v0  ;;  %v12241_v47 = vand.u32 4294901760, %v5510_v59  ;;  %v12243_v20 = vand.u32 4294901760, %v5509_v19  ;;  %v5508_v23 = vld [vmem:[#allocation9 + $0x60] sm:$0xff]  ;;  %v5507_v6 = vld [vmem:[#allocation9 + $0x58] sm:$0xff]  ;;  %v5506_v7 = vld [vmem:[#allocation9 + $0x50] sm:$0xff] }
 0x59c   : > { %v12245_v35 = vand.u32 4294901760, %v5508_v23  ;;  %v12247_v55 = vand.u32 4294901760, %v5507_v6  ;;  %v12249_v12 = vand.u32 4294901760, %v5506_v7  ;;  %v5505_v13 = vld [vmem:[#allocation9 + $0x48] sm:$0xff]  ;;  %v5504_v26 = vld [vmem:[#allocation9 + $0x40] sm:$0xff]  ;;  %v5503_v39 = vld [vmem:[#allocation9 + $0x38] sm:$0xff] }
 0x59d   : > { %5609 = vmatpush.msra.mxu0 %v12239_v62  ;;  %v12253_v44 = vsub.f32 %v5511_v0, %v12239_v62  ;;  %v12256_v43 = vsub.f32 %v5510_v59, %v12241_v47  ;;  %5856 = vmatpush.msra.mxu3 %v12239_v62  ;;  %v12260_v58 = vsub.f32 %v5509_v19, %v12243_v20  ;;  %v12262_v30 = vand.u32 4294901760, %v5505_v13  ;;  %v5502_v9 = vld [vmem:[#allocation9 + $0x30] sm:$0xff]  ;;  %v5501_v60 = vld [vmem:[#allocation9 + $0x28] sm:$0xff]  ;;  %v5500_v3 = vld [vmem:[#allocation9 + $0x20] sm:$0xff] }
 0x59e   : > { %v12265_v4 = vsub.f32 %v5508_v23, %v12245_v35  ;;  %v12268_v17 = vsub.f32 %v5507_v6, %v12247_v55  ;;  %v12270_v45 = vand.u32 4294901760, %v5504_v26  ;;  %v12273_v28 = vsub.f32 %v5506_v7, %v12249_v12  ;;  %v5499_v18 = vld [vmem:[#allocation9 + $0x18] sm:$0xff]  ;;  %v12344_v46 = vld [vmem:[#allocation9 + $0x10] sm:$0xff]  ;;  %v12353_v40 = vld [vmem:[#allocation9 + $0x8] sm:$0xff] }
 0x59f   : > { %5611 = vmatpush.msra.mxu0 %v12241_v47  ;;  %5788 = vmatpush.msra.mxu2 %v12253_v44  ;;  %v16936_v27 = vand.u32 4294901760, %v12253_v44  ;;  %v16935_v29 = vand.u32 4294901760, %v12256_v43  ;;  %v16934_v52 = vand.u32 4294901760, %v12260_v58  ;;  %v12280_v37 = vand.u32 4294901760, %v5503_v39  ;;  %v12366_v10 = vld [vmem:[%s16863_s8] sm:$0xff] }
 0x5a0   : > { %5858 = vmatpush.msra.mxu3 %v12241_v47  ;;  %v16933_v2 = vand.u32 4294901760, %v12265_v4  ;;  %v16932_v42 = vand.u32 4294901760, %v12268_v17  ;;  %v12286_v38 = vsub.f32 %v5505_v13, %v12262_v30  ;;  %v12288_v36 = vand.u32 4294901760, %v5502_v9 }
 0x5a1   : > { %17475 = vst [vmem:[#allocation33_spill] sm:$0xff] %v12280_v37  ;;  %5613 = vmatpush.msra.mxu0 %v12243_v20  ;;  %5791 = vmatpush.msra.mxu2 %v12256_v43  ;;  %v5676_v41 = vsub.f32 %v12253_v44, %v16936_v27  ;;  %v5682_v33 = vsub.f32 %v12256_v43, %v16935_v29  ;;  %v16931_v31 = vand.u32 4294901760, %v12273_v28  ;;  %v12306_v49 = vand.u32 4294901760, %v5501_v60 }
 0x5a2   : > { %17476 = vst [vmem:[#allocation34_spill] sm:$0xff] %v12288_v36  ;;  %v5688_v21 = vsub.f32 %v12260_v58, %v16934_v52  ;;  %5860 = vmatpush.msra.mxu3 %v12243_v20  ;;  %v12304_v11 = vsub.f32 %v5504_v26, %v12270_v45  ;;  %v5694_v50 = vsub.f32 %v12265_v4, %v16933_v2  ;;  %v16930_v25 = vand.u32 4294901760, %v12286_v38 }
 0x5a3   : > { %17477 = vst [vmem:[#allocation35_spill] sm:$0xff] %v12306_v49  ;;  %5615 = vmatpush.msra.mxu0 %v12245_v35  ;;  %v5677_v51 = vand.u32 4294901760, %v5676_v41  ;;  %5794 = vmatpush.msra.mxu2 %v12260_v58  ;;  %v5683_v15 = vand.u32 4294901760, %v5682_v33  ;;  %v5700_v14 = vsub.f32 %v12268_v17, %v16932_v42  ;;  %v12319_v22 = vsub.f32 %v5503_v39, %v12280_v37  ;;  %v12390_v39 = vld [vmem:[#allocation9] sm:$0xff] }
 0x5a4   : > { %v5689_v56 = vand.u32 4294901760, %v5688_v21  ;;  %5862 = vmatpush.msra.mxu3 %v12245_v35  ;;  %v12325_v24 = vsub.f32 %v12273_v28, %v16931_v31  ;;  %v12327_v34 = vand.u32 4294901760, %v5500_v3  ;;  %v16929_v48 = vand.u32 4294901760, %v12304_v11  ;;  %v4703_v31 = vld [vmem:[%s16864_s9 + $0x8] sm:$0xff] }
 0x5a5   : > { %5617 = vmatpush.msra.mxu0 %v12247_v55  ;;  %5678 = vmatpush.msra.mxu1 %v5677_v51  ;;  %v12331_v8 = vsub.f32 %v5502_v9, %v12288_v36  ;;  %v12338_v63 = vsub.f32 %v12286_v38, %v16930_v25  ;;  %v16928_v1 = vand.u32 4294901760, %v12319_v22  ;;  %v12342_v54 = vsub.f32 %v5501_v60, %v12306_v49  ;;  %v12392_v9 = vld [vmem:[#allocation3] sm:$0xff] }
 0x5a6   : > { %17478 = vst [vmem:[#allocation36_spill] sm:$0xff] %v12327_v34  ;;  %5797 = vmatpush.msra.mxu2 %v12265_v4  ;;  %5864 = vmatpush.msra.mxu3 %v12247_v55  ;;  %v5695_v53 = vand.u32 4294901760, %v5694_v50  ;;  %v12350_v16 = vsub.f32 %v12304_v11, %v16929_v48  ;;  %v12357_v61 = vand.u32 4294901760, %v5499_v18  ;;  %v12360_v57 = vsub.f32 %v5500_v3, %v12327_v34 }
 0x5a7   : > { %5619 = vmatpush.msra.mxu0 %v12249_v12  ;;  %5684 = vmatpush.msra.mxu1 %v5683_v15  ;;  %v16927_v32 = vand.u32 4294901760, %v12331_v8  ;;  %v16926_v5 = vand.u32 4294901760, %v12342_v54  ;;  %v5701_v0 = vand.u32 4294901760, %v5700_v14  ;;  %v5707_v59 = vand.u32 4294901760, %v12325_v24  ;;  %17482 = vst [vmem:[#allocation40_spill] sm:$0xff] %v12392_v9  ;;  %v12428_v14 = vld [vmem:[%s16864_s9] sm:$0xff] }
 0x5a8   : > { %5800 = vmatpush.msra.mxu2 %v12268_v17  ;;  %5866 = vmatpush.msra.mxu3 %v12249_v12  ;;  %17479 = vst [vmem:[#allocation37_spill] sm:$0xff] %v12357_v61  ;;  %v5713_v19 = vand.u32 4294901760, %v12338_v63  ;;  %v12372_v23 = vand.u32 4294901760, %v12344_v46  ;;  %v5719_v6 = vand.u32 4294901760, %v12350_v16  ;;  %v12380_v7 = vsub.f32 %v12319_v22, %v16928_v1 }
 0x5a9   : > { %5621 = vmatpush.msra.mxu0 %v12262_v30  ;;  %5690 = vmatpush.msra.mxu1 %v5689_v56  ;;  %v12385_v13 = vsub.f32 %v12331_v8, %v16927_v32  ;;  %v12388_v26 = vand.u32 4294901760, %v12353_v40  ;;  %v12398_v60 = vsub.f32 %v12342_v54, %v16926_v5  ;;  %v12401_v41 = vperm.slane %v12366_v10, 0  ;;  %17484 = vst [vmem:[#allocation42_spill] sm:$0xff] %v12428_v14 }
 0x5aa   : > { %17480 = vst [vmem:[#allocation38_spill] sm:$0xff] %v12372_v23  ;;  %5803 = vmatpush.msra.mxu2 %v12273_v28  ;;  %5868 = vmatpush.msra.mxu3 %v12262_v30  ;;  %v12404_v33 = vperm.slane %v12366_v10, 1  ;;  %v12407_v21 = vperm.slane %v12366_v10, 2  ;;  %v12412_v3 = vsub.f32 %v5499_v18, %v12357_v61  ;;  %v16925_v51 = vand.u32 4294901760, %v12360_v57 }
 0x5ab   : > { %17481 = vst [vmem:[#allocation39_spill] sm:$0xff] %v12388_v26  ;;  %5623 = vmatpush.msra.mxu0 %v12270_v45  ;;  %5696 = vmatpush.msra.mxu1 %v5695_v53  ;;  %v12416_v15 = vperm.slane %v12366_v10, 3  ;;  %v12419_v50 = vperm.slane %v12366_v10, 4  ;;  %v12423_v56 = vand.u32 4294901760, %v12390_v39  ;;  %vm4707_vm6 = vcmp.ge.f32.partialorder %v12392_v9, %v12401_v41 }
 0x5ac   : > { %5806 = vmatpush.msra.mxu2 %v12286_v38  ;;  %5870 = vmatpush.msra.mxu3 %v12270_v45  ;;  %vm4712_vm7 = vcmp.lt.f32.partialorder %v12392_v9, %v12404_v33  ;;  %vm4728_vm8 = vcmp.ge.f32.partialorder %v12392_v9, %v12404_v33  ;;  %v5725_v24 = vand.u32 4294901760, %v12380_v7  ;;  %vm4733_vm10 = vcmp.lt.f32.partialorder %v12392_v9, %v12407_v21 }
 0x5ad   : > { %5625 = vmatpush.msra.mxu0 %v12280_v37  ;;  %5702 = vmatpush.msra.mxu1 %v5701_v0  ;;  %17483 = vst [vmem:[#allocation41_spill] sm:$0xff] %v12423_v56  ;;  %vm4716_vm9 = vmand %vm4707_vm6, %vm4712_vm7  ;;  %vm4749_vm11 = vcmp.ge.f32.partialorder %v12392_v9, %v12407_v21  ;;  %vm4754_vm12 = vcmp.lt.f32.partialorder %v12392_v9, %v12416_v15  ;;  %v5731_v18 = vand.u32 4294901760, %v12385_v13  ;;  %v5737_v63 = vand.u32 4294901760, %v12398_v60 }
 0x5ae   : > { %5809 = vmatpush.msra.mxu2 %v12304_v11  ;;  %5872 = vmatpush.msra.mxu3 %v12280_v37  ;;  %vm4737_vm13 = vmand %vm4728_vm8, %vm4733_vm10  ;;  %vm4770_vm14 = vcmp.ge.f32.partialorder %v12392_v9, %v12416_v15  ;;  %vm4775_vm15 = vcmp.lt.f32.partialorder %v12392_v9, %v12419_v50  ;;  %v12457_v53 = vsub.f32 %v12360_v57, %v16925_v51  ;;  %v16937_v16 = vmov 0.0  }
 0x5af   : > { %5627 = vmatpush.msra.mxu0 %v12288_v36  ;;  %5708 = vmatpush.msra.mxu1 %v5707_v59  ;;  %v9284_v0 = vsel %vm4716_vm9, 1.0, %v16937_v16  ;;  %vm4758_vm0 = vmand %vm4749_vm11, %vm4754_vm12  ;;  %v12462_v59 = vsub.f32 %v12392_v9, %v12401_v41  ;;  %v12465_v7 = vperm.slane %v12428_v14, 0  ;;  %v9288_v13 = vsel %vm4737_vm13, 1.0, %v16937_v16 }
 0x5b0   : > { %5812 = vmatpush.msra.mxu2 %v12319_v22  ;;  %5874 = vmatpush.msra.mxu3 %v12288_v36  ;;  %v4930_v60 = vsub.f32 %v12407_v21, %v12392_v9  ;;  %v12472_v51 = vperm.slane %v12428_v14, 1  ;;  %v12476_v5 = vsub.f32 %v12392_v9, %v12404_v33  ;;  %v9292_v32 = vsel %vm4758_vm0, 1.0, %v16937_v16  ;;  %vm12487_vm1 = vmand %vm4770_vm14, %vm4775_vm15 }
 0x5b1   : > { %5629 = vmatpush.msra.mxu0 %v12306_v49  ;;  %5714 = vmatpush.msra.mxu1 %v5713_v19  ;;  %v4922_v1 = vmul.f32 %v12465_v7, %v12462_v59  ;;  %v4959_v48 = vsub.f32 %v12416_v15, %v12392_v9  ;;  %v12496_v25 = vperm.slane %v12428_v14, 2  ;;  %v12507_v52 = vsub.f32 %v12392_v9, %v12407_v21 }
 0x5b2   : > { %17485 = vst [vmem:[#allocation43_spill] sm:$0xff] %v12476_v5  ;;  %5815 = vmatpush.msra.mxu2 %v12331_v8  ;;  %5876 = vmatpush.msra.mxu3 %v12306_v49  ;;  %v4935_v42 = vmul.f32 %v12472_v51, %v4930_v60  ;;  %v4951_v2 = vmul.f32 %v12476_v5, %v12472_v51  ;;  %v12510_v29 = vperm.slane %v12428_v14, 3  ;;  %v17489_v49 = vmov 0.0  }
 0x5b3   : > { %5631 = vmatpush.msra.mxu0 %v12327_v34  ;;  %5720 = vmatpush.msra.mxu1 %v5719_v6  ;;  %17488 = vst [vmem:[#allocation44_spill] sm:$0xff] %v12507_v52  ;;  %v5743_v6 = vand.u32 4294901760, %v12457_v53  ;;  %v4926_v27 = vmul.f32 %v9284_v0, %v4922_v1  ;;  %v4964_v16 = vmul.f32 %v12496_v25, %v4959_v48  ;;  %v12522_v14 = vsel %vm12487_vm1, 1.0, %v17489_v49 }
 0x5b4   : > { %5818 = vmatpush.msra.mxu2 %v12342_v54  ;;  %5878 = vmatpush.msra.mxu3 %v12327_v34  ;;  %v4988_v60 = vsub.f32 %v12419_v50, %v12392_v9  ;;  %17490 = vst [vmem:[#allocation45_spill] sm:$0xff] %v12522_v14  ;;  %v4939_v36 = vmul.f32 %v9288_v13, %v4935_v42  ;;  %v12533_v0 = vperm.slane %v4703_v31, 3  ;;  %v12538_v19 = vperm.slane %v4703_v31, 5 }
 0x5b5   : > { %5633 = vmatpush.msra.mxu0 %v12357_v61  ;;  %5726 = vmatpush.msra.mxu1 %v5725_v24  ;;  %v4955_v37 = vmul.f32 %v9288_v13, %v4951_v2  ;;  %v4980_v34 = vmul.f32 %v12507_v52, %v12496_v25  ;;  %v4968_v1 = vmul.f32 %v9292_v32, %v4964_v16  ;;  %v12536_v13 = vperm.slane %v4703_v31, 4 }
 0x5b6   : > { %5821 = vmatpush.msra.mxu2 %v12360_v57  ;;  %5880 = vmatpush.msra.mxu3 %v12357_v61  ;;  %v4993_v53 = vmul.f32 %v12510_v29, %v4988_v60  ;;  %v12531_v24 = vsub.f32 %v12392_v9, %v12416_v15  ;;  %v4943_v2 = vadd.f32 %v4939_v36, %v4926_v27  ;;  %v4704_v27 = vld [vmem:[%s16864_s9 + $0x10] sm:$0xff] }
 0x5b7   : > { %5635 = vmatpush.msra.mxu0 %v12372_v23  ;;  %5732 = vmatpush.msra.mxu1 %v5731_v18  ;;  %v4984_v42 = vmul.f32 %v9292_v32, %v4980_v34  ;;  %v12543_v16 = vsub.f32 %v12344_v46, %v12372_v23  ;;  %v4972_v52 = vadd.f32 %v4968_v1, %v4955_v37  ;;  %v12562_v18 = vperm.slane %v12366_v10, 5  ;;  %v5527_v10 = vld [vmem:[#allocation9 + $0xf8] sm:$0xff] }
 0x5b8   : > { %17491 = vst [vmem:[#allocation46_spill] sm:$0xff] %v12531_v24  ;;  %5824 = vmatpush.msra.mxu2 %v12412_v3  ;;  %v4997_v9 = vmul.f32 %v12522_v14, %v4993_v53  ;;  %v5180_v61 = vmul.f32 %v12533_v0, %v12462_v59  ;;  %v5189_v36 = vmul.f32 %v12536_v13, %v4959_v48 }
 0x5b9   : > { %5637 = vmatpush.msra.mxu0 %v12388_v26  ;;  %5738 = vmatpush.msra.mxu1 %v5737_v63  ;;  %v5201_v34 = vmul.f32 %v12536_v13, %v12476_v5  ;;  %v5210_v46 = vmul.f32 %v12538_v19, %v4988_v60  ;;  %17493 = vst [vmem:[#allocation48_spill] sm:$0xff] %v12562_v18  ;;  %v12569_v5 = vperm.slane %v4703_v31, 6  ;;  %v16950_v31 = vand.u32 4294901760, %v12543_v16 }
 0x5ba   : > { %5827 = vmatpush.msra.mxu2 %v12543_v16  ;;  %v12557_v37 = vadd.f32 %v4997_v9, %v4984_v42  ;;  %v5184_v32 = vmul.f32 %v5180_v61, %v4943_v2  ;;  %5882 = vmatpush.msra.mxu3 %v12372_v23  ;;  %v12566_v48 = vmul.f32 %v12531_v24, %v12510_v29  ;;  %v12571_v9 = vperm.slane %v4704_v27, 6 }
 0x5bb   : > { %5639 = vmatpush.msra.mxu0 %v12423_v56  ;;  %5744 = vmatpush.msra.mxu1 %v5743_v6  ;;  %v5193_v63 = vmul.f32 %v5189_v36, %v4972_v52  ;;  %v5205_v1 = vmul.f32 %v5201_v34, %v4972_v52  ;;  %17495 = vst [vmem:[#allocation50_spill] sm:$0xff] %v12569_v5  ;;  %v12573_v61 = vperm.slane %v4704_v27, 7  ;;  %v17496_v2 = vand.u32 4294901760, %v12253_v44  ;;  %v12584_v36 = vld [vmem:[#allocation9 + $0xf0] sm:$0xff] }
 0x5bc   : > { %17492 = vst [vmem:[#allocation47_spill] sm:$0xff] %v12557_v37  ;;  %v5214_v53 = vmul.f32 %v5210_v46, %v12557_v37  ;;  %5884 = vmatpush.msra.mxu3 %v12388_v26  ;;  %v16951_v42 = vand.u32 4294901760, %v12412_v3  ;;  %v12581_v52 = vsub.f32 %v12353_v40, %v12388_v26  ;;  %v5349_v44 = vmul.f32 %v12571_v9, %v12462_v59 }
 0x5bd   : > { %17494 = vst [vmem:[#allocation49_spill] sm:$0xff] %v12566_v48  ;;  %5915 = vmatpush.msrb.mxu0 %v17496_v2  ;;  %v5197_v6 = vadd.f32 %v5193_v63, %v5184_v32  ;;  %v5358_v27 = vmul.f32 %v12573_v61, %v4988_v60  ;;  %v12593_v46 = vsub.f32 %v12390_v39, %v12423_v56  ;;  %v17498_v32 = vand.u32 4294901760, %v12256_v43  ;;  %v12608_v39 = vld [vmem:[#allocation3 + $0x18] sm:$0xff]  ;;  %v12610_v43 = vld [vmem:[#allocation9 + $0xe8] sm:$0xff] }
 0x5be   : > { %v12586_v34 = vadd.f32 %v5214_v53, %v5205_v1  ;;  %v5748_v40 = vsub.f32 %v12412_v3, %v16951_v42  ;;  %5830 = vmatpush.msra.mxu2 %v12581_v52  ;;  %v5754_v63 = vsub.f32 %v12543_v16, %v16950_v31  ;;  %v12604_v59 = vand.u32 4294901760, %v5527_v10  ;;  %5886 = vmatpush.msra.mxu3 %v12423_v56 }
 0x5bf   : > { %5919 = vmatpush.msrb.mxu0 %v17498_v32  ;;  %v16957_v60 = vand.u32 4294901760, %v12581_v52  ;;  %v5353_v1 = vmul.f32 %v5349_v44, %v5197_v6  ;;  %v17500_v2 = vand.u32 4294901760, %v12260_v58  ;;  %v12616_v32 = vand.u32 4294901760, %v12584_v36 }
 0x5c0   : > { %17497 = vst [vmem:[#allocation51_spill] sm:$0xff] %v12586_v34  ;;  %v5362_v53 = vmul.f32 %v5358_v27, %v12586_v34  ;;  %v16956_v31 = vand.u32 4294901760, %v12593_v46  ;;  %v5749_v42 = vand.u32 4294901760, %v5748_v40  ;;  %v5755_v24 = vand.u32 4294901760, %v5754_v63  ;;  %5833 = vmatpush.msra.mxu2 %v12593_v46 }
 0x5c1   : > { %17499 = vst [vmem:[#allocation52_spill] sm:$0xff] %v12604_v59  ;;  %5923 = vmatpush.msrb.mxu0 %v17500_v2  ;;  %v5760_v37 = vsub.f32 %v12581_v52, %v16957_v60  ;;  %v12624_v6 = vsub.f32 %v5527_v10, %v12604_v59  ;;  %v17501_v27 = vand.u32 4294901760, %v12265_v4  ;;  %vm4708_vm2 = vcmp.ge.f32.partialorder %v12608_v39, %v12401_v41 }
 0x5c2   : > { %v5366_v44 = vadd.f32 %v5362_v53, %v5353_v1  ;;  %6043 = vmatpush.msrb.mxu2 %v12604_v59  ;;  %v5766_v58 = vsub.f32 %v12593_v46, %v16956_v31  ;;  %v12635_v40 = vand.u32 4294901760, %v12610_v43  ;;  %5750 = vmatpush.msra.mxu1 %v5749_v42  ;;  %vm4713_vm3 = vcmp.lt.f32.partialorder %v12608_v39, %v12404_v33 }
 0x5c3   : > { %5927 = vmatpush.msrb.mxu0 %v17501_v27  ;;  %v5761_v63 = vand.u32 4294901760, %v5760_v37  ;;  %v16955_v10 = vand.u32 4294901760, %v12624_v6  ;;  %vm4729_vm4 = vcmp.ge.f32.partialorder %v12608_v39, %v12404_v33  ;;  %vm4717_vm5 = vmand %vm4708_vm2, %vm4713_vm3  ;;  %vm4734_vm6 = vcmp.lt.f32.partialorder %v12608_v39, %v12407_v21 }
 0x5c4   : > { %v12642_v1 = vand.u32 4294901760, %v5366_v44  ;;  %6045 = vmatpush.msrb.mxu2 %v12616_v32  ;;  %v5767_v4 = vand.u32 4294901760, %v5766_v58  ;;  %vm4750_vm7 = vcmp.ge.f32.partialorder %v12608_v39, %v12407_v21  ;;  %v17503_v37 = vand.u32 4294901760, %v12268_v17  ;;  %5756 = vmatpush.msra.mxu1 %v5755_v24  ;;  %vm4738_vm8 = vmand %vm4729_vm4, %vm4734_vm6  ;;  %v5524_v24 = vld [vmem:[#allocation9 + $0xe0] sm:$0xff] }
 0x5c5   : > { %v6110_v42 = vsub.f32 %v12624_v6, %v16955_v10  ;;  %v9285_v53 = vsel %vm4717_vm5, 1.0, %v17489_v49  ;;  %vm4755_vm9 = vcmp.lt.f32.partialorder %v12608_v39, %v12416_v15  ;;  %vm4771_vm10 = vcmp.ge.f32.partialorder %v12608_v39, %v12416_v15 }
 0x5c6   : > { %17502 = vst [vmem:[#allocation53_spill] sm:$0xff] %v12642_v1  ;;  %5931 = vmatpush.msrb.mxu0 %v17503_v37  ;;  %v5641_v2 = vsub.f32 %v5366_v44, %v12642_v1  ;;  %v9289_v58 = vsel %vm4738_vm8, 1.0, %v17489_v49  ;;  %vm4759_vm11 = vmand %vm4750_vm7, %vm4755_vm9  ;;  %vm4776_vm12 = vcmp.lt.f32.partialorder %v12608_v39, %v12419_v50  ;;  %v4918_v17 = vsub.f32 %v12608_v39, %v12401_v41 }
 0x5c7   : > { %6047 = vmatpush.msrb.mxu2 %v12635_v40  ;;  %v17504_v27 = vand.u32 4294901760, %v12273_v28  ;;  %5762 = vmatpush.msra.mxu1 %v5761_v63  ;;  %v6111_v37 = vand.u32 4294901760, %v6110_v42  ;;  %v9293_v10 = vsel %vm4759_vm11, 1.0, %v17489_v49  ;;  %vm4780_vm13 = vmand %vm4771_vm10, %vm4776_vm12  ;;  %v4931_v44 = vsub.f32 %v12407_v21, %v12608_v39 }
 0x5c8   : > { %v12673_v31 = vsub.f32 %v12608_v39, %v12404_v33  ;;  %v5642_v60 = vand.u32 4294901760, %v5641_v2  ;;  %5836 = vmatmul.f32.vlgmr.msra.gmra.mxu2 %v5641_v2  ;;  %v12676_v34 = vsel %vm4780_vm13, 1.0, %v17489_v49  ;;  %v4923_v28 = vmul.f32 %v12465_v7, %v4918_v17 }
 0x5c9   : > { %5935 = vmatpush.msrb.mxu0 %v17504_v27  ;;  %v4960_v63 = vsub.f32 %v12416_v15, %v12608_v39  ;;  %v17505_v42 = vand.u32 4294901760, %v12286_v38  ;;  %6112 = vmatpush.msrb.mxu3 %v6111_v37  ;;  %v4936_v27 = vmul.f32 %v12472_v51, %v4931_v44  ;;  %v12688_v14 = vsub.f32 %v12608_v39, %v12407_v21 }
 0x5ca   : > { %5768 = vmatpush.msra.mxu1 %v5767_v4  ;;  %v4952_v5 = vmul.f32 %v12673_v31, %v12472_v51  ;;  %v12690_v48 = vand.u32 4294901760, %v5524_v24  ;;  %v5643_v18 = vsub.f32 %v5641_v2, %v5642_v60  ;;  %5890 = vmatmul.f32.vlgmr.msra.gmra.mxu3 %v5642_v60  ;;  %v4927_v59 = vmul.f32 %v9285_v53, %v4923_v28  ;;  %v5523_v53 = vld [vmem:[#allocation9 + $0xd8] sm:$0xff] }
 0x5cb   : > { %5939 = vmatpush.msrb.mxu0 %v17505_v42  ;;  %17506 = vst [vmem:[#allocation54_spill] sm:$0xff] %v12688_v14  ;;  %v4965_v56 = vmul.f32 %v12496_v25, %v4960_v63  ;;  %v4989_v38 = vsub.f32 %v12419_v50, %v12608_v39  ;;  %v4940_v4 = vmul.f32 %v9289_v58, %v4936_v27 }
 0x5cc   : > { %v4956_v37 = vmul.f32 %v9289_v58, %v4952_v5  ;;  %v4981_v44 = vmul.f32 %v12688_v14, %v12496_v25  ;;  %v5181_v42 = vmul.f32 %v12533_v0, %v4918_v17  ;;  %5770 = vmatmul.f32.vlgmr.msra.gmra.mxu1 %v12642_v1  ;;  %v5644_v26 = vand.u32 4294901760, %v5643_v18  ;;  %6049 = vmatpush.msrb.mxu2 %v12690_v48  ;;  %v12711_v14 = vld [vmem:[#allocation9 + $0xd0] sm:$0xff] }
 0x5cd   : > { %v4969_v23 = vmul.f32 %v9293_v10, %v4965_v56  ;;  %v4994_v2 = vmul.f32 %v12510_v29, %v4989_v38  ;;  %v5190_v60 = vmul.f32 %v12536_v13, %v4960_v63  ;;  %5994 = vmatpush.msrb.mxu1 %v12239_v62  ;;  %v4944_v28 = vadd.f32 %v4940_v4, %v4927_v59 }
 0x5ce   : > { %v4985_v5 = vmul.f32 %v9293_v10, %v4981_v44  ;;  %v5202_v58 = vmul.f32 %v12536_v13, %v12673_v31  ;;  %v5211_v27 = vmul.f32 %v12538_v19, %v4989_v38  ;;  %v17507_v1 = vand.u32 4294901760, %v12304_v11  ;;  %5645 = vmatmul.f32.vlgmr.msra.gmra.mxu0 %v5644_v26  ;;  %v12724_v26 = vld [vmem:[#allocation3 + $0x8] sm:$0xff] }
 0x5cf   : > { %v4973_v56 = vadd.f32 %v4969_v23, %v4956_v37  ;;  %v4998_v18 = vmul.f32 %v12676_v34, %v4994_v2  ;;  %v5350_v63 = vmul.f32 %v12571_v9, %v4918_v17  ;;  %v5359_v62 = vmul.f32 %v12573_v61, %v4989_v38  ;;  %5996 = vmatpush.msrb.mxu1 %v12241_v47 }
 0x5d0   : > { %5943 = vmatpush.msrb.mxu0 %v17507_v1  ;;  %v5185_v59 = vmul.f32 %v5181_v42, %v4944_v28  ;;  %v12715_v10 = vsub.f32 %v12584_v36, %v12616_v32  ;;  %v12720_v11 = vsub.f32 %v12610_v43, %v12635_v40  ;;  %v12722_v23 = vand.u32 4294901760, %v5523_v53 }
 0x5d1   : > { %v17509_v1 = vand.u32 4294901760, %v12319_v22  ;;  %v12728_v17 = vadd.f32 %v4998_v18, %v4985_v5  ;;  %v5194_v38 = vmul.f32 %v5190_v60, %v4973_v56  ;;  %v5206_v4 = vmul.f32 %v5202_v58, %v4973_v56  ;;  %5998 = vmatpush.msrb.mxu1 %v12243_v20 }
 0x5d2   : > { %17508 = vst [vmem:[#allocation55_spill] sm:$0xff] %v12722_v23  ;;  %v12731_v36 = vsub.f32 %v5524_v24, %v12690_v48  ;;  %v16974_v47 = vand.u32 4294901760, %v12715_v10  ;;  %v16973_v37 = vand.u32 4294901760, %v12720_v11  ;;  %6051 = vmatpush.msrb.mxu2 %v12722_v23  ;;  %v12738_v43 = vand.u32 4294901760, %v12711_v14 }
 0x5d3   : > { %5947 = vmatpush.msrb.mxu0 %v17509_v1  ;;  %v12741_v22 = vsub.f32 %v5523_v53, %v12722_v23  ;;  %v5198_v44 = vadd.f32 %v5194_v38, %v5185_v59  ;;  %v5215_v42 = vmul.f32 %v5211_v27, %v12728_v17  ;;  %vm4709_vm14 = vcmp.ge.f32.partialorder %v12724_v26, %v12401_v41 }
 0x5d4   : > { %v16972_v24 = vand.u32 4294901760, %v12731_v36  ;;  %v17510_v2 = vand.u32 4294901760, %v12331_v8  ;;  %v6116_v20 = vsub.f32 %v12715_v10, %v16974_v47  ;;  %v6122_v60 = vsub.f32 %v12720_v11, %v16973_v37  ;;  %6000 = vmatpush.msrb.mxu1 %v12245_v35  ;;  %6053 = vmatpush.msrb.mxu2 %v12738_v43 }
 0x5d5   : > { %v16971_v53 = vand.u32 4294901760, %v12741_v22  ;;  %vm4714_vm15 = vcmp.lt.f32.partialorder %v12724_v26, %v12404_v33  ;;  %v12760_v28 = vadd.f32 %v5215_v42, %v5206_v4  ;;  %v5354_v8 = vmul.f32 %v5350_v63, %v5198_v44 }
 0x5d6   : > { %5951 = vmatpush.msrb.mxu0 %v17510_v2  ;;  %v6128_v5 = vsub.f32 %v12731_v36, %v16972_v24  ;;  %vm4718_vm0 = vmand %vm4709_vm14, %vm4714_vm15  ;;  %vm4730_vm1 = vcmp.ge.f32.partialorder %v12724_v26, %v12404_v33  ;;  %v17511_v35 = vand.u32 4294901760, %v12342_v54  ;;  %v6117_v58 = vand.u32 4294901760, %v6116_v20  ;;  %6002 = vmatpush.msrb.mxu1 %v12247_v55 }
 0x5d7   : > { %v6123_v27 = vand.u32 4294901760, %v6122_v60  ;;  %v6134_v56 = vsub.f32 %v12741_v22, %v16971_v53  ;;  %v9286_v18 = vsel %vm4718_vm0, 1.0, %v17489_v49  ;;  %v5363_v63 = vmul.f32 %v5359_v62, %v12760_v28  ;;  %v5521_v53 = vld [vmem:[#allocation9 + $0xc8] sm:$0xff] }
 0x5d8   : > { %5955 = vmatpush.msrb.mxu0 %v17511_v35  ;;  %v6129_v59 = vand.u32 4294901760, %v6128_v5  ;;  %vm4735_vm2 = vcmp.lt.f32.partialorder %v12724_v26, %v12407_v21  ;;  %vm4751_vm3 = vcmp.ge.f32.partialorder %v12724_v26, %v12407_v21  ;;  %v17512_v54 = vand.u32 4294901760, %v12360_v57  ;;  %6118 = vmatpush.msrb.mxu3 %v6117_v58 }
 0x5d9   : > { %v6135_v1 = vand.u32 4294901760, %v6134_v56  ;;  %vm4739_vm4 = vmand %vm4730_vm1, %vm4735_vm2  ;;  %vm4756_vm5 = vcmp.lt.f32.partialorder %v12724_v26, %v12416_v15  ;;  %vm4772_vm6 = vcmp.ge.f32.partialorder %v12724_v26, %v12416_v15  ;;  %vm4777_vm7 = vcmp.lt.f32.partialorder %v12724_v26, %v12419_v50  ;;  %6004 = vmatpush.msrb.mxu1 %v12249_v12 }
 0x5da   : > { %5959 = vmatpush.msrb.mxu0 %v17512_v54  ;;  %v5367_v55 = vadd.f32 %v5363_v63, %v5354_v8  ;;  %v9290_v62 = vsel %vm4739_vm4, 1.0, %v17489_v49  ;;  %vm4760_vm8 = vmand %vm4751_vm3, %vm4756_vm5  ;;  %v4919_v57 = vsub.f32 %v12724_v26, %v12401_v41  ;;  %v4932_v38 = vsub.f32 %v12407_v21, %v12724_v26  ;;  %6124 = vmatpush.msrb.mxu3 %v6123_v27 }
 0x5db   : > { %v17513_v4 = vand.u32 4294901760, %v12412_v3  ;;  %v9294_v44 = vsel %vm4760_vm8, 1.0, %v17489_v49  ;;  %vm4781_vm9 = vmand %vm4772_vm6, %vm4777_vm7  ;;  %v12798_v12 = vsub.f32 %v12724_v26, %v12404_v33  ;;  %v4961_v42 = vsub.f32 %v12416_v15, %v12724_v26  ;;  %6006 = vmatpush.msrb.mxu1 %v12262_v30 }
 0x5dc   : > { %v12804_v2 = vsub.f32 %v12724_v26, %v12407_v21  ;;  %v12807_v20 = vand.u32 4294901760, %v5367_v55  ;;  %v12810_v3 = vsel %vm4781_vm9, 1.0, %v17489_v49  ;;  %v4924_v60 = vmul.f32 %v12465_v7, %v4919_v57  ;;  %6130 = vmatpush.msrb.mxu3 %v6129_v59 }
 0x5dd   : > { %5963 = vmatpush.msrb.mxu0 %v17513_v4  ;;  %17515 = vst [vmem:[#allocation57_spill] sm:$0xff] %v12810_v3  ;;  %v4937_v8 = vmul.f32 %v12472_v51, %v4932_v38  ;;  %v17516_v5 = vand.u32 4294901760, %v12543_v16  ;;  %v4953_v35 = vmul.f32 %v12798_v12, %v12472_v51  ;;  %v4966_v58 = vmul.f32 %v12496_v25, %v4961_v42 }
 0x5de   : > { %17514 = vst [vmem:[#allocation56_spill] sm:$0xff] %v12807_v20  ;;  %v4982_v30 = vmul.f32 %v12804_v2, %v12496_v25  ;;  %v4990_v27 = vsub.f32 %v12419_v50, %v12724_v26  ;;  %v5649_v56 = vsub.f32 %v5367_v55, %v12807_v20  ;;  %v4928_v63 = vmul.f32 %v9286_v18, %v4924_v60 }
 0x5df   : > { %5967 = vmatpush.msrb.mxu0 %v17516_v5  ;;  %v4941_v54 = vmul.f32 %v9290_v62, %v4937_v8  ;;  %v5182_v38 = vmul.f32 %v12533_v0, %v4919_v57  ;;  %5774 = vmatmul.f32.gmra.mxu1 %v12807_v20  ;;  %v4957_v16 = vmul.f32 %v9290_v62, %v4953_v35  ;;  %v5519_v8 = vld [vmem:[#allocation9 + $0xb8] sm:$0xff]  ;;  %v17517_v35 = vand.u32 4294901760, %v12581_v52  ;;  %v12848_v52 = vld [vmem:[#allocation3 + $0x10] sm:$0xff]  ;;  %v5517_v20 = vld [vmem:[#allocation9 + $0xa8] sm:$0xff] }
 0x5e0   : > { %6136 = vmatpush.msrb.mxu3 %v6135_v1  ;;  %v4970_v59 = vmul.f32 %v9294_v44, %v4966_v58  ;;  %v4986_v4 = vmul.f32 %v9294_v44, %v4982_v30  ;;  %v4995_v5 = vmul.f32 %v12510_v29, %v4990_v27  ;;  %v5650_v24 = vand.u32 4294901760, %v5649_v56  ;;  %5841 = vmatmul.f32.gmra.mxu2 %v5649_v56  ;;  %v5520_v44 = vld [vmem:[#allocation9 + $0xc0] sm:$0xff] }
 0x5e1   : > { %v4945_v37 = vadd.f32 %v4941_v54, %v4928_v63  ;;  %v5191_v47 = vmul.f32 %v12536_v13, %v4961_v42  ;;  %v5203_v18 = vmul.f32 %v12536_v13, %v12798_v12  ;;  %6008 = vmatpush.msrb.mxu1 %v12270_v45  ;;  %v5212_v1 = vmul.f32 %v12538_v19, %v4990_v27  ;;  %v12839_v45 = vld [vmem:[#allocation9 + $0xb0] sm:$0xff]  ;;  %v17518_v54 = vld [vmem:[#allocation33_spill] sm:$0xff] }
 0x5e2   : > { %v4974_v55 = vadd.f32 %v4970_v59, %v4957_v16  ;;  %v4999_v60 = vmul.f32 %v12810_v3, %v4995_v5  ;;  %v5351_v62 = vmul.f32 %v12571_v9, %v4919_v57  ;;  %5971 = vmatpush.msrb.mxu0 %v17517_v35  ;;  %v5651_v58 = vsub.f32 %v5649_v56, %v5650_v24 }
 0x5e3   : > { %5896 = vmatmul.f32.gmra.mxu3 %v5650_v24  ;;  %v5186_v42 = vmul.f32 %v5182_v38, %v4945_v37  ;;  %v5360_v30 = vmul.f32 %v12573_v61, %v4990_v27  ;;  %v12837_v63 = vand.u32 4294901760, %v5521_v53  ;;  %6010 = vmatpush.msrb.mxu1 %v17518_v54  ;;  %v12846_v5 = vsub.f32 %v12711_v14, %v12738_v43 }
 0x5e4   : > { %v12842_v16 = vadd.f32 %v4999_v60, %v4986_v4  ;;  %v5195_v59 = vmul.f32 %v5191_v47, %v4974_v55  ;;  %v5207_v57 = vmul.f32 %v5203_v18, %v4974_v55  ;;  %v17520_v37 = vand.u32 4294901760, %v12593_v46  ;;  %v17521_v47 = vld [vmem:[#allocation34_spill] sm:$0xff] }
 0x5e5   : > { %v5652_v24 = vand.u32 4294901760, %v5651_v58  ;;  %6055 = vmatpush.msrb.mxu2 %v12837_v63  ;;  %v12853_v27 = vand.u32 4294901760, %v5520_v44  ;;  %v12856_v56 = vsub.f32 %v5521_v53, %v12837_v63  ;;  %v12858_v38 = vand.u32 4294901760, %v5519_v8  ;;  %6012 = vmatpush.msrb.mxu1 %v17521_v47 }
 0x5e6   : > { %17519 = vst [vmem:[#allocation33_spill] sm:$0xff] %v12842_v16  ;;  %5975 = vmatpush.msrb.mxu0 %v17520_v37  ;;  %v5199_v4 = vadd.f32 %v5195_v59, %v5186_v42  ;;  %v5216_v14 = vmul.f32 %v5212_v1, %v12842_v16  ;;  %v16978_v18 = vand.u32 4294901760, %v12846_v5  ;;  %v12864_v46 = vand.u32 4294901760, %v12839_v45  ;;  %v17523_v42 = vld [vmem:[#allocation35_spill] sm:$0xff]  ;;  %v17524_v37 = vld [vmem:[#allocation36_spill] sm:$0xff] }
 0x5e7   : > { %5653 = vmatmul.f32.gmra.mxu0 %v5652_v24  ;;  %6057 = vmatpush.msrb.mxu2 %v12853_v27  ;;  %v16977_v53 = vand.u32 4294901760, %v12856_v56  ;;  %v12870_v55 = vsub.f32 %v5520_v44, %v12853_v27  ;;  %v12873_v60 = vsub.f32 %v5519_v8, %v12858_v38  ;;  %vm4710_vm10 = vcmp.ge.f32.partialorder %v12848_v52, %v12401_v41 }
 0x5e8   : > { %6222 = vmatpush.msra.mxu0 %v12624_v6  ;;  %v12877_v1 = vadd.f32 %v5216_v14, %v5207_v57  ;;  %v5355_v35 = vmul.f32 %v5351_v62, %v5199_v4  ;;  %v6140_v58 = vsub.f32 %v12846_v5, %v16978_v18  ;;  %vm4715_vm11 = vcmp.lt.f32.partialorder %v12848_v52, %v12404_v33 }
 0x5e9   : > { %6014 = vmatpush.msrb.mxu1 %v17523_v42  ;;  %v6146_v44 = vsub.f32 %v12856_v56, %v16977_v53  ;;  %6059 = vmatpush.msrb.mxu2 %v12858_v38  ;;  %v16976_v8 = vand.u32 4294901760, %v12870_v55  ;;  %v16975_v54 = vand.u32 4294901760, %v12873_v60  ;;  %vm4719_vm12 = vmand %vm4710_vm10, %vm4715_vm11  ;;  %vm4731_vm13 = vcmp.ge.f32.partialorder %v12848_v52, %v12404_v33 }
 0x5ea   : > { %17522 = vst [vmem:[#allocation34_spill] sm:$0xff] %v12877_v1  ;;  %6225 = vmatpush.msra.mxu0 %v12715_v10  ;;  %v5364_v62 = vmul.f32 %v5360_v30, %v12877_v1  ;;  %v6141_v59 = vand.u32 4294901760, %v6140_v58  ;;  %v9287_v57 = vsel %vm4719_vm12, 1.0, %v17489_v49  ;;  %vm4736_vm14 = vcmp.lt.f32.partialorder %v12848_v52, %v12407_v21  ;;  %v17525_v58 = vld [vmem:[#allocation37_spill] sm:$0xff] }
 0x5eb   : > { %6016 = vmatpush.msrb.mxu1 %v17524_v37  ;;  %v6147_v24 = vand.u32 4294901760, %v6146_v44  ;;  %v6152_v47 = vsub.f32 %v12870_v55, %v16976_v8  ;;  %6061 = vmatpush.msrb.mxu2 %v12864_v46  ;;  %v6158_v4 = vsub.f32 %v12873_v60, %v16975_v54  ;;  %vm4740_vm15 = vmand %vm4731_vm13, %vm4736_vm14  ;;  %vm4752_vm0 = vcmp.ge.f32.partialorder %v12848_v52, %v12407_v21 }
 0x5ec   : > { %6228 = vmatpush.msra.mxu0 %v12720_v11  ;;  %v5368_v30 = vadd.f32 %v5364_v62, %v5355_v35  ;;  %6142 = vmatpush.msrb.mxu3 %v6141_v59  ;;  %v9291_v14 = vsel %vm4740_vm15, 1.0, %v17489_v49  ;;  %vm4757_vm1 = vcmp.lt.f32.partialorder %v12848_v52, %v12416_v15  ;;  %vm4773_vm2 = vcmp.ge.f32.partialorder %v12848_v52, %v12416_v15 }
 0x5ed   : > { %6018 = vmatpush.msrb.mxu1 %v17525_v58  ;;  %v6153_v42 = vand.u32 4294901760, %v6152_v47  ;;  %v6159_v44 = vand.u32 4294901760, %v6158_v4  ;;  %vm4761_vm3 = vmand %vm4752_vm0, %vm4757_vm1  ;;  %vm4778_vm4 = vcmp.lt.f32.partialorder %v12848_v52, %v12419_v50  ;;  %v4920_v35 = vsub.f32 %v12848_v52, %v12401_v41  ;;  %v17528_v4 = vld [vmem:[#allocation38_spill] sm:$0xff] }
 0x5ee   : > { %6231 = vmatpush.msra.mxu0 %v12731_v36  ;;  %v12920_v62 = vand.u32 4294901760, %v5368_v30  ;;  %6148 = vmatpush.msrb.mxu3 %v6147_v24  ;;  %v9295_v59 = vsel %vm4761_vm3, 1.0, %v17489_v49  ;;  %vm4782_vm5 = vmand %vm4773_vm2, %vm4778_vm4  ;;  %v4933_v37 = vsub.f32 %v12407_v21, %v12848_v52  ;;  %v12927_v47 = vsub.f32 %v12848_v52, %v12404_v33 }
 0x5ef   : > { %6020 = vmatpush.msrb.mxu1 %v17528_v4  ;;  %v12931_v58 = vsel %vm4782_vm5, 1.0, %v17489_v49  ;;  %v4925_v41 = vmul.f32 %v12465_v7, %v4920_v35  ;;  %v4962_v24 = vsub.f32 %v12416_v15, %v12848_v52  ;;  %v12938_v54 = vsub.f32 %v12848_v52, %v12407_v21 }
 0x5f0   : > { %17526 = vst [vmem:[#allocation35_spill] sm:$0xff] %v12920_v62  ;;  %6234 = vmatpush.msra.mxu0 %v12741_v22  ;;  %v5657_v8 = vsub.f32 %v5368_v30, %v12920_v62  ;;  %6154 = vmatpush.msrb.mxu3 %v6153_v42  ;;  %v4938_v33 = vmul.f32 %v12472_v51, %v4933_v37 }
 0x5f1   : > { %17527 = vst [vmem:[#allocation36_spill] sm:$0xff] %v12927_v47  ;;  %v4954_v4 = vmul.f32 %v12927_v47, %v12472_v51  ;;  %v4991_v7 = vsub.f32 %v12419_v50, %v12848_v52  ;;  %v4929_v53 = vmul.f32 %v9287_v57, %v4925_v41  ;;  %v4967_v18 = vmul.f32 %v12496_v25, %v4962_v24 }
 0x5f2   : > { %17529 = vst [vmem:[#allocation37_spill] sm:$0xff] %v12938_v54  ;;  %v4983_v21 = vmul.f32 %v12938_v54, %v12496_v25  ;;  %v5183_v1 = vmul.f32 %v12533_v0, %v4920_v35  ;;  %5778 = vmatmul.f32.gmra.mxu1 %v12920_v62  ;;  %v5658_v30 = vand.u32 4294901760, %v5657_v8  ;;  %5846 = vmatmul.f32.gmra.mxu2 %v5657_v8  ;;  %v17530_v25 = vld [vmem:[#allocation39_spill] sm:$0xff] }
 0x5f3   : > { %6160 = vmatpush.msrb.mxu3 %v6159_v44  ;;  %v4942_v42 = vmul.f32 %v9291_v14, %v4938_v33  ;;  %v4958_v37 = vmul.f32 %v9291_v14, %v4954_v4  ;;  %v4996_v51 = vmul.f32 %v12510_v29, %v4991_v7  ;;  %v4971_v3 = vmul.f32 %v9295_v59, %v4967_v18  ;;  %v5516_v14 = vld [vmem:[#allocation9 + $0xa0] sm:$0xff] }
 0x5f4   : > { %v4987_v16 = vmul.f32 %v9295_v59, %v4983_v21  ;;  %v5192_v57 = vmul.f32 %v12536_v13, %v4962_v24  ;;  %v5204_v41 = vmul.f32 %v12536_v13, %v12927_v47  ;;  %6022 = vmatpush.msrb.mxu1 %v17530_v25  ;;  %v5659_v0 = vsub.f32 %v5657_v8, %v5658_v30  ;;  %v5515_v24 = vld [vmem:[#allocation9 + $0x98] sm:$0xff]  ;;  %v5514_v21 = vld [vmem:[#allocation9 + $0x90] sm:$0xff]  ;;  %v17532_v13 = vld [vmem:[#allocation41_spill] sm:$0xff] }
 0x5f5   : > { %5902 = vmatmul.f32.gmra.mxu3 %v5658_v30  ;;  %v4946_v62 = vadd.f32 %v4942_v42, %v4929_v53  ;;  %v5000_v54 = vmul.f32 %v12931_v58, %v4996_v51  ;;  %v5213_v44 = vmul.f32 %v12538_v19, %v4991_v7  ;;  %v4975_v33 = vadd.f32 %v4971_v3, %v4958_v37  ;;  %v5513_v3 = vld [vmem:[#allocation9 + $0x88] sm:$0xff]  ;;  %v17550_v47 = vld [vmem:[#allocation44_spill] sm:$0xff] }
 0x5f6   : > { %v5352_v4 = vmul.f32 %v12571_v9, %v4920_v35  ;;  %v5361_v18 = vmul.f32 %v12573_v61, %v4991_v7  ;;  %v12961_v59 = vand.u32 4294901760, %v5517_v20  ;;  %6024 = vmatpush.msrb.mxu1 %v17532_v13  ;;  %6237 = vmatpush.msra.mxu0 %v12846_v5  ;;  %v5660_v8 = vand.u32 4294901760, %v5659_v0  ;;  %v17534_v9 = vld [vmem:[#allocation52_spill] sm:$0xff] }
 0x5f7   : > { %v12965_v53 = vadd.f32 %v5000_v54, %v4987_v16  ;;  %v5187_v30 = vmul.f32 %v5183_v1, %v4946_v62  ;;  %v12969_v42 = vsub.f32 %v12839_v45, %v12864_v46  ;;  %v5196_v35 = vmul.f32 %v5192_v57, %v4975_v33  ;;  %v12985_v62 = vld [vmem:[#allocation9 + $0x80] sm:$0xff] }
 0x5f8   : > { %17531 = vst [vmem:[#allocation38_spill] sm:$0xff] %v12961_v59  ;;  %6290 = vmatpush.msra.mxu1 %v17534_v9  ;;  %v5208_v7 = vmul.f32 %v5204_v41, %v4975_v33  ;;  %6063 = vmatpush.msrb.mxu2 %v12961_v59  ;;  %v12973_v37 = vand.u32 4294901760, %v5516_v14  ;;  %v12976_v51 = vsub.f32 %v5517_v20, %v12961_v59  ;;  %v12981_v1 = vand.u32 4294901760, %v5515_v24 }
 0x5f9   : > { %17533 = vst [vmem:[#allocation39_spill] sm:$0xff] %v12965_v53  ;;  %6240 = vmatpush.msra.mxu0 %v12856_v56  ;;  %v5217_v16 = vmul.f32 %v5213_v44, %v12965_v53  ;;  %v16989_v45 = vand.u32 4294901760, %v12969_v42  ;;  %v12983_v54 = vand.u32 4294901760, %v5514_v21  ;;  %v5200_v57 = vadd.f32 %v5196_v35, %v5187_v30 }
 0x5fa   : > { %17535 = vst [vmem:[#allocation41_spill] sm:$0xff] %v12973_v37  ;;  %5661 = vmatmul.f32.gmra.mxu0 %v5660_v8  ;;  %6292 = vmatpush.msra.mxu1 %v12616_v32  ;;  %v16988_v20 = vand.u32 4294901760, %v12976_v51  ;;  %v12991_v41 = vsub.f32 %v5516_v14, %v12973_v37  ;;  %v12993_v25 = vand.u32 4294901760, %v5513_v3  ;;  %v13002_v33 = vsub.f32 %v5515_v24, %v12981_v1 }
 0x5fb   : > { %17536 = vst [vmem:[#allocation52_spill] sm:$0xff] %v12976_v51  ;;  %6065 = vmatpush.msrb.mxu2 %v12973_v37  ;;  %6243 = vmatpush.msra.mxu0 %v12870_v55  ;;  %v12996_v0 = vadd.f32 %v5217_v16, %v5208_v7  ;;  %v6164_v44 = vsub.f32 %v12969_v42, %v16989_v45  ;;  %v13014_v35 = vand.u32 4294901760, %v12985_v62  ;;  %v17542_v45 = vld [vmem:[#allocation40_spill] sm:$0xff] }
 0x5fc   : > { %17537 = vst [vmem:[#allocation58_spill] sm:$0xff] %v12981_v1  ;;  %v13005_v13 = vsub.f32 %v5514_v21, %v12983_v54  ;;  %6294 = vmatpush.msra.mxu1 %v12635_v40  ;;  %v5356_v14 = vmul.f32 %v5352_v4, %v5200_v57  ;;  %v6170_v8 = vsub.f32 %v12976_v51, %v16988_v20  ;;  %v16990_v30 = vand.u32 4294901760, %v12991_v41 }
 0x5fd   : > { %17538 = vst [vmem:[#allocation59_spill] sm:$0xff] %v12983_v54  ;;  %6067 = vmatpush.msrb.mxu2 %v12981_v1  ;;  %6246 = vmatpush.msra.mxu0 %v12873_v60  ;;  %v5365_v24 = vmul.f32 %v5361_v18, %v12996_v0  ;;  %v6165_v21 = vand.u32 4294901760, %v6164_v44  ;;  %v16993_v7 = vand.u32 4294901760, %v13002_v33  ;;  %v13026_v20 = vsub.f32 %v5513_v3, %v12993_v25  ;;  %v17548_v1 = vld [vmem:[#allocation45_spill] sm:$0xff] }
 0x5fe   : > { %17539 = vst [vmem:[#allocation60_spill] sm:$0xff] %v12993_v25  ;;  %v16994_v4 = vand.u32 4294901760, %v13005_v13  ;;  %6296 = vmatpush.msra.mxu1 %v12690_v48  ;;  %v6171_v16 = vand.u32 4294901760, %v6170_v8  ;;  %v6176_v57 = vsub.f32 %v12991_v41, %v16990_v30  ;;  %vm4791_vm6 = vcmp.ge.f32.partialorder %v17542_v45, %v12419_v50  ;;  %v17543_v30 = vld [vmem:[#allocation48_spill] sm:$0xff] }
 0x5ff   : > { %17540 = vst [vmem:[#allocation61_spill] sm:$0xff] %v12996_v0  ;;  %6069 = vmatpush.msrb.mxu2 %v12983_v54  ;;  %6249 = vmatpush.msra.mxu0 %v12969_v42  ;;  %v5369_v18 = vadd.f32 %v5365_v24, %v5356_v14  ;;  %v6182_v44 = vsub.f32 %v13002_v33, %v16993_v7  ;;  %v13044_v14 = vld [vmem:[%s16864_s9 + $0x18] sm:$0xff] }
 0x600   : > { %17541 = vst [vmem:[#allocation62_spill] sm:$0xff] %v13026_v20  ;;  %6166 = vmatpush.msrb.mxu3 %v6165_v21  ;;  %v6188_v8 = vsub.f32 %v13005_v13, %v16994_v4  ;;  %vm4796_vm7 = vcmp.lt.f32.partialorder %v17542_v45, %v17543_v30  ;;  %v6177_v3 = vand.u32 4294901760, %v6176_v57  ;;  %v5017_v24 = vsub.f32 %v17543_v30, %v17542_v45  ;;  %v17545_v21 = vld [vmem:[#allocation42_spill] sm:$0xff] }
 0x601   : > { %6071 = vmatpush.msrb.mxu2 %v12993_v25  ;;  %17544 = vst [vmem:[#allocation40_spill] sm:$0xff] %v13044_v14  ;;  %vm4800_vm8 = vmand %vm4791_vm6, %vm4796_vm7  ;;  %v13049_v7 = vperm.slane %v17545_v21, 4  ;;  %6298 = vmatpush.msra.mxu1 %v12722_v23  ;;  %v13052_v4 = vand.u32 4294901760, %v5369_v18  ;;  %v6183_v57 = vand.u32 4294901760, %v6182_v44  ;;  %v17547_v25 = vld [vmem:[#allocation49_spill] sm:$0xff]  ;;  %v17549_v45 = vand.u32 4294901760, %v13026_v20 }
 0x602   : > { %6172 = vmatpush.msrb.mxu3 %v6171_v16  ;;  %v13055_v54 = vsel %vm4800_vm8, 1.0, %v17489_v49  ;;  %6252 = vmatpush.msra.mxu0 %v12976_v51  ;;  %v5013_v37 = vmul.f32 %v17548_v1, %v17547_v25  ;;  %v5222_v16 = vmul.f32 %v12538_v19, %v17550_v47  ;;  %v13070_v53 = vperm.slane %v13044_v14, 0  ;;  %v17551_v51 = vld [vmem:[#allocation50_spill] sm:$0xff]  ;;  %v17552_v23 = vld [vmem:[#allocation43_spill] sm:$0xff] }
 0x603   : > { %17546 = vst [vmem:[#allocation48_spill] sm:$0xff] %v13055_v54  ;;  %6073 = vmatpush.msrb.mxu2 %v13014_v35  ;;  %v6194_v21 = vsub.f32 %v13026_v20, %v17549_v45  ;;  %v5022_v0 = vmul.f32 %v13049_v7, %v5017_v24  ;;  %v5665_v44 = vsub.f32 %v5369_v18, %v13052_v4  ;;  %v6189_v1 = vand.u32 4294901760, %v6188_v8  ;;  %v17554_v47 = vld [vmem:[#allocation47_spill] sm:$0xff] }
 0x604   : > { %6178 = vmatpush.msrb.mxu3 %v6177_v3  ;;  %5782 = vmatmul.f32.gmra.mxu1 %v13052_v4  ;;  %v5231_v59 = vmul.f32 %v17551_v51, %v5017_v24  ;;  %v5370_v45 = vmul.f32 %v12573_v61, %v17552_v23  ;;  %v17553_v20 = vand.u32 4294901760, %v12624_v6  ;;  %v5226_v14 = vmul.f32 %v5222_v16, %v17554_v47 }
 0x605   : > { %v5026_v25 = vmul.f32 %v13055_v54, %v5022_v0  ;;  %6300 = vmatpush.msra.mxu1 %v12738_v43  ;;  %v5666_v18 = vand.u32 4294901760, %v5665_v44  ;;  %5851 = vmatmul.f32.gmra.mxu2 %v5665_v44  ;;  %v6195_v3 = vand.u32 4294901760, %v6194_v21  ;;  %v13082_v8 = vsub.f32 %v12985_v62, %v13014_v35 }
 0x606   : > { %6349 = vmatpush.msra.mxu2 %v17553_v20  ;;  %6184 = vmatpush.msrb.mxu3 %v6183_v57  ;;  %v5379_v54 = vmul.f32 %v13070_v53, %v5017_v24  ;;  %v17555_v23 = vand.u32 4294901760, %v12715_v10  ;;  %vm4792_vm9 = vcmp.ge.f32.partialorder %v12608_v39, %v12419_v50  ;;  %vm4797_vm10 = vcmp.lt.f32.partialorder %v12608_v39, %v17543_v30  ;;  %v17558_v57 = vld [vmem:[#allocation54_spill] sm:$0xff] }
 0x607   : > { %v13084_v0 = vadd.f32 %v5026_v25, %v5013_v37  ;;  %v5667_v6 = vsub.f32 %v5665_v44, %v5666_v18  ;;  %5908 = vmatmul.f32.gmra.mxu3 %v5666_v18  ;;  %v17012_v47 = vand.u32 4294901760, %v13082_v8  ;;  %vm4801_vm11 = vmand %vm4792_vm9, %vm4797_vm10  ;;  %v13096_v37 = vsub.f32 %v12608_v39, %v12416_v15  ;;  %6302 = vmatpush.msra.mxu1 %v12837_v63  ;;  %v17559_v25 = vld [vmem:[#allocation51_spill] sm:$0xff] }
 0x608   : > { %6353 = vmatpush.msra.mxu2 %v17555_v23  ;;  %v5018_v62 = vsub.f32 %v17543_v30, %v12608_v39  ;;  %6190 = vmatpush.msrb.mxu3 %v6189_v1  ;;  %v17557_v20 = vand.u32 4294901760, %v12720_v11  ;;  %v13105_v24 = vsel %vm4801_vm11, 1.0, %v17489_v49  ;;  %v5223_v21 = vmul.f32 %v12538_v19, %v17558_v57 }
 0x609   : > { %17556 = vst [vmem:[#allocation42_spill] sm:$0xff] %v13096_v37  ;;  %v5235_v10 = vmul.f32 %v5231_v59, %v13084_v0  ;;  %v5371_v16 = vmul.f32 %v12573_v61, %v12673_v31  ;;  %v5668_v44 = vand.u32 4294901760, %v5667_v6  ;;  %v6200_v39 = vsub.f32 %v13082_v8, %v17012_v47  ;;  %6304 = vmatpush.msra.mxu1 %v12853_v27 }
 0x60a   : > { %6357 = vmatpush.msra.mxu2 %v17557_v20  ;;  %v5010_v59 = vmul.f32 %v13096_v37, %v12510_v29  ;;  %v5023_v11 = vmul.f32 %v13049_v7, %v5018_v62  ;;  %6255 = vmatpush.msra.mxu0 %v12991_v41  ;;  %v5374_v18 = vmul.f32 %v5370_v45, %v17559_v25  ;;  %v17560_v31 = vand.u32 4294901760, %v12731_v36  ;;  %v17561_v20 = vld [vmem:[#allocation53_spill] sm:$0xff] }
 0x60b   : > { %6196 = vmatpush.msrb.mxu3 %v6195_v3  ;;  %v13119_v1 = vadd.f32 %v5235_v10, %v5226_v14  ;;  %v5227_v23 = vmul.f32 %v5223_v21, %v12728_v17  ;;  %5669 = vmatmul.f32.gmra.mxu0 %v5668_v44  ;;  %v6201_v6 = vand.u32 4294901760, %v6200_v39  ;;  %v5232_v37 = vmul.f32 %v17551_v51, %v5018_v62 }
 0x60c   : > { %6361 = vmatpush.msra.mxu2 %v17560_v31  ;;  %6026 = vmatmul.f32.vlgmr.msrb.gmra.mxu1 %v17561_v20  ;;  %v5014_v47 = vmul.f32 %v12676_v34, %v5010_v59  ;;  %v5027_v57 = vmul.f32 %v13105_v24, %v5023_v11  ;;  %v5375_v3 = vmul.f32 %v5371_v16, %v12760_v28  ;;  %v17562_v45 = vand.u32 4294901760, %v12741_v22  ;;  %v17567_v59 = vld [vmem:[#allocation57_spill] sm:$0xff] }
 0x60d   : > { %v5383_v14 = vmul.f32 %v5379_v54, %v13119_v1  ;;  %vm4793_vm12 = vcmp.ge.f32.partialorder %v12724_v26, %v12419_v50  ;;  %vm4798_vm13 = vcmp.lt.f32.partialorder %v12724_v26, %v17543_v30  ;;  %6202 = vmatpush.msrb.mxu3 %v6201_v6  ;;  %v13141_v34 = vsub.f32 %v12724_v26, %v12416_v15  ;;  %v5543_v6 = vld [vmem:[#allocation9 + $0x178] sm:$0xff] }
 0x60e   : > { %6365 = vmatpush.msra.mxu2 %v17562_v45  ;;  %v13137_v17 = vadd.f32 %v5027_v57, %v5014_v47  ;;  %vm4802_vm14 = vmand %vm4793_vm12, %vm4798_vm13  ;;  %v5019_v36 = vsub.f32 %v17543_v30, %v12724_v26  ;;  %v5224_v22 = vmul.f32 %v12538_v19, %v12804_v2  ;;  %v5380_v54 = vmul.f32 %v13070_v53, %v5018_v62 }
 0x60f   : > { %17563 = vst [vmem:[#allocation49_spill] sm:$0xff] %v13141_v34  ;;  %v5387_v28 = vadd.f32 %v5383_v14, %v5374_v18  ;;  %6428 = vmatpush.msra.mxu3 %v17534_v9  ;;  %v17564_v10 = vand.u32 4294901760, %v12846_v5  ;;  %v13152_v47 = vsel %vm4802_vm14, 1.0, %v17489_v49  ;;  %v5372_v57 = vmul.f32 %v12573_v61, %v12798_v12  ;;  %6306 = vmatpush.msra.mxu1 %v12858_v38  ;;  %v17566_v12 = vld [vmem:[#allocation33_spill] sm:$0xff] }
 0x610   : > { %v5236_v21 = vmul.f32 %v5232_v37, %v13137_v17  ;;  %v5011_v26 = vmul.f32 %v13141_v34, %v12510_v29  ;;  %v5024_v16 = vmul.f32 %v13049_v7, %v5019_v36  ;;  %vm4794_vm15 = vcmp.ge.f32.partialorder %v12848_v52, %v12419_v50  ;;  %6258 = vmatpush.msra.mxu0 %v13002_v33 }
 0x611   : > { %6369 = vmatpush.msra.mxu2 %v17564_v10  ;;  %v13163_v5 = vand.u32 4294901760, %v5387_v28  ;;  %6430 = vmatpush.msra.mxu3 %v12616_v32  ;;  %v17565_v9 = vand.u32 4294901760, %v12856_v56  ;;  %v5228_v62 = vmul.f32 %v5224_v22, %v17566_v12  ;;  %v5233_v37 = vmul.f32 %v17551_v51, %v5019_v36  ;;  %v17575_v10 = vld [vmem:[#allocation34_spill] sm:$0xff] }
 0x612   : > { %v5381_v44 = vmul.f32 %v13070_v53, %v5019_v36  ;;  %v13171_v39 = vadd.f32 %v5236_v21, %v5227_v23  ;;  %v5015_v11 = vmul.f32 %v17567_v59, %v5011_v26  ;;  %v5028_v25 = vmul.f32 %v13152_v47, %v5024_v16  ;;  %6308 = vmatpush.msra.mxu1 %v12864_v46  ;;  %v17574_v36 = vld [vmem:[#allocation37_spill] sm:$0xff]  ;;  %v17578_v26 = vld [vmem:[#allocation55_spill] sm:$0xff] }
 0x613   : > { %6373 = vmatpush.msra.mxu2 %v17565_v9  ;;  %v13178_v32 = vsub.f32 %v5387_v28, %v13163_v5  ;;  %6204 = vmatmul.f32.vlgmr.msrb.gmra.mxu3 %v13163_v5  ;;  %v17568_v56 = vand.u32 4294901760, %v12870_v55  ;;  %vm4799_vm0 = vcmp.lt.f32.partialorder %v12848_v52, %v17543_v30  ;;  %v13187_v18 = vsub.f32 %v12848_v52, %v12416_v15  ;;  %v17571_v15 = vld [vmem:[#allocation56_spill] sm:$0xff] }
 0x614   : > { %5977 = vmatmul.f32.vlgmr.msrb.gmra.mxu0 %v17561_v20  ;;  %6432 = vmatpush.msra.mxu3 %v12635_v40  ;;  %v5384_v31 = vmul.f32 %v5380_v54, %v13171_v39  ;;  %v13192_v23 = vadd.f32 %v5028_v25, %v5015_v11  ;;  %vm4803_vm1 = vmand %vm4794_vm15, %vm4799_vm0  ;;  %v5020_v55 = vsub.f32 %v17543_v30, %v12848_v52  ;;  %v17572_v20 = vand.u32 4294901760, %v12873_v60 }
 0x615   : > { %6377 = vmatpush.msra.mxu2 %v17568_v56  ;;  %17569 = vst [vmem:[#allocation45_spill] sm:$0xff] %v13187_v18  ;;  %v17018_v14 = vand.u32 4294901760, %v13178_v32  ;;  %6030 = vmatmul.f32.gmra.mxu1 %v17571_v15  ;;  %v13204_v40 = vsel %vm4803_vm1, 1.0, %v17489_v49  ;;  %v5012_v45 = vmul.f32 %v13187_v18, %v12510_v29  ;;  %v5225_v22 = vmul.f32 %v12538_v19, %v17574_v36  ;;  %v17584_v56 = vld [vmem:[#allocation62_spill] sm:$0xff] }
 0x616   : > { %17570 = vst [vmem:[#allocation50_spill] sm:$0xff] %v13192_v23  ;;  %v5388_v28 = vadd.f32 %v5384_v31, %v5375_v3  ;;  %6434 = vmatpush.msra.mxu3 %v12690_v48  ;;  %v5237_v52 = vmul.f32 %v5233_v37, %v13192_v23  ;;  %6261 = vmatpush.msra.mxu0 %v13005_v13  ;;  %v17576_v29 = vand.u32 4294901760, %v12969_v42  ;;  %v13221_v3 = vand.u32 4294901760, %v5543_v6  ;;  %v17580_v37 = vld [vmem:[#allocation38_spill] sm:$0xff]  ;;  %v17581_v42 = vld [vmem:[#allocation52_spill] sm:$0xff] }
 0x617   : > { %6381 = vmatpush.msra.mxu2 %v17572_v20  ;;  %17573 = vst [vmem:[#allocation43_spill] sm:$0xff] %v13204_v40  ;;  %v5025_v54 = vmul.f32 %v13049_v7, %v5020_v55  ;;  %v6077_v60 = vsub.f32 %v13178_v32, %v17018_v14  ;;  %v5376_v21 = vmul.f32 %v5372_v57, %v17575_v10  ;;  %v5542_v57 = vld [vmem:[#allocation9 + $0x170] sm:$0xff]  ;;  %v17582_v11 = vand.u32 4294901760, %v17581_v42  ;;  %v5540_v10 = vld [vmem:[#allocation9 + $0x160] sm:$0xff]  ;;  %v5539_v42 = vld [vmem:[#allocation9 + $0x158] sm:$0xff] }
 0x618   : > { %v5016_v19 = vmul.f32 %v12931_v58, %v5012_v45  ;;  %17577 = vst [vmem:[#allocation47_spill] sm:$0xff] %v13221_v3  ;;  %v13223_v48 = vand.u32 4294901760, %v5388_v28  ;;  %6436 = vmatpush.msra.mxu3 %v17578_v26  ;;  %v13226_v16 = vadd.f32 %v5237_v52, %v5228_v62  ;;  %v5234_v12 = vmul.f32 %v17551_v51, %v5020_v55  ;;  %v17583_v58 = vld [vmem:[#allocation39_spill] sm:$0xff]  ;;  %v17586_v45 = vld [vmem:[#allocation36_spill] sm:$0xff] }
 0x619   : > { %6385 = vmatpush.msra.mxu2 %v17576_v29  ;;  %v5029_v9 = vmul.f32 %v13204_v40, %v5025_v54  ;;  %6310 = vmatpush.msra.mxu1 %v17580_v37  ;;  %v6078_v59 = vand.u32 4294901760, %v6077_v60  ;;  %v5229_v25 = vmul.f32 %v5225_v22, %v17583_v58  ;;  %v5373_v52 = vmul.f32 %v12573_v61, %v17586_v45  ;;  %v5541_v54 = vld [vmem:[#allocation9 + $0x168] sm:$0xff]  ;;  %v17589_v29 = vld [vmem:[#allocation35_spill] sm:$0xff]  ;;  %v9467_v45 = vld [vmem:[%s16863_s8] sm:$0xff] }
 0x61a   : > { %17579 = vst [vmem:[#allocation51_spill] sm:$0xff] %v13226_v16  ;;  %6264 = vmatpush.msra.mxu0 %v17584_v56  ;;  %v13236_v31 = vsub.f32 %v5388_v28, %v13223_v48  ;;  %6438 = vmatpush.msra.mxu3 %v12738_v43  ;;  %v5385_v62 = vmul.f32 %v5381_v44, %v13226_v16  ;;  %v13246_v60 = vand.u32 4294901760, %v5542_v57  ;;  %v13260_v26 = vand.u32 4294901760, %v5540_v10 }
 0x61b   : > { %6389 = vmatpush.msra.mxu2 %v17582_v11  ;;  %v13240_v20 = vadd.f32 %v5029_v9, %v5016_v19  ;;  %6208 = vmatmul.f32.gmra.mxu3 %v13223_v48  ;;  %v5382_v22 = vmul.f32 %v13070_v53, %v5020_v55  ;;  %v13253_v61 = vsub.f32 %v5543_v6, %v13221_v3  ;;  %v17590_v19 = vand.u32 4294901760, %v12991_v41  ;;  %v17594_v6 = vld [vmem:[#allocation61_spill] sm:$0xff]  ;;  %v5538_v11 = vld [vmem:[#allocation9 + $0x150] sm:$0xff] }
 0x61c   : > { %6079 = vmatmul.f32.vlgmr.msrb.gmra.mxu2 %v6078_v59  ;;  %17587 = vst [vmem:[#allocation33_spill] sm:$0xff] %v13246_v60  ;;  %5981 = vmatmul.f32.gmra.mxu0 %v17571_v15  ;;  %v17017_v43 = vand.u32 4294901760, %v13236_v31  ;;  %v5389_v44 = vadd.f32 %v5385_v62, %v5376_v21  ;;  %v13258_v55 = vand.u32 4294901760, %v5541_v54  ;;  %v5377_v9 = vmul.f32 %v5373_v52, %v17594_v6 }
 0x61d   : > { %17585 = vst [vmem:[#allocation53_spill] sm:$0xff] %v13240_v20  ;;  %6440 = vmatpush.msra.mxu3 %v12837_v63  ;;  %v5238_v28 = vmul.f32 %v5234_v12, %v13240_v20  ;;  %6034 = vmatmul.f32.gmra.mxu1 %v17589_v29  ;;  %v17595_v12 = vld [vmem:[#allocation41_spill] sm:$0xff]  ;;  %v17596_v41 = vand.u32 4294901760, %v13002_v33  ;;  %v13276_v59 = vsub.f32 %v5542_v57, %v13246_v60  ;;  %v17015_v33 = vand.u32 4294901760, %v13253_v61  ;;  %v17624_v20 = vld [vmem:[#allocation48_spill] sm:$0xff] }
 0x61e   : > { %17588 = vst [vmem:[#allocation57_spill] sm:$0xff] %v13253_v61  ;;  %6393 = vmatpush.msra.mxu2 %v17590_v19  ;;  %v6085_v15 = vsub.f32 %v13236_v31, %v17017_v43  ;;  %v13265_v63 = vand.u32 4294901760, %v5389_v44  ;;  %6312 = vmatpush.msra.mxu1 %v17595_v12  ;;  %v13288_v57 = vperm.slane %v9467_v45, 6  ;;  %v17599_v52 = vand.u32 4294901760, %v13005_v13  ;;  %v17602_v19 = vld [vmem:[#allocation59_spill] sm:$0xff]  ;;  %v13306_v13 = vld [vmem:[#allocation3] sm:$0xff] }
 0x61f   : > { %17591 = vst [vmem:[#allocation56_spill] sm:$0xff] %v13258_v55  ;;  %6442 = vmatpush.msra.mxu3 %v12853_v27  ;;  %v13268_v21 = vadd.f32 %v5238_v28, %v5229_v25  ;;  %6267 = vmatpush.msra.mxu0 %v13082_v8  ;;  %v17598_v25 = vld [vmem:[#allocation58_spill] sm:$0xff]  ;;  %v13304_v6 = vand.u32 4294901760, %v5538_v11  ;;  %vm4812_vm2 = vcmp.ge.f32.partialorder %v13306_v13, %v17543_v30  ;;  %v13348_v43 = vperm.slane %v9467_v45, 7 }
 0x620   : > { %17592 = vst [vmem:[#allocation34_spill] sm:$0xff] %v13260_v26  ;;  %6397 = vmatpush.msra.mxu2 %v17596_v41  ;;  %v6086_v58 = vand.u32 4294901760, %v6085_v15  ;;  %v13279_v62 = vsub.f32 %v5389_v44, %v13265_v63  ;;  %6314 = vmatpush.msra.mxu1 %v17598_v25  ;;  %v13294_v44 = vsub.f32 %v5541_v54, %v13258_v55  ;;  %v13302_v15 = vand.u32 4294901760, %v5539_v42 }
 0x621   : > { %17593 = vst [vmem:[#allocation55_spill] sm:$0xff] %v13268_v21  ;;  %6444 = vmatpush.msra.mxu3 %v12858_v38  ;;  %v5386_v27 = vmul.f32 %v5382_v22, %v13268_v21  ;;  %6477 = vmatpush.msrb.mxu0 %v13221_v3  ;;  %v13297_v38 = vsub.f32 %v5540_v10, %v13260_v26  ;;  %v5537_v10 = vld [vmem:[#allocation9 + $0x148] sm:$0xff] }
 0x622   : > { %17597 = vst [vmem:[#allocation38_spill] sm:$0xff] %v13276_v59  ;;  %6401 = vmatpush.msra.mxu2 %v17599_v52  ;;  %v17016_v22 = vand.u32 4294901760, %v13279_v62  ;;  %6316 = vmatpush.msra.mxu1 %v17602_v19  ;;  %v13310_v54 = vsub.f32 %v13306_v13, %v12419_v50  ;;  %v13323_v41 = vsub.f32 %v13253_v61, %v17015_v33  ;;  %v17612_v52 = vand.u32 4294901760, %v13082_v8 }
 0x623   : > { %17600 = vst [vmem:[#allocation52_spill] sm:$0xff] %v13294_v44  ;;  %6446 = vmatpush.msra.mxu3 %v12864_v46  ;;  %v5390_v28 = vadd.f32 %v5386_v27, %v5377_v9  ;;  %v17607_v27 = vand.u32 4294901760, %v17584_v56  ;;  %vm4817_vm3 = vcmp.lt.f32.partialorder %v13306_v13, %v13288_v57  ;;  %6479 = vmatpush.msrb.mxu0 %v13246_v60  ;;  %v17626_v8 = vand.u32 4294901760, %v13178_v32 }
 0x624   : > { %17601 = vst [vmem:[#allocation39_spill] sm:$0xff] %v13297_v38  ;;  %6087 = vmatmul.f32.gmra.mxu2 %v6086_v58  ;;  %6212 = vmatmul.f32.gmra.mxu3 %v13265_v63  ;;  %v6093_v46 = vsub.f32 %v13279_v62, %v17016_v22  ;;  %v17019_v58 = vand.u32 4294901760, %v13276_v59  ;;  %v13341_v56 = vsub.f32 %v5539_v42, %v13302_v15  ;;  %v5536_v22 = vld [vmem:[#allocation9 + $0x140] sm:$0xff]  ;;  %vm13372_vm4 = vmand %vm4812_vm2, %vm4817_vm3 }
 0x625   : > { %17603 = vst [vmem:[#allocation62_spill] sm:$0xff] %v13302_v15  ;;  %5985 = vmatmul.f32.gmra.mxu0 %v17589_v29  ;;  %6448 = vmatpush.msra.mxu3 %v17580_v37  ;;  %v13318_v9 = vand.u32 4294901760, %v5390_v28  ;;  %v13346_v33 = vsub.f32 %v5538_v11, %v13304_v6  ;;  %v17613_v42 = vld [vmem:[#allocation60_spill] sm:$0xff]  ;;  %v5038_v29 = vmul.f32 %v13310_v54, %v13049_v7 }
 0x626   : > { %17604 = vst [vmem:[#allocation36_spill] sm:$0xff] %v13304_v6  ;;  %6038 = vmatmul.f32.gmra.mxu1 %v13052_v4  ;;  %6405 = vmatpush.msra.mxu2 %v17607_v27  ;;  %v13343_v27 = vand.u32 4294901760, %v5537_v10  ;;  %v6550_v45 = vsub.f32 %v13276_v59, %v17019_v58  ;;  %v17617_v58 = vand.u32 4294901760, %v13297_v38 }
 0x627   : > { %17605 = vst [vmem:[#allocation35_spill] sm:$0xff] %v13306_v13  ;;  %v13336_v37 = vsub.f32 %v5390_v28, %v13318_v9  ;;  %6450 = vmatpush.msra.mxu3 %v17595_v12  ;;  %v9469_v28 = vld [vmem:[%s16864_s9 + $0x8] sm:$0xff]  ;;  %v6094_v12 = vand.u32 4294901760, %v6093_v46  ;;  %6318 = vmatpush.msra.mxu1 %v17613_v42  ;;  %v17616_v46 = vand.u32 4294901760, %v13294_v44 }
 0x628   : > { %17606 = vst [vmem:[#allocation61_spill] sm:$0xff] %v13310_v54  ;;  %v13353_v14 = vperm.slane %v9469_v28, 7  ;;  %6409 = vmatpush.msra.mxu2 %v17612_v52  ;;  %v5535_v28 = vld [vmem:[#allocation9 + $0x138] sm:$0xff]  ;;  %6481 = vmatpush.msrb.mxu0 %v13258_v55  ;;  %v13388_v11 = vsub.f32 %v13297_v38, %v17617_v58  ;;  %v13390_v54 = vand.u32 4294901760, %v5536_v22  ;;  %v13405_v36 = vsub.f32 %v5537_v10, %v13343_v27 }
 0x629   : > { %17608 = vst [vmem:[#allocation41_spill] sm:$0xff] %v13336_v37  ;;  %6452 = vmatpush.msra.mxu3 %v17598_v25  ;;  %v13378_v25 = vsub.f32 %v13288_v57, %v13306_v13  ;;  %6320 = vmatpush.msra.mxu1 %v13014_v35  ;;  %v6556_v52 = vsub.f32 %v13294_v44, %v17616_v46  ;;  %v13395_v13 = vld [vmem:[%s16864_s9] sm:$0xff]  ;;  %v6545_v46 = vand.u32 4294901760, %v13323_v41  ;;  %v17620_v40 = vand.u32 4294901760, %v13336_v37  ;;  %v9471_v41 = vld [vmem:[%s16864_s9 + $0x10] sm:$0xff] }
 0x62a   : > { %17609 = vst [vmem:[#allocation58_spill] sm:$0xff] %v13341_v56  ;;  %6656 = vmatpush.msrb.mxu2 %v13253_v61  ;;  %v13398_v21 = vperm.slane %v13395_v13, 5  ;;  %v6551_v58 = vand.u32 4294901760, %v6550_v45  ;;  %6483 = vmatpush.msrb.mxu0 %v13260_v26  ;;  %v6563_v16 = vand.u32 4294901760, %v13388_v11 }
 0x62b   : > { %17610 = vst [vmem:[#allocation59_spill] sm:$0xff] %v13343_v27  ;;  %6454 = vmatpush.msra.mxu3 %v17602_v19  ;;  %v6101_v18 = vsub.f32 %v13336_v37, %v17620_v40  ;;  %v13417_v19 = vsel %vm13372_vm4, 1.0, %v17489_v49  ;;  %v5042_v40 = vmul.f32 %v17624_v20, %v5038_v29  ;;  %v6557_v61 = vand.u32 4294901760, %v6556_v52  ;;  %v5532_v20 = vld [vmem:[#allocation9 + $0x120] sm:$0xff]  ;;  %v17628_v29 = vld [vmem:[#allocation46_spill] sm:$0xff]  ;;  %6546 = vmatpush.msrb.mxu1 %v6545_v46 }
 0x62c   : > { %17611 = vst [vmem:[#allocation63_spill] sm:$0xff] %v13348_v43  ;;  %v5534_v43 = vld [vmem:[#allocation9 + $0x130] sm:$0xff]  ;;  %6659 = vmatpush.msrb.mxu2 %v13276_v59  ;;  %6216 = vmatmul.f32.gmra.mxu3 %v13318_v9  ;;  %v5051_v10 = vmul.f32 %v13398_v21, %v13378_v25  ;;  %v17630_v52 = vand.u32 4294901760, %v13346_v33 }
 0x62d   : > { %17618 = vst [vmem:[#allocation60_spill] sm:$0xff] %v13390_v54  ;;  %6095 = vmatmul.f32.gmra.mxu2 %v6094_v12  ;;  %v13424_v12 = vperm.slane %v9471_v41, 0  ;;  %5989 = vmatmul.f32.gmra.mxu0 %v13052_v4  ;;  %v13429_v59 = vand.u32 4294901760, %v5534_v43  ;;  %v13436_v41 = vsub.f32 %v5536_v22, %v13390_v54  ;;  %v5243_v4 = vmul.f32 %v17551_v51, %v17628_v29  ;;  %v5530_v46 = vld [vmem:[#allocation9 + $0x110] sm:$0xff]  ;;  %v17631_v29 = vld [vmem:[#allocation40_spill] sm:$0xff] }
 0x62e   : > { %17619 = vst [vmem:[#allocation64_spill] sm:$0xff] %v13395_v13  ;;  %v13412_v13 = vand.u32 4294901760, %v5535_v28  ;;  %6456 = vmatpush.msra.mxu3 %v17613_v42  ;;  %6324 = vmatmul.f32.vlgmr.msra.gmra.mxu1 %v17626_v8  ;;  %v17629_v42 = vand.u32 4294901760, %v13341_v56  ;;  %v13449_v11 = vsub.f32 %v13346_v33, %v17630_v52  ;;  %v5531_v8 = vld [vmem:[#allocation9 + $0x118] sm:$0xff]  ;;  %v5055_v37 = vmul.f32 %v13417_v19, %v5051_v10 }
 0x62f   : > { %17622 = vst [vmem:[#allocation66_spill] sm:$0xff] %v13417_v19  ;;  %v6102_v23 = vand.u32 4294901760, %v6101_v18  ;;  %6662 = vmatpush.msrb.mxu2 %v13294_v44  ;;  %v13461_v52 = vperm.slane %v17631_v29, 1  ;;  %6485 = vmatpush.msrb.mxu0 %v13302_v15  ;;  %v13467_v18 = vsub.f32 %v5534_v43, %v13429_v59  ;;  %v13469_v10 = vand.u32 4294901760, %v5532_v20 }
 0x630   : > { %17621 = vst [vmem:[#allocation65_spill] sm:$0xff] %v13412_v13  ;;  %6458 = vmatpush.msra.mxu3 %v13014_v35  ;;  %v13444_v45 = vsub.f32 %v13341_v56, %v17629_v42  ;;  %v13456_v35 = vsub.f32 %v5535_v28, %v13412_v13  ;;  %v5252_v42 = vmul.f32 %v13353_v14, %v13378_v25  ;;  %v13476_v29 = vand.u32 4294901760, %v5531_v8 }
 0x631   : > { %17623 = vst [vmem:[#allocation67_spill] sm:$0xff] %v13424_v12  ;;  %v5533_v12 = vld [vmem:[#allocation9 + $0x128] sm:$0xff]  ;;  %6552 = vmatpush.msrb.mxu1 %v6551_v58  ;;  %v13471_v19 = vadd.f32 %v5055_v37, %v5042_v40  ;;  %6665 = vmatpush.msrb.mxu2 %v13297_v38  ;;  %v17636_v58 = vld [vmem:[#allocation44_spill] sm:$0xff]  ;;  %v17637_v43 = vand.u32 4294901760, %v13405_v36  ;;  %v13487_v40 = vand.u32 4294901760, %v5530_v46  ;;  %v5400_v28 = vmul.f32 %v13461_v52, %v13378_v25 }
 0x632   : > { %17625 = vst [vmem:[#allocation48_spill] sm:$0xff] %v13429_v59  ;;  %6724 = vmatpush.msrb.mxu3 %v13221_v3  ;;  %v13464_v22 = vand.u32 4294901760, %v5533_v12  ;;  %v5247_v3 = vmul.f32 %v5243_v4, %v13084_v0  ;;  %v5391_v44 = vmul.f32 %v13070_v53, %v17636_v58  ;;  %6487 = vmatpush.msrb.mxu0 %v13304_v6  ;;  %v6569_v0 = vand.u32 4294901760, %v13444_v45 }
 0x633   : > { %17627 = vst [vmem:[#allocation68_spill] sm:$0xff] %v13436_v41  ;;  %6558 = vmatpush.msrb.mxu1 %v6557_v61  ;;  %v13485_v37 = vsub.f32 %v13405_v36, %v17637_v43  ;;  %v5529_v61 = vld [vmem:[#allocation9 + $0x108] sm:$0xff]  ;;  %v5256_v4 = vmul.f32 %v5252_v42, %v13471_v19  ;;  %v13512_v42 = vsub.f32 %v5532_v20, %v13469_v10  ;;  %v5528_v43 = vld [vmem:[#allocation9 + $0x100] sm:$0xff]  ;;  %v17643_v45 = vand.u32 4294901760, %v13436_v41 }
 0x634   : > { %17632 = vst [vmem:[#allocation40_spill] sm:$0xff] %v13464_v22  ;;  %6726 = vmatpush.msrb.mxu3 %v13246_v60  ;;  %v13491_v60 = vld [vmem:[#allocation3 + $0x18] sm:$0xff]  ;;  %v13508_v25 = vsub.f32 %v5533_v12, %v13464_v22  ;;  %6668 = vmatpush.msrb.mxu2 %v13341_v56  ;;  %v5395_v12 = vmul.f32 %v5391_v44, %v13119_v1  ;;  %v13528_v38 = vand.u32 4294901760, %v5529_v61 }
 0x635   : > { %17633 = vst [vmem:[#allocation69_spill] sm:$0xff] %v13469_v10  ;;  %vm4813_vm5 = vcmp.ge.f32.partialorder %v13491_v60, %v17543_v30  ;;  %6103 = vmatmul.f32.gmra.mxu2 %v6102_v23  ;;  %6460 = vmatmul.f32.vlgmr.msra.gmra.mxu3 %v13163_v5  ;;  %vm4818_vm6 = vcmp.lt.f32.partialorder %v13491_v60, %v13288_v57  ;;  %v6581_v20 = vand.u32 4294901760, %v13485_v37  ;;  %v17649_v37 = vand.u32 4294901760, %v13456_v35 }
 0x636   : > { %17634 = vst [vmem:[#allocation70_spill] sm:$0xff] %v13471_v19  ;;  %v13502_v58 = vsub.f32 %v13491_v60, %v12419_v50  ;;  %6270 = vmatmul.f32.vlgmr.msra.gmra.mxu0 %v13178_v32  ;;  %6728 = vmatpush.msrb.mxu3 %v13258_v55  ;;  %v5559_v19 = vld [vmem:[#allocation9 + $0x1f8] sm:$0xff]  ;;  %v6575_v32 = vand.u32 4294901760, %v13449_v11  ;;  %v13518_v55 = vsub.f32 %v5531_v8, %v13476_v29  ;;  %vm13539_vm7 = vmand %vm4813_vm5, %vm4818_vm6 }
 0x637   : > { %17635 = vst [vmem:[#allocation71_spill] sm:$0xff] %v13476_v29  ;;  %6489 = vmatpush.msrb.mxu0 %v13343_v27  ;;  %v13520_v23 = vadd.f32 %v5256_v4, %v5247_v3  ;;  %6564 = vmatpush.msrb.mxu1 %v6563_v16  ;;  %v6586_v56 = vsub.f32 %v13436_v41, %v17643_v45  ;;  %v13545_v3 = vand.u32 4294901760, %v5528_v43  ;;  %v13548_v44 = vand.u32 4294901760, %v5559_v19 }
 0x638   : > { %17638 = vst [vmem:[#allocation44_spill] sm:$0xff] %v13491_v60  ;;  %6730 = vmatpush.msrb.mxu3 %v13260_v26  ;;  %v13531_v11 = vsub.f32 %v5530_v46, %v13487_v40  ;;  %6671 = vmatpush.msrb.mxu2 %v13346_v33  ;;  %v5039_v8 = vmul.f32 %v13502_v58, %v13049_v7  ;;  %v17648_v46 = vand.u32 4294901760, %v13236_v31  ;;  %v17650_v45 = vand.u32 4294901760, %v13467_v18 }
 0x639   : > { %17639 = vst [vmem:[#allocation72_spill] sm:$0xff] %v13502_v58  ;;  %6491 = vmatpush.msrb.mxu0 %v13390_v54  ;;  %v5404_v16 = vmul.f32 %v5400_v28, %v13520_v23  ;;  %v13558_v4 = vsub.f32 %v13456_v35, %v17649_v37  ;;  %v5047_v58 = vsub.f32 %v13288_v57, %v13491_v60  ;;  %v13574_v37 = vsel %vm13539_vm7, 1.0, %v17489_v49  ;;  %v17652_v60 = vld [vmem:[#allocation42_spill] sm:$0xff] }
 0x63a   : > { %17640 = vst [vmem:[#allocation73_spill] sm:$0xff] %v13512_v42  ;;  %6732 = vmatpush.msrb.mxu3 %v13302_v15  ;;  %6330 = vmatmul.f32.gmra.mxu1 %v17648_v46  ;;  %v13563_v26 = vsub.f32 %v13467_v18, %v17650_v45  ;;  %v6587_v45 = vand.u32 4294901760, %v6586_v56  ;;  %v5043_v28 = vmul.f32 %v13105_v24, %v5039_v8  ;;  %v5558_v24 = vld [vmem:[#allocation9 + $0x1f0] sm:$0xff] }
 0x63b   : > { %17641 = vst [vmem:[#allocation74_spill] sm:$0xff] %v13518_v55  ;;  %6570 = vmatpush.msrb.mxu1 %v6569_v0  ;;  %6674 = vmatpush.msrb.mxu2 %v13405_v36  ;;  %v5052_v0 = vmul.f32 %v13398_v21, %v5047_v58  ;;  %v5244_v46 = vmul.f32 %v17551_v51, %v17652_v60  ;;  %v6593_v8 = vand.u32 4294901760, %v13558_v4  ;;  %v17656_v4 = vand.u32 4294901760, %v13518_v55 }
 0x63c   : > { %17642 = vst [vmem:[#allocation75_spill] sm:$0xff] %v13520_v23  ;;  %v5408_v23 = vadd.f32 %v5404_v16, %v5395_v12  ;;  %6734 = vmatpush.msrb.mxu3 %v13304_v6  ;;  %6493 = vmatpush.msrb.mxu0 %v13412_v13  ;;  %v13585_v12 = vsub.f32 %v5529_v61, %v13528_v38  ;;  %v13619_v60 = vand.u32 4294901760, %v5558_v24 }
 0x63d   : > { %17646 = vst [vmem:[#allocation76_spill] sm:$0xff] %v13545_v3  ;;  %6411 = vmatmul.f32.vlgmr.msra.gmra.mxu2 %v13163_v5  ;;  %6464 = vmatmul.f32.gmra.mxu3 %v13223_v48  ;;  %v13589_v16 = vsub.f32 %v5528_v43, %v13545_v3  ;;  %v13592_v56 = vsub.f32 %v5559_v19, %v13548_v44  ;;  %v17654_v5 = vand.u32 4294901760, %v13508_v25  ;;  %v6599_v19 = vand.u32 4294901760, %v13563_v26 }
 0x63e   : > { %17647 = vst [vmem:[#allocation77_spill] sm:$0xff] %v13548_v44  ;;  %6275 = vmatmul.f32.gmra.mxu0 %v13236_v31  ;;  %6576 = vmatpush.msrb.mxu1 %v6575_v32  ;;  %v5056_v61 = vmul.f32 %v13574_v37, %v5052_v0  ;;  %v5253_v1 = vmul.f32 %v13353_v14, %v5047_v58  ;;  %v17655_v31 = vand.u32 4294901760, %v13512_v42  ;;  %v13611_v32 = vand.u32 4294901760, %v5408_v23  ;;  %v5557_v0 = vld [vmem:[#allocation9 + $0x1e8] sm:$0xff] }
 0x63f   : > { %17651 = vst [vmem:[#allocation78_spill] sm:$0xff] %v13574_v37  ;;  %v13599_v15 = vsub.f32 %v13508_v25, %v17654_v5  ;;  %6677 = vmatpush.msrb.mxu2 %v13436_v41  ;;  %6736 = vmatpush.msrb.mxu3 %v13343_v27  ;;  %v13616_v5 = vsub.f32 %v13518_v55, %v17656_v4  ;;  %v17659_v27 = vld [vmem:[#allocation54_spill] sm:$0xff]  ;;  %v17660_v4 = vand.u32 4294901760, %v13531_v11 }
 0x640   : > { %17653 = vst [vmem:[#allocation79_spill] sm:$0xff] %v13592_v56  ;;  %v13609_v43 = vsub.f32 %v13512_v42, %v17655_v31  ;;  %6495 = vmatpush.msrb.mxu0 %v13429_v59  ;;  %6582 = vmatpush.msrb.mxu1 %v6581_v20  ;;  %v13621_v37 = vadd.f32 %v5056_v61, %v5043_v28  ;;  %v5556_v61 = vld [vmem:[#allocation9 + $0x1e0] sm:$0xff] }
 0x641   : > { %17657 = vst [vmem:[#allocation80_spill] sm:$0xff] %v13619_v60  ;;  %v5248_v26 = vmul.f32 %v5244_v46, %v13137_v17  ;;  %v5392_v31 = vmul.f32 %v13070_v53, %v17659_v27  ;;  %6680 = vmatpush.msrb.mxu2 %v13456_v35  ;;  %6738 = vmatpush.msrb.mxu3 %v13390_v54  ;;  %v13639_v46 = vand.u32 4294901760, %v5557_v0  ;;  %v13641_v54 = vld [vmem:[#allocation3 + $0x8] sm:$0xff] }
 0x642   : > { %17658 = vst [vmem:[#allocation81_spill] sm:$0xff] %v13621_v37  ;;  %v13631_v6 = vsub.f32 %v13531_v11, %v17660_v4  ;;  %6497 = vmatpush.msrb.mxu0 %v13464_v22  ;;  %6588 = vmatpush.msrb.mxu1 %v6587_v45  ;;  %v5257_v17 = vmul.f32 %v5253_v1, %v13621_v37  ;;  %v6605_v4 = vand.u32 4294901760, %v13599_v15  ;;  %v6611_v28 = vand.u32 4294901760, %v13609_v43  ;;  %v5555_v43 = vld [vmem:[#allocation9 + $0x1d8] sm:$0xff] }
 0x643   : > { %v5401_v27 = vmul.f32 %v13461_v52, %v5047_v58  ;;  %17661 = vst [vmem:[#allocation54_spill] sm:$0xff] %v13639_v46  ;;  %vm4814_vm8 = vcmp.ge.f32.partialorder %v13641_v54, %v17543_v30  ;;  %6683 = vmatpush.msrb.mxu2 %v13467_v18  ;;  %6740 = vmatpush.msrb.mxu3 %v13412_v13  ;;  %v17663_v58 = vand.u32 4294901760, %v13279_v62  ;;  %v13663_v15 = vand.u32 4294901760, %v5556_v61 }
 0x644   : > { %17662 = vst [vmem:[#allocation82_spill] sm:$0xff] %v13641_v54  ;;  %v13650_v45 = vsub.f32 %v5408_v23, %v13611_v32  ;;  %vm4819_vm9 = vcmp.lt.f32.partialorder %v13641_v54, %v13288_v57  ;;  %6499 = vmatpush.msrb.mxu0 %v13469_v10  ;;  %v13657_v1 = vadd.f32 %v5257_v17, %v5248_v26  ;;  %v17667_v37 = vand.u32 4294901760, %v13585_v12 }
 0x645   : > { %6336 = vmatmul.f32.gmra.mxu1 %v17663_v58  ;;  %v5396_v41 = vmul.f32 %v5392_v31, %v13171_v39  ;;  %v13661_v20 = vsub.f32 %v5558_v24, %v13619_v60  ;;  %17666 = vst [vmem:[#allocation85_spill] sm:$0xff] %v13663_v15  ;;  %6415 = vmatmul.f32.gmra.mxu2 %v13223_v48  ;;  %v17668_v26 = vand.u32 4294901760, %v13589_v16  ;;  %vm13681_vm10 = vmand %vm4814_vm8, %vm4819_vm9  ;;  %v17672_v31 = vand.u32 4294901760, %v13592_v56  ;;  %v5551_v24 = vld [vmem:[#allocation9 + $0x1b8] sm:$0xff] }
 0x646   : > { %17664 = vst [vmem:[#allocation83_spill] sm:$0xff] %v13657_v1  ;;  %6468 = vmatmul.f32.gmra.mxu3 %v13265_v63  ;;  %v13671_v58 = vsub.f32 %v13585_v12, %v17667_v37  ;;  %v13687_v48 = vsub.f32 %v13641_v54, %v12419_v50  ;;  %6280 = vmatmul.f32.gmra.mxu0 %v13279_v62  ;;  %v13703_v62 = vand.u32 4294901760, %v5555_v43  ;;  %v13717_v13 = vsel %vm13681_vm10, 1.0, %v17489_v49 }
 0x647   : > { %17665 = vst [vmem:[#allocation84_spill] sm:$0xff] %v13661_v20  ;;  %v13676_v39 = vsub.f32 %v13589_v16, %v17668_v26  ;;  %6594 = vmatpush.msrb.mxu1 %v6593_v8  ;;  %v13694_v17 = vsub.f32 %v13592_v56, %v17672_v31  ;;  %v5405_v26 = vmul.f32 %v5401_v27, %v13657_v1  ;;  %v5554_v8 = vld [vmem:[#allocation9 + $0x1d0] sm:$0xff]  ;;  %v5553_v1 = vld [vmem:[#allocation9 + $0x1c8] sm:$0xff]  ;;  %v17679_v27 = vand.u32 4294901760, %v13650_v45 }
 0x648   : > { %17671 = vst [vmem:[#allocation86_spill] sm:$0xff] %v13687_v48  ;;  %v13698_v23 = vsub.f32 %v5557_v0, %v13639_v46  ;;  %6686 = vmatpush.msrb.mxu2 %v13508_v25  ;;  %6742 = vmatpush.msrb.mxu3 %v13429_v59  ;;  %v5040_v37 = vmul.f32 %v13687_v48, %v13049_v7  ;;  %v13731_v59 = vand.u32 4294901760, %v5554_v8  ;;  %v13740_v48 = vand.u32 4294901760, %v5553_v1 }
 0x649   : > { %17674 = vst [vmem:[#allocation88_spill] sm:$0xff] %v13703_v62  ;;  %v5048_v31 = vsub.f32 %v13288_v57, %v13641_v54  ;;  %6501 = vmatpush.msrb.mxu0 %v13476_v29  ;;  %6600 = vmatpush.msrb.mxu1 %v6599_v19  ;;  %v5409_v0 = vadd.f32 %v5405_v26, %v5396_v41 }
 0x64a   : > { %17673 = vst [vmem:[#allocation87_spill] sm:$0xff] %v13698_v23  ;;  %v13712_v56 = vsub.f32 %v5556_v61, %v13663_v15  ;;  %6689 = vmatpush.msrb.mxu2 %v13512_v42  ;;  %6744 = vmatpush.msrb.mxu3 %v13464_v22  ;;  %v5044_v19 = vmul.f32 %v13152_v47, %v5040_v37  ;;  %v5552_v22 = vld [vmem:[#allocation9 + $0x1c0] sm:$0xff] }
 0x64b   : > { %17676 = vst [vmem:[#allocation90_spill] sm:$0xff] %v13717_v13  ;;  %v5053_v41 = vmul.f32 %v13398_v21, %v5048_v31  ;;  %v5245_v61 = vmul.f32 %v17551_v51, %v13141_v34  ;;  %6503 = vmatpush.msrb.mxu0 %v13487_v40  ;;  %6606 = vmatpush.msrb.mxu1 %v6605_v4  ;;  %v13728_v26 = vand.u32 4294901760, %v5409_v0  ;;  %v13759_v42 = vand.u32 4294901760, %v5552_v22 }
 0x64c   : > { %17675 = vst [vmem:[#allocation89_spill] sm:$0xff] %v13712_v56  ;;  %6692 = vmatpush.msrb.mxu2 %v13518_v55  ;;  %6746 = vmatpush.msrb.mxu3 %v13469_v10  ;;  %v13736_v47 = vsub.f32 %v5555_v43, %v13703_v62  ;;  %v5254_v4 = vmul.f32 %v13353_v14, %v5048_v31  ;;  %v17680_v55 = vand.u32 4294901760, %v13661_v20  ;;  %v17686_v43 = vand.u32 4294901760, %v13698_v23 }
 0x64d   : > { %17677 = vst [vmem:[#allocation91_spill] sm:$0xff] %v13731_v59  ;;  %v5057_v37 = vmul.f32 %v13717_v13, %v5053_v41  ;;  %6505 = vmatpush.msrb.mxu0 %v13528_v38  ;;  %6612 = vmatpush.msrb.mxu1 %v6611_v28  ;;  %v6511_v34 = vsub.f32 %v13650_v45, %v17679_v27  ;;  %v17681_v28 = vld [vmem:[#allocation50_spill] sm:$0xff] }
 0x64e   : > { %17678 = vst [vmem:[#allocation92_spill] sm:$0xff] %v13736_v47  ;;  %v13749_v10 = vsub.f32 %v13661_v20, %v17680_v55  ;;  %v5393_v41 = vmul.f32 %v13070_v53, %v12804_v2  ;;  %6419 = vmatmul.f32.gmra.mxu2 %v13265_v63  ;;  %6472 = vmatmul.f32.gmra.mxu3 %v13318_v9  ;;  %v13761_v27 = vld [vmem:[#allocation3 + $0x10] sm:$0xff]  ;;  %v17682_v55 = vld [vmem:[#allocation41_spill] sm:$0xff] }
 0x64f   : > { %v13756_v13 = vadd.f32 %v5057_v37, %v5044_v19  ;;  %v5249_v54 = vmul.f32 %v5245_v61, %v17681_v28  ;;  %vm4815_vm11 = vcmp.ge.f32.partialorder %v13761_v27, %v17543_v30  ;;  %6285 = vmatmul.f32.gmra.mxu0 %v17682_v55  ;;  %6695 = vmatpush.msrb.mxu2 %v13531_v11  ;;  %v13773_v19 = vand.u32 4294901760, %v5551_v24 }
 0x650   : > { %v13768_v2 = vsub.f32 %v5409_v0, %v13728_v26  ;;  %v13771_v63 = vsub.f32 %v5554_v8, %v13731_v59  ;;  %vm4820_vm12 = vcmp.lt.f32.partialorder %v13761_v27, %v13288_v57  ;;  %6748 = vmatpush.msrb.mxu3 %v13476_v29  ;;  %6507 = vmatpush.msrb.mxu0 %v13545_v3  ;;  %v17685_v8 = vand.u32 4294901760, %v17682_v55 }
 0x651   : > { %v5258_v37 = vmul.f32 %v5254_v4, %v13756_v13  ;;  %v5402_v28 = vmul.f32 %v13461_v52, %v5048_v31  ;;  %v13783_v0 = vsub.f32 %v5553_v1, %v13740_v48  ;;  %6698 = vmatpush.msrb.mxu2 %v13585_v12  ;;  %v13791_v20 = vsub.f32 %v13698_v23, %v17686_v43  ;;  %v17688_v4 = vld [vmem:[#allocation51_spill] sm:$0xff]  ;;  %vm13803_vm13 = vmand %vm4815_vm11, %vm4820_vm12 }
 0x652   : > { %17683 = vst [vmem:[#allocation50_spill] sm:$0xff] %v13771_v63  ;;  %6342 = vmatmul.f32.gmra.mxu1 %v17685_v8  ;;  %v17687_v29 = vand.u32 4294901760, %v13712_v56  ;;  %v5397_v1 = vmul.f32 %v5393_v41, %v17688_v4  ;;  %v6512_v8 = vand.u32 4294901760, %v6511_v34  ;;  %v17691_v43 = vand.u32 4294901760, %v13616_v5  ;;  %6750 = vmatpush.msrb.mxu3 %v13487_v40  ;;  %v17694_v4 = vld [vmem:[#allocation57_spill] sm:$0xff] }
 0x653   : > { %17684 = vst [vmem:[#allocation41_spill] sm:$0xff] %v13783_v0  ;;  %v13810_v23 = vadd.f32 %v5258_v37, %v5249_v54  ;;  %v13817_v41 = vsub.f32 %v13761_v27, %v12419_v50  ;;  %v17695_v31 = vand.u32 4294901760, %v17694_v4  ;;  %6701 = vmatpush.msrb.mxu2 %v13589_v16  ;;  %v5049_v54 = vsub.f32 %v13288_v57, %v13761_v27  ;;  %v17699_v4 = vld [vmem:[#allocation38_spill] sm:$0xff]  ;;  %v17701_v37 = vld [vmem:[#allocation45_spill] sm:$0xff] }
 0x654   : > { %v13796_v61 = vsub.f32 %v13712_v56, %v17687_v29  ;;  %6618 = vmatpush.msrb.mxu1 %v17691_v43  ;;  %v13813_v29 = vsub.f32 %v5552_v22, %v13759_v42  ;;  %v13825_v43 = vsub.f32 %v5551_v24, %v13773_v19  ;;  %v17697_v22 = vand.u32 4294901760, %v13631_v6  ;;  %6752 = vmatpush.msrb.mxu3 %v13528_v38  ;;  %v5550_v56 = vld [vmem:[#allocation9 + $0x1b0] sm:$0xff] }
 0x655   : > { %17693 = vst [vmem:[#allocation93_spill] sm:$0xff] %v13817_v41  ;;  %6783 = vmatpush.msra.mxu0 %v17695_v31  ;;  %v5406_v50 = vmul.f32 %v5402_v28, %v13810_v23  ;;  %v13837_v31 = vsel %vm13803_vm13, 1.0, %v17489_v49  ;;  %v5041_v24 = vmul.f32 %v13817_v41, %v13049_v7  ;;  %v17700_v5 = vand.u32 4294901760, %v17699_v4  ;;  %6911 = vmatpush.msra.mxu2 %v13548_v44 }
 0x656   : > { %17692 = vst [vmem:[#allocation51_spill] sm:$0xff] %v13813_v29  ;;  %6624 = vmatpush.msrb.mxu1 %v17697_v22  ;;  %v6985_v6 = vand.u32 4294901760, %v13749_v10  ;;  %v5054_v28 = vmul.f32 %v13398_v21, %v5049_v54  ;;  %v5246_v34 = vmul.f32 %v17551_v51, %v17701_v37  ;;  %6423 = vmatmul.f32.gmra.mxu2 %v13318_v9  ;;  %v17702_v55 = vand.u32 4294901760, %v13671_v58  ;;  %v17704_v22 = vld [vmem:[#allocation43_spill] sm:$0xff] }
 0x657   : > { %17696 = vst [vmem:[#allocation57_spill] sm:$0xff] %v13825_v43  ;;  %6787 = vmatpush.msra.mxu0 %v17700_v5  ;;  %v17703_v7 = vand.u32 4294901760, %v13736_v47  ;;  %v5410_v4 = vadd.f32 %v5406_v50, %v5397_v1  ;;  %v5045_v44 = vmul.f32 %v17704_v22, %v5041_v24  ;;  %6754 = vmatpush.msrb.mxu3 %v13545_v3  ;;  %v17705_v51 = vand.u32 4294901760, %v13768_v2  ;;  %v5548_v1 = vld [vmem:[#allocation9 + $0x1a0] sm:$0xff]  ;;  %v5547_v3 = vld [vmem:[#allocation9 + $0x198] sm:$0xff] }
 0x658   : > { %17698 = vst [vmem:[#allocation94_spill] sm:$0xff] %v13837_v31  ;;  %6630 = vmatpush.msrb.mxu1 %v17702_v55  ;;  %6513 = vmatmul.f32.vlgmr.msrb.gmra.mxu0 %v6512_v8  ;;  %v6997_v58 = vand.u32 4294901760, %v13796_v61  ;;  %v5058_v55 = vmul.f32 %v13837_v31, %v5054_v28  ;;  %v17706_v50 = vld [vmem:[#allocation52_spill] sm:$0xff]  ;;  %v17708_v24 = vand.u32 4294901760, %v13676_v39  ;;  %v17709_v22 = vand.u32 4294901760, %v13771_v63 }
 0x659   : > { %v13855_v5 = vsub.f32 %v13736_v47, %v17703_v7  ;;  %v6519_v9 = vsub.f32 %v13768_v2, %v17705_v51  ;;  %v5255_v7 = vmul.f32 %v13353_v14, %v5049_v54  ;;  %v5549_v47 = vld [vmem:[#allocation9 + $0x1a8] sm:$0xff]  ;;  %v17707_v10 = vand.u32 4294901760, %v17706_v50  ;;  %6913 = vmatpush.msra.mxu2 %v13619_v60 }
 0x65a   : > { %6636 = vmatpush.msrb.mxu1 %v17708_v24  ;;  %v13870_v8 = vand.u32 4294901760, %v5410_v4  ;;  %v13875_v51 = vsub.f32 %v13771_v63, %v17709_v22  ;;  %v17710_v61 = vand.u32 4294901760, %v13783_v0  ;;  %v13886_v39 = vand.u32 4294901760, %v5550_v56  ;;  %v17712_v24 = vld [vmem:[#allocation53_spill] sm:$0xff] }
 0x65b   : > { %6791 = vmatpush.msra.mxu0 %v17707_v10  ;;  %v17711_v10 = vand.u32 4294901760, %v13650_v45  ;;  %v13888_v50 = vadd.f32 %v5058_v55, %v5045_v44  ;;  %v5250_v22 = vmul.f32 %v5246_v34, %v17712_v24  ;;  %v17713_v63 = vld [vmem:[#allocation37_spill] sm:$0xff]  ;;  %v13905_v44 = vand.u32 4294901760, %v5549_v47  ;;  %6638 = vmatmul.f32.vlgmr.msrb.gmra.mxu1 %v13611_v32 }
 0x65c   : > { %v13880_v28 = vsub.f32 %v13783_v0, %v17710_v61  ;;  %v5394_v41 = vmul.f32 %v13070_v53, %v17713_v63  ;;  %v17714_v61 = vand.u32 4294901760, %v13694_v17  ;;  %v17715_v0 = vld [vmem:[#allocation39_spill] sm:$0xff]  ;;  %v13898_v31 = vsub.f32 %v5410_v4, %v13870_v8  ;;  %6915 = vmatpush.msra.mxu2 %v13639_v46  ;;  %v17725_v46 = vld [vmem:[#allocation33_spill] sm:$0xff] }
 0x65d   : > { %6758 = vmatmul.f32.vlgmr.msrb.gmra.mxu3 %v17711_v10  ;;  %v17716_v37 = vand.u32 4294901760, %v17715_v0  ;;  %v17717_v10 = vand.u32 4294901760, %v13813_v29  ;;  %v13907_v34 = vand.u32 4294901760, %v5548_v1  ;;  %v6520_v55 = vand.u32 4294901760, %v6519_v9  ;;  %v5546_v0 = vld [vmem:[#allocation9 + $0x190] sm:$0xff]  ;;  %v5545_v9 = vld [vmem:[#allocation9 + $0x188] sm:$0xff] }
 0x65e   : > { %6980 = vmatpush.msra.mxu3 %v17714_v61  ;;  %v5259_v53 = vmul.f32 %v5255_v7, %v13888_v50  ;;  %v5403_v17 = vmul.f32 %v13461_v52, %v5049_v54  ;;  %v13913_v63 = vand.u32 4294901760, %v5547_v3  ;;  %v7003_v4 = vand.u32 4294901760, %v13855_v5  ;;  %v17720_v7 = vld [vmem:[#allocation58_spill] sm:$0xff]  ;;  %6917 = vmatpush.msra.mxu2 %v13663_v15  ;;  %v17744_v15 = vld [vmem:[#allocation67_spill] sm:$0xff] }
 0x65f   : > { %6795 = vmatpush.msra.mxu0 %v17716_v37  ;;  %v13903_v60 = vsub.f32 %v13813_v29, %v17717_v10  ;;  %v17718_v37 = vld [vmem:[#allocation47_spill] sm:$0xff]  ;;  %v17719_v61 = vand.u32 4294901760, %v13825_v43  ;;  %v17721_v29 = vand.u32 4294901760, %v17720_v7  ;;  %v13932_v24 = vsub.f32 %v5550_v56, %v13886_v39  ;;  %6704 = vmatmul.f32.vlgmr.msrb.gmra.mxu2 %v13650_v45 }
 0x660   : > { %6862 = vmatpush.msra.mxu1 %v17718_v37  ;;  %6986 = vmatpush.msra.mxu3 %v6985_v6  ;;  %v13928_v37 = vadd.f32 %v5259_v53, %v5250_v22  ;;  %v17723_v6 = vld [vmem:[#allocation55_spill] sm:$0xff]  ;;  %v13941_v54 = vsub.f32 %v5549_v47, %v13905_v44  ;;  %v13943_v22 = vand.u32 4294901760, %v5546_v0  ;;  %v17728_v56 = vand.u32 4294901760, %v13791_v20  ;;  %v17730_v53 = vld [vmem:[#allocation64_spill] sm:$0xff] }
 0x661   : > { %v13922_v10 = vsub.f32 %v13825_v43, %v17719_v61  ;;  %6799 = vmatpush.msra.mxu0 %v17721_v29  ;;  %v5398_v5 = vmul.f32 %v5394_v41, %v17723_v6  ;;  %17724 = vst [vmem:[#allocation43_spill] sm:$0xff] %v13932_v24  ;;  %v17726_v61 = vand.u32 4294901760, %v13898_v31  ;;  %v13949_v45 = vsub.f32 %v5548_v1, %v13907_v34  ;;  %v17733_v20 = vld [vmem:[#allocation35_spill] sm:$0xff] }
 0x662   : > { %17722 = vst [vmem:[#allocation38_spill] sm:$0xff] %v13928_v37  ;;  %6864 = vmatpush.msra.mxu1 %v17725_v46  ;;  %6521 = vmatmul.f32.gmra.mxu0 %v6520_v55  ;;  %v5407_v41 = vmul.f32 %v5403_v17, %v13928_v37  ;;  %v13952_v46 = vsub.f32 %v5547_v3, %v13913_v63  ;;  %v13955_v6 = vperm.slane %v17730_v53, 6  ;;  %v17731_v47 = vand.u32 4294901760, %v13346_v33  ;;  %v17734_v17 = vld [vmem:[#allocation63_spill] sm:$0xff]  ;;  %v17739_v33 = vld [vmem:[#allocation34_spill] sm:$0xff] }
 0x663   : > { %v6527_v29 = vsub.f32 %v13898_v31, %v17726_v61  ;;  %17727 = vst [vmem:[#allocation52_spill] sm:$0xff] %v13941_v54  ;;  %6992 = vmatpush.msra.mxu3 %v17728_v56  ;;  %v17732_v61 = vld [vmem:[#allocation56_spill] sm:$0xff]  ;;  %v13960_v55 = vand.u32 4294901760, %v5545_v9  ;;  %vm4833_vm14 = vcmp.ge.f32.partialorder %v17733_v20, %v13288_v57  ;;  %vm4838_vm15 = vcmp.lt.f32.partialorder %v17733_v20, %v17734_v17 }
 0x664   : > { %17729 = vst [vmem:[#allocation53_spill] sm:$0xff] %v13952_v46  ;;  %6803 = vmatpush.msra.mxu0 %v17731_v47  ;;  %6866 = vmatpush.msra.mxu1 %v17732_v61  ;;  %v13968_v3 = vsub.f32 %v17733_v20, %v17543_v30  ;;  %v5411_v1 = vadd.f32 %v5407_v41, %v5398_v5  ;;  %vm4842_vm0 = vmand %vm4833_vm14, %vm4838_vm15  ;;  %v17737_v47 = vand.u32 4294901760, %v13405_v36  ;;  %v17738_v61 = vand.u32 4294901760, %v13768_v2 }
 0x665   : > { %6919 = vmatpush.msra.mxu2 %v13703_v62  ;;  %6998 = vmatpush.msra.mxu3 %v6997_v58  ;;  %v5075_v56 = vsub.f32 %v17734_v17, %v17733_v20  ;;  %v13976_v53 = vsub.f32 %v17733_v20, %v13288_v57  ;;  %v6528_v7 = vand.u32 4294901760, %v6527_v29  ;;  %v9308_v5 = vsel %vm4842_vm0, 1.0, %v17489_v49  ;;  %v17741_v58 = vld [vmem:[#allocation68_spill] sm:$0xff] }
 0x666   : > { %17735 = vst [vmem:[#allocation37_spill] sm:$0xff] %v13968_v3  ;;  %6807 = vmatpush.msra.mxu0 %v17737_v47  ;;  %6764 = vmatmul.f32.gmra.mxu3 %v17738_v61  ;;  %v5067_v41 = vmul.f32 %v13968_v3, %v13398_v21  ;;  %v13988_v20 = vand.u32 4294901760, %v5411_v1  ;;  %v17740_v61 = vld [vmem:[#allocation61_spill] sm:$0xff]  ;;  %v17742_v43 = vand.u32 4294901760, %v17741_v58  ;;  %v7027_v3 = vand.u32 4294901760, %v13922_v10 }
 0x667   : > { %17736 = vst [vmem:[#allocation39_spill] sm:$0xff] %v13976_v53  ;;  %6868 = vmatpush.msra.mxu1 %v17739_v33  ;;  %6921 = vmatpush.msra.mxu2 %v13731_v59  ;;  %v5080_v36 = vmul.f32 %v13955_v6, %v5075_v56  ;;  %v5096_v47 = vmul.f32 %v13976_v53, %v13955_v6  ;;  %v17743_v59 = vld [vmem:[#allocation66_spill] sm:$0xff]  ;;  %v17748_v10 = vand.u32 4294901760, %v13932_v24  ;;  %v17749_v58 = vand.u32 4294901760, %v13941_v54 }
 0x668   : > { %v5264_v29 = vmul.f32 %v13353_v14, %v17740_v61  ;;  %7004 = vmatpush.msra.mxu3 %v7003_v4  ;;  %6811 = vmatpush.msra.mxu0 %v17742_v43  ;;  %v13999_v33 = vsub.f32 %v5546_v0, %v13943_v22  ;;  %v5071_v62 = vmul.f32 %v17743_v59, %v5067_v41  ;;  %v14013_v43 = vld [vmem:[%s16864_s9 + $0x18] sm:$0xff]  ;;  %v17747_v59 = vld [vmem:[#allocation62_spill] sm:$0xff]  ;;  %v17754_v41 = vand.u32 4294901760, %v13456_v35 }
 0x669   : > { %v5273_v37 = vmul.f32 %v17744_v15, %v5075_v56  ;;  %6642 = vmatmul.f32.gmra.mxu1 %v13728_v26  ;;  %6923 = vmatpush.msra.mxu2 %v13740_v48  ;;  %v14006_v53 = vsub.f32 %v5411_v1, %v13988_v20  ;;  %v5084_v4 = vmul.f32 %v9308_v5, %v5080_v36  ;;  %v14016_v0 = vperm.slane %v14013_v43, 2  ;;  %v5544_v36 = vld [vmem:[#allocation9 + $0x180] sm:$0xff] }
 0x66a   : > { %v14008_v61 = vmul.f32 %v9308_v5, %v5096_v47  ;;  %17746 = vst [vmem:[#allocation58_spill] sm:$0xff] %v14013_v43  ;;  %6709 = vmatmul.f32.gmra.mxu2 %v13768_v2  ;;  %6870 = vmatpush.msra.mxu1 %v17747_v59  ;;  %v14023_v1 = vsub.f32 %v13932_v24, %v17748_v10  ;;  %v14034_v43 = vpop.f32.mrf.mxu1  ;;  %v17751_v2 = vand.u32 4294901760, %v13875_v51  ;;  %v17758_v51 = vand.u32 4294901760, %v13880_v28 }
 0x66b   : > { %v14028_v5 = vsub.f32 %v13941_v54, %v17749_v58  ;;  %v14032_v47 = vsub.f32 %v5545_v9, %v13960_v55  ;;  %17750 = vst [vmem:[#allocation55_spill] sm:$0xff] %v14034_v43  ;;  %6529 = vmatmul.f32.gmra.mxu0 %v6528_v7  ;;  %v17117_v59 = vand.u32 4294901760, %v14006_v53  ;;  %v14039_v10 = vadd.f32 %v5084_v4, %v5071_v62  ;;  %v17753_v58 = vld [vmem:[#allocation46_spill] sm:$0xff]  ;;  %v17755_v9 = vld [vmem:[#allocation36_spill] sm:$0xff] }
 0x66c   : > { %17745 = vst [vmem:[#allocation47_spill] sm:$0xff] %v14008_v61  ;;  %7010 = vmatpush.msra.mxu3 %v17751_v2  ;;  %v17752_v61 = vld [vmem:[#allocation70_spill] sm:$0xff]  ;;  %v5412_v54 = vmul.f32 %v13461_v52, %v17753_v58  ;;  %6815 = vmatpush.msra.mxu0 %v17754_v41  ;;  %v17756_v7 = vld [vmem:[#allocation44_spill] sm:$0xff]  ;;  %v5421_v4 = vmul.f32 %v14016_v0, %v5075_v56  ;;  %v17759_v41 = vand.u32 4294901760, %v13467_v18  ;;  %v17760_v2 = vld [vmem:[#allocation59_spill] sm:$0xff]  ;;  %v17761_v58 = vand.u32 4294901760, %v13949_v45 }
 0x66d   : > { %v5268_v24 = vmul.f32 %v5264_v29, %v17752_v61  ;;  %6872 = vmatpush.msra.mxu1 %v17755_v9  ;;  %vm4834_vm1 = vcmp.ge.f32.partialorder %v17756_v7, %v13288_v57  ;;  %vm4839_vm2 = vcmp.lt.f32.partialorder %v17756_v7, %v17734_v17  ;;  %v14054_v62 = vsub.f32 %v17756_v7, %v17543_v30 }
 0x66e   : > { %6925 = vmatpush.msra.mxu2 %v13759_v42  ;;  %7016 = vmatpush.msra.mxu3 %v17758_v51  ;;  %v6535_v35 = vsub.f32 %v14006_v53, %v17117_v59  ;;  %v14062_v61 = vand.u32 4294901760, %v5544_v36  ;;  %v5277_v29 = vmul.f32 %v5273_v37, %v14039_v10  ;;  %vm4843_vm3 = vmand %vm4834_vm1, %vm4839_vm2  ;;  %v14072_v28 = vsub.f32 %v13949_v45, %v17761_v58 }
 0x66f   : > { %17757 = vst [vmem:[#allocation33_spill] sm:$0xff] %v14054_v62  ;;  %6819 = vmatpush.msra.mxu0 %v17759_v41  ;;  %6874 = vmatpush.msra.mxu1 %v17760_v2  ;;  %v5068_v51 = vmul.f32 %v14054_v62, %v13398_v21  ;;  %v5076_v37 = vsub.f32 %v17734_v17, %v17756_v7  ;;  %v17762_v18 = vand.u32 4294901760, %v13903_v60  ;;  %v17764_v41 = vld [vmem:[#allocation75_spill] sm:$0xff]  ;;  %v9309_v58 = vsel %vm4843_vm3, 1.0, %v17489_v49 }
 0x670   : > { %6927 = vmatpush.msra.mxu2 %v13773_v19  ;;  %v14082_v56 = vadd.f32 %v5277_v29, %v5268_v24  ;;  %v5416_v2 = vmul.f32 %v5412_v54, %v17764_v41  ;;  %v14088_v59 = vsub.f32 %v17756_v7, %v13288_v57  ;;  %v17766_v9 = vand.u32 4294901760, %v13508_v25  ;;  %v17769_v29 = vld [vmem:[#allocation78_spill] sm:$0xff]  ;;  %v17770_v41 = vld [vmem:[#allocation60_spill] sm:$0xff] }
 0x671   : > { %7022 = vmatpush.msra.mxu3 %v17762_v18  ;;  %v17767_v43 = vand.u32 4294901760, %v13898_v31  ;;  %v6536_v62 = vand.u32 4294901760, %v6535_v35  ;;  %v17768_v60 = vand.u32 4294901760, %v13952_v46  ;;  %v5072_v54 = vmul.f32 %v17769_v29, %v5068_v51  ;;  %6876 = vmatpush.msra.mxu1 %v17770_v41 }
 0x672   : > { %17763 = vst [vmem:[#allocation64_spill] sm:$0xff] %v14082_v56  ;;  %6823 = vmatpush.msra.mxu0 %v17766_v9  ;;  %v5081_v18 = vmul.f32 %v13955_v6, %v5076_v37  ;;  %6929 = vmatpush.msra.mxu2 %v13886_v39  ;;  %v7033_v25 = vand.u32 4294901760, %v14023_v1  ;;  %v5425_v7 = vmul.f32 %v5421_v4, %v14082_v56  ;;  %v14111_v9 = vpop.f32.mrf.mxu0  ;;  %v17773_v1 = vld [vmem:[#allocation73_spill] sm:$0xff] }
 0x673   : > { %17765 = vst [vmem:[#allocation56_spill] sm:$0xff] %v14088_v59  ;;  %6770 = vmatmul.f32.gmra.mxu3 %v17767_v43  ;;  %v14097_v24 = vsub.f32 %v13952_v46, %v17768_v60  ;;  %v14106_v43 = vsub.f32 %v5544_v36, %v14062_v61  ;;  %v5097_v35 = vmul.f32 %v14088_v59, %v13955_v6  ;;  %v17772_v60 = vld [vmem:[#allocation72_spill] sm:$0xff]  ;;  %v17774_v46 = vand.u32 4294901760, %v17773_v1 }
 0x674   : > { %6714 = vmatmul.f32.gmra.mxu2 %v13898_v31  ;;  %7028 = vmatpush.msra.mxu3 %v7027_v3  ;;  %17771 = vst [vmem:[#allocation35_spill] sm:$0xff] %v14111_v9  ;;  %v5085_v51 = vmul.f32 %v9309_v58, %v5081_v18  ;;  %v5265_v29 = vmul.f32 %v13353_v14, %v17772_v60  ;;  %v7039_v36 = vand.u32 4294901760, %v14028_v5  ;;  %v17775_v31 = vld [vmem:[#allocation42_spill] sm:$0xff]  ;;  %v17776_v18 = vld [vmem:[#allocation65_spill] sm:$0xff]  ;;  %v17777_v60 = vand.u32 4294901760, %v13999_v33 }
 0x675   : > { %v5274_v41 = vmul.f32 %v17744_v15, %v5076_v37  ;;  %6827 = vmatpush.msra.mxu0 %v17774_v46  ;;  %6646 = vmatmul.f32.gmra.mxu1 %v13870_v8  ;;  %v5429_v4 = vadd.f32 %v5425_v7, %v5416_v2  ;;  %v14120_v59 = vmul.f32 %v9309_v58, %v5097_v35  ;;  %v17127_v46 = vand.u32 4294901760, %v14032_v47  ;;  %v17779_v9 = vld [vmem:[#allocation81_spill] sm:$0xff]  ;;  %v14134_v2 = vpop.f32.mrf.mxu1  ;;  %v14140_v7 = vpop.f32.mrf.mxu3 }
 0x676   : > { %v5413_v3 = vmul.f32 %v13461_v52, %v17775_v31  ;;  %6537 = vmatmul.f32.gmra.mxu0 %v6536_v62  ;;  %6878 = vmatpush.msra.mxu1 %v17776_v18  ;;  %v14128_v56 = vsub.f32 %v13999_v33, %v17777_v60  ;;  %v14131_v1 = vadd.f32 %v5085_v51, %v5072_v54  ;;  %v7045_v62 = vand.u32 4294901760, %v14072_v28  ;;  %v17781_v60 = vld [vmem:[#allocation82_spill] sm:$0xff]  ;;  %v17786_v18 = vld [vmem:[#allocation83_spill] sm:$0xff] }
 0x677   : > { %v5269_v5 = vmul.f32 %v5265_v29, %v17779_v9  ;;  %6931 = vmatpush.msra.mxu2 %v13905_v44  ;;  %7034 = vmatpush.msra.mxu3 %v7033_v25  ;;  %v14138_v58 = vand.u32 4294901760, %v5429_v4  ;;  %17780 = vst [vmem:[#allocation34_spill] sm:$0xff] %v14140_v7  ;;  %v5422_v35 = vmul.f32 %v14016_v0, %v5076_v37  ;;  %v17782_v54 = vld [vmem:[#allocation74_spill] sm:$0xff]  ;;  %v17784_v9 = vld [vmem:[#allocation48_spill] sm:$0xff]  ;;  %v7051_v29 = vand.u32 4294901760, %v14097_v24 }
 0x678   : > { %17778 = vst [vmem:[#allocation63_spill] sm:$0xff] %v14131_v1  ;;  %vm4835_vm4 = vcmp.ge.f32.partialorder %v17781_v60, %v13288_v57  ;;  %v17783_v51 = vand.u32 4294901760, %v17782_v54  ;;  %6880 = vmatpush.msra.mxu1 %v17784_v9  ;;  %v5278_v25 = vmul.f32 %v5274_v41, %v14131_v1  ;;  %vm4840_vm5 = vcmp.lt.f32.partialorder %v17781_v60, %v17734_v17 }
 0x679   : > { %v14154_v28 = vsub.f32 %v17781_v60, %v17543_v30  ;;  %6933 = vmatpush.msra.mxu2 %v13907_v34  ;;  %7040 = vmatpush.msra.mxu3 %v7039_v36  ;;  %v14158_v37 = vsub.f32 %v5429_v4, %v14138_v58  ;;  %v5417_v54 = vmul.f32 %v5413_v3, %v17786_v18  ;;  %vm4844_vm6 = vmand %vm4835_vm4, %vm4840_vm5  ;;  %v17787_v41 = vand.u32 4294901760, %v13531_v11  ;;  %v17794_v3 = vld [vmem:[#allocation69_spill] sm:$0xff] }
 0x67a   : > { %6831 = vmatpush.msra.mxu0 %v17783_v51  ;;  %v5077_v24 = vsub.f32 %v17734_v17, %v17781_v60  ;;  %v17788_v51 = vld [vmem:[#allocation40_spill] sm:$0xff]  ;;  %v14167_v9 = vadd.f32 %v5278_v25, %v5269_v5  ;;  %v9310_v36 = vsel %vm4844_vm6, 1.0, %v17489_v49  ;;  %v14174_v31 = vsub.f32 %v17781_v60, %v13288_v57  ;;  %v17790_v25 = vld [vmem:[#allocation86_spill] sm:$0xff] }
 0x67b   : > { %17785 = vst [vmem:[#allocation68_spill] sm:$0xff] %v14154_v28  ;;  %6882 = vmatpush.msra.mxu1 %v17788_v51  ;;  %v5069_v4 = vmul.f32 %v14154_v28, %v13398_v21  ;;  %6935 = vmatpush.msra.mxu2 %v13913_v63  ;;  %v7062_v11 = vsub.f32 %v14032_v47, %v17127_v46  ;;  %v17792_v51 = vld [vmem:[#allocation90_spill] sm:$0xff]  ;;  %v17793_v46 = vand.u32 4294901760, %v14006_v53  ;;  %v7057_v7 = vand.u32 4294901760, %v14128_v56 }
 0x67c   : > { %6835 = vmatpush.msra.mxu0 %v17787_v41  ;;  %17789 = vst [vmem:[#allocation66_spill] sm:$0xff] %v14174_v31  ;;  %7046 = vmatpush.msra.mxu3 %v7045_v62  ;;  %v5082_v5 = vmul.f32 %v13955_v6, %v5077_v24  ;;  %v5266_v18 = vmul.f32 %v13353_v14, %v17790_v25  ;;  %v17791_v41 = vand.u32 4294901760, %v13585_v12  ;;  %v17795_v25 = vand.u32 4294901760, %v14158_v37 }
 0x67d   : > { %6719 = vmatmul.f32.gmra.mxu2 %v14006_v53  ;;  %v5426_v60 = vmul.f32 %v5422_v35, %v14167_v9  ;;  %v5073_v62 = vmul.f32 %v17792_v51, %v5069_v4  ;;  %v5098_v28 = vmul.f32 %v14174_v31, %v13955_v6  ;;  %6776 = vmatmul.f32.gmra.mxu3 %v17793_v46  ;;  %v17796_v12 = vand.u32 4294901760, %v14106_v43  ;;  %v14202_v4 = vpop.f32.mrf.mxu0  ;;  %v14210_v51 = vpop.f32.mrf.mxu2 }
 0x67e   : > { %6839 = vmatpush.msra.mxu0 %v17791_v41  ;;  %6884 = vmatpush.msra.mxu1 %v17794_v3  ;;  %v6945_v1 = vsub.f32 %v14158_v37, %v17795_v25  ;;  %v5086_v41 = vmul.f32 %v9310_v36, %v5082_v5  ;;  %v5275_v3 = vmul.f32 %v17744_v15, %v5077_v24  ;;  %v17798_v56 = vand.u32 4294901760, %v13589_v16  ;;  %v14221_v16 = vpop.f32.mrf.mxu1 }
 0x67f   : > { %v7068_v35 = vsub.f32 %v14106_v43, %v17796_v12  ;;  %6937 = vmatpush.msra.mxu2 %v13943_v22  ;;  %7052 = vmatpush.msra.mxu3 %v7051_v29  ;;  %v5430_v53 = vadd.f32 %v5426_v60, %v5417_v54  ;;  %v14204_v46 = vmul.f32 %v9310_v36, %v5098_v28  ;;  %v7063_v25 = vand.u32 4294901760, %v7062_v11  ;;  %v17800_v29 = vld [vmem:[#allocation49_spill] sm:$0xff]  ;;  %v17801_v28 = vld [vmem:[#allocation71_spill] sm:$0xff] }
 0x680   : > { %6843 = vmatpush.msra.mxu0 %v17798_v56  ;;  %6650 = vmatmul.f32.gmra.mxu1 %v13988_v20  ;;  %v14212_v12 = vadd.f32 %v5086_v41, %v5073_v62  ;;  %v5270_v5 = vmul.f32 %v5266_v18, %v13756_v13  ;;  %v5414_v31 = vmul.f32 %v13461_v52, %v17800_v29  ;;  %v6946_v36 = vand.u32 4294901760, %v6945_v1  ;;  %v14232_v18 = vpop.f32.mrf.mxu3  ;;  %v17803_v41 = vld [vmem:[#allocation79_spill] sm:$0xff] }
 0x681   : > { %17797 = vst [vmem:[#allocation67_spill] sm:$0xff] %v14204_v46  ;;  %6845 = vmatmul.f32.vlgmr.msra.gmra.mxu0 %v13611_v32  ;;  %6886 = vmatpush.msra.mxu1 %v17801_v28  ;;  %v14219_v54 = vand.u32 4294901760, %v5430_v53  ;;  %vm4836_vm7 = vcmp.ge.f32.partialorder %v13761_v27, %v13288_v57  ;;  %vm4841_vm8 = vcmp.lt.f32.partialorder %v13761_v27, %v17734_v17  ;;  %v7069_v11 = vand.u32 4294901760, %v7068_v35  ;;  %v17856_v46 = vld [vmem:[#allocation61_spill] sm:$0xff] }
 0x682   : > { %17799 = vst [vmem:[#allocation62_spill] sm:$0xff] %v14212_v12  ;;  %v14229_v13 = vsub.f32 %v13761_v27, %v17543_v30  ;;  %6939 = vmatpush.msra.mxu2 %v13960_v55  ;;  %7058 = vmatpush.msra.mxu3 %v7057_v7  ;;  %v5279_v60 = vmul.f32 %v5275_v3, %v14212_v12  ;;  %vm4845_vm9 = vmand %vm4836_vm7, %vm4841_vm8  ;;  %v17807_v3 = vld [vmem:[#allocation94_spill] sm:$0xff] }
 0x683   : > { %v5423_v62 = vmul.f32 %v14016_v0, %v5077_v24  ;;  %7090 = vmatpush.msrb.mxu0 %v17803_v41  ;;  %6888 = vmatpush.msra.mxu1 %v13487_v40  ;;  %v14239_v56 = vsub.f32 %v5430_v53, %v14219_v54  ;;  %v5078_v1 = vsub.f32 %v17734_v17, %v13761_v27  ;;  %v9311_v35 = vsel %vm4845_vm9, 1.0, %v17489_v49  ;;  %v17806_v53 = vld [vmem:[#allocation84_spill] sm:$0xff] }
 0x684   : > { %17802 = vst [vmem:[#allocation70_spill] sm:$0xff] %v14229_v13  ;;  %v5070_v30 = vmul.f32 %v14229_v13, %v13398_v21  ;;  %6941 = vmatpush.msra.mxu2 %v14062_v61  ;;  %7064 = vmatpush.msra.mxu3 %v7063_v25  ;;  %v14246_v7 = vadd.f32 %v5279_v60, %v5270_v5  ;;  %v17808_v5 = vld [vmem:[#allocation93_spill] sm:$0xff] }
 0x685   : > { %v5418_v24 = vmul.f32 %v5414_v31, %v13810_v23  ;;  %v14252_v40 = vsub.f32 %v13761_v27, %v13288_v57  ;;  %7093 = vmatpush.msrb.mxu0 %v17806_v53  ;;  %6890 = vmatpush.msra.mxu1 %v13528_v38  ;;  %v17131_v21 = vand.u32 4294901760, %v14239_v56  ;;  %v5083_v25 = vmul.f32 %v13955_v6, %v5078_v1  ;;  %v17810_v38 = vld [vmem:[#allocation87_spill] sm:$0xff] }
 0x686   : > { %17804 = vst [vmem:[#allocation46_spill] sm:$0xff] %v14246_v7  ;;  %v5074_v29 = vmul.f32 %v17807_v3, %v5070_v30  ;;  %v5267_v28 = vmul.f32 %v13353_v14, %v17808_v5  ;;  %6947 = vmatmul.f32.vlgmr.msra.gmra.mxu2 %v6946_v36  ;;  %7070 = vmatpush.msra.mxu3 %v7069_v11  ;;  %v17809_v27 = vand.u32 4294901760, %v17803_v41  ;;  %v17811_v30 = vld [vmem:[#allocation76_spill] sm:$0xff]  ;;  %v14278_v41 = vpop.f32.mrf.mxu0 }
 0x687   : > { %17805 = vst [vmem:[#allocation36_spill] sm:$0xff] %v14252_v40  ;;  %v5427_v23 = vmul.f32 %v5423_v62, %v14246_v7  ;;  %v5099_v57 = vmul.f32 %v14252_v40, %v13955_v6  ;;  %7096 = vmatpush.msrb.mxu0 %v17810_v38  ;;  %v6953_v31 = vsub.f32 %v14239_v56, %v17131_v21  ;;  %v17813_v6 = vand.u32 4294901760, %v17806_v53  ;;  %v17814_v62 = vld [vmem:[#allocation77_spill] sm:$0xff]  ;;  %v17855_v7 = vld [vmem:[#allocation58_spill] sm:$0xff] }
 0x688   : > { %7217 = vmatpush.msrb.mxu2 %v17809_v27  ;;  %v5087_v60 = vmul.f32 %v9311_v35, %v5083_v25  ;;  %6892 = vmatpush.msra.mxu1 %v17811_v30  ;;  %v5276_v11 = vmul.f32 %v17744_v15, %v5078_v1  ;;  %v5271_v25 = vmul.f32 %v5267_v28, %v13888_v50  ;;  %v17816_v27 = vld [vmem:[#allocation45_spill] sm:$0xff]  ;;  %v14295_v28 = vpop.f32.mrf.mxu1 }
 0x689   : > { %7072 = vmatmul.f32.vlgmr.msra.gmra.mxu3 %v14138_v58  ;;  %v5431_v14 = vadd.f32 %v5427_v23, %v5418_v24  ;;  %v14272_v36 = vmul.f32 %v9311_v35, %v5099_v57  ;;  %v5415_v30 = vmul.f32 %v13461_v52, %v17816_v27  ;;  %v17817_v21 = vld [vmem:[#allocation89_spill] sm:$0xff]  ;;  %6894 = vmatmul.f32.vlgmr.msra.gmra.mxu1 %v13611_v32  ;;  %v14287_v24 = vpop.f32.mrf.mxu2  ;;  %v6954_v53 = vand.u32 4294901760, %v6953_v31  ;;  %v17820_v23 = vld [vmem:[#allocation80_spill] sm:$0xff]  ;;  %v14303_v57 = vpop.f32.mrf.mxu3  ;;  %v17827_v27 = vld [vmem:[#allocation50_spill] sm:$0xff] }
 0x68a   : > { %7221 = vmatpush.msrb.mxu2 %v17813_v6  ;;  %7296 = vmatpush.msrb.mxu3 %v17814_v62  ;;  %v14280_v3 = vadd.f32 %v5087_v60, %v5074_v29  ;;  %v5424_v50 = vmul.f32 %v14016_v0, %v5078_v1  ;;  %v17819_v52 = vand.u32 4294901760, %v17810_v38  ;;  %v17822_v60 = vld [vmem:[#allocation92_spill] sm:$0xff]  ;;  %v17825_v6 = vand.u32 4294901760, %v17817_v21  ;;  %v17826_v38 = vld [vmem:[#allocation54_spill] sm:$0xff] }
 0x68b   : > { %17812 = vst [vmem:[#allocation44_spill] sm:$0xff] %v14272_v36  ;;  %7099 = vmatpush.msrb.mxu0 %v17817_v21  ;;  %v14289_v35 = vand.u32 4294901760, %v5431_v14  ;;  %7158 = vmatpush.msrb.mxu1 %v17814_v62 }
 0x68c   : > { %17815 = vst [vmem:[#allocation59_spill] sm:$0xff] %v14280_v3  ;;  %6849 = vmatmul.f32.gmra.mxu0 %v13728_v26  ;;  %v5280_v29 = vmul.f32 %v5276_v11, %v14280_v3  ;;  %7225 = vmatpush.msrb.mxu2 %v17819_v52  ;;  %v17824_v11 = vld [vmem:[#allocation38_spill] sm:$0xff]  ;;  %v17828_v52 = vand.u32 4294901760, %v17822_v60 }
 0x68d   : > { %17818 = vst [vmem:[#allocation75_spill] sm:$0xff] %v14289_v35  ;;  %7298 = vmatpush.msrb.mxu3 %v17820_v23  ;;  %v14301_v32 = vsub.f32 %v5431_v14, %v14289_v35  ;;  %7102 = vmatpush.msrb.mxu0 %v17822_v60  ;;  %v5419_v1 = vmul.f32 %v5415_v30, %v17824_v11  ;;  %v17830_v30 = vld [vmem:[#allocation41_spill] sm:$0xff]  ;;  %v17833_v11 = vld [vmem:[#allocation51_spill] sm:$0xff] }
 0x68e   : > { %7160 = vmatpush.msrb.mxu1 %v17820_v23  ;;  %v14307_v31 = vadd.f32 %v5280_v29, %v5271_v25  ;;  %7229 = vmatpush.msrb.mxu2 %v17825_v6  ;;  %v17829_v25 = vld [vmem:[#allocation85_spill] sm:$0xff]  ;;  %v14329_v23 = vpop.f32.mrf.mxu0 }
 0x68f   : > { %17821 = vst [vmem:[#allocation78_spill] sm:$0xff] %v14301_v32  ;;  %7300 = vmatpush.msrb.mxu3 %v17826_v38  ;;  %v17132_v62 = vand.u32 4294901760, %v14301_v32  ;;  %7105 = vmatpush.msrb.mxu0 %v17827_v27 }
 0x690   : > { %17823 = vst [vmem:[#allocation60_spill] sm:$0xff] %v14307_v31  ;;  %6955 = vmatmul.f32.gmra.mxu2 %v6954_v53  ;;  %v5428_v14 = vmul.f32 %v5424_v50, %v14307_v31  ;;  %7162 = vmatpush.msrb.mxu1 %v17826_v38  ;;  %v17831_v53 = vand.u32 4294901760, %v17827_v27  ;;  %v17832_v50 = vld [vmem:[#allocation88_spill] sm:$0xff]  ;;  %v14342_v38 = vld [vmem:[%s16863_s8 + $0x8] sm:$0x7]  ;;  %v5575_v31 = vld [vmem:[#allocation9 + $0x278] sm:$0xff] }
 0x691   : > { %7233 = vmatpush.msrb.mxu2 %v17828_v52  ;;  %7302 = vmatpush.msrb.mxu3 %v17829_v25  ;;  %v6961_v21 = vsub.f32 %v14301_v32, %v17132_v62  ;;  %v14335_v6 = vpop.f32.mrf.mxu2  ;;  %17834 = vst [vmem:[#allocation73_spill] sm:$0xff] %v14342_v38  ;;  %v17836_v52 = vand.u32 4294901760, %v17830_v30  ;;  %v9476_v62 = vld [vmem:[%s16864_s9] sm:$0xff]  ;;  %v14436_v32 = vld [vmem:[#allocation3 + $0x18] sm:$0xff] }
 0x692   : > { %7108 = vmatpush.msrb.mxu0 %v17830_v30  ;;  %v5432_v29 = vadd.f32 %v5428_v14, %v5419_v1  ;;  %7076 = vmatmul.f32.gmra.mxu3 %v14219_v54  ;;  %v14337_v1 = vpop.f32.mrf.mxu1  ;;  %v14360_v40 = vperm.slane %v9476_v62, 7  ;;  %17858 = vst [vmem:[#allocation69_spill] sm:$0xff] %v14436_v32  ;;  %vm4855_vm13 = vcmp.ge.f32.partialorder %v14436_v32, %v17734_v17 }
 0x693   : > { %7164 = vmatpush.msrb.mxu1 %v17829_v25  ;;  %7237 = vmatpush.msrb.mxu2 %v17831_v53  ;;  %v6962_v27 = vand.u32 4294901760, %v6961_v21  ;;  %v14352_v25 = vpop.f32.mrf.mxu3  ;;  %v14355_v53 = vperm.slane %v14342_v38, 0  ;;  %v17839_v21 = vld [vmem:[#allocation57_spill] sm:$0xff] }
 0x694   : > { %7304 = vmatpush.msrb.mxu3 %v17832_v50  ;;  %v14331_v60 = vand.u32 4294901760, %v5432_v29  ;;  %7111 = vmatpush.msrb.mxu0 %v17833_v11 }
 0x695   : > { %6898 = vmatmul.f32.gmra.mxu1 %v13728_v26  ;;  %6853 = vmatmul.f32.gmra.mxu0 %v13870_v8  ;;  %v17837_v26 = vld [vmem:[#allocation91_spill] sm:$0xff]  ;;  %17838 = vst [vmem:[#allocation65_spill] sm:$0xff] %v14355_v53  ;;  %vm4860_vm14 = vcmp.lt.f32.partialorder %v14436_v32, %v14355_v53 }
 0x696   : > { %7166 = vmatpush.msrb.mxu1 %v17832_v50  ;;  %v14347_v14 = vsub.f32 %v5432_v29, %v14331_v60  ;;  %7241 = vmatpush.msrb.mxu2 %v17836_v52  ;;  %v17840_v29 = vand.u32 4294901760, %v17833_v11  ;;  %v14368_v50 = vld [vmem:[#allocation3] sm:$0xff]  ;;  %v17842_v52 = vld [vmem:[#allocation43_spill] sm:$0xff]  ;;  %v14380_v11 = vld [vmem:[%s16864_s9 + $0x10] sm:$0xff]  ;;  %v14393_v38 = vpop.f32.mrf.mxu0 }
 0x697   : > { %7306 = vmatpush.msrb.mxu3 %v17837_v26  ;;  %7114 = vmatpush.msrb.mxu0 %v17839_v21  ;;  %17841 = vst [vmem:[#allocation81_spill] sm:$0xff] %v14368_v50  ;;  %vm4854_vm10 = vcmp.ge.f32.partialorder %v14368_v50, %v17734_v17  ;;  %vm4859_vm11 = vcmp.lt.f32.partialorder %v14368_v50, %v14355_v53  ;;  %v17849_v3 = vand.u32 4294901760, %v17842_v52  ;;  %vm4864_vm15 = vmand %vm4855_vm13, %vm4860_vm14 }
 0x698   : > { %17835 = vst [vmem:[#allocation42_spill] sm:$0xff] %v14347_v14  ;;  %7168 = vmatpush.msrb.mxu1 %v17837_v26  ;;  %v17141_v30 = vand.u32 4294901760, %v14347_v14  ;;  %7245 = vmatpush.msrb.mxu2 %v17840_v29  ;;  %v5104_v62 = vsub.f32 %v14355_v53, %v14368_v50  ;;  %v14383_v26 = vperm.slane %v14380_v11, 1  ;;  %v17844_v29 = vand.u32 4294901760, %v17839_v21  ;;  %vm4863_vm12 = vmand %vm4854_vm10, %vm4859_vm11 }
 0x699   : > { %7308 = vmatpush.msrb.mxu3 %v13740_v48  ;;  %7117 = vmatpush.msrb.mxu0 %v17842_v52  ;;  %17843 = vst [vmem:[#allocation82_spill] sm:$0xff] %v14380_v11  ;;  %v14396_v11 = vsel %vm4863_vm12, 1.0, %v17489_v49  ;;  %v14411_v13 = vpop.f32.mrf.mxu2 }
 0x69a   : > { %6963 = vmatmul.f32.gmra.mxu2 %v6962_v27  ;;  %7170 = vmatpush.msrb.mxu1 %v13740_v48  ;;  %v17845_v27 = vld [vmem:[#allocation52_spill] sm:$0xff]  ;;  %v6969_v50 = vsub.f32 %v14347_v14, %v17141_v30  ;;  %17846 = vst [vmem:[#allocation74_spill] sm:$0xff] %v14396_v11  ;;  %v5109_v48 = vmul.f32 %v14360_v40, %v5104_v62  ;;  %v14401_v21 = vpop.f32.mrf.mxu1  ;;  %v5574_v30 = vld [vmem:[#allocation9 + $0x270] sm:$0xff] }
 0x69b   : > { %7249 = vmatpush.msrb.mxu2 %v17844_v29  ;;  %7310 = vmatpush.msrb.mxu3 %v13759_v42  ;;  %17847 = vst [vmem:[#allocation48_spill] sm:$0xff] %v14401_v21  ;;  %v17848_v29 = vld [vmem:[#allocation37_spill] sm:$0xff]  ;;  %v5294_v14 = vmul.f32 %v14383_v26, %v5104_v62  ;;  %v17850_v52 = vand.u32 4294901760, %v17845_v27  ;;  %v5570_v21 = vld [vmem:[#allocation9 + $0x250] sm:$0xff] }
 0x69c   : > { %7120 = vmatpush.msrb.mxu0 %v17845_v27  ;;  %7080 = vmatmul.f32.gmra.mxu3 %v14289_v35  ;;  %v5285_v5 = vmul.f32 %v17744_v15, %v17848_v29  ;;  %v5113_v36 = vmul.f32 %v14396_v11, %v5109_v48  ;;  %v14421_v48 = vand.u32 4294901760, %v5574_v30  ;;  %v14423_v29 = vpop.f32.mrf.mxu3  ;;  %v14429_v35 = vperm.slane %v17855_v7, 3  ;;  %v5573_v27 = vld [vmem:[#allocation9 + $0x268] sm:$0xff] }
 0x69d   : > { %7172 = vmatpush.msrb.mxu1 %v13759_v42  ;;  %7253 = vmatpush.msrb.mxu2 %v17849_v3  ;;  %v14413_v42 = vand.u32 4294901760, %v5575_v31  ;;  %v6970_v3 = vand.u32 4294901760, %v6969_v50  ;;  %17852 = vst [vmem:[#allocation40_spill] sm:$0xff] %v14423_v29  ;;  %v17857_v50 = vld [vmem:[#allocation53_spill] sm:$0xff]  ;;  %v17859_v7 = vand.u32 4294901760, %v13949_v45  ;;  %v17864_v29 = vld [vmem:[#allocation35_spill] sm:$0xff] }
 0x69e   : > { %7312 = vmatpush.msrb.mxu3 %v13773_v19  ;;  %7123 = vmatpush.msrb.mxu0 %v13949_v45  ;;  %17851 = vst [vmem:[#allocation83_spill] sm:$0xff] %v14421_v48  ;;  %v5289_v12 = vmul.f32 %v5285_v5, %v14039_v10  ;;  %v14451_v5 = vpop.f32.mrf.mxu0 }
 0x69f   : > { %6902 = vmatmul.f32.gmra.mxu1 %v13870_v8  ;;  %6857 = vmatmul.f32.gmra.mxu0 %v13988_v20  ;;  %v17853_v8 = vld [vmem:[#allocation47_spill] sm:$0xff]  ;;  %v14446_v10 = vsub.f32 %v5575_v31, %v14413_v42  ;;  %v17860_v31 = vand.u32 4294901760, %v17857_v50 }
 0x6a0   : > { %7174 = vmatpush.msrb.mxu1 %v13773_v19  ;;  %7257 = vmatpush.msrb.mxu2 %v17850_v52  ;;  %v14426_v11 = vadd.f32 %v5113_v36, %v17853_v8  ;;  %v5433_v19 = vmul.f32 %v14016_v0, %v17856_v46  ;;  %v5572_v52 = vld [vmem:[#allocation9 + $0x260] sm:$0xff]  ;;  %v14440_v36 = vsub.f32 %v14355_v53, %v14436_v32  ;;  %v5571_v8 = vld [vmem:[#allocation9 + $0x258] sm:$0xff] }
 0x6a1   : > { %7314 = vmatpush.msrb.mxu3 %v13886_v39  ;;  %7126 = vmatpush.msrb.mxu0 %v17857_v50  ;;  %v17865_v32 = vld [vmem:[#allocation55_spill] sm:$0xff]  ;;  %v14478_v50 = vsel %vm4864_vm15, 1.0, %v17489_v49 }
 0x6a2   : > { %17854 = vst [vmem:[#allocation90_spill] sm:$0xff] %v14426_v11  ;;  %7176 = vmatpush.msrb.mxu1 %v13886_v39  ;;  %7261 = vmatpush.msrb.mxu2 %v17859_v7  ;;  %v5298_v46 = vmul.f32 %v5294_v14, %v14426_v11  ;;  %v5442_v39 = vmul.f32 %v14429_v35, %v5104_v62  ;;  %v14462_v14 = vand.u32 4294901760, %v5573_v27  ;;  %v14469_v7 = vpop.f32.mrf.mxu1 }
 0x6a3   : > { %7316 = vmatpush.msrb.mxu3 %v13905_v44  ;;  %7129 = vmatpush.msrb.mxu0 %v13999_v33  ;;  %v5110_v45 = vmul.f32 %v14360_v40, %v14440_v36  ;;  %v14465_v62 = vsub.f32 %v5574_v30, %v14421_v48  ;;  %17863 = vst [vmem:[#allocation79_spill] sm:$0xff] %v14469_v7  ;;  %v17868_v30 = vld [vmem:[#allocation64_spill] sm:$0xff]  ;;  %v17872_v7 = vld [vmem:[#allocation33_spill] sm:$0xff] }
 0x6a4   : > { %6971 = vmatmul.f32.gmra.mxu2 %v6970_v3  ;;  %7178 = vmatpush.msrb.mxu1 %v13905_v44  ;;  %17861 = vst [vmem:[#allocation49_spill] sm:$0xff] %v14462_v14  ;;  %v14467_v3 = vand.u32 4294901760, %v5572_v52  ;;  %v5772_v11 = vadd.f32 %v17865_v32, %v17864_v29  ;;  %v14475_v44 = vadd.f32 %v5298_v46, %v5289_v12  ;;  %v17869_v12 = vand.u32 4294901760, %v13999_v33 }
 0x6a5   : > { %7265 = vmatpush.msrb.mxu2 %v17860_v31  ;;  %7318 = vmatpush.msrb.mxu3 %v13907_v34  ;;  %17867 = vst [vmem:[#allocation94_spill] sm:$0xff] %v14478_v50  ;;  %v5437_v31 = vmul.f32 %v5433_v19, %v17868_v30  ;;  %v5114_v32 = vmul.f32 %v14478_v50, %v5110_v45  ;;  %v14490_v46 = vand.u32 4294901760, %v5571_v8  ;;  %v5568_v30 = vld [vmem:[#allocation9 + $0x240] sm:$0xff] }
 0x6a6   : > { %17862 = vst [vmem:[#allocation71_spill] sm:$0xff] %v14467_v3  ;;  %7132 = vmatpush.msrb.mxu0 %v14032_v47  ;;  %7084 = vmatmul.f32.gmra.mxu3 %v14331_v60  ;;  %v5776_v29 = vadd.f32 %v14134_v2, %v14202_v4  ;;  %v5446_v19 = vmul.f32 %v5442_v39, %v14475_v44  ;;  %v5569_v4 = vld [vmem:[#allocation9 + $0x248] sm:$0xff] }
 0x6a7   : > { %17866 = vst [vmem:[#allocation84_spill] sm:$0xff] %v14475_v44  ;;  %7180 = vmatpush.msrb.mxu1 %v13907_v34  ;;  %7269 = vmatpush.msrb.mxu2 %v17869_v12  ;;  %v14495_v34 = vpop.f32.mrf.mxu2  ;;  %v14498_v45 = vsub.f32 %v5573_v27, %v14462_v14  ;;  %v14502_v33 = vsub.f32 %v5572_v52, %v14467_v3  ;;  %v14504_v12 = vpop.f32.mrf.mxu3  ;;  %v9480_v2 = vld [vmem:[%s16864_s9 + $0x8] sm:$0xff] }
 0x6a8   : > { %7320 = vmatpush.msrb.mxu3 %v13913_v63  ;;  %17870 = vst [vmem:[#allocation87_spill] sm:$0xff] %v14490_v46  ;;  %7135 = vmatpush.msrb.mxu0 %v14106_v43  ;;  %v5286_v39 = vmul.f32 %v17744_v15, %v17872_v7  ;;  %v5838_v50 = vadd.f32 %v14210_v51, %v5772_v11  ;;  %v17876_v11 = vand.u32 4294901760, %v14032_v47  ;;  %v14540_v47 = vand.u32 4294901760, %v5569_v4 }
 0x6a9   : > { %6906 = vmatmul.f32.gmra.mxu1 %v13988_v20  ;;  %17871 = vst [vmem:[#allocation76_spill] sm:$0xff] %v14504_v12  ;;  %7138 = vmatmul.f32.vlgmr.msrb.gmra.mxu0 %v14158_v37  ;;  %v14511_v20 = vand.u32 4294901760, %v5570_v21  ;;  %v14514_v27 = vadd.f32 %v5114_v32, %v14120_v59  ;;  %v5295_v52 = vmul.f32 %v14383_v26, %v14440_v36  ;;  %v14521_v12 = vperm.slane %v9480_v2, 0  ;;  %v5567_v32 = vld [vmem:[#allocation9 + $0x238] sm:$0xff] }
 0x6aa   : > { %7182 = vmatpush.msrb.mxu1 %v13913_v63  ;;  %v5780_v51 = vadd.f32 %v14221_v16, %v14278_v41  ;;  %7273 = vmatpush.msrb.mxu2 %v17876_v11  ;;  %v17877_v63 = vand.u32 4294901760, %v14446_v10  ;;  %v14531_v7 = vadd.f32 %v5446_v19, %v5437_v31  ;;  %v14536_v2 = vsub.f32 %v5571_v8, %v14490_v46  ;;  %v14538_v16 = vpop.f32.mrf.mxu0  ;;  %v17881_v11 = vld [vmem:[#allocation63_spill] sm:$0xff] }
 0x6ab   : > { %17873 = vst [vmem:[#allocation77_spill] sm:$0xff] %v14511_v20  ;;  %7322 = vmatpush.msrb.mxu3 %v13943_v22  ;;  %7345 = vmatpush.msra.mxu0 %v14413_v42  ;;  %v14542_v41 = vand.u32 4294901760, %v5568_v30  ;;  %v5290_v44 = vmul.f32 %v5286_v39, %v17881_v11  ;;  %v17882_v31 = vand.u32 4294901760, %v14106_v43  ;;  %v14557_v39 = vsub.f32 %v5570_v21, %v14511_v20  ;;  %v14561_v43 = vpop.f32.mrf.mxu1  ;;  %v17887_v11 = vld [vmem:[#allocation72_spill] sm:$0xff]  ;;  %v5566_v21 = vld [vmem:[#allocation9 + $0x230] sm:$0xff] }
 0x6ac   : > { %17874 = vst [vmem:[#allocation45_spill] sm:$0xff] %v14514_v27  ;;  %v7412_v59 = vsub.f32 %v14446_v10, %v17877_v63  ;;  %7184 = vmatpush.msrb.mxu1 %v13943_v22  ;;  %v5843_v63 = vadd.f32 %v14287_v24, %v5776_v29  ;;  %v17883_v22 = vand.u32 4294901760, %v14465_v62  ;;  %v14559_v24 = vand.u32 4294901760, %v5567_v32 }
 0x6ad   : > { %17875 = vst [vmem:[#allocation89_spill] sm:$0xff] %v14521_v12  ;;  %7277 = vmatpush.msrb.mxu2 %v17882_v31  ;;  %7324 = vmatpush.msrb.mxu3 %v13960_v55  ;;  %v5299_v29 = vmul.f32 %v5295_v52, %v14514_v27  ;;  %v5434_v31 = vmul.f32 %v14016_v0, %v17887_v11 }
 0x6ae   : > { %17878 = vst [vmem:[#allocation80_spill] sm:$0xff] %v14538_v16  ;;  %v7418_v8 = vsub.f32 %v14465_v62, %v17883_v22  ;;  %7347 = vmatpush.msra.mxu0 %v14421_v48  ;;  %7186 = vmatpush.msrb.mxu1 %v13960_v55  ;;  %v5848_v22 = vadd.f32 %v14335_v6, %v5780_v51  ;;  %v7413_v55 = vand.u32 4294901760, %v7412_v59  ;;  %v17891_v59 = vld [vmem:[#allocation34_spill] sm:$0xff] }
 0x6af   : > { %17879 = vst [vmem:[#allocation92_spill] sm:$0xff] %v14540_v47  ;;  %v5784_v16 = vadd.f32 %v14295_v28, %v14329_v23  ;;  %7279 = vmatmul.f32.vlgmr.msrb.gmra.mxu2 %v14138_v58  ;;  %7326 = vmatpush.msrb.mxu3 %v14062_v61  ;;  %v5443_v19 = vmul.f32 %v14429_v35, %v14440_v36  ;;  %v5565_v23 = vld [vmem:[#allocation9 + $0x228] sm:$0xff]  ;;  %v14590_v27 = vpop.f32.mrf.mxu2 }
 0x6b0   : > { %17880 = vst [vmem:[#allocation38_spill] sm:$0xff] %v14542_v41  ;;  %7524 = vmatpush.msra.mxu2 %v14446_v10  ;;  %7349 = vmatpush.msra.mxu0 %v14462_v14  ;;  %v14577_v6 = vsub.f32 %v5569_v4, %v14540_v47  ;;  %v14580_v28 = vsub.f32 %v5568_v30, %v14542_v41  ;;  %v7419_v36 = vand.u32 4294901760, %v7418_v8  ;;  %v14592_v4 = vpop.f32.mrf.mxu3 }
 0x6b1   : > { %17884 = vst [vmem:[#allocation54_spill] sm:$0xff] %v14557_v39  ;;  %v14582_v51 = vadd.f32 %v5299_v29, %v5290_v44  ;;  %v5892_v11 = vadd.f32 %v17891_v59, %v5838_v50  ;;  %7188 = vmatpush.msrb.mxu1 %v14062_v61  ;;  %7328 = vmatmul.f32.vlgmr.msrb.gmra.mxu3 %v14138_v58  ;;  %v17895_v44 = vand.u32 4294901760, %v14502_v33  ;;  %v14603_v50 = vand.u32 4294901760, %v5566_v21 }
 0x6b2   : > { %17885 = vst [vmem:[#allocation50_spill] sm:$0xff] %v14559_v24  ;;  %v5438_v30 = vmul.f32 %v5434_v31, %v14167_v9  ;;  %7527 = vmatpush.msra.mxu2 %v14465_v62  ;;  %7592 = vmatpush.msra.mxu3 %v14413_v42  ;;  %v14606_v8 = vsub.f32 %v5567_v32, %v14559_v24  ;;  %v17899_v31 = vand.u32 4294901760, %v14158_v37  ;;  %v14615_v59 = vand.u32 4294901760, %v5565_v23 }
 0x6b3   : > { %17886 = vst [vmem:[#allocation85_spill] sm:$0xff] %v14561_v43  ;;  %v17892_v43 = vand.u32 4294901760, %v14498_v45  ;;  %v14600_v61 = vsub.f32 %v14502_v33, %v17895_v44  ;;  %v5898_v29 = vadd.f32 %v14232_v18, %v5843_v63  ;;  %v14610_v9 = vadd.f32 %v14303_v57, %v5848_v22  ;;  %7351 = vmatpush.msra.mxu0 %v14467_v3  ;;  %v14626_v63 = vpop.f32.mrf.mxu0  ;;  %v5563_v22 = vld [vmem:[#allocation9 + $0x218] sm:$0xff] }
 0x6b4   : > { %17888 = vst [vmem:[#allocation41_spill] sm:$0xff] %v14577_v6  ;;  %7192 = vmatmul.f32.vlgmr.msrb.gmra.mxu1 %v17899_v31  ;;  %v5447_v44 = vmul.f32 %v5443_v19, %v14582_v51  ;;  %v5853_v58 = vadd.f32 %v14411_v13, %v5784_v16  ;;  %7143 = vmatmul.f32.gmra.mxu0 %v14239_v56  ;;  %v17901_v32 = vand.u32 4294901760, %v14536_v2 }
 0x6b5   : > { %17889 = vst [vmem:[#allocation88_spill] sm:$0xff] %v14580_v28  ;;  %v7424_v52 = vsub.f32 %v14498_v45, %v17892_v43  ;;  %v5564_v43 = vld [vmem:[#allocation9 + $0x220] sm:$0xff]  ;;  %7414 = vmatpush.msra.mxu1 %v7413_v55  ;;  %7530 = vmatpush.msra.mxu2 %v14498_v45  ;;  %v14635_v55 = vld [vmem:[#allocation3 + $0x8] sm:$0xff]  ;;  %v7431_v31 = vand.u32 4294901760, %v14600_v61  ;;  %v5979_v57 = vadd.f32 %v14393_v38, %v5892_v11  ;;  %v14656_v61 = vand.u32 4294901760, %v5563_v22 }
 0x6b6   : > { %17890 = vst [vmem:[#allocation51_spill] sm:$0xff] %v14582_v51  ;;  %v14623_v18 = vsub.f32 %v14536_v2, %v17901_v32  ;;  %7594 = vmatpush.msra.mxu3 %v14421_v48  ;;  %v14631_v16 = vand.u32 4294901760, %v5564_v43  ;;  %v14633_v19 = vadd.f32 %v5447_v44, %v5438_v30  ;;  %vm4856_vm0 = vcmp.ge.f32.partialorder %v14635_v55, %v17734_v17  ;;  %v5562_v44 = vld [vmem:[#allocation9 + $0x210] sm:$0xff]  ;;  %v17973_v48 = vld [vmem:[#allocation93_spill] sm:$0xff] }
 0x6b7   : > { %17893 = vst [vmem:[#allocation91_spill] sm:$0xff] %v14590_v27  ;;  %v7425_v13 = vand.u32 4294901760, %v7424_v52  ;;  %7353 = vmatpush.msra.mxu0 %v14490_v46  ;;  %7420 = vmatpush.msra.mxu1 %v7419_v36  ;;  %v17904_v32 = vand.u32 4294901760, %v14557_v39  ;;  %v14647_v52 = vsub.f32 %v5566_v21, %v14603_v50  ;;  %v14654_v36 = vsub.f32 %v5565_v23, %v14615_v59 }
 0x6b8   : > { %17894 = vst [vmem:[#allocation57_spill] sm:$0xff] %v14592_v4  ;;  %7533 = vmatpush.msra.mxu2 %v14502_v33  ;;  %7596 = vmatpush.msra.mxu3 %v14462_v14  ;;  %vm4861_vm1 = vcmp.lt.f32.partialorder %v14635_v55, %v14355_v53  ;;  %v14661_v21 = vadd.f32 %v14352_v25, %v5853_v58  ;;  %v7437_v38 = vand.u32 4294901760, %v14623_v18  ;;  %v17908_v11 = vand.u32 4294901760, %v14577_v6  ;;  %v14676_v4 = vpop.f32.mrf.mxu1  ;;  %v14687_v18 = vpop.f32.mrf.mxu2 }
 0x6b9   : > { %17896 = vst [vmem:[#allocation43_spill] sm:$0xff] %v14603_v50  ;;  %v14644_v37 = vsub.f32 %v14557_v39, %v17904_v32  ;;  %7355 = vmatpush.msra.mxu0 %v14511_v20  ;;  %7283 = vmatmul.f32.gmra.mxu2 %v14219_v54  ;;  %v17909_v23 = vand.u32 4294901760, %v14580_v28  ;;  %vm14681_vm2 = vmand %vm4856_vm0, %vm4861_vm1  ;;  %v6028_v58 = vadd.f32 %v14337_v1, %v5979_v57  ;;  %v17916_v57 = vand.u32 4294901760, %v14606_v8 }
 0x6ba   : > { %17897 = vst [vmem:[#allocation52_spill] sm:$0xff] %v14606_v8  ;;  %v14669_v32 = vsub.f32 %v14577_v6, %v17908_v11  ;;  %7426 = vmatpush.msra.mxu1 %v7425_v13  ;;  %7536 = vmatpush.msra.mxu2 %v14536_v2  ;;  %v14690_v11 = vsub.f32 %v5564_v43, %v14631_v16  ;;  %v17921_v13 = vld [vmem:[#allocation68_spill] sm:$0xff]  ;;  %v17925_v51 = vand.u32 4294901760, %v14647_v52 }
 0x6bb   : > { %17898 = vst [vmem:[#allocation47_spill] sm:$0xff] %v14610_v9  ;;  %v14674_v30 = vsub.f32 %v14580_v28, %v17909_v23  ;;  %v14692_v23 = vand.u32 4294901760, %v5562_v44  ;;  %v5106_v27 = vsub.f32 %v14355_v53, %v14635_v55  ;;  %7598 = vmatpush.msra.mxu3 %v14467_v3  ;;  %7357 = vmatpush.msra.mxu0 %v14540_v47  ;;  %v7443_v1 = vand.u32 4294901760, %v14644_v37 }
 0x6bc   : > { %17900 = vst [vmem:[#allocation58_spill] sm:$0xff] %v14615_v59  ;;  %v14705_v43 = vsub.f32 %v14606_v8, %v17916_v57  ;;  %7332 = vmatmul.f32.gmra.mxu3 %v14219_v54  ;;  %7432 = vmatpush.msra.mxu1 %v7431_v31  ;;  %v17918_v57 = vld [vmem:[#allocation48_spill] sm:$0xff]  ;;  %v7449_v54 = vand.u32 4294901760, %v14669_v32  ;;  %v5287_v25 = vmul.f32 %v17744_v15, %v17921_v13  ;;  %v17922_v9 = vand.u32 4294901760, %v14239_v56  ;;  %v5591_v32 = vld [vmem:[#allocation9 + $0x2f8] sm:$0xff] }
 0x6bd   : > { %17902 = vst [vmem:[#allocation61_spill] sm:$0xff] %v14626_v63  ;;  %v5983_v63 = vadd.f32 %v14451_v5, %v5898_v29  ;;  %v14711_v5 = vsub.f32 %v5563_v22, %v14656_v61  ;;  %v14716_v29 = vsel %vm14681_vm2, 1.0, %v17489_v49  ;;  %v5111_v37 = vmul.f32 %v14360_v40, %v5106_v27  ;;  %7539 = vmatpush.msra.mxu2 %v14557_v39  ;;  %v14726_v22 = vpop.f32.mrf.mxu0 }
 0x6be   : > { %17903 = vst [vmem:[#allocation53_spill] sm:$0xff] %v14635_v55  ;;  %7600 = vmatpush.msra.mxu3 %v14490_v46  ;;  %v7455_v31 = vand.u32 4294901760, %v14674_v30  ;;  %7359 = vmatpush.msra.mxu0 %v14542_v41  ;;  %v14740_v30 = vand.u32 4294901760, %v14531_v7  ;;  %v14747_v56 = vsub.f32 %v14647_v52, %v17925_v51  ;;  %v17933_v46 = vld [vmem:[#allocation86_spill] sm:$0xff] }
 0x6bf   : > { %17905 = vst [vmem:[#allocation35_spill] sm:$0xff] %v14647_v52  ;;  %7198 = vmatmul.f32.gmra.mxu1 %v17922_v9  ;;  %v5115_v9 = vmul.f32 %v14716_v29, %v5111_v37  ;;  %7542 = vmatpush.msra.mxu2 %v14577_v6  ;;  %v14765_v37 = vand.u32 4294901760, %v5591_v32  ;;  %v5435_v3 = vmul.f32 %v14016_v0, %v17933_v46  ;;  %v14799_v6 = vld [vmem:[#allocation3 + $0x10] sm:$0xff] }
 0x6c0   : > { %17906 = vst [vmem:[#allocation55_spill] sm:$0xff] %v14654_v36  ;;  %7438 = vmatpush.msra.mxu1 %v7437_v38  ;;  %7602 = vmatpush.msra.mxu3 %v14511_v20  ;;  %v17927_v38 = vand.u32 4294901760, %v14654_v36  ;;  %vm4857_vm3 = vcmp.ge.f32.partialorder %v14799_v6, %v17734_v17  ;;  %vm4862_vm4 = vcmp.lt.f32.partialorder %v14799_v6, %v14355_v53 }
 0x6c1   : > { %17907 = vst [vmem:[#allocation64_spill] sm:$0xff] %v14661_v21  ;;  %v14720_v21 = vadd.f32 %v17918_v57, %v5983_v63  ;;  %v5296_v57 = vmul.f32 %v14383_v26, %v5106_v27  ;;  %7361 = vmatpush.msra.mxu0 %v14559_v24  ;;  %7545 = vmatpush.msra.mxu2 %v14580_v28  ;;  %v14795_v28 = vpop.f32.mrf.mxu1  ;;  %vm14840_vm5 = vmand %vm4857_vm3, %vm4862_vm4 }
 0x6c2   : > { %17910 = vst [vmem:[#allocation63_spill] sm:$0xff] %v14676_v4  ;;  %v14694_v4 = vpop.f32.mrf.mxu3  ;;  %v14759_v13 = vsub.f32 %v14654_v36, %v17927_v38  ;;  %7444 = vmatpush.msra.mxu1 %v7443_v1  ;;  %7604 = vmatpush.msra.mxu3 %v14540_v47  ;;  %v17934_v38 = vand.u32 4294901760, %v14690_v11  ;;  %v14780_v1 = vpop.f32.mrf.mxu2  ;;  %v17937_v47 = vld [vmem:[#allocation75_spill] sm:$0xff]  ;;  %v5107_v14 = vsub.f32 %v14355_v53, %v14799_v6 }
 0x6c3   : > { %17913 = vst [vmem:[#allocation72_spill] sm:$0xff] %v14687_v18  ;;  %v5561_v18 = vld [vmem:[#allocation9 + $0x208] sm:$0xff]  ;;  %7363 = vmatpush.msra.mxu0 %v14603_v50  ;;  %7287 = vmatmul.f32.gmra.mxu2 %v17937_v47 }
 0x6c4   : > { %17914 = vst [vmem:[#allocation34_spill] sm:$0xff] %v14690_v11  ;;  %v14733_v63 = vand.u32 4294901760, %v5561_v18  ;;  %v14778_v51 = vsub.f32 %v14690_v11, %v17934_v38  ;;  %v7467_v38 = vand.u32 4294901760, %v14747_v56  ;;  %7450 = vmatpush.msra.mxu1 %v7449_v54  ;;  %7548 = vmatpush.msra.mxu2 %v14606_v8  ;;  %v7473_v8 = vand.u32 4294901760, %v14759_v13 }
 0x6c5   : > { %17915 = vst [vmem:[#allocation95_spill] sm:$0xff] %v14694_v4  ;;  %v5560_v4 = vld [vmem:[#allocation9 + $0x200] sm:$0xff]  ;;  %7606 = vmatpush.msra.mxu3 %v14542_v41  ;;  %7365 = vmatpush.msra.mxu0 %v14615_v59  ;;  %v14821_v54 = vpop.f32.mrf.mxu0 }
 0x6c6   : > { %17917 = vst [vmem:[#allocation96_spill] sm:$0xff] %v14716_v29  ;;  %v14761_v55 = vand.u32 4294901760, %v5560_v4  ;;  %v17932_v29 = vld [vmem:[#allocation62_spill] sm:$0xff]  ;;  %7336 = vmatmul.f32.gmra.mxu3 %v17937_v47  ;;  %7456 = vmatpush.msra.mxu1 %v7455_v31  ;;  %v14848_v47 = vand.u32 4294901760, %v14633_v19 }
 0x6c7   : > { %17919 = vst [vmem:[#allocation48_spill] sm:$0xff] %v14720_v21  ;;  %v14737_v21 = vsub.f32 %v5562_v44, %v14692_v23  ;;  %v14752_v44 = vadd.f32 %v14495_v34, %v6028_v58  ;;  %v5590_v34 = vld [vmem:[#allocation9 + $0x2f0] sm:$0xff]  ;;  %v17930_v58 = vld [vmem:[#allocation67_spill] sm:$0xff]  ;;  %v5291_v20 = vmul.f32 %v5287_v25, %v17932_v29  ;;  %v14787_v29 = vsub.f32 %v5561_v18, %v14733_v63  ;;  %v5589_v25 = vld [vmem:[#allocation9 + $0x2e8] sm:$0xff] }
 0x6c8   : > { %17920 = vst [vmem:[#allocation97_spill] sm:$0xff] %v14726_v22  ;;  %v17924_v22 = vld [vmem:[#allocation78_spill] sm:$0xff]  ;;  %v17940_v18 = vand.u32 4294901760, %v14711_v5  ;;  %v14810_v56 = vsub.f32 %v5560_v4, %v14761_v55  ;;  %7551 = vmatpush.msra.mxu2 %v14647_v52  ;;  %7608 = vmatpush.msra.mxu3 %v14559_v24 }
 0x6c9   : > { %17923 = vst [vmem:[#allocation98_spill] sm:$0xff] %v14733_v63  ;;  %7148 = vmatmul.f32.gmra.mxu0 %v17924_v22  ;;  %v17946_v4 = vld [vmem:[#allocation46_spill] sm:$0xff] }
 0x6ca   : > { %17926 = vst [vmem:[#allocation78_spill] sm:$0xff] %v14752_v44  ;;  %v14768_v44 = vadd.f32 %v5115_v9, %v17930_v58  ;;  %v14784_v9 = vsub.f32 %v14531_v7, %v14740_v30  ;;  %v14790_v58 = vpop.f32.mrf.mxu3  ;;  %v5444_v7 = vmul.f32 %v14429_v35, %v5106_v27  ;;  %v14807_v46 = vsub.f32 %v14711_v5, %v17940_v18 }
 0x6cb   : > { %17928 = vst [vmem:[#allocation99_spill] sm:$0xff] %v14761_v55  ;;  %v14819_v27 = vsub.f32 %v5591_v32, %v14765_v37  ;;  %v14823_v18 = vand.u32 4294901760, %v5589_v25  ;;  %v17947_v32 = vand.u32 4294901760, %v14737_v21  ;;  %7367 = vmatpush.msra.mxu0 %v14631_v16  ;;  %7554 = vmatpush.msra.mxu2 %v14654_v36 }
 0x6cc   : > { %17929 = vst [vmem:[#allocation100_spill] sm:$0xff] %v14765_v37  ;;  %7610 = vmatpush.msra.mxu3 %v14603_v50  ;;  %v17962_v50 = vand.u32 4294901760, %v14787_v29  ;;  %7291 = vmatmul.f32.gmra.mxu2 %v14331_v60 }
 0x6cd   : > { %17931 = vst [vmem:[#allocation67_spill] sm:$0xff] %v14768_v44  ;;  %v14835_v39 = vsub.f32 %v14737_v21, %v17947_v32  ;;  %v17961_v32 = vld [vmem:[#allocation70_spill] sm:$0xff]  ;;  %7369 = vmatpush.msra.mxu0 %v14656_v61  ;;  %7557 = vmatpush.msra.mxu2 %v14690_v11  ;;  %v5436_v11 = vmul.f32 %v14016_v0, %v17973_v48 }
 0x6ce   : > { %17935 = vst [vmem:[#allocation62_spill] sm:$0xff] %v14780_v1  ;;  %v5300_v1 = vmul.f32 %v5296_v57, %v14768_v44  ;;  %v5588_v57 = vld [vmem:[#allocation9 + $0x2e0] sm:$0xff]  ;;  %v5439_v44 = vmul.f32 %v5435_v3, %v17946_v4  ;;  %v5587_v3 = vld [vmem:[#allocation9 + $0x2d8] sm:$0xff]  ;;  %v17958_v4 = vand.u32 4294901760, %v14784_v9  ;;  %v5288_v24 = vmul.f32 %v17744_v15, %v17961_v32  ;;  %7612 = vmatpush.msra.mxu3 %v14615_v59 }
 0x6cf   : > { %17936 = vst [vmem:[#allocation86_spill] sm:$0xff] %v14790_v58  ;;  %v14812_v58 = vand.u32 4294901760, %v5590_v34  ;;  %v14850_v13 = vand.u32 4294901760, %v5588_v57  ;;  %v17965_v15 = vand.u32 4294901760, %v14810_v56  ;;  %v5584_v32 = vld [vmem:[#allocation9 + $0x2c0] sm:$0xff]  ;;  %7371 = vmatpush.msra.mxu0 %v14692_v23  ;;  %7560 = vmatpush.msra.mxu2 %v14711_v5 }
 0x6d0   : > { %17938 = vst [vmem:[#allocation75_spill] sm:$0xff] %v14795_v28  ;;  %v14825_v28 = vadd.f32 %v5300_v1, %v5291_v20  ;;  %v17952_v1 = vand.u32 4294901760, %v17924_v22  ;;  %v14868_v22 = vsub.f32 %v5589_v25, %v14823_v18  ;;  %v5586_v25 = vld [vmem:[#allocation9 + $0x2d0] sm:$0xff]  ;;  %v5112_v20 = vmul.f32 %v14360_v40, %v5107_v14  ;;  %7614 = vmatpush.msra.mxu3 %v14631_v16 }
 0x6d1   : > { %17939 = vst [vmem:[#allocation101_spill] sm:$0xff] %v14799_v6  ;;  %v14859_v41 = vsub.f32 %v5590_v34, %v14812_v58  ;;  %v14875_v34 = vsel %vm14840_vm5, 1.0, %v17489_v49  ;;  %v5297_v6 = vmul.f32 %v14383_v26, %v5107_v14  ;;  %v14925_v36 = vand.u32 4294901760, %v5586_v25  ;;  %7373 = vmatpush.msra.mxu0 %v14733_v63  ;;  %7340 = vmatmul.f32.gmra.mxu3 %v14331_v60 }
 0x6d2   : > { %17941 = vst [vmem:[#allocation102_spill] sm:$0xff] %v14812_v58  ;;  %v5448_v31 = vmul.f32 %v5444_v7, %v14825_v28  ;;  %7204 = vmatmul.f32.gmra.mxu1 %v17952_v1  ;;  %v17955_v7 = vand.u32 4294901760, %v14705_v43  ;;  %v7379_v43 = vsub.f32 %v14784_v9, %v17958_v4  ;;  %v14894_v4 = vsub.f32 %v14787_v29, %v17962_v50 }
 0x6d3   : > { %17942 = vst [vmem:[#allocation103_spill] sm:$0xff] %v14819_v27  ;;  %v17977_v0 = vand.u32 4294901760, %v14859_v41  ;;  %7563 = vmatpush.msra.mxu2 %v14737_v21  ;;  %7616 = vmatpush.msra.mxu3 %v14656_v61 }
 0x6d4   : > { %17943 = vst [vmem:[#allocation104_spill] sm:$0xff] %v14821_v54  ;;  %v17954_v54 = vld [vmem:[#allocation42_spill] sm:$0xff]  ;;  %7462 = vmatpush.msra.mxu1 %v17955_v7  ;;  %v14870_v1 = vadd.f32 %v5448_v31, %v5439_v44  ;;  %v5585_v44 = vld [vmem:[#allocation9 + $0x2c8] sm:$0xff]  ;;  %v14885_v31 = vpop.f32.mrf.mxu3  ;;  %v14898_v7 = vsub.f32 %v14633_v19, %v14848_v47  ;;  %v5116_v19 = vmul.f32 %v14875_v34, %v5112_v20  ;;  %v5583_v20 = vld [vmem:[#allocation9 + $0x2b8] sm:$0xff]  ;;  %v7380_v52 = vand.u32 4294901760, %v7379_v43 }
 0x6d5   : > { %17944 = vst [vmem:[#allocation105_spill] sm:$0xff] %v14823_v18  ;;  %7153 = vmatmul.f32.gmra.mxu0 %v17954_v54  ;;  %v14927_v50 = vand.u32 4294901760, %v5585_v44  ;;  %v14945_v43 = vand.u32 4294901760, %v5584_v32  ;;  %v14953_v48 = vsub.f32 %v14859_v41, %v17977_v0  ;;  %v7497_v60 = vand.u32 4294901760, %v14894_v4  ;;  %7566 = vmatpush.msra.mxu2 %v14787_v29 }
 0x6d6   : > { %17945 = vst [vmem:[#allocation106_spill] sm:$0xff] %v14825_v28  ;;  %v14883_v28 = vpop.f32.mrf.mxu2  ;;  %7468 = vmatpush.msra.mxu1 %v7467_v38  ;;  %v14910_v38 = vsub.f32 %v14810_v56, %v17965_v15  ;;  %v14923_v15 = vpop.f32.mrf.mxu0  ;;  %7375 = vmatpush.msra.mxu0 %v14761_v55  ;;  %v14979_v4 = vand.u32 4294901760, %v14870_v1 }
 0x6d7   : > { %17950 = vst [vmem:[#allocation46_spill] sm:$0xff] %v14848_v47  ;;  %v17971_v47 = vld [vmem:[#allocation44_spill] sm:$0xff]  ;;  %v14971_v0 = vsub.f32 %v5585_v44, %v14927_v50  ;;  %v17988_v44 = vand.u32 4294901760, %v14807_v46  ;;  %7618 = vmatpush.msra.mxu3 %v14692_v23  ;;  %7569 = vmatpush.msra.mxu2 %v14810_v56 }
 0x6d8   : > { %17951 = vst [vmem:[#allocation107_spill] sm:$0xff] %v14850_v13  ;;  %7474 = vmatpush.msra.mxu1 %v7473_v8  ;;  %7572 = vmatmul.f32.vlgmr.msra.gmra.mxu2 %v14784_v9 }
 0x6d9   : > { %17953 = vst [vmem:[#allocation108_spill] sm:$0xff] %v14859_v41  ;;  %7620 = vmatpush.msra.mxu3 %v14733_v63  ;;  %7779 = vmatpush.msrb.mxu2 %v14765_v37  ;;  %v18043_v63 = vld [vmem:[#allocation71_spill] sm:$0xff] }
 0x6da   : > { %17956 = vst [vmem:[#allocation42_spill] sm:$0xff] %v14868_v22 }
 0x6db   : > { %17957 = vst [vmem:[#allocation109_spill] sm:$0xff] %v14875_v34  ;;  %v14929_v34 = vpop.f32.mrf.mxu1  ;;  %7622 = vmatpush.msra.mxu3 %v14761_v55  ;;  %7781 = vmatpush.msrb.mxu2 %v14812_v58  ;;  %v18016_v58 = vld [vmem:[#allocation74_spill] sm:$0xff]  ;;  %v18041_v55 = vld [vmem:[#allocation84_spill] sm:$0xff] }
 0x6dc   : > { %17959 = vst [vmem:[#allocation110_spill] sm:$0xff] %v14883_v28  ;;  %v14900_v28 = vand.u32 4294901760, %v5587_v3 }
 0x6dd   : > { %17960 = vst [vmem:[#allocation111_spill] sm:$0xff] %v14885_v31  ;;  %v14903_v31 = vsub.f32 %v5588_v57, %v14850_v13  ;;  %v17966_v57 = vand.u32 4294901760, %v14819_v27  ;;  %v14933_v13 = vadd.f32 %v5116_v19, %v17971_v47  ;;  %v14955_v47 = vand.u32 4294901760, %v5583_v20  ;;  %7381 = vmatmul.f32.vlgmr.msra.gmra.mxu0 %v7380_v52  ;;  %7783 = vmatpush.msrb.mxu2 %v14823_v18  ;;  %v18025_v18 = vld [vmem:[#allocation90_spill] sm:$0xff] }
 0x6de   : > { %17963 = vst [vmem:[#allocation112_spill] sm:$0xff] %v14900_v28  ;;  %v14943_v8 = vsub.f32 %v5587_v3, %v14900_v28 }
 0x6df   : > { %17964 = vst [vmem:[#allocation113_spill] sm:$0xff] %v14903_v31  ;;  %v14920_v59 = vsub.f32 %v14819_v27, %v17966_v57  ;;  %v17972_v57 = vld [vmem:[#allocation59_spill] sm:$0xff]  ;;  %v5301_v19 = vmul.f32 %v5297_v6, %v14933_v13  ;;  %v14976_v6 = vpop.f32.mrf.mxu2  ;;  %v15011_v46 = vsub.f32 %v5583_v20, %v14955_v47 }
 0x6e0   : > { %17967 = vst [vmem:[#allocation114_spill] sm:$0xff] %v14923_v15  ;;  %v5292_v27 = vmul.f32 %v5288_v24, %v17972_v57  ;;  %v17976_v24 = vand.u32 4294901760, %v14778_v51  ;;  %v5445_v57 = vmul.f32 %v14429_v35, %v5107_v14  ;;  %v17979_v51 = vand.u32 4294901760, %v14868_v22  ;;  %7577 = vmatmul.f32.gmra.mxu2 %v14898_v7 }
 0x6e1   : > { %17968 = vst [vmem:[#allocation115_spill] sm:$0xff] %v14925_v36  ;;  %v17982_v14 = vand.u32 4294901760, %v17954_v54  ;;  %v17989_v54 = vand.u32 4294901760, %v14898_v7 }
 0x6e2   : > { %17969 = vst [vmem:[#allocation116_spill] sm:$0xff] %v14927_v50  ;;  %7480 = vmatpush.msra.mxu1 %v17976_v24  ;;  %v14965_v3 = vsub.f32 %v14868_v22, %v17979_v51  ;;  %v14968_v24 = vsub.f32 %v5586_v25, %v14925_v36  ;;  %v17985_v51 = vld [vmem:[#allocation60_spill] sm:$0xff]  ;;  %v14984_v22 = vpop.f32.mrf.mxu3  ;;  %v17987_v25 = vld [vmem:[#allocation73_spill] sm:$0xff] }
 0x6e3   : > { %17970 = vst [vmem:[#allocation117_spill] sm:$0xff] %v14929_v34  ;;  %7210 = vmatmul.f32.gmra.mxu1 %v17982_v14  ;;  %v14981_v34 = vadd.f32 %v5301_v19, %v5292_v27  ;;  %v5440_v15 = vmul.f32 %v5436_v11, %v17985_v51  ;;  %v14987_v41 = vperm.slane %v17987_v25, 1  ;;  %v14994_v14 = vsub.f32 %v14898_v7, %v17989_v54  ;;  %v17992_v51 = vld [vmem:[#allocation82_spill] sm:$0xff] }
 0x6e4   : > { %17974 = vst [vmem:[#allocation44_spill] sm:$0xff] %v14943_v8  ;;  %7486 = vmatpush.msra.mxu1 %v17988_v44  ;;  %v15003_v19 = vsub.f32 %v5584_v32, %v14945_v43  ;;  %v15006_v52 = vperm.slane %v17992_v51, 2  ;;  %v17995_v44 = vand.u32 4294901760, %v14446_v10  ;;  %v17996_v32 = vand.u32 4294901760, %v14835_v39 }
 0x6e5   : > { %17975 = vst [vmem:[#allocation59_spill] sm:$0xff] %v14945_v43  ;;  %v5449_v25 = vmul.f32 %v5445_v57, %v14981_v34  ;;  %v7503_v54 = vand.u32 4294901760, %v14910_v38  ;;  %v7847_v51 = vand.u32 4294901760, %v14920_v59  ;;  %v5582_v57 = vld [vmem:[#allocation9 + $0x2b0] sm:$0xff]  ;;  %v7853_v10 = vand.u32 4294901760, %v14953_v48 }
 0x6e6   : > { %17978 = vst [vmem:[#allocation93_spill] sm:$0xff] %v14955_v47  ;;  %7651 = vmatpush.msrb.mxu0 %v17995_v44  ;;  %7492 = vmatpush.msra.mxu1 %v17996_v32  ;;  %v15031_v39 = vsub.f32 %v14870_v1, %v14979_v4  ;;  %v5581_v44 = vld [vmem:[#allocation9 + $0x2a8] sm:$0xff]  ;;  %v17998_v59 = vand.u32 4294901760, %v14465_v62  ;;  %v7388_v32 = vand.u32 4294901760, %v14994_v14  ;;  %v7859_v20 = vand.u32 4294901760, %v14965_v3 }
 0x6e7   : > { %17980 = vst [vmem:[#allocation118_spill] sm:$0xff] %v14968_v24  ;;  %v5453_v38 = vadd.f32 %v5449_v25, %v5440_v15  ;;  %v17999_v11 = vand.u32 4294901760, %v14943_v8  ;;  %v15045_v15 = vpop.f32.mrf.mxu1  ;;  %v15057_v3 = vand.u32 4294901760, %v5582_v57  ;;  %v18004_v25 = vand.u32 4294901760, %v14498_v45  ;;  %7848 = vmatpush.msrb.mxu3 %v7847_v51 }
 0x6e8   : > { %17981 = vst [vmem:[#allocation119_spill] sm:$0xff] %v14971_v0  ;;  %7655 = vmatpush.msrb.mxu0 %v17998_v59  ;;  %7498 = vmatpush.msra.mxu1 %v7497_v60  ;;  %v18005_v59 = vand.u32 4294901760, %v14968_v24  ;;  %v18006_v60 = vand.u32 4294901760, %v14971_v0  ;;  %v15077_v14 = vand.u32 4294901760, %v5581_v44  ;;  %v18007_v45 = vand.u32 4294901760, %v14784_v9 }
 0x6e9   : > { %17983 = vst [vmem:[#allocation120_spill] sm:$0xff] %v14976_v6  ;;  %v17990_v6 = vand.u32 4294901760, %v14903_v31  ;;  %v15042_v48 = vsub.f32 %v14943_v8, %v17999_v11  ;;  %v15114_v9 = vsub.f32 %v5582_v57, %v15057_v3  ;;  %7389 = vmatmul.f32.gmra.mxu0 %v7388_v32  ;;  %7854 = vmatpush.msrb.mxu3 %v7853_v10  ;;  %v18021_v32 = vld [vmem:[#allocation37_spill] sm:$0xff] }
 0x6ea   : > { %17984 = vst [vmem:[#allocation121_spill] sm:$0xff] %v14981_v34  ;;  %7659 = vmatpush.msrb.mxu0 %v18004_v25  ;;  %v15070_v1 = vsub.f32 %v14968_v24, %v18005_v59  ;;  %v15075_v8 = vsub.f32 %v14971_v0, %v18006_v60  ;;  %7504 = vmatpush.msra.mxu1 %v7503_v54  ;;  %v15086_v59 = vand.u32 4294901760, %v5453_v38  ;;  %v18011_v25 = vld [vmem:[#allocation39_spill] sm:$0xff]  ;;  %v15118_v24 = vpop.f32.mrf.mxu3 }
 0x6eb   : > { %17986 = vst [vmem:[#allocation60_spill] sm:$0xff] %v14984_v22  ;;  %v14999_v27 = vsub.f32 %v14903_v31, %v17990_v6  ;;  %v17994_v6 = vld [vmem:[#allocation81_spill] sm:$0xff]  ;;  %v15024_v22 = vpop.f32.mrf.mxu0  ;;  %7626 = vmatmul.f32.vlgmr.msra.gmra.mxu3 %v18007_v45  ;;  %v15084_v31 = vpop.f32.mrf.mxu2  ;;  %v5306_v62 = vmul.f32 %v14383_v26, %v18011_v25  ;;  %7506 = vmatmul.f32.vlgmr.msra.gmra.mxu1 %v14740_v30 }
 0x6ec   : > { %17991 = vst [vmem:[#allocation73_spill] sm:$0xff] %v15003_v19  ;;  %vm4875_vm6 = vcmp.ge.f32.partialorder %v17994_v6, %v14355_v53  ;;  %vm4880_vm7 = vcmp.lt.f32.partialorder %v17994_v6, %v14987_v41  ;;  %v15062_v11 = vsub.f32 %v17994_v6, %v17734_v17  ;;  %7730 = vmatpush.msrb.mxu1 %v14413_v42  ;;  %v18020_v42 = vand.u32 4294901760, %v15031_v39 }
 0x6ed   : > { %17993 = vst [vmem:[#allocation82_spill] sm:$0xff] %v15011_v46  ;;  %vm15050_vm8 = vmand %vm4875_vm6, %vm4880_vm7  ;;  %v5310_v37 = vmul.f32 %v5306_v62, %v18025_v18  ;;  %7860 = vmatpush.msrb.mxu3 %v7859_v20  ;;  %7582 = vmatmul.f32.gmra.mxu2 %v15031_v39 }
 0x6ee   : > { %17997 = vst [vmem:[#allocation81_spill] sm:$0xff] %v15024_v22  ;;  %v5133_v22 = vsub.f32 %v14987_v41, %v17994_v6  ;;  %v15091_v60 = vsel %vm15050_vm8, 1.0, %v17489_v49  ;;  %v5125_v0 = vmul.f32 %v15062_v11, %v14360_v40  ;;  %v18010_v6 = vand.u32 4294901760, %v15003_v19 }
 0x6ef   : > { %18000 = vst [vmem:[#allocation122_spill] sm:$0xff] %v15045_v15  ;;  %v5580_v15 = vld [vmem:[#allocation9 + $0x2a0] sm:$0xff] }
 0x6f0   : > { %18003 = vst [vmem:[#allocation123_spill] sm:$0xff] %v15062_v11  ;;  %v15100_v54 = vsub.f32 %v15003_v19, %v18010_v6  ;;  %v5138_v45 = vmul.f32 %v14521_v12, %v5133_v22  ;;  %v18013_v11 = vand.u32 4294901760, %v15011_v46  ;;  %v15116_v6 = vand.u32 4294901760, %v5580_v15  ;;  %v5579_v19 = vld [vmem:[#allocation9 + $0x298] sm:$0xff] }
 0x6f1   : > { %18008 = vst [vmem:[#allocation124_spill] sm:$0xff] %v15084_v31  ;;  %v18012_v31 = vand.u32 4294901760, %v14502_v33  ;;  %v5129_v25 = vmul.f32 %v18016_v58, %v5125_v0  ;;  %v15123_v33 = vsub.f32 %v5581_v44, %v15077_v14  ;;  %v5315_v57 = vmul.f32 %v15006_v52, %v5133_v22  ;;  %v18027_v0 = vld [vmem:[#allocation107_spill] sm:$0xff] }
 0x6f2   : > { %18009 = vst [vmem:[#allocation125_spill] sm:$0xff] %v15091_v60  ;;  %v15111_v51 = vsub.f32 %v15011_v46, %v18013_v11  ;;  %v5142_v11 = vmul.f32 %v15091_v60, %v5138_v45  ;;  %v15132_v46 = vld [vmem:[%s16864_s9 + $0x18] sm:$0xff]  ;;  %v7395_v58 = vsub.f32 %v15031_v39, %v18020_v42  ;;  %v15143_v44 = vsub.f32 %v5453_v38, %v15086_v59  ;;  %v18026_v42 = vld [vmem:[#allocation69_spill] sm:$0xff] }
 0x6f3   : > { %7663 = vmatpush.msrb.mxu0 %v18012_v31  ;;  %18014 = vst [vmem:[#allocation126_spill] sm:$0xff] %v15114_v9  ;;  %v15125_v31 = vpop.f32.mrf.mxu0  ;;  %v5454_v45 = vmul.f32 %v14429_v35, %v18021_v32  ;;  %v18022_v60 = vand.u32 4294901760, %v14536_v2  ;;  %vm4876_vm9 = vcmp.ge.f32.partialorder %v18026_v42, %v14355_v53  ;;  %7785 = vmatpush.msrb.mxu2 %v18027_v0  ;;  %v15176_v32 = vpop.f32.mrf.mxu1  ;;  %v18033_v38 = vld [vmem:[#allocation49_spill] sm:$0xff] }
 0x6f4   : > { %18015 = vst [vmem:[#allocation127_spill] sm:$0xff] %v15118_v24  ;;  %v15135_v24 = vperm.slane %v15132_v46, 4  ;;  %v15152_v10 = vadd.f32 %v5142_v11, %v5129_v25  ;;  %vm4881_vm10 = vcmp.lt.f32.partialorder %v18026_v42, %v14987_v41  ;;  %v15163_v2 = vsub.f32 %v18026_v42, %v17734_v17  ;;  %v18029_v25 = vld [vmem:[#allocation54_spill] sm:$0xff] }
 0x6f5   : > { %18017 = vst [vmem:[#allocation74_spill] sm:$0xff] %v15123_v33  ;;  %7667 = vmatpush.msrb.mxu0 %v18022_v60  ;;  %v18030_v18 = vand.u32 4294901760, %v18029_v25  ;;  %v15172_v20 = vsub.f32 %v5580_v15, %v15116_v6  ;;  %vm4885_vm11 = vmand %vm4876_vm9, %vm4881_vm10  ;;  %7787 = vmatpush.msrb.mxu2 %v14900_v28  ;;  %v18037_v60 = vand.u32 4294901760, %v14999_v27  ;;  %v7396_v28 = vand.u32 4294901760, %v7395_v58 }
 0x6f6   : > { %18018 = vst [vmem:[#allocation128_spill] sm:$0xff] %v15125_v31  ;;  %v15150_v31 = vand.u32 4294901760, %v5579_v19  ;;  %v5319_v62 = vmul.f32 %v5315_v57, %v15152_v10  ;;  %v5463_v11 = vmul.f32 %v15135_v24, %v5133_v22  ;;  %v15183_v25 = vsel %vm4885_vm11, 1.0, %v17489_v49  ;;  %v18036_v57 = vld [vmem:[#allocation56_spill] sm:$0xff]  ;;  %7587 = vmatmul.f32.gmra.mxu2 %v15143_v44 }
 0x6f7   : > { %18019 = vst [vmem:[#allocation129_spill] sm:$0xff] %v15132_v46  ;;  %v18023_v46 = vld [vmem:[#allocation83_spill] sm:$0xff]  ;;  %7671 = vmatpush.msrb.mxu0 %v18030_v18  ;;  %v5126_v15 = vmul.f32 %v15163_v2, %v14360_v40  ;;  %v5307_v22 = vmul.f32 %v14383_v26, %v18036_v57  ;;  %7866 = vmatpush.msrb.mxu3 %v18037_v60  ;;  %v17225_v0 = vand.u32 4294901760, %v15143_v44  ;;  %v7883_v57 = vand.u32 4294901760, %v15075_v8 }
 0x6f8   : > { %7732 = vmatpush.msrb.mxu1 %v18023_v46  ;;  %18024 = vst [vmem:[#allocation37_spill] sm:$0xff] %v15152_v10  ;;  %v5134_v46 = vsub.f32 %v14987_v41, %v18026_v42  ;;  %v15180_v42 = vpop.f32.mrf.mxu2  ;;  %v18038_v10 = vld [vmem:[#allocation41_spill] sm:$0xff]  ;;  %v5458_v34 = vmul.f32 %v5454_v45, %v18041_v55  ;;  %v15203_v27 = vsub.f32 %v5579_v19, %v15150_v31  ;;  %v7889_v55 = vand.u32 4294901760, %v15100_v54 }
 0x6f9   : > { %18028 = vst [vmem:[#allocation83_spill] sm:$0xff] %v15163_v2  ;;  %v18042_v2 = vand.u32 4294901760, %v14898_v7  ;;  %7789 = vmatpush.msrb.mxu2 %v14925_v36  ;;  %v18047_v7 = vand.u32 4294901760, %v15114_v9  ;;  %7397 = vmatmul.f32.gmra.mxu0 %v7396_v28 }
 0x6fa   : > { %18031 = vst [vmem:[#allocation90_spill] sm:$0xff] %v15172_v20  ;;  %7734 = vmatpush.msrb.mxu1 %v18033_v38  ;;  %v5139_v18 = vmul.f32 %v14521_v12, %v5134_v46  ;;  %v18039_v38 = vand.u32 4294901760, %v18038_v10  ;;  %v18045_v10 = vld [vmem:[#allocation94_spill] sm:$0xff]  ;;  %v5316_v45 = vmul.f32 %v15006_v52, %v5134_v46  ;;  %v5464_v28 = vmul.f32 %v15135_v24, %v5134_v46 }
 0x6fb   : > { %18032 = vst [vmem:[#allocation69_spill] sm:$0xff] %v15176_v32  ;;  %v15195_v32 = vadd.f32 %v5319_v62, %v5310_v37  ;;  %7632 = vmatmul.f32.gmra.mxu3 %v18042_v2  ;;  %v5130_v60 = vmul.f32 %v18045_v10, %v5126_v15  ;;  %v18046_v37 = vand.u32 4294901760, %v15042_v48  ;;  %v15217_v19 = vpop.f32.mrf.mxu0  ;;  %v18049_v2 = vld [vmem:[#allocation88_spill] sm:$0xff]  ;;  %v18051_v15 = vld [vmem:[#allocation46_spill] sm:$0xff]  ;;  %v18052_v48 = vand.u32 4294901760, %v15123_v33  ;;  %7791 = vmatpush.msrb.mxu2 %v14927_v50 }
 0x6fc   : > { %18034 = vst [vmem:[#allocation54_spill] sm:$0xff] %v15180_v42  ;;  %7675 = vmatpush.msrb.mxu0 %v18039_v38  ;;  %v5578_v42 = vld [vmem:[#allocation9 + $0x290] sm:$0xff]  ;;  %7736 = vmatpush.msrb.mxu1 %v18043_v63  ;;  %v5143_v58 = vmul.f32 %v15183_v25, %v5139_v18  ;;  %v15214_v63 = vsub.f32 %v15114_v9, %v18047_v7  ;;  %v18050_v62 = vand.u32 4294901760, %v18049_v2  ;;  %v15230_v38 = vpop.f32.mrf.mxu3  ;;  %v18056_v7 = vld [vmem:[#allocation87_spill] sm:$0xff]  ;;  %v18073_v9 = vld [vmem:[#allocation96_spill] sm:$0xff] }
 0x6fd   : > { %18035 = vst [vmem:[#allocation49_spill] sm:$0xff] %v15183_v25  ;;  %7872 = vmatpush.msrb.mxu3 %v18046_v37  ;;  %v5467_v8 = vmul.f32 %v5463_v11, %v15195_v32  ;;  %7510 = vmatmul.f32.gmra.mxu1 %v18051_v15  ;;  %v15226_v54 = vsub.f32 %v15123_v33, %v18052_v48  ;;  %v15228_v18 = vand.u32 4294901760, %v5578_v42  ;;  %v18055_v11 = vld [vmem:[#allocation45_spill] sm:$0xff]  ;;  %v18070_v33 = vld [vmem:[#allocation66_spill] sm:$0xff] }
 0x6fe   : > { %18040 = vst [vmem:[#allocation41_spill] sm:$0xff] %v15195_v32  ;;  %7679 = vmatpush.msrb.mxu0 %v18050_v62  ;;  %v15232_v10 = vadd.f32 %v5143_v58, %v5130_v60  ;;  %v5311_v37 = vmul.f32 %v5307_v22, %v18055_v11  ;;  %7738 = vmatpush.msrb.mxu1 %v18056_v7  ;;  %v5577_v48 = vld [vmem:[#allocation9 + $0x288] sm:$0xff]  ;;  %v18058_v60 = vand.u32 4294901760, %v15070_v1  ;;  %v5576_v22 = vld [vmem:[#allocation9 + $0x280] sm:$0xff]  ;;  %v7895_v1 = vand.u32 4294901760, %v15111_v51 }
 0x6ff   : > { %18044 = vst [vmem:[#allocation84_spill] sm:$0xff] %v15203_v27  ;;  %v15239_v2 = vsub.f32 %v15143_v44, %v17225_v0  ;;  %v5471_v25 = vadd.f32 %v5467_v8, %v5458_v34  ;;  %v18057_v32 = vld [vmem:[#allocation53_spill] sm:$0xff]  ;;  %v18060_v34 = vld [vmem:[#allocation52_spill] sm:$0xff]  ;;  %7793 = vmatpush.msrb.mxu2 %v14945_v43  ;;  %v15267_v62 = vand.u32 4294901760, %v5577_v48 }
 0x700   : > { %18048 = vst [vmem:[#allocation71_spill] sm:$0xff] %v15217_v19  ;;  %vm4877_vm12 = vcmp.ge.f32.partialorder %v18057_v32, %v14355_v53  ;;  %7878 = vmatpush.msrb.mxu3 %v18058_v60  ;;  %v5320_v58 = vmul.f32 %v5316_v45, %v15232_v10  ;;  %vm4882_vm13 = vcmp.lt.f32.partialorder %v18057_v32, %v14987_v41  ;;  %v18061_v8 = vand.u32 4294901760, %v18060_v34  ;;  %v18062_v7 = vld [vmem:[#allocation77_spill] sm:$0xff]  ;;  %v15269_v34 = vpop.f32.mrf.mxu2  ;;  %v18071_v43 = vld [vmem:[#allocation92_spill] sm:$0xff] }
 0x701   : > { %18053 = vst [vmem:[#allocation94_spill] sm:$0xff] %v15230_v38  ;;  %v15253_v11 = vsub.f32 %v18057_v32, %v17734_v17  ;;  %7740 = vmatpush.msrb.mxu1 %v18062_v7  ;;  %v18063_v60 = vld [vmem:[#allocation33_spill] sm:$0xff]  ;;  %vm4886_vm14 = vmand %vm4877_vm12, %vm4882_vm13  ;;  %v15264_v45 = vsub.f32 %v14987_v41, %v18057_v32  ;;  %v18066_v7 = vld [vmem:[#allocation35_spill] sm:$0xff]  ;;  %v18068_v32 = vand.u32 4294901760, %v15172_v20  ;;  %7795 = vmatpush.msrb.mxu2 %v14955_v47 }
 0x702   : > { %18054 = vst [vmem:[#allocation88_spill] sm:$0xff] %v15232_v10  ;;  %7683 = vmatpush.msrb.mxu0 %v18061_v8  ;;  %v5455_v0 = vmul.f32 %v14429_v35, %v18063_v60  ;;  %7884 = vmatpush.msrb.mxu3 %v7883_v57  ;;  %v15271_v8 = vadd.f32 %v5320_v58, %v5311_v37  ;;  %v15274_v51 = vsel %vm4886_vm14, 1.0, %v17489_v49  ;;  %v18067_v60 = vand.u32 4294901760, %v18066_v7  ;;  %v15288_v37 = vpop.f32.mrf.mxu1  ;;  %v18074_v38 = vld [vmem:[#allocation55_spill] sm:$0xff] }
 0x703   : > { %18059 = vst [vmem:[#allocation46_spill] sm:$0xff] %v15253_v11  ;;  %v5127_v46 = vmul.f32 %v15253_v11, %v14360_v40  ;;  %v15284_v57 = vsub.f32 %v15172_v20, %v18068_v32  ;;  %v15286_v10 = vand.u32 4294901760, %v5576_v22  ;;  %v5140_v58 = vmul.f32 %v14521_v12, %v15264_v45  ;;  %7742 = vmatpush.msrb.mxu1 %v18071_v43  ;;  %v15312_v19 = vpop.f32.mrf.mxu0 }
 0x704   : > { %18064 = vst [vmem:[#allocation45_spill] sm:$0xff] %v15271_v8  ;;  %7687 = vmatpush.msrb.mxu0 %v18067_v60  ;;  %v5308_v11 = vmul.f32 %v14383_v26, %v18070_v33  ;;  %v18072_v7 = vand.u32 4294901760, %v15203_v27  ;;  %v15302_v32 = vsub.f32 %v5578_v42, %v15228_v18  ;;  %v15304_v20 = vand.u32 4294901760, %v5471_v25  ;;  %7890 = vmatpush.msrb.mxu3 %v7889_v55  ;;  %v18076_v33 = vld [vmem:[#allocation51_spill] sm:$0xff] }
 0x705   : > { %18065 = vst [vmem:[#allocation87_spill] sm:$0xff] %v15274_v51  ;;  %v5131_v50 = vmul.f32 %v18073_v9, %v5127_v46  ;;  %v18075_v36 = vand.u32 4294901760, %v18074_v38  ;;  %v7404_v43 = vand.u32 4294901760, %v15239_v2  ;;  %v5459_v47 = vmul.f32 %v5455_v0, %v18076_v33  ;;  %v18079_v33 = vld [vmem:[#allocation101_spill] sm:$0xff]  ;;  %7797 = vmatpush.msrb.mxu2 %v15057_v3  ;;  %v18082_v2 = vld [vmem:[#allocation34_spill] sm:$0xff]  ;;  %7514 = vmatmul.f32.gmra.mxu1 %v14979_v4 }
 0x706   : > { %18069 = vst [vmem:[#allocation53_spill] sm:$0xff] %v15288_v37  ;;  %v15299_v60 = vsub.f32 %v15203_v27, %v18072_v7  ;;  %v5468_v37 = vmul.f32 %v5464_v28, %v15271_v8  ;;  %v5144_v7 = vmul.f32 %v15274_v51, %v5140_v58  ;;  %v18077_v42 = vand.u32 4294901760, %v15031_v39  ;;  %v18078_v27 = vld [vmem:[#allocation38_spill] sm:$0xff]  ;;  %7896 = vmatpush.msrb.mxu3 %v7895_v1  ;;  %v15341_v1 = vpop.f32.mrf.mxu3  ;;  %v18183_v51 = vld [vmem:[#allocation59_spill] sm:$0xff] }
 0x707   : > { %7691 = vmatpush.msrb.mxu0 %v18075_v36  ;;  %7744 = vmatpush.msrb.mxu1 %v18078_v27  ;;  %v7901_v9 = vand.u32 4294901760, %v15214_v63  ;;  %v15320_v55 = vsub.f32 %v5577_v48, %v15267_v62  ;;  %v5317_v36 = vmul.f32 %v15006_v52, %v15264_v45  ;;  %vm4878_vm15 = vcmp.ge.f32.partialorder %v18079_v33, %v14355_v53  ;;  %v18081_v63 = vld [vmem:[#allocation67_spill] sm:$0xff]  ;;  %v18184_v8 = vld [vmem:[#allocation74_spill] sm:$0xff] }
 0x708   : > { %7638 = vmatmul.f32.gmra.mxu3 %v18077_v42  ;;  %v7907_v0 = vand.u32 4294901760, %v15226_v54  ;;  %v15329_v39 = vsub.f32 %v5576_v22, %v15286_v10  ;;  %v15331_v27 = vadd.f32 %v5144_v7, %v5131_v50  ;;  %v5312_v38 = vmul.f32 %v5308_v11, %v18081_v63  ;;  %7405 = vmatmul.f32.gmra.mxu0 %v7404_v43  ;;  %v18085_v54 = vld [vmem:[#allocation50_spill] sm:$0xff]  ;;  %v15361_v43 = vpop.f32.mrf.mxu2  ;;  %v18086_v7 = vld [vmem:[#allocation68_spill] sm:$0xff] }
 0x709   : > { %v18083_v48 = vand.u32 4294901760, %v18082_v2  ;;  %v17244_v28 = vand.u32 4294901760, %v15302_v32  ;;  %v15339_v46 = vsub.f32 %v5471_v25, %v15304_v20  ;;  %vm4883_vm0 = vcmp.lt.f32.partialorder %v18079_v33, %v14987_v41  ;;  %7746 = vmatpush.msrb.mxu1 %v18085_v54  ;;  %7799 = vmatpush.msrb.mxu2 %v15077_v14 }
 0x70a   : > { %18080 = vst [vmem:[#allocation52_spill] sm:$0xff] %v15331_v27  ;;  %v15347_v50 = vsub.f32 %v18079_v33, %v17734_v17  ;;  %v7913_v22 = vand.u32 4294901760, %v15284_v57  ;;  %v5472_v11 = vadd.f32 %v5468_v37, %v5459_v47  ;;  %v5321_v58 = vmul.f32 %v5317_v36, %v15331_v27  ;;  %vm4887_vm1 = vmand %vm4878_vm15, %vm4883_vm0  ;;  %7902 = vmatpush.msrb.mxu3 %v7901_v9  ;;  %v18089_v36 = vld [vmem:[#allocation43_spill] sm:$0xff] }
 0x70b   : > { %7695 = vmatpush.msrb.mxu0 %v18083_v48  ;;  %v15357_v25 = vsub.f32 %v14987_v41, %v18079_v33  ;;  %v17248_v17 = vand.u32 4294901760, %v15320_v55  ;;  %v5456_v47 = vmul.f32 %v14429_v35, %v18086_v7  ;;  %v15366_v57 = vsel %vm4887_vm1, 1.0, %v17489_v49  ;;  %7748 = vmatpush.msrb.mxu1 %v18089_v36  ;;  %v18094_v7 = vld [vmem:[#allocation36_spill] sm:$0xff] }
 0x70c   : > { %18084 = vst [vmem:[#allocation77_spill] sm:$0xff] %v15347_v50  ;;  %v5128_v37 = vmul.f32 %v15347_v50, %v14360_v40  ;;  %v18088_v42 = vand.u32 4294901760, %v14711_v5  ;;  %v7919_v9 = vand.u32 4294901760, %v15299_v60  ;;  %v15374_v33 = vadd.f32 %v5321_v58, %v5312_v38  ;;  %7801 = vmatpush.msrb.mxu2 %v15116_v6  ;;  %7908 = vmatpush.msrb.mxu3 %v7907_v0  ;;  %v18091_v60 = vld [vmem:[#allocation109_spill] sm:$0xff]  ;;  %v15392_v58 = vpop.f32.mrf.mxu1  ;;  %v18096_v48 = vld [vmem:[#allocation40_spill] sm:$0xff]  ;;  %v18099_v5 = vld [vmem:[#allocation58_spill] sm:$0xff]  ;;  %v15408_v50 = vpop.f32.mrf.mxu0 }
 0x70d   : > { %18087 = vst [vmem:[#allocation33_spill] sm:$0xff] %v15366_v57  ;;  %v5465_v63 = vmul.f32 %v15135_v24, %v15264_v45  ;;  %v5141_v2 = vmul.f32 %v14521_v12, %v15357_v25  ;;  %v7924_v40 = vsub.f32 %v15302_v32, %v17244_v28  ;;  %v18092_v54 = vand.u32 4294901760, %v14737_v21  ;;  %v18095_v28 = vld [vmem:[#allocation78_spill] sm:$0xff]  ;;  %v18098_v21 = vld [vmem:[#allocation80_spill] sm:$0xff]  ;;  %7750 = vmatpush.msrb.mxu1 %v18099_v5  ;;  %v18104_v5 = vld [vmem:[#allocation61_spill] sm:$0xff] }
 0x70e   : > { %7699 = vmatpush.msrb.mxu0 %v18088_v42  ;;  %18090 = vst [vmem:[#allocation35_spill] sm:$0xff] %v15374_v33  ;;  %v5132_v38 = vmul.f32 %v18091_v60, %v5128_v37  ;;  %v15390_v45 = vand.u32 4294901760, %v5472_v11  ;;  %v5309_v42 = vmul.f32 %v14383_v26, %v18094_v7  ;;  %v5318_v36 = vmul.f32 %v15006_v52, %v15357_v25  ;;  %v18097_v60 = vld [vmem:[#allocation47_spill] sm:$0xff]  ;;  %v18101_v7 = vld [vmem:[#allocation106_spill] sm:$0xff] }
 0x70f   : > { %v5145_v0 = vmul.f32 %v15366_v57, %v5141_v2  ;;  %v6206_v37 = vadd.f32 %v18096_v48, %v18095_v28  ;;  %7803 = vmatpush.msrb.mxu2 %v15150_v31  ;;  %v7930_v2 = vsub.f32 %v15320_v55, %v17248_v17  ;;  %7914 = vmatpush.msrb.mxu3 %v7913_v22  ;;  %v18100_v26 = vand.u32 4294901760, %v14787_v29 }
 0x710   : > { %7703 = vmatpush.msrb.mxu0 %v18092_v54  ;;  %18093 = vst [vmem:[#allocation92_spill] sm:$0xff] %v15390_v45  ;;  %v5987_v54 = vadd.f32 %v18098_v21, %v18097_v60  ;;  %v5460_v57 = vmul.f32 %v5456_v47, %v18101_v7  ;;  %v5469_v28 = vmul.f32 %v5465_v63, %v15374_v33  ;;  %v18103_v60 = vld [vmem:[#allocation64_spill] sm:$0xff]  ;;  %v18105_v27 = vand.u32 4294901760, %v15143_v44 }
 0x711   : > { %v15414_v48 = vadd.f32 %v5145_v0, %v5132_v38  ;;  %v5991_v21 = vadd.f32 %v18104_v5, %v18103_v60  ;;  %7752 = vmatpush.msrb.mxu1 %v14631_v16  ;;  %v7925_v17 = vand.u32 4294901760, %v7924_v40  ;;  %v18106_v22 = vand.u32 4294901760, %v15339_v46  ;;  %7805 = vmatpush.msrb.mxu2 %v15228_v18  ;;  %v18109_v16 = vld [vmem:[#allocation79_spill] sm:$0xff]  ;;  %v18110_v38 = vld [vmem:[#allocation97_spill] sm:$0xff]  ;;  %v15438_v5 = vpop.f32.mrf.mxu2 }
 0x712   : > { %7707 = vmatpush.msrb.mxu0 %v18100_v26  ;;  %7644 = vmatmul.f32.gmra.mxu3 %v18105_v27  ;;  %v18107_v26 = vand.u32 4294901760, %v15329_v39  ;;  %v15429_v63 = vsub.f32 %v5472_v11, %v15390_v45  ;;  %v5313_v44 = vmul.f32 %v5309_v42, %v14933_v13  ;;  %v6036_v40 = vadd.f32 %v18109_v16, %v5987_v54  ;;  %v18112_v11 = vld [vmem:[#allocation85_spill] sm:$0xff]  ;;  %v18113_v42 = vld [vmem:[#allocation48_spill] sm:$0xff]  ;;  %v18115_v54 = vld [vmem:[#allocation63_spill] sm:$0xff] }
 0x713   : > { %18102 = vst [vmem:[#allocation96_spill] sm:$0xff] %v15414_v48  ;;  %v7813_v29 = vsub.f32 %v15339_v46, %v18106_v22  ;;  %7920 = vmatpush.msrb.mxu3 %v7919_v9  ;;  %v5322_v27 = vmul.f32 %v5318_v36, %v15414_v48  ;;  %v6272_v0 = vadd.f32 %v18110_v38, %v6206_v37  ;;  %v18111_v7 = vand.u32 4294901760, %v14810_v56  ;;  %v15440_v9 = vpop.f32.mrf.mxu3  ;;  %v18114_v36 = vld [vmem:[#allocation91_spill] sm:$0xff] }
 0x714   : > { %v7936_v47 = vsub.f32 %v15329_v39, %v18107_v26  ;;  %18108 = vst [vmem:[#allocation55_spill] sm:$0xff] %v15429_v63  ;;  %7518 = vmatmul.f32.gmra.mxu1 %v15086_v59  ;;  %v7931_v60 = vand.u32 4294901760, %v7930_v2  ;;  %v6040_v22 = vadd.f32 %v18112_v11, %v5991_v21  ;;  %v5473_v13 = vadd.f32 %v5469_v28, %v5460_v57  ;;  %v18116_v16 = vld [vmem:[#allocation103_spill] sm:$0xff] }
 0x715   : > { %7711 = vmatpush.msrb.mxu0 %v18111_v7  ;;  %7754 = vmatpush.msrb.mxu1 %v14656_v61  ;;  %v6089_v37 = vadd.f32 %v18114_v36, %v18113_v42  ;;  %v6326_v56 = vadd.f32 %v18115_v54, %v6272_v0  ;;  %v7814_v2 = vand.u32 4294901760, %v7813_v29  ;;  %v17249_v21 = vand.u32 4294901760, %v15429_v63  ;;  %v18118_v61 = vld [vmem:[#allocation70_spill] sm:$0xff]  ;;  %v18119_v0 = vld [vmem:[#allocation72_spill] sm:$0xff]  ;;  %v18128_v54 = vld [vmem:[#allocation121_spill] sm:$0xff] }
 0x716   : > { %7713 = vmatmul.f32.vlgmr.msrb.gmra.mxu0 %v14740_v30  ;;  %7807 = vmatpush.msrb.mxu2 %v15267_v62  ;;  %v7937_v26 = vand.u32 4294901760, %v7936_v47  ;;  %v15452_v38 = vadd.f32 %v5322_v27, %v5313_v44  ;;  %v5457_v57 = vmul.f32 %v14429_v35, %v18118_v61  ;;  %v5466_v28 = vmul.f32 %v15135_v24, %v15357_v25  ;;  %v18121_v47 = vld [vmem:[#allocation108_spill] sm:$0xff]  ;;  %v15465_v44 = vpop.f32.mrf.mxu1  ;;  %v18125_v42 = vld [vmem:[#allocation110_spill] sm:$0xff]  ;;  %v15469_v25 = vpop.f32.mrf.mxu0 }
 0x717   : > { %7926 = vmatpush.msrb.mxu3 %v7925_v17  ;;  %7958 = vmatpush.msra.mxu0 %v18116_v16  ;;  %v6097_v7 = vadd.f32 %v18119_v0, %v6036_v40  ;;  %v18120_v17 = vld [vmem:[#allocation62_spill] sm:$0xff]  ;;  %v15463_v11 = vand.u32 4294901760, %v5473_v13  ;;  %v18124_v27 = vld [vmem:[#allocation76_spill] sm:$0xff]  ;;  %v6413_v36 = vadd.f32 %v18125_v42, %v6326_v56  ;;  %v18126_v40 = vand.u32 4294901760, %v18116_v16 }
 0x718   : > { %7756 = vmatpush.msrb.mxu1 %v14692_v23  ;;  %18117 = vst [vmem:[#allocation51_spill] sm:$0xff] %v15452_v38  ;;  %7809 = vmatpush.msrb.mxu2 %v15286_v10  ;;  %v6105_v29 = vadd.f32 %v18120_v17, %v6040_v22  ;;  %v18122_v23 = vld [vmem:[#allocation98_spill] sm:$0xff]  ;;  %v6210_v35 = vadd.f32 %v18124_v27, %v6089_v37  ;;  %v18129_v37 = vld [vmem:[#allocation57_spill] sm:$0xff]  ;;  %v18130_v56 = vld [vmem:[#allocation104_spill] sm:$0xff]  ;;  %v18133_v42 = vand.u32 4294901760, %v18121_v47 }
 0x719   : > { %7932 = vmatpush.msrb.mxu3 %v7931_v60  ;;  %7961 = vmatpush.msra.mxu0 %v18121_v47  ;;  %18123 = vst [vmem:[#allocation38_spill] sm:$0xff] %v15463_v11  ;;  %v18127_v60 = vld [vmem:[#allocation42_spill] sm:$0xff]  ;;  %v7821_v22 = vsub.f32 %v15429_v63, %v17249_v21  ;;  %v5461_v61 = vmul.f32 %v5457_v57, %v18128_v54  ;;  %v15483_v16 = vpop.f32.mrf.mxu2  ;;  %v18137_v54 = vld [vmem:[#allocation75_spill] sm:$0xff]  ;;  %v18141_v21 = vld [vmem:[#allocation117_spill] sm:$0xff] }
 0x71a   : > { %7758 = vmatpush.msrb.mxu1 %v18122_v23  ;;  %7815 = vmatmul.f32.vlgmr.msrb.gmra.mxu2 %v7814_v2  ;;  %v5470_v0 = vmul.f32 %v5466_v28, %v15452_v38  ;;  %v6214_v17 = vadd.f32 %v18129_v37, %v6097_v7  ;;  %v6277_v2 = vadd.f32 %v18130_v56, %v6210_v35  ;;  %v18132_v23 = vld [vmem:[#allocation95_spill] sm:$0xff]  ;;  %v18136_v28 = vld [vmem:[#allocation114_spill] sm:$0xff]  ;;  %v18138_v37 = vld [vmem:[#allocation113_spill] sm:$0xff] }
 0x71b   : > { %7938 = vmatpush.msrb.mxu3 %v7937_v26  ;;  %8085 = vmatpush.msra.mxu2 %v18126_v40  ;;  %v18131_v26 = vld [vmem:[#allocation99_spill] sm:$0xff]  ;;  %v6218_v27 = vadd.f32 %v18132_v23, %v6105_v29  ;;  %v18134_v40 = vld [vmem:[#allocation100_spill] sm:$0xff]  ;;  %v15490_v57 = vsub.f32 %v5473_v13, %v15463_v11  ;;  %v15496_v56 = vpop.f32.mrf.mxu3  ;;  %v18140_v23 = vld [vmem:[#allocation81_spill] sm:$0xff]  ;;  %v7822_v13 = vand.u32 4294901760, %v7821_v22 }
 0x71c   : > { %7964 = vmatpush.msra.mxu0 %v18127_v60  ;;  %7760 = vmatpush.msrb.mxu1 %v18131_v26  ;;  %v6282_v7 = vadd.f32 %v18136_v28, %v6214_v17  ;;  %v6332_v35 = vadd.f32 %v18137_v54, %v6277_v2  ;;  %v18139_v26 = vld [vmem:[#allocation86_spill] sm:$0xff]  ;;  %v18142_v2 = vand.u32 4294901760, %v18127_v60  ;;  %v18145_v38 = vld [vmem:[#allocation128_spill] sm:$0xff]  ;;  %v18150_v60 = vld [vmem:[#allocation69_spill] sm:$0xff] }
 0x71d   : > { %7940 = vmatmul.f32.vlgmr.msrb.gmra.mxu3 %v15304_v20  ;;  %8089 = vmatpush.msra.mxu2 %v18133_v42  ;;  %18135 = vst [vmem:[#allocation101_spill] sm:$0xff] %v15490_v57  ;;  %v6462_v29 = vadd.f32 %v18139_v26, %v6413_v36  ;;  %v6287_v47 = vadd.f32 %v18140_v23, %v6218_v27  ;;  %v18143_v28 = vld [vmem:[#allocation102_spill] sm:$0xff]  ;;  %v18146_v36 = vld [vmem:[#allocation44_spill] sm:$0xff]  ;;  %v17252_v27 = vand.u32 4294901760, %v15490_v57 }
 0x71e   : > { %8164 = vmatpush.msra.mxu3 %v18134_v40  ;;  %7967 = vmatpush.msra.mxu0 %v18138_v37  ;;  %v5474_v42 = vadd.f32 %v5470_v0, %v5461_v61  ;;  %v6338_v17 = vadd.f32 %v18141_v21, %v6282_v7  ;;  %v18148_v61 = vand.u32 4294901760, %v18138_v37  ;;  %v18149_v21 = vld [vmem:[#allocation105_spill] sm:$0xff]  ;;  %v18151_v7 = vld [vmem:[#allocation118_spill] sm:$0xff]  ;;  %v15525_v37 = vpop.f32.mrf.mxu0 }
 0x71f   : > { %7762 = vmatmul.f32.vlgmr.msrb.gmra.mxu1 %v14740_v30  ;;  %7717 = vmatmul.f32.gmra.mxu0 %v18051_v15  ;;  %v18144_v30 = vld [vmem:[#allocation122_spill] sm:$0xff]  ;;  %v6515_v48 = vadd.f32 %v18145_v38, %v6462_v29  ;;  %v15519_v38 = vpop.f32.mrf.mxu1  ;;  %v18153_v29 = vld [vmem:[#allocation124_spill] sm:$0xff] }
 0x720   : > { %8026 = vmatpush.msra.mxu1 %v18134_v40  ;;  %8093 = vmatpush.msra.mxu2 %v18142_v2  ;;  %v6344_v54 = vadd.f32 %v18144_v30, %v6287_v47  ;;  %v18147_v40 = vld [vmem:[#allocation120_spill] sm:$0xff]  ;;  %v15517_v26 = vand.u32 4294901760, %v5474_v42  ;;  %v6421_v23 = vadd.f32 %v18153_v29, %v6338_v17  ;;  %v18155_v47 = vld [vmem:[#allocation54_spill] sm:$0xff]  ;;  %v18158_v17 = vld [vmem:[#allocation111_spill] sm:$0xff] }
 0x721   : > { %8166 = vmatpush.msra.mxu3 %v18143_v28  ;;  %7970 = vmatpush.msra.mxu0 %v18146_v36  ;;  %v6417_v22 = vadd.f32 %v18147_v40, %v6332_v35  ;;  %v6640_v0 = vadd.f32 %v18150_v60, %v6515_v48  ;;  %v18154_v35 = vand.u32 4294901760, %v18146_v36  ;;  %v18157_v48 = vld [vmem:[#allocation119_spill] sm:$0xff]  ;;  %v15533_v30 = vpop.f32.mrf.mxu2  ;;  %v18162_v29 = vld [vmem:[#allocation60_spill] sm:$0xff] }
 0x722   : > { %8028 = vmatpush.msra.mxu1 %v18143_v28  ;;  %8097 = vmatpush.msra.mxu2 %v18148_v61  ;;  %18152 = vst [vmem:[#allocation67_spill] sm:$0xff] %v15517_v26  ;;  %v6425_v2 = vadd.f32 %v18155_v47, %v6344_v54  ;;  %v18156_v28 = vld [vmem:[#allocation107_spill] sm:$0xff]  ;;  %v18159_v54 = vand.u32 4294901760, %v18151_v7  ;;  %v18160_v61 = vld [vmem:[#allocation112_spill] sm:$0xff] }
 0x723   : > { %8168 = vmatpush.msra.mxu3 %v18149_v21  ;;  %7973 = vmatpush.msra.mxu0 %v18151_v7  ;;  %v6466_v40 = vadd.f32 %v18158_v17, %v6417_v22  ;;  %v6706_v36 = vadd.f32 %v15269_v34, %v6640_v0  ;;  %v5607_v60 = vld [vmem:[#allocation9 + $0x378] sm:$0xff]  ;;  %v18164_v22 = vld [vmem:[#allocation73_spill] sm:$0xff] }
 0x724   : > { %7823 = vmatmul.f32.gmra.mxu2 %v7822_v13  ;;  %8030 = vmatpush.msra.mxu1 %v18149_v21  ;;  %v7829_v13 = vsub.f32 %v15490_v57, %v17252_v27  ;;  %v15543_v21 = vsub.f32 %v5474_v42, %v15517_v26  ;;  %v18163_v47 = vld [vmem:[#allocation71_spill] sm:$0xff]  ;;  %v5606_v42 = vld [vmem:[#allocation9 + $0x370] sm:$0xff] }
 0x725   : > { %8101 = vmatpush.msra.mxu2 %v18154_v35  ;;  %8170 = vmatpush.msra.mxu3 %v18156_v28  ;;  %v6470_v35 = vadd.f32 %v18162_v29, %v6421_v23  ;;  %v6523_v27 = vadd.f32 %v18163_v47, %v6466_v40  ;;  %v18165_v34 = vld [vmem:[#allocation127_spill] sm:$0xff]  ;;  %v18167_v40 = vand.u32 4294901760, %v18157_v48 }
 0x726   : > { %7976 = vmatpush.msra.mxu0 %v18157_v48  ;;  %7944 = vmatmul.f32.gmra.mxu3 %v15390_v45  ;;  %18161 = vst [vmem:[#allocation34_spill] sm:$0xff] %v15543_v21  ;;  %v6474_v0 = vadd.f32 %v18165_v34, %v6425_v2  ;;  %v7830_v7 = vand.u32 4294901760, %v7829_v13  ;;  %v18168_v29 = vld [vmem:[#allocation115_spill] sm:$0xff]  ;;  %v9484_v2 = vld [vmem:[%s16863_s8 + $0x8] sm:$0x7]  ;;  %v18172_v34 = vld [vmem:[#allocation82_spill] sm:$0xff] }
 0x727   : > { %8032 = vmatpush.msra.mxu1 %v18156_v28  ;;  %8105 = vmatpush.msra.mxu2 %v18159_v54  ;;  %v15549_v28 = vpop.f32.mrf.mxu3  ;;  %v6531_v17 = vadd.f32 %v15312_v19, %v6470_v35  ;;  %v18166_v54 = vld [vmem:[#allocation53_spill] sm:$0xff]  ;;  %v15564_v47 = vperm.slane %v9484_v2, 2  ;;  %v15571_v48 = vld [vmem:[#allocation3] sm:$0xff]  ;;  %v15579_v2 = vand.u32 4294901760, %v5606_v42 }
 0x728   : > { %8172 = vmatpush.msra.mxu3 %v18160_v61  ;;  %7979 = vmatpush.msra.mxu0 %v18164_v22  ;;  %v6644_v23 = vadd.f32 %v18166_v54, %v6523_v27  ;;  %v6539_v19 = vadd.f32 %v15408_v50, %v6474_v0  ;;  %18173 = vst [vmem:[#allocation43_spill] sm:$0xff] %v15571_v48  ;;  %v18174_v54 = vand.u32 4294901760, %v18164_v22  ;;  %v18177_v50 = vld [vmem:[#allocation126_spill] sm:$0xff]  ;;  %v15587_v0 = vpop.f32.mrf.mxu1  ;;  %v9486_v27 = vld [vmem:[%s16864_s9 + $0x8] sm:$0xff] }
 0x729   : > { %7766 = vmatmul.f32.gmra.mxu1 %v18051_v15  ;;  %7721 = vmatmul.f32.gmra.mxu0 %v14979_v4  ;;  %v15559_v15 = vand.u32 4294901760, %v5607_v60  ;;  %18170 = vst [vmem:[#allocation68_spill] sm:$0xff] %v15564_v47  ;;  %v5150_v35 = vsub.f32 %v15571_v48, %v14355_v53  ;;  %vm4896_vm2 = vcmp.ge.f32.partialorder %v15571_v48, %v14987_v41  ;;  %v15601_v33 = vperm.slane %v9486_v27, 1  ;;  %v18192_v45 = vld [vmem:[#allocation93_spill] sm:$0xff] }
 0x72a   : > { %8034 = vmatpush.msra.mxu1 %v18160_v61  ;;  %8109 = vmatpush.msra.mxu2 %v18167_v40  ;;  %v18171_v61 = vld [vmem:[#allocation94_spill] sm:$0xff]  ;;  %v18175_v40 = vld [vmem:[#allocation116_spill] sm:$0xff]  ;;  %18176 = vst [vmem:[#allocation109_spill] sm:$0xff] %v15579_v2  ;;  %vm4901_vm3 = vcmp.lt.f32.partialorder %v15571_v48, %v15564_v47  ;;  %v6652_v22 = vadd.f32 %v15465_v44, %v6539_v19  ;;  %v18185_v27 = vand.u32 4294901760, %v15543_v21  ;;  %v18191_v57 = vand.u32 4294901760, %v18177_v50 }
 0x72b   : > { %8174 = vmatpush.msra.mxu3 %v18168_v29  ;;  %18169 = vst [vmem:[#allocation50_spill] sm:$0xff] %v15559_v15  ;;  %v6760_v13 = vadd.f32 %v18171_v61, %v6706_v36  ;;  %7982 = vmatpush.msra.mxu0 %v18172_v34  ;;  %v6648_v36 = vadd.f32 %v15392_v58, %v6531_v17  ;;  %v5605_v61 = vld [vmem:[#allocation9 + $0x368] sm:$0xff]  ;;  %vm15589_vm4 = vmand %vm4896_vm2, %vm4901_vm3 }
 0x72c   : > { %8036 = vmatpush.msra.mxu1 %v18168_v29  ;;  %8113 = vmatpush.msra.mxu2 %v18174_v54  ;;  %v5604_v29 = vld [vmem:[#allocation9 + $0x360] sm:$0xff]  ;;  %v5154_v58 = vmul.f32 %v5150_v35, %v14521_v12  ;;  %v15596_v17 = vsub.f32 %v15564_v47, %v15571_v48  ;;  %18180 = vst [vmem:[#allocation78_spill] sm:$0xff] %v15601_v33  ;;  %v15611_v48 = vpop.f32.mrf.mxu0 }
 0x72d   : > { %8176 = vmatpush.msra.mxu3 %v18175_v40  ;;  %7985 = vmatpush.msra.mxu0 %v18177_v50  ;;  %v6711_v44 = vadd.f32 %v15361_v43, %v6644_v23  ;;  %v6847_v19 = vadd.f32 %v15469_v25, %v6760_v13  ;;  %v15609_v35 = vsub.f32 %v5607_v60, %v15559_v15  ;;  %v15618_v23 = vand.u32 4294901760, %v5605_v61  ;;  %v18190_v13 = vld [vmem:[#allocation125_spill] sm:$0xff] }
 0x72e   : > { %7831 = vmatmul.f32.gmra.mxu2 %v7830_v7  ;;  %8038 = vmatpush.msra.mxu1 %v18175_v40  ;;  %v18181_v7 = vand.u32 4294901760, %v18172_v34  ;;  %v7837_v43 = vsub.f32 %v15543_v21, %v18185_v27  ;;  %v15620_v40 = vand.u32 4294901760, %v5604_v29  ;;  %v5603_v34 = vld [vmem:[#allocation9 + $0x358] sm:$0xff]  ;;  %v9320_v25 = vsel %vm15589_vm4, 1.0, %v17489_v49 }
 0x72f   : > { %18182 = vst [vmem:[#allocation40_spill] sm:$0xff] %v15609_v35  ;;  %8178 = vmatpush.msra.mxu3 %v18183_v51  ;;  %7988 = vmatpush.msra.mxu0 %v18184_v8  ;;  %v15630_v60 = vsub.f32 %v5606_v42, %v15579_v2  ;;  %v5158_v27 = vmul.f32 %v18190_v13, %v5154_v58  ;;  %v15645_v58 = vand.u32 4294901760, %v5603_v34  ;;  %v15647_v13 = vpop.f32.mrf.mxu3  ;;  %v17268_v50 = vand.u32 4294901760, %v15609_v35 }
 0x730   : > { %8117 = vmatpush.msra.mxu2 %v18181_v7  ;;  %18186 = vst [vmem:[#allocation47_spill] sm:$0xff] %v15618_v23  ;;  %v15622_v7 = vpop.f32.mrf.mxu2  ;;  %7948 = vmatmul.f32.gmra.mxu3 %v15463_v11  ;;  %v5167_v21 = vmul.f32 %v15601_v33, %v15596_v17  ;;  %v6716_v54 = vadd.f32 %v15438_v5, %v6648_v36  ;;  %v18193_v11 = vld [vmem:[#allocation123_spill] sm:$0xff]  ;;  %v9487_v5 = vld [vmem:[%s16864_s9 + $0x10] sm:$0xff] }
 0x731   : > { %18187 = vst [vmem:[#allocation80_spill] sm:$0xff] %v15620_v40  ;;  %8040 = vmatpush.msra.mxu1 %v18183_v51  ;;  %8180 = vmatpush.msra.mxu3 %v18192_v45  ;;  %v6721_v63 = vadd.f32 %v15483_v16, %v6652_v22  ;;  %v5327_v51 = vmul.f32 %v15006_v52, %v18193_v11  ;;  %v15652_v36 = vperm.slane %v9487_v5, 3  ;;  %v5602_v22 = vld [vmem:[#allocation9 + $0x350] sm:$0xff] }
 0x732   : > { %18188 = vst [vmem:[#allocation58_spill] sm:$0xff] %v15622_v7  ;;  %8121 = vmatpush.msra.mxu2 %v18191_v57  ;;  %v18194_v7 = vld [vmem:[#allocation90_spill] sm:$0xff]  ;;  %7770 = vmatmul.f32.gmra.mxu1 %v14979_v4  ;;  %v6896_v42 = vadd.f32 %v15519_v38, %v6847_v19  ;;  %v5171_v57 = vmul.f32 %v9320_v25, %v5167_v21  ;;  %v7838_v4 = vand.u32 4294901760, %v7837_v43  ;;  %v18198_v21 = vand.u32 4294901760, %v18184_v8  ;;  %v18199_v19 = vld [vmem:[#allocation37_spill] sm:$0xff] }
 0x733   : > { %18189 = vst [vmem:[#allocation106_spill] sm:$0xff] %v15630_v60  ;;  %7991 = vmatpush.msra.mxu0 %v18194_v7  ;;  %v6766_v16 = vadd.f32 %v15341_v1, %v6711_v44  ;;  %8042 = vmatpush.msra.mxu1 %v18192_v45  ;;  %v15658_v11 = vsub.f32 %v5605_v61, %v15618_v23  ;;  %v17267_v1 = vand.u32 4294901760, %v15630_v60  ;;  %v18200_v61 = vld [vmem:[#allocation84_spill] sm:$0xff]  ;;  %v18201_v5 = vand.u32 4294901760, %v18194_v7 }
 0x734   : > { %18195 = vst [vmem:[#allocation64_spill] sm:$0xff] %v15645_v58  ;;  %7725 = vmatmul.f32.gmra.mxu0 %v15086_v59  ;;  %v15661_v38 = vsub.f32 %v5604_v29, %v15620_v40  ;;  %8125 = vmatpush.msra.mxu2 %v18198_v21  ;;  %v5175_v44 = vadd.f32 %v5171_v57, %v5158_v27  ;;  %v5601_v29 = vld [vmem:[#allocation9 + $0x348] sm:$0xff]  ;;  %v15692_v57 = vand.u32 4294901760, %v5602_v22 }
 0x735   : > { %18196 = vst [vmem:[#allocation61_spill] sm:$0xff] %v15658_v11  ;;  %8182 = vmatpush.msra.mxu3 %v15057_v3  ;;  %v5331_v45 = vmul.f32 %v5327_v51, %v18199_v19  ;;  %v15670_v43 = vadd.f32 %v15440_v9, %v6716_v54  ;;  %7994 = vmatpush.msra.mxu0 %v18200_v61  ;;  %v5600_v54 = vld [vmem:[#allocation9 + $0x340] sm:$0xff]  ;;  %v18203_v51 = vld [vmem:[#allocation39_spill] sm:$0xff]  ;;  %v17270_v7 = vand.u32 4294901760, %v15658_v11 }
 0x736   : > { %18197 = vst [vmem:[#allocation79_spill] sm:$0xff] %v15661_v38  ;;  %8044 = vmatpush.msra.mxu1 %v15057_v3  ;;  %v15675_v8 = vadd.f32 %v15496_v56, %v6721_v63  ;;  %v5336_v25 = vmul.f32 %v15652_v36, %v15596_v17  ;;  %8129 = vmatpush.msra.mxu2 %v18201_v5  ;;  %v18204_v63 = vld [vmem:[#allocation129_spill] sm:$0xff]  ;;  %v17269_v21 = vand.u32 4294901760, %v15661_v38 }
 0x737   : > { %8184 = vmatpush.msra.mxu3 %v15077_v14  ;;  %v6949_v27 = vadd.f32 %v15533_v30, %v6896_v42  ;;  %v15684_v9 = vsub.f32 %v5603_v34, %v15645_v58  ;;  %v5475_v3 = vmul.f32 %v15135_v24, %v18203_v51  ;;  %v15689_v56 = vperm.slane %v18204_v63, 5  ;;  %7997 = vmatpush.msra.mxu0 %v15302_v32  ;;  %v15696_v30 = vpop.f32.mrf.mxu1  ;;  %v5596_v63 = vld [vmem:[#allocation9 + $0x320] sm:$0xff] }
 0x738   : > { %7839 = vmatmul.f32.gmra.mxu2 %v7838_v4  ;;  %18205 = vst [vmem:[#allocation85_spill] sm:$0xff] %v15692_v57  ;;  %v5340_v34 = vmul.f32 %v5336_v25, %v5175_v44  ;;  %8046 = vmatpush.msra.mxu1 %v15077_v14  ;;  %v18206_v42 = vand.u32 4294901760, %v18200_v61  ;;  %v6851_v19 = vadd.f32 %v15525_v37, %v6766_v16  ;;  %v15712_v51 = vand.u32 4294901760, %v5601_v29  ;;  %v15714_v44 = vpop.f32.mrf.mxu0  ;;  %v15720_v37 = vpop.f32.mrf.mxu2  ;;  %v15722_v61 = vld [vmem:[#allocation3 + $0x18] sm:$0xff] }
 0x739   : > { %18202 = vst [vmem:[#allocation97_spill] sm:$0xff] %v15684_v9  ;;  %v15705_v4 = vsub.f32 %v15609_v35, %v17268_v50  ;;  %v15710_v5 = vsub.f32 %v15630_v60, %v17267_v1  ;;  %8186 = vmatpush.msra.mxu3 %v15116_v6  ;;  %8000 = vmatpush.msra.mxu0 %v15320_v55  ;;  %v15718_v14 = vand.u32 4294901760, %v5600_v54 }
 0x73a   : > { %8133 = vmatpush.msra.mxu2 %v18206_v42  ;;  %18207 = vst [vmem:[#allocation48_spill] sm:$0xff] %v15712_v51  ;;  %v5344_v16 = vadd.f32 %v5340_v34, %v5331_v45  ;;  %vm4897_vm5 = vcmp.ge.f32.partialorder %v15722_v61, %v14987_v41  ;;  %vm4902_vm6 = vcmp.lt.f32.partialorder %v15722_v61, %v15564_v47  ;;  %v18210_v42 = vld [vmem:[#allocation41_spill] sm:$0xff]  ;;  %v18211_v34 = vand.u32 4294901760, %v15302_v32  ;;  %v5598_v32 = vld [vmem:[#allocation9 + $0x330] sm:$0xff] }
 0x73b   : > { %18208 = vst [vmem:[#allocation91_spill] sm:$0xff] %v15718_v14  ;;  %7952 = vmatmul.f32.gmra.mxu3 %v15517_v26  ;;  %8048 = vmatpush.msra.mxu1 %v15116_v6  ;;  %v15731_v25 = vadd.f32 %v15549_v28, %v6949_v27  ;;  %v5479_v1 = vmul.f32 %v5475_v3, %v18210_v42  ;;  %v5599_v27 = vld [vmem:[#allocation9 + $0x338] sm:$0xff]  ;;  %vm15763_vm7 = vmand %vm4897_vm5, %vm4902_vm6  ;;  %v18217_v26 = vand.u32 4294901760, %v15320_v55  ;;  %v15813_v55 = vand.u32 4294901760, %v5596_v63 }
 0x73c   : > { %18209 = vst [vmem:[#allocation63_spill] sm:$0xff] %v15722_v61  ;;  %v5484_v45 = vmul.f32 %v15689_v56, %v15596_v17  ;;  %8137 = vmatpush.msra.mxu2 %v18211_v34  ;;  %8188 = vmatpush.msra.mxu3 %v15150_v31  ;;  %v15743_v50 = vsub.f32 %v15658_v11, %v17270_v7  ;;  %v15755_v17 = vpop.f32.mrf.mxu3  ;;  %v5597_v7 = vld [vmem:[#allocation9 + $0x328] sm:$0xff] }
 0x73d   : > { %v15748_v6 = vsub.f32 %v15661_v38, %v17269_v21  ;;  %v15751_v28 = vsub.f32 %v5602_v22, %v15692_v57  ;;  %8003 = vmatpush.msra.mxu0 %v15329_v39  ;;  %7774 = vmatmul.f32.gmra.mxu1 %v15086_v59  ;;  %v5151_v22 = vsub.f32 %v15722_v61, %v14355_v53 }
 0x73e   : > { %v5488_v3 = vmul.f32 %v5484_v45, %v5344_v16  ;;  %v15771_v59 = vsub.f32 %v15564_v47, %v15722_v61  ;;  %8006 = vmatmul.f32.vlgmr.msra.gmra.mxu0 %v15339_v46  ;;  %8050 = vmatpush.msra.mxu1 %v15150_v31  ;;  %v6900_v45 = vadd.f32 %v15587_v0, %v6851_v19  ;;  %v18218_v61 = vand.u32 4294901760, %v15684_v9  ;;  %v5595_v0 = vld [vmem:[#allocation9 + $0x318] sm:$0xff] }
 0x73f   : > { %18212 = vst [vmem:[#allocation103_spill] sm:$0xff] %v15751_v28  ;;  %v15778_v34 = vsub.f32 %v5601_v29, %v15712_v51  ;;  %v15781_v21 = vsub.f32 %v5600_v54, %v15718_v14  ;;  %8141 = vmatpush.msra.mxu2 %v18217_v26  ;;  %8190 = vmatpush.msra.mxu3 %v15228_v18  ;;  %v15791_v16 = vand.u32 4294901760, %v5599_v27  ;;  %v15799_v26 = vand.u32 4294901760, %v5598_v32  ;;  %v18231_v47 = vld [vmem:[#allocation83_spill] sm:$0xff] }
 0x740   : > { %v15789_v31 = vsub.f32 %v15684_v9, %v18218_v61  ;;  %v15793_v29 = vadd.f32 %v5488_v3, %v5479_v1  ;;  %v5155_v54 = vmul.f32 %v5151_v22, %v14521_v12  ;;  %8213 = vmatpush.msrb.mxu0 %v15559_v15  ;;  %8052 = vmatpush.msra.mxu1 %v15228_v18  ;;  %v9321_v19 = vsel %vm15763_vm7, 1.0, %v17489_v49  ;;  %v15823_v49 = vpop.f32.mrf.mxu1  ;;  %v15831_v12 = vpop.f32.mrf.mxu0 }
 0x741   : > { %18215 = vst [vmem:[#allocation70_spill] sm:$0xff] %v15778_v34  ;;  %v5168_v61 = vmul.f32 %v15601_v33, %v15771_v59  ;;  %v18221_v1 = vand.u32 4294901760, %v15329_v39  ;;  %8192 = vmatpush.msra.mxu3 %v15267_v62  ;;  %v8287_v3 = vand.u32 4294901760, %v15710_v5  ;;  %v15811_v22 = vand.u32 4294901760, %v5597_v7  ;;  %v5594_v5 = vld [vmem:[#allocation9 + $0x310] sm:$0xff] }
 0x742   : > { %18216 = vst [vmem:[#allocation72_spill] sm:$0xff] %v15781_v21  ;;  %8215 = vmatpush.msrb.mxu0 %v15579_v2  ;;  %8054 = vmatpush.msra.mxu1 %v15267_v62  ;;  %v6855_v42 = vadd.f32 %v15611_v48, %v15670_v43  ;;  %v15821_v33 = vand.u32 4294901760, %v5595_v0  ;;  %v15829_v62 = vsub.f32 %v5599_v27, %v15791_v16  ;;  %v18224_v48 = vld [vmem:[#allocation49_spill] sm:$0xff]  ;;  %v18226_v14 = vand.u32 4294901760, %v15751_v28 }
 0x743   : > { %18219 = vst [vmem:[#allocation62_spill] sm:$0xff] %v15791_v16  ;;  %8145 = vmatpush.msra.mxu2 %v18221_v1  ;;  %8194 = vmatpush.msra.mxu3 %v15286_v10  ;;  %v5159_v43 = vmul.f32 %v18224_v48, %v5155_v54  ;;  %v5172_v39 = vmul.f32 %v9321_v19, %v5168_v61  ;;  %v18225_v1 = vld [vmem:[#allocation58_spill] sm:$0xff]  ;;  %v15846_v16 = vpop.f32.mrf.mxu2  ;;  %v15857_v61 = vand.u32 4294901760, %v5594_v5 }
 0x744   : > { %18220 = vst [vmem:[#allocation108_spill] sm:$0xff] %v15799_v26  ;;  %8147 = vmatmul.f32.vlgmr.msra.gmra.mxu2 %v15304_v20  ;;  %8217 = vmatpush.msrb.mxu0 %v15618_v23  ;;  %v6957_v53 = vadd.f32 %v18225_v1, %v6900_v45  ;;  %v15841_v18 = vsub.f32 %v15751_v28, %v18226_v14  ;;  %v5593_v14 = vld [vmem:[#allocation9 + $0x308] sm:$0xff]  ;;  %v15881_v48 = vpop.f32.mrf.mxu3 }
 0x745   : > { %18222 = vst [vmem:[#allocation98_spill] sm:$0xff] %v15811_v22  ;;  %8392 = vmatpush.msrb.mxu2 %v15609_v35  ;;  %v15844_v27 = vsub.f32 %v5598_v32, %v15799_v26  ;;  %8056 = vmatpush.msra.mxu1 %v15286_v10  ;;  %v6904_v54 = vadd.f32 %v15696_v30, %v6855_v42  ;;  %v18227_v32 = vand.u32 4294901760, %v15778_v34  ;;  %v18230_v42 = vand.u32 4294901760, %v15339_v46 }
 0x746   : > { %18223 = vst [vmem:[#allocation76_spill] sm:$0xff] %v15829_v62  ;;  %8196 = vmatmul.f32.vlgmr.msra.gmra.mxu3 %v15304_v20  ;;  %v15852_v45 = vsub.f32 %v5597_v7, %v15811_v22  ;;  %v15855_v19 = vsub.f32 %v5596_v63, %v15813_v55  ;;  %v18228_v20 = vand.u32 4294901760, %v15781_v21  ;;  %v15872_v30 = vsub.f32 %v5595_v0, %v15821_v33 }
 0x747   : > { %8395 = vmatpush.msrb.mxu2 %v15630_v60  ;;  %8460 = vmatpush.msrb.mxu3 %v15559_v15  ;;  %v15864_v10 = vsub.f32 %v15778_v34, %v18227_v32  ;;  %v15875_v63 = vand.u32 4294901760, %v15793_v29  ;;  %v5176_v32 = vadd.f32 %v5172_v39, %v5159_v43  ;;  %v5337_v0 = vmul.f32 %v15652_v36, %v15771_v59  ;;  %v18232_v15 = vld [vmem:[#allocation55_spill] sm:$0xff] }
 0x748   : > { %v15869_v7 = vsub.f32 %v15781_v21, %v18228_v20  ;;  %8219 = vmatpush.msrb.mxu0 %v15620_v40  ;;  %8060 = vmatmul.f32.vlgmr.msra.gmra.mxu1 %v18230_v42  ;;  %v5328_v20 = vmul.f32 %v15006_v52, %v18231_v47  ;;  %v18233_v60 = vand.u32 4294901760, %v15705_v4  ;;  %v15891_v35 = vadd.f32 %v15647_v13, %v6957_v53  ;;  %v5592_v53 = vld [vmem:[#allocation9 + $0x300] sm:$0xff] }
 0x749   : > { %18229 = vst [vmem:[#allocation110_spill] sm:$0xff] %v15875_v63  ;;  %8011 = vmatmul.f32.gmra.mxu0 %v18232_v15  ;;  %v17291_v42 = vand.u32 4294901760, %v15844_v27  ;;  %v15895_v1 = vand.u32 4294901760, %v5593_v14  ;;  %8398 = vmatpush.msrb.mxu2 %v15658_v11  ;;  %v6965_v47 = vadd.f32 %v15720_v37, %v6904_v54  ;;  %v6859_v43 = vadd.f32 %v15714_v44, %v15675_v8  ;;  %v4699_v8 = vld [vmem:[%s16865_s10 + $0x78] sm:$0xff]  ;;  %v18237_v44 = vld [vmem:[#allocation88_spill] sm:$0xff] }
 0x74a   : > { %8282 = vmatpush.msrb.mxu1 %v18233_v60  ;;  %8462 = vmatpush.msrb.mxu3 %v15579_v2  ;;  %v15903_v60 = vsub.f32 %v5594_v5, %v15857_v61  ;;  %v15911_v46 = vsub.f32 %v15793_v29, %v15875_v63  ;;  %v18236_v54 = vand.u32 4294901760, %v15829_v62  ;;  %v5332_v29 = vmul.f32 %v5328_v20, %v18237_v44  ;;  %v18238_v37 = vld [vmem:[#allocation92_spill] sm:$0xff] }
 0x74b   : > { %18234 = vst [vmem:[#allocation42_spill] sm:$0xff] %v15895_v1  ;;  %8221 = vmatpush.msrb.mxu0 %v15645_v58  ;;  %8401 = vmatpush.msrb.mxu2 %v15661_v38  ;;  %v5341_v13 = vmul.f32 %v5337_v0, %v5176_v32  ;;  %v15931_v5 = vsub.f32 %v15844_v27, %v17291_v42  ;;  %v18241_v32 = vand.u32 4294901760, %v15743_v50  ;;  %v18243_v0 = vand.u32 4294901760, %v15852_v45  ;;  %v15958_v42 = vpop.f32.mrf.mxu0  ;;  %v18260_v38 = vld [vmem:[#allocation45_spill] sm:$0xff] }
 0x74c   : > { %8288 = vmatpush.msrb.mxu1 %v8287_v3  ;;  %18235 = vst [vmem:[#allocation121_spill] sm:$0xff] %v15911_v46  ;;  %8464 = vmatpush.msrb.mxu3 %v15618_v23  ;;  %v15920_v3 = vsub.f32 %v15829_v62, %v18236_v54  ;;  %v6908_v4 = vadd.f32 %v15823_v49, %v6859_v43  ;;  %v15934_v54 = vand.u32 4294901760, %v5592_v53  ;;  %v15939_v23 = vpop.f32.mrf.mxu1  ;;  %v18244_v49 = vand.u32 4294901760, %v15855_v19 }
 0x74d   : > { %8223 = vmatpush.msrb.mxu0 %v15692_v57  ;;  %8151 = vmatmul.f32.gmra.mxu2 %v18238_v37  ;;  %v15937_v39 = vsub.f32 %v5593_v14, %v15895_v1  ;;  %v15945_v20 = vadd.f32 %v15755_v17, %v6965_v47  ;;  %v15950_v44 = vsub.f32 %v15852_v45, %v18243_v0  ;;  %v18245_v17 = vand.u32 4294901760, %v15872_v30  ;;  %v15970_v0 = vpop.f32.mrf.mxu2 }
 0x74e   : > { %18239 = vst [vmem:[#allocation57_spill] sm:$0xff] %v15934_v54  ;;  %8294 = vmatpush.msrb.mxu1 %v18241_v32  ;;  %8404 = vmatpush.msrb.mxu2 %v15684_v9  ;;  %v15955_v14 = vsub.f32 %v15855_v19, %v18244_v49  ;;  %v15968_v32 = vand.u32 4294901760, %v4699_v8  ;;  %v18247_v49 = vld [vmem:[#allocation56_spill] sm:$0xff]  ;;  %v5345_v50 = vadd.f32 %v5341_v13, %v5332_v29  ;;  %v4698_v13 = vld [vmem:[%s16865_s10 + $0x70] sm:$0xff]  ;;  %v18250_v29 = vld [vmem:[#allocation91_spill] sm:$0xff]  ;;  %v18257_v2 = vand.u32 4294901760, %v15789_v31 }
 0x74f   : > { %18240 = vst [vmem:[#allocation104_spill] sm:$0xff] %v15937_v39  ;;  %8466 = vmatpush.msrb.mxu3 %v15620_v40  ;;  %8225 = vmatpush.msrb.mxu0 %v15712_v51  ;;  %v15966_v47 = vsub.f32 %v15872_v30, %v18245_v17  ;;  %v5476_v43 = vmul.f32 %v15135_v24, %v18247_v49  ;;  %v18248_v40 = vand.u32 4294901760, %v15748_v6  ;;  %v15980_v17 = vld [vmem:[#allocation3 + $0x8] sm:$0xff]  ;;  %v18251_v49 = vand.u32 4294901760, %v18232_v15 }
 0x750   : > { %18242 = vst [vmem:[#allocation99_spill] sm:$0xff] %v15945_v20  ;;  %8200 = vmatmul.f32.gmra.mxu3 %v18238_v37  ;;  %v5485_v9 = vmul.f32 %v15689_v56, %v15771_v59  ;;  %vm4898_vm8 = vcmp.ge.f32.partialorder %v15980_v17, %v14987_v41  ;;  %8407 = vmatpush.msrb.mxu2 %v15751_v28  ;;  %v18255_v59 = vld [vmem:[#allocation65_spill] sm:$0xff]  ;;  %v18271_v20 = vld [vmem:[#allocation46_spill] sm:$0xff] }
 0x751   : > { %18246 = vst [vmem:[#allocation95_spill] sm:$0xff] %v15968_v32  ;;  %8300 = vmatpush.msrb.mxu1 %v18248_v40  ;;  %8468 = vmatpush.msrb.mxu3 %v15645_v58  ;;  %v15988_v37 = vadd.f32 %v15831_v12, %v15731_v25  ;;  %v6973_v40 = vadd.f32 %v15846_v16, %v6908_v4  ;;  %v18252_v12 = vand.u32 4294901760, %v15903_v60  ;;  %v4697_v16 = vld [vmem:[%s16865_s10 + $0x68] sm:$0xff]  ;;  %v16010_v4 = vpop.f32.mrf.mxu3  ;;  %v18258_v58 = vand.u32 4294901760, %v15911_v46 }
 0x752   : > { %18249 = vst [vmem:[#allocation100_spill] sm:$0xff] %v15980_v17  ;;  %v15992_v6 = vsub.f32 %v5592_v53, %v15934_v54  ;;  %8227 = vmatpush.msrb.mxu0 %v18250_v29  ;;  %8066 = vmatmul.f32.gmra.mxu1 %v18251_v49  ;;  %v18254_v53 = vld [vmem:[#allocation68_spill] sm:$0xff]  ;;  %v5152_v15 = vsub.f32 %v15980_v17, %v18255_v59  ;;  %v18256_v49 = vld [vmem:[#allocation101_spill] sm:$0xff] }
 0x753   : > { %v16005_v25 = vsub.f32 %v15903_v60, %v18252_v12  ;;  %18253 = vst [vmem:[#allocation114_spill] sm:$0xff] %v16010_v4  ;;  %vm4903_vm9 = vcmp.lt.f32.partialorder %v15980_v17, %v18254_v53  ;;  %8016 = vmatmul.f32.gmra.mxu0 %v18256_v49  ;;  %8306 = vmatpush.msrb.mxu1 %v18257_v2  ;;  %v16034_v2 = vand.u32 4294901760, %v4698_v13  ;;  %v18262_v12 = vld [vmem:[#allocation89_spill] sm:$0xff] }
 0x754   : > { %v16023_v28 = vsub.f32 %v15911_v46, %v18258_v58  ;;  %v16026_v63 = vsub.f32 %v4699_v8, %v15968_v32  ;;  %v5480_v11 = vmul.f32 %v5476_v43, %v18260_v38  ;;  %vm4907_vm10 = vmand %vm4898_vm8, %vm4903_vm9  ;;  %8410 = vmatpush.msrb.mxu2 %v15778_v34  ;;  %8470 = vmatpush.msrb.mxu3 %v15692_v57  ;;  %v18263_v8 = vld [vmem:[#allocation62_spill] sm:$0xff]  ;;  %v18264_v38 = vand.u32 4294901760, %v15841_v18 }
 0x755   : > { %18261 = vst [vmem:[#allocation113_spill] sm:$0xff] %v16034_v2  ;;  %v5489_v31 = vmul.f32 %v5485_v9, %v5345_v50  ;;  %v5156_v4 = vmul.f32 %v5152_v15, %v18262_v12  ;;  %v5164_v58 = vsub.f32 %v18254_v53, %v15980_v17  ;;  %8229 = vmatpush.msrb.mxu0 %v18263_v8  ;;  %v18265_v43 = vand.u32 4294901760, %v15937_v39  ;;  %v18269_v17 = vld [vmem:[#allocation87_spill] sm:$0xff]  ;;  %v18272_v57 = vld [vmem:[#allocation38_spill] sm:$0xff] }
 0x756   : > { %18259 = vst [vmem:[#allocation75_spill] sm:$0xff] %v16026_v63  ;;  %8312 = vmatpush.msrb.mxu1 %v18264_v38  ;;  %v16048_v34 = vand.u32 4294901760, %v4697_v16  ;;  %v18268_v9 = vmov 0.0   ;;  %8413 = vmatpush.msrb.mxu2 %v15781_v21  ;;  %v18270_v38 = vld [vmem:[#allocation78_spill] sm:$0xff]  ;;  %v16062_v54 = vadd.f32 %v15881_v48, %v6973_v40  ;;  %v4695_v48 = vld [vmem:[%s16865_s10 + $0x58] sm:$0xff]  ;;  %v16078_v40 = vpop.f32.mrf.mxu0 }
 0x757   : > { %v16045_v32 = vsub.f32 %v15937_v39, %v18265_v43  ;;  %v9322_v50 = vsel %vm4907_vm10, 1.0, %v18268_v9  ;;  %8472 = vmatpush.msrb.mxu3 %v15712_v51  ;;  %v5160_v18 = vmul.f32 %v18269_v17, %v5156_v4  ;;  %v5169_v46 = vmul.f32 %v18270_v38, %v5164_v58  ;;  %8231 = vmatpush.msrb.mxu0 %v15799_v26  ;;  %v4696_v17 = vld [vmem:[%s16865_s10 + $0x60] sm:$0xff]  ;;  %v16069_v4 = vpop.f32.mrf.mxu1 }
 0x758   : > { %18267 = vst [vmem:[#allocation81_spill] sm:$0xff] %v16048_v34  ;;  %v5329_v43 = vmul.f32 %v15006_v52, %v18271_v20  ;;  %8155 = vmatmul.f32.gmra.mxu2 %v18272_v57  ;;  %v18274_v20 = vand.u32 4294901760, %v15864_v10  ;;  %v5493_v21 = vadd.f32 %v5489_v31, %v5480_v11  ;;  %v5338_v15 = vmul.f32 %v15652_v36, %v5164_v58 }
 0x759   : > { %18266 = vst [vmem:[#allocation86_spill] sm:$0xff] %v16045_v32  ;;  %8416 = vmatpush.msrb.mxu2 %v15829_v62  ;;  %v5173_v51 = vmul.f32 %v9322_v50, %v5169_v46  ;;  %8474 = vmatpush.msrb.mxu3 %v18250_v29  ;;  %v16090_v11 = vsub.f32 %v4698_v13, %v16034_v2  ;;  %v16095_v46 = vpop.f32.mrf.mxu2  ;;  %v18278_v50 = vand.u32 4294901760, %v15869_v7  ;;  %v16100_v29 = vand.u32 4294901760, %v4696_v17  ;;  %v18280_v62 = vld [vmem:[#allocation52_spill] sm:$0xff]  ;;  %v16114_v7 = vld [vmem:[#allocation3 + $0x10] sm:$0xff] }
 0x75a   : > { %18273 = vst [vmem:[#allocation117_spill] sm:$0xff] %v16062_v54  ;;  %8318 = vmatpush.msrb.mxu1 %v18274_v20  ;;  %8233 = vmatpush.msrb.mxu0 %v15811_v22  ;;  %v18275_v20 = vand.u32 4294901760, %v15992_v6  ;;  %v16093_v31 = vsub.f32 %v4697_v16, %v16048_v34  ;;  %v5333_v54 = vmul.f32 %v5329_v43, %v18280_v62  ;;  %v18282_v13 = vand.u32 4294901760, %v16026_v63 }
 0x75b   : > { %18276 = vst [vmem:[#allocation102_spill] sm:$0xff] %v16090_v11  ;;  %8204 = vmatmul.f32.gmra.mxu3 %v18272_v57  ;;  %v5177_v10 = vadd.f32 %v5173_v51, %v5160_v18  ;;  %8419 = vmatpush.msrb.mxu2 %v15844_v27  ;;  %v16112_v57 = vand.u32 4294901760, %v4695_v48  ;;  %vm4899_vm11 = vcmp.ge.f32.partialorder %v16114_v7, %v14987_v41  ;;  %v18285_v51 = vld [vmem:[#allocation43_spill] sm:$0xff]  ;;  %v18286_v18 = vand.u32 4294901760, %v18256_v49 }
 0x75c   : > { %v16087_v39 = vsub.f32 %v15992_v6, %v18275_v20  ;;  %18277 = vst [vmem:[#allocation122_spill] sm:$0xff] %v16093_v31  ;;  %8324 = vmatpush.msrb.mxu1 %v18278_v50  ;;  %v18281_v20 = vld [vmem:[#allocation66_spill] sm:$0xff]  ;;  %8476 = vmatpush.msrb.mxu3 %v18263_v8  ;;  %v16110_v16 = vsub.f32 %v16026_v63, %v18282_v13  ;;  %v9280_v62 = vmul.f32 -1.442695, %v18285_v51  ;;  %v16122_v43 = vand.u32 4294901760, %v5493_v21  ;;  %v16128_v63 = vpop.f32.mrf.mxu3 }
 0x75d   : > { %18279 = vst [vmem:[#allocation128_spill] sm:$0xff] %v16100_v29  ;;  %v5477_v32 = vmul.f32 %v15135_v24, %v18281_v20  ;;  %8235 = vmatpush.msrb.mxu0 %v15813_v55  ;;  %8072 = vmatmul.f32.gmra.mxu1 %v18286_v18  ;;  %v4694_v50 = vld [vmem:[%s16865_s10 + $0x50] sm:$0xff]  ;;  %v5342_v20 = vmul.f32 %v5338_v15, %v5177_v10  ;;  %v18288_v8 = vand.u32 4294901760, %v15920_v3  ;;  %v18293_v41 = vand.u32 4294901760, %v15931_v5 }
 0x75e   : > { %18283 = vst [vmem:[#allocation44_spill] sm:$0xff] %v16112_v57  ;;  %v5486_v13 = vmul.f32 %v15689_v56, %v5164_v58  ;;  %vm4904_vm12 = vcmp.lt.f32.partialorder %v16114_v7, %v18254_v53  ;;  %v18287_v51 = vld [vmem:[#allocation34_spill] sm:$0xff]  ;;  %v16137_v49 = vadd.f32 %v15958_v42, %v15891_v35  ;;  %v7194_v18 = vadd.f32 %v15939_v23, %v15988_v37  ;;  %v4693_v58 = vld [vmem:[%s16865_s10 + $0x48] sm:$0xff]  ;;  %v18292_v37 = vld [vmem:[#allocation35_spill] sm:$0xff] }
 0x75f   : > { %18284 = vst [vmem:[#allocation120_spill] sm:$0xff] %v16114_v7  ;;  %8021 = vmatmul.f32.gmra.mxu0 %v18287_v51  ;;  %8330 = vmatpush.msrb.mxu1 %v18288_v8  ;;  %vm16148_vm13 = vmand %vm4899_vm11, %vm4904_vm12  ;;  %v5153_v35 = vsub.f32 %v16114_v7, %v18255_v59  ;;  %v16158_v42 = vsub.f32 %v4696_v17, %v16100_v29  ;;  %v16164_v15 = vand.u32 4294901760, %v4694_v50  ;;  %v4692_v23 = vld [vmem:[%s16865_s10 + $0x40] sm:$0xff]  ;;  %9451 = vpow2.f32 %v9280_v62 }
 0x760   : > { %8422 = vmatpush.msrb.mxu2 %v15852_v45  ;;  %8478 = vmatpush.msrb.mxu3 %v15799_v26  ;;  %v5346_v3 = vadd.f32 %v5342_v20, %v5333_v54  ;;  %v5481_v8 = vmul.f32 %v5477_v32, %v18292_v37  ;;  %v16167_v59 = vsub.f32 %v4695_v48, %v16112_v57  ;;  %v16180_v20 = vand.u32 4294901760, %v4693_v58 }
 0x761   : > { %18291 = vst [vmem:[#allocation105_spill] sm:$0xff] %v16158_v42  ;;  %8237 = vmatpush.msrb.mxu0 %v15821_v33  ;;  %8336 = vmatpush.msrb.mxu1 %v18293_v41  ;;  %v5157_v17 = vmul.f32 %v5153_v35, %v18262_v12  ;;  %v5165_v54 = vsub.f32 %v18254_v53, %v16114_v7  ;;  %v9323_v48 = vsel %vm16148_vm13, 1.0, %v18268_v9  ;;  %v18295_v12 = vld [vmem:[#allocation67_spill] sm:$0xff]  ;;  %v16187_v35 = vpop.f32.mrf.mxu1  ;;  %v18296_v53 = vld [vmem:[#allocation33_spill] sm:$0xff]  ;;  %v17323_v10 = vand.u32 4294901760, %v16158_v42 }
 0x762   : > { %18294 = vst [vmem:[#allocation69_spill] sm:$0xff] %v16167_v59  ;;  %8425 = vmatpush.msrb.mxu2 %v15855_v19  ;;  %8480 = vmatpush.msrb.mxu3 %v15811_v22  ;;  %v16178_v5 = vsub.f32 %v5493_v21, %v16122_v43  ;;  %v5490_v32 = vmul.f32 %v5486_v13, %v5346_v3  ;;  %v18297_v22 = vld [vmem:[#allocation77_spill] sm:$0xff]  ;;  %v18298_v13 = vand.u32 4294901760, %v15950_v44  ;;  %v16200_v26 = vand.u32 4294901760, %v4692_v23  ;;  %v16213_v44 = vpop.f32.mrf.mxu2 }
 0x763   : > { %8239 = vmatpush.msrb.mxu0 %v15857_v61  ;;  %8159 = vmatmul.f32.gmra.mxu2 %v18295_v12  ;;  %v5161_v37 = vmul.f32 %v18296_v53, %v5157_v17  ;;  %v5170_v41 = vmul.f32 %v18270_v38, %v5165_v54  ;;  %v5330_v21 = vmul.f32 %v15006_v52, %v18297_v22  ;;  %v4691_v38 = vld [vmem:[%s16865_s10 + $0x38] sm:$0xff]  ;;  %v16205_v17 = vpop.f32.mrf.mxu0  ;;  %v18305_v52 = vld [vmem:[#allocation57_spill] sm:$0xff] }
 0x764   : > { %8342 = vmatpush.msrb.mxu1 %v18298_v13  ;;  %8428 = vmatpush.msrb.mxu2 %v15872_v30  ;;  %v16197_v9 = vadd.f32 %v15970_v0, %v7194_v18  ;;  %v5494_v3 = vadd.f32 %v5490_v32, %v5481_v8  ;;  %v16211_v22 = vsub.f32 %v4694_v50, %v16164_v15  ;;  %v18300_v18 = vand.u32 4294901760, %v15955_v14 }
 0x765   : > { %8482 = vmatpush.msrb.mxu3 %v15813_v55  ;;  %8241 = vmatpush.msrb.mxu0 %v15895_v1  ;;  %v5174_v0 = vmul.f32 %v9323_v48, %v5170_v41  ;;  %v5339_v62 = vmul.f32 %v15652_v36, %v5165_v54  ;;  %v18301_v32 = vand.u32 4294901760, %v16090_v11  ;;  %v16227_v13 = vsub.f32 %v4693_v58, %v16180_v20  ;;  %v18303_v48 = vld [vmem:[#allocation96_spill] sm:$0xff] }
 0x766   : > { %18299 = vst [vmem:[#allocation118_spill] sm:$0xff] %v16211_v22  ;;  %8208 = vmatmul.f32.gmra.mxu3 %v18295_v12  ;;  %8348 = vmatpush.msrb.mxu1 %v18300_v18  ;;  %v16231_v36 = vand.u32 4294901760, %v4691_v38  ;;  %v5334_v12 = vmul.f32 %v5330_v21, %v18303_v48  ;;  %v18304_v41 = vld [vmem:[#allocation36_spill] sm:$0xff]  ;;  %v18307_v58 = vand.u32 4294901760, %v16093_v31  ;;  %v16247_v8 = vsub.f32 %v16158_v42, %v17323_v10 }
 0x767   : > { %v16223_v53 = vsub.f32 %v16090_v11, %v18301_v32  ;;  %18302 = vst [vmem:[#allocation124_spill] sm:$0xff] %v16227_v13  ;;  %8431 = vmatpush.msrb.mxu2 %v15903_v60  ;;  %8484 = vmatpush.msrb.mxu3 %v15821_v33  ;;  %v5178_v14 = vadd.f32 %v5174_v0, %v5161_v37  ;;  %v18306_v32 = vand.u32 4294901760, %v18287_v51  ;;  %v16249_v37 = vand.u32 4294901760, %v5494_v3  ;;  %v9452_v0 = vpop.eup %9451  ;;  %v18311_v42 = vld [vmem:[#allocation104_spill] sm:$0xff] }
 0x768   : > { %v5478_v18 = vmul.f32 %v15135_v24, %v18304_v41  ;;  %8243 = vmatpush.msrb.mxu0 %v18305_v52  ;;  %v16242_v50 = vsub.f32 %v16093_v31, %v18307_v58  ;;  %v16252_v21 = vsub.f32 %v4692_v23, %v16200_v26  ;;  %v16254_v24 = vpop.f32.mrf.mxu3  ;;  %v18309_v51 = vand.u32 4294901760, %v16023_v28  ;;  %v4690_v58 = vld [vmem:[%s16865_s10 + $0x30] sm:$0xff] }
 0x769   : > { %8078 = vmatmul.f32.gmra.mxu1 %v18306_v32  ;;  %v18310_v48 = vand.u32 4294901760, %v15966_v47  ;;  %v7200_v41 = vadd.f32 %v16069_v4, %v16137_v49  ;;  %v5343_v23 = vmul.f32 %v5339_v62, %v5178_v14  ;;  %v5487_v10 = vmul.f32 %v15689_v56, %v5165_v54  ;;  %8434 = vmatpush.msrb.mxu2 %v18311_v42  ;;  %v18315_v14 = vld [vmem:[#allocation40_spill] sm:$0xff] }
 0x76a   : > { %18308 = vst [vmem:[#allocation54_spill] sm:$0xff] %v16252_v21  ;;  %8249 = vmatmul.f32.vlgmr.msrb.gmra.mxu0 %v18309_v51  ;;  %8486 = vmatpush.msrb.mxu3 %v15857_v61  ;;  %v18312_v28 = vand.u32 4294901760, %v16178_v5  ;;  %v18313_v51 = vld [vmem:[#allocation99_spill] sm:$0xff]  ;;  %v18314_v49 = vand.u32 4294901760, %v16167_v59  ;;  %v18316_v56 = vand.u32 4294901760, %v18315_v14  ;;  %v18317_v54 = vand.u32 4294901760, %v16005_v25 }
 0x76b   : > { %8354 = vmatpush.msrb.mxu1 %v18310_v48  ;;  %v7150_v4 = vadd.f32 %v16078_v40, %v18313_v51  ;;  %v8715_v32 = vand.u32 4294901760, %v16110_v16  ;;  %v5347_v31 = vadd.f32 %v5343_v23, %v5334_v12  ;;  %v18319_v40 = vld [vmem:[#allocation51_spill] sm:$0xff]  ;;  %8437 = vmatpush.msrb.mxu2 %v15992_v6  ;;  %v4689_v25 = vld [vmem:[%s16865_s10 + $0x28] sm:$0xff]  ;;  %v16300_v16 = vadd.f32 1.0, %v9452_v0 }
 0x76c   : > { %v8255_v47 = vsub.f32 %v16178_v5, %v18312_v28  ;;  %v16277_v48 = vsub.f32 %v16167_v59, %v18314_v49  ;;  %8519 = vmatpush.msra.mxu0 %v18316_v56  ;;  %v16286_v28 = vsub.f32 %v4691_v38, %v16231_v36  ;;  %v5482_v51 = vmul.f32 %v5478_v18, %v18319_v40  ;;  %v18320_v38 = vld [vmem:[#allocation106_spill] sm:$0xff]  ;;  %v16313_v59 = vpop.f32.mrf.mxu1  ;;  %v18325_v0 = vld [vmem:[#allocation121_spill] sm:$0xff] }
 0x76d   : > { %8360 = vmatpush.msrb.mxu1 %v18317_v54  ;;  %8488 = vmatpush.msrb.mxu3 %v15895_v1  ;;  %v16292_v49 = vsub.f32 %v5494_v3, %v16249_v37  ;;  %v16295_v56 = vand.u32 4294901760, %v4690_v58  ;;  %v18321_v12 = vand.u32 4294901760, %v18320_v38  ;;  %v18322_v18 = vld [vmem:[#allocation86_spill] sm:$0xff]  ;;  %v8721_v54 = vand.u32 4294901760, %v16223_v53 }
 0x76e   : > { %18318 = vst [vmem:[#allocation107_spill] sm:$0xff] %v16286_v28  ;;  %v18323_v23 = vand.u32 4294901760, %v18322_v18  ;;  %v7285_v3 = vadd.f32 %v16095_v46, %v7200_v41  ;;  %v18324_v40 = vand.u32 4294901760, %v16211_v22  ;;  %v5491_v62 = vmul.f32 %v5487_v10, %v5347_v31  ;;  %8440 = vmatmul.f32.vlgmr.msrb.gmra.mxu2 %v18325_v0  ;;  %v18326_v38 = vld [vmem:[#allocation114_spill] sm:$0xff]  ;;  %v18328_v31 = vld [vmem:[#allocation95_spill] sm:$0xff]  ;;  %v18329_v10 = vld [vmem:[#allocation61_spill] sm:$0xff] }
 0x76f   : > { %8523 = vmatpush.msra.mxu0 %v18321_v12  ;;  %8490 = vmatpush.msrb.mxu3 %v18305_v52  ;;  %v7330_v12 = vadd.f32 %v18326_v38, %v16197_v9  ;;  %v8727_v18 = vand.u32 4294901760, %v16242_v50  ;;  %v18327_v53 = vand.u32 4294901760, %v16227_v13  ;;  %v7206_v41 = vadd.f32 %v16187_v35, %v7150_v4  ;;  %v4688_v50 = vld [vmem:[%s16865_s10 + $0x20] sm:$0xff]  ;;  %v16335_v38 = vpop.f32.mrf.mxu2 }
 0x770   : > { %8366 = vmatpush.msrb.mxu1 %v18323_v23  ;;  %v16311_v14 = vsub.f32 %v16211_v22, %v18324_v40  ;;  %v7382_v23 = vpop.f32.mrf.mxu0  ;;  %8647 = vmatpush.msra.mxu2 %v18328_v31  ;;  %v18330_v40 = vand.u32 4294901760, %v18329_v10  ;;  %v8256_v22 = vand.u32 4294901760, %v8255_v47  ;;  %v5495_v1 = vadd.f32 %v5491_v62, %v5482_v51  ;;  %v18338_v10 = vld [vmem:[#allocation63_spill] sm:$0xff] }
 0x771   : > { %v16323_v46 = vsub.f32 %v16227_v13, %v18327_v53  ;;  %v16330_v9 = vand.u32 4294901760, %v4689_v25  ;;  %v18331_v35 = vand.u32 4294901760, %v16087_v39  ;;  %v18332_v4 = vand.u32 4294901760, %v18325_v0  ;;  %8716 = vmatpush.msra.mxu3 %v8715_v32  ;;  %v16368_v32 = vpop.f32.mrf.mxu3  ;;  %v18342_v0 = vld [vmem:[#allocation100_spill] sm:$0xff]  ;;  %v18346_v13 = vld [vmem:[#allocation109_spill] sm:$0xff] }
 0x772   : > { %8527 = vmatpush.msra.mxu0 %v18330_v40  ;;  %v18333_v47 = vand.u32 4294901760, %v16252_v21  ;;  %v16348_v51 = vsub.f32 %v4690_v58, %v16295_v56  ;;  %9453 = vrcp.f32 %v16300_v16  ;;  %8649 = vmatpush.msra.mxu2 %v16034_v2  ;;  %v8733_v39 = vand.u32 4294901760, %v16247_v8  ;;  %v4687_v8 = vld [vmem:[%s16865_s10 + $0x18] sm:$0xff]  ;;  %v18347_v2 = vld [vmem:[#allocation117_spill] sm:$0xff] }
 0x773   : > { %8372 = vmatpush.msrb.mxu1 %v18331_v35  ;;  %8494 = vmatmul.f32.vlgmr.msrb.gmra.mxu3 %v18332_v4  ;;  %v16356_v40 = vadd.f32 %v16128_v63, %v7285_v3  ;;  %v18335_v35 = vld [vmem:[#allocation79_spill] sm:$0xff]  ;;  %v7289_v53 = vadd.f32 %v16213_v44, %v7206_v41  ;;  %v16363_v52 = vand.u32 4294901760, %v4688_v50  ;;  %v9281_v63 = vmul.f32 -1.442695, %v18338_v10  ;;  %v18339_v3 = vld [vmem:[#allocation50_spill] sm:$0xff] }
 0x774   : > { %v16345_v62 = vsub.f32 %v16252_v21, %v18333_v47  ;;  %18334 = vst [vmem:[#allocation119_spill] sm:$0xff] %v16348_v51  ;;  %v18336_v4 = vand.u32 4294901760, %v18335_v35  ;;  %v18337_v47 = vld [vmem:[#allocation110_spill] sm:$0xff]  ;;  %8257 = vmatmul.f32.gmra.mxu0 %v8256_v22  ;;  %v18340_v35 = vand.u32 4294901760, %v16286_v28  ;;  %v16377_v58 = vand.u32 4294901760, %v5495_v1  ;;  %8651 = vmatpush.msra.mxu2 %v16048_v34 }
 0x775   : > { %8374 = vmatmul.f32.vlgmr.msrb.gmra.mxu1 %v18337_v47  ;;  %v16380_v44 = vsub.f32 %v4689_v25, %v16330_v9  ;;  %v4686_v41 = vld [vmem:[%s16865_s10 + $0x10] sm:$0xff]  ;;  %v9282_v21 = vmul.f32 -1.442695, %v18342_v0  ;;  %8722 = vmatpush.msra.mxu3 %v8721_v54  ;;  %v18343_v22 = vand.u32 4294901760, %v16292_v49  ;;  %9455 = vpow2.f32 %v9281_v63  ;;  %v18344_v25 = vld [vmem:[#allocation97_spill] sm:$0xff] }
 0x776   : > { %8531 = vmatpush.msra.mxu0 %v18336_v4  ;;  %8598 = vmatpush.msra.mxu1 %v18339_v3  ;;  %v16375_v4 = vsub.f32 %v16286_v28, %v18340_v35  ;;  %v17344_v35 = vand.u32 4294901760, %v16348_v51  ;;  %v18345_v28 = vand.u32 4294901760, %v18344_v25  ;;  %v16399_v31 = vadd.f32 %v16205_v17, %v18347_v2  ;;  %v18348_v2 = vld [vmem:[#allocation103_spill] sm:$0xff] }
 0x777   : > { %18341 = vst [vmem:[#allocation111_spill] sm:$0xff] %v16380_v44  ;;  %v16390_v10 = vsub.f32 %v16292_v49, %v18343_v22  ;;  %v16401_v54 = vand.u32 4294901760, %v4687_v8  ;;  %9457 = vpow2.f32 %v9282_v21  ;;  %v9283_v22 = vmul.f32 -1.442695, %v16114_v7  ;;  %8653 = vmatpush.msra.mxu2 %v16100_v29  ;;  %8728 = vmatpush.msra.mxu3 %v8727_v18  ;;  %v7507_v18 = vpop.f32.mrf.mxu1 }
 0x778   : > { %8535 = vmatpush.msra.mxu0 %v18345_v28  ;;  %8600 = vmatpush.msra.mxu1 %v18346_v13  ;;  %v16404_v34 = vpop.eup %9453  ;;  %v16408_v63 = vadd.f32 %v16254_v24, %v7289_v53  ;;  %v16411_v28 = vsub.f32 %v4688_v50, %v16363_v52  ;;  %v7383_v13 = vadd.f32 %v7382_v23, %v7330_v12  ;;  %v16413_v25 = vand.u32 4294901760, %v4686_v41  ;;  %v18350_v50 = vld [vmem:[#allocation47_spill] sm:$0xff] }
 0x779   : > { %v18349_v17 = vand.u32 4294901760, %v18348_v2  ;;  %8445 = vmatmul.f32.gmra.mxu2 %v16178_v5  ;;  %v16419_v21 = vsub.f32 %v5495_v1, %v16377_v58  ;;  %v4621_v24 = vmul.f32 %v16404_v34, %v16300_v16  ;;  %9459 = vpow2.f32 %v9283_v22  ;;  %v4685_v1 = vld [vmem:[%s16865_s10 + $0x8] sm:$0xff]  ;;  %v7390_v2 = vpop.f32.mrf.mxu0  ;;  %8734 = vmatpush.msra.mxu3 %v8733_v39  ;;  %v18351_v22 = vld [vmem:[#allocation70_spill] sm:$0xff]  ;;  %v18354_v39 = vld [vmem:[#allocation80_spill] sm:$0xff] }
 0x77a   : > { %8602 = vmatpush.msra.mxu1 %v18350_v50  ;;  %8655 = vmatpush.msra.mxu2 %v16112_v57  ;;  %v8264_v12 = vand.u32 4294901760, %v16390_v10  ;;  %v16430_v23 = vsub.f32 %v16348_v51, %v17344_v35  ;;  %v4631_v53 = vand.u32 2147483648, %v16300_v16  ;;  %v18352_v50 = vand.u32 4294901760, %v18351_v22  ;;  %v4684_v10 = vld [vmem:[%s16865_s10] sm:$0xff]  ;;  %v7573_v51 = vpop.f32.mrf.mxu2 }
 0x77b   : > { %8539 = vmatpush.msra.mxu0 %v18349_v17  ;;  %v7508_v17 = vadd.f32 %v7507_v18, %v7383_v13  ;;  %v4622_v3 = vsub.f32 1.0, %v4621_v24  ;;  %vm4625_vm14 = vweird.f32 %v16300_v16  ;;  %vm4626_vm15 = vweird.f32 %v16404_v34  ;;  %v9456_v57 = vpop.eup %9455 }
 0x77c   : > { %v4629_v35 = vand.u32 2147483647, %v16300_v16  ;;  %v18353_v29 = vand.u32 4294901760, %v16178_v5  ;;  %8604 = vmatpush.msra.mxu1 %v18354_v39  ;;  %v16449_v18 = vsub.f32 %v4687_v8, %v16401_v54  ;;  %v16452_v24 = vsub.f32 %v4686_v41, %v16413_v25  ;;  %8657 = vmatpush.msra.mxu2 %v16164_v15  ;;  %v18356_v8 = vld [vmem:[#allocation72_spill] sm:$0xff]  ;;  %vm16477_vm0 = vmor %vm4625_vm14, %vm4626_vm15 }
 0x77d   : > { %8543 = vmatpush.msra.mxu0 %v18352_v50  ;;  %v7574_v22 = vadd.f32 %v7573_v51, %v7508_v17  ;;  %v9458_v50 = vpop.eup %9457  ;;  %v18355_v7 = vand.u32 4294901760, %v16277_v48  ;;  %v4623_v39 = vmul.f32 %v16404_v34, %v4622_v3  ;;  %v16461_v13 = vadd.f32 1.0, %v9456_v57  ;;  %8378 = vmatmul.f32.gmra.mxu1 %v16122_v43  ;;  %v7627_v3 = vpop.f32.mrf.mxu3  ;;  %v18372_v5 = vld [vmem:[#allocation48_spill] sm:$0xff] }
 0x77e   : > { %8500 = vmatmul.f32.gmra.mxu3 %v18353_v29  ;;  %v16458_v29 = vand.u32 4294901760, %v4685_v1  ;;  %v18357_v11 = vand.u32 4294901760, %v18356_v8  ;;  %v18358_v51 = vand.u32 4294901760, %v16380_v44  ;;  %v16471_v48 = vand.u32 4294901760, %v4684_v10  ;;  %8265 = vmatmul.f32.gmra.mxu0 %v8264_v12  ;;  %v18361_v8 = vld [vmem:[#allocation64_spill] sm:$0xff] }
 0x77f   : > { %8740 = vmatpush.msra.mxu3 %v18355_v7  ;;  %v4632_v57 = vor.u32 1.1754944e-38, %v4631_v53  ;;  %v9460_v17 = vpop.eup %9459  ;;  %8606 = vmatpush.msra.mxu1 %v18361_v8  ;;  %vm16485_vm1 = vcmp.eq.f32.partialorder %v4629_v35, 8.507059e+37  ;;  %9461 = vrcp.f32 %v16461_v13  ;;  %v18364_v16 = vand.u32 4294901760, %v16311_v14 }
 0x780   : > { %8547 = vmatpush.msra.mxu0 %v18357_v11  ;;  %v16469_v41 = vsub.f32 %v16380_v44, %v18358_v51  ;;  %v16481_v11 = vadd.f32 1.0, %v9458_v50  ;;  %v4624_v51 = vadd.f32 %v16404_v34, %v4623_v39  ;;  %v16489_v44 = vadd.f32 %v7627_v3, %v7574_v22  ;;  %8659 = vmatpush.msra.mxu2 %v16180_v20  ;;  %v18366_v22 = vld [vmem:[#allocation76_spill] sm:$0xff]  ;;  %v18368_v3 = vld [vmem:[#allocation85_spill] sm:$0xff] }
 0x781   : > { %8746 = vmatpush.msra.mxu3 %v18364_v16  ;;  %v18365_v53 = vand.u32 4294901760, %v16411_v28  ;;  %v17356_v35 = vand.u32 4294901760, %v16452_v24  ;;  %v18367_v39 = vand.u32 4294901760, %v18366_v22  ;;  %8608 = vmatpush.msra.mxu1 %v18368_v3  ;;  %v18369_v8 = vand.u32 4294901760, %v16419_v21 }
 0x782   : > { %9463 = vrcp.f32 %v16481_v11  ;;  %v16510_v16 = vsub.f32 %v4685_v1, %v16458_v29  ;;  %v16515_v50 = vadd.f32 1.0, %v9460_v17  ;;  %8661 = vmatpush.msra.mxu2 %v16200_v26  ;;  %v18370_v22 = vand.u32 4294901760, %v16323_v46  ;;  %v9491_v17 = vld [vmem:[#allocation3] sm:$0xff] }
 0x783   : > { %v16498_v12 = vsub.f32 %v16411_v28, %v18365_v53  ;;  %8551 = vmatpush.msra.mxu0 %v18367_v39  ;;  %v8271_v14 = vsub.f32 %v16419_v21, %v18369_v8  ;;  %v4628_v53 = vsel %vm16477_vm0, %v16404_v34, %v4624_v51  ;;  %v8763_v39 = vand.u32 4294901760, %v16375_v4  ;;  %8450 = vmatmul.f32.gmra.mxu2 %v16292_v49  ;;  %v7511_v4 = vpop.f32.mrf.mxu1 }
 0x784   : > { %8752 = vmatpush.msra.mxu3 %v18370_v22  ;;  %v4633_v3 = vsel %vm16485_vm1, %v4632_v57, %v4628_v53  ;;  %v16524_v8 = vsub.f32 %v4684_v10, %v16471_v48  ;;  %v7391_v1 = vadd.f32 %v7390_v2, %v16356_v40  ;;  %v18371_v7 = vand.u32 4294901760, %v15844_v27  ;;  %8610 = vmatpush.msra.mxu1 %v18372_v5  ;;  %v7398_v10 = vpop.f32.mrf.mxu0 }
 0x785   : > { %v8769_v34 = vand.u32 4294901760, %v16430_v23  ;;  %v8775_v46 = vand.u32 4294901760, %v16469_v41  ;;  %v4680_v51 = vmul.f32 %v9491_v17, %v4633_v3  ;;  %9465 = vrcp.f32 %v16515_v50  ;;  %8663 = vmatpush.msra.mxu2 %v16231_v36  ;;  %v16543_v57 = vpop.eup %9461  ;;  %v7578_v17 = vpop.f32.mrf.mxu2  ;;  %8382 = vmatmul.f32.gmra.mxu1 %v16249_v37 }
 0x786   : > { %8555 = vmatpush.msra.mxu0 %v18371_v7  ;;  %v7212_v27 = vadd.f32 %v16313_v59, %v16399_v31  ;;  %v18373_v2 = vand.u32 4294901760, %v16449_v18  ;;  %v7512_v41 = vadd.f32 %v7511_v4, %v7391_v1  ;;  %v18374_v53 = vand.u32 4294901760, %v16345_v62  ;;  %v18377_v62 = vld [vmem:[#allocation91_spill] sm:$0xff] }
 0x787   : > { %v18375_v22 = vand.u32 4294901760, %v15852_v45  ;;  %v8272_v3 = vand.u32 4294901760, %v8271_v14  ;;  %v16552_v59 = vsub.f32 %v16452_v24, %v17356_v35  ;;  %v8797_v31 = vand.u32 4294901760, %v16510_v16  ;;  %8612 = vmatpush.msra.mxu1 %v18377_v62  ;;  %8665 = vmatpush.msra.mxu2 %v16295_v56 }
 0x788   : > { %v16541_v23 = vsub.f32 %v16449_v18, %v18373_v2  ;;  %8758 = vmatpush.msra.mxu3 %v18374_v53  ;;  %v16555_v7 = vand.u32 4294901760, %v4680_v51  ;;  %v16557_v1 = vpop.eup %9463  ;;  %v18376_v4 = vand.u32 4294901760, %v16292_v49  ;;  %v4636_v14 = vmul.f32 %v16543_v57, %v16461_v13 }
 0x789   : > { %8559 = vmatpush.msra.mxu0 %v18375_v22  ;;  %vm4640_vm2 = vweird.f32 %v16461_v13  ;;  %v7579_v5 = vadd.f32 %v7578_v17, %v7512_v41  ;;  %v4644_v53 = vand.u32 2147483647, %v16461_v13  ;;  %v4646_v49 = vand.u32 2147483648, %v16461_v13  ;;  %v7633_v41 = vpop.f32.mrf.mxu3  ;;  %v18379_v17 = vld [vmem:[#allocation62_spill] sm:$0xff]  ;;  %8667 = vmatpush.msra.mxu2 %v16330_v9 }
 0x78a   : > { %8506 = vmatmul.f32.gmra.mxu3 %v18376_v4  ;;  %v16568_v2 = vsub.f32 %v4680_v51, %v16555_v7  ;;  %v4651_v22 = vmul.f32 %v16557_v1, %v16481_v11  ;;  %v18378_v4 = vand.u32 4294901760, %v15855_v19  ;;  %v4637_v62 = vsub.f32 1.0, %v4636_v14  ;;  %8273 = vmatmul.f32.gmra.mxu0 %v8272_v3 }
 0x78b   : > { %8764 = vmatpush.msra.mxu3 %v8763_v39  ;;  %vm4641_vm3 = vweird.f32 %v16543_v57  ;;  %vm4655_vm4 = vweird.f32 %v16481_v11  ;;  %v4661_v39 = vand.u32 2147483648, %v16481_v11  ;;  %v16580_v51 = vpop.eup %9465  ;;  %8614 = vmatpush.msra.mxu1 %v18379_v17  ;;  %v16583_v35 = vadd.f32 %v7633_v41, %v7579_v5 }
 0x78c   : > { %8563 = vmatpush.msra.mxu0 %v18378_v4  ;;  %v4652_v40 = vsub.f32 1.0, %v4651_v22  ;;  %vm4656_vm5 = vweird.f32 %v16557_v1  ;;  %v4659_v19 = vand.u32 2147483647, %v16481_v11  ;;  %v8787_v14 = vand.u32 4294901760, %v16541_v23  ;;  %v18381_v22 = vld [vmem:[#allocation108_spill] sm:$0xff]  ;;  %vm16601_vm6 = vmor %vm4640_vm2, %vm4641_vm3  ;;  %8669 = vmatpush.msra.mxu2 %v16363_v52 }
 0x78d   : > { %8770 = vmatpush.msra.mxu3 %v8769_v34  ;;  %v17357_v4 = vand.u32 4294901760, %v16568_v2  ;;  %v4638_v45 = vmul.f32 %v16543_v57, %v4637_v62  ;;  %v4666_v3 = vmul.f32 %v16580_v51, %v16515_v50  ;;  %v18380_v5 = vand.u32 4294901760, %v15872_v30  ;;  %8616 = vmatpush.msra.mxu1 %v18381_v22  ;;  %vm16617_vm8 = vmor %vm4655_vm4, %vm4656_vm5  ;;  %v9492_v34 = vld [vmem:[#allocation3 + $0x18] sm:$0xff] }
 0x78e   : > { %v7293_v41 = vadd.f32 %v16335_v38, %v7212_v27  ;;  %vm16605_vm7 = vcmp.eq.f32.partialorder %v4644_v53, 8.507059e+37  ;;  %v4647_v62 = vor.u32 1.1754944e-38, %v4646_v49  ;;  %v4653_v30 = vmul.f32 %v16557_v1, %v4652_v40  ;;  %8455 = vmatmul.f32.gmra.mxu2 %v16419_v21  ;;  %8386 = vmatmul.f32.gmra.mxu1 %v16377_v58 }
 0x78f   : > { %8567 = vmatpush.msra.mxu0 %v18380_v5  ;;  %8776 = vmatpush.msra.mxu3 %v8775_v46  ;;  %v4639_v38 = vadd.f32 %v16543_v57, %v4638_v45  ;;  %v7399_v27 = vadd.f32 %v7398_v10, %v16408_v63  ;;  %v4662_v53 = vor.u32 1.1754944e-38, %v4661_v39  ;;  %v4667_v17 = vsub.f32 1.0, %v4666_v3  ;;  %v7515_v45 = vpop.f32.mrf.mxu1  ;;  %v18392_v39 = vld [vmem:[#allocation98_spill] sm:$0xff]  ;;  %v7406_v5 = vpop.f32.mrf.mxu0 }
 0x790   : > { %v18388_v49 = vand.u32 4294901760, %v15903_v60  ;;  %v8798_v46 = vsub.f32 %v16510_v16, %v8797_v31  ;;  %v18389_v63 = vand.u32 4294901760, %v16524_v8  ;;  %v4654_v11 = vadd.f32 %v16557_v1, %v4653_v30  ;;  %8618 = vmatpush.msra.mxu1 %v18392_v39  ;;  %8671 = vmatpush.msra.mxu2 %v16401_v54  ;;  %v7583_v39 = vpop.f32.mrf.mxu2  ;;  %v18401_v10 = vld [vmem:[#allocation42_spill] sm:$0xff] }
 0x791   : > { %vm16631_vm9 = vcmp.eq.f32.partialorder %v4659_v19, 8.507059e+37  ;;  %v8681_v60 = vsub.f32 %v16568_v2, %v17357_v4  ;;  %v4643_v3 = vsel %vm16601_vm6, %v16543_v57, %v4639_v38  ;;  %v7516_v22 = vadd.f32 %v7515_v45, %v7399_v27 }
 0x792   : > { %8571 = vmatpush.msra.mxu0 %v18388_v49  ;;  %v8804_v40 = vsub.f32 %v16524_v8, %v18389_v63  ;;  %v18393_v19 = vand.u32 4294901760, %v16498_v12  ;;  %v18394_v30 = vand.u32 4294901760, %v18311_v42  ;;  %v4648_v49 = vsel %vm16605_vm7, %v4647_v62, %v4643_v3  ;;  %8620 = vmatpush.msra.mxu1 %v15813_v55 }
 0x793   : > { %v4658_v63 = vsel %vm16617_vm8, %v16557_v1, %v4654_v11  ;;  %v4668_v4 = vmul.f32 %v16580_v51, %v4667_v17  ;;  %v18395_v57 = vand.u32 4294901760, %v16419_v21  ;;  %v8793_v12 = vand.u32 4294901760, %v16552_v59  ;;  %8673 = vmatpush.msra.mxu2 %v16413_v25  ;;  %v7639_v1 = vpop.f32.mrf.mxu3 }
 0x794   : > { %8782 = vmatpush.msra.mxu3 %v18393_v19  ;;  %8575 = vmatpush.msra.mxu0 %v18394_v30  ;;  %v4681_v42 = vmul.f32 %v9492_v34, %v4648_v49  ;;  %v4663_v23 = vsel %vm16631_vm9, %v4662_v53, %v4658_v63  ;;  %v7584_v62 = vadd.f32 %v7583_v39, %v7516_v22  ;;  %vm4670_vm10 = vweird.f32 %v16515_v50  ;;  %v18404_v63 = vld [vmem:[#allocation57_spill] sm:$0xff] }
 0x795   : > { %8512 = vmatmul.f32.gmra.mxu3 %v18395_v57  ;;  %vm4671_vm11 = vweird.f32 %v16580_v51  ;;  %v18396_v21 = vand.u32 4294901760, %v15992_v6  ;;  %v8799_v55 = vand.u32 4294901760, %v8798_v46  ;;  %v4676_v38 = vand.u32 2147483648, %v16515_v50  ;;  %8622 = vmatpush.msra.mxu1 %v15821_v33 }
 0x796   : > { %8788 = vmatpush.msra.mxu3 %v8787_v14  ;;  %v16665_v59 = vand.u32 4294901760, %v4681_v42  ;;  %v4682_v14 = vmul.f32 %v18342_v0, %v4663_v23  ;;  %v16671_v27 = vadd.f32 %v7639_v1, %v7584_v62  ;;  %v4669_v13 = vadd.f32 %v16580_v51, %v4668_v4  ;;  %8675 = vmatpush.msra.mxu2 %v16458_v29  ;;  %vm16684_vm12 = vmor %vm4670_vm10, %vm4671_vm11  ;;  %v18399_v0 = vld [vmem:[#allocation75_spill] sm:$0xff]  ;;  %v18408_v62 = vld [vmem:[#allocation120_spill] sm:$0xff] }
 0x797   : > { %8579 = vmatpush.msra.mxu0 %v18396_v21  ;;  %v4674_v6 = vand.u32 2147483647, %v16515_v50  ;;  %v7342_v53 = vadd.f32 %v16368_v32, %v7293_v41  ;;  %v8682_v17 = vand.u32 4294901760, %v8681_v60  ;;  %v8805_v46 = vand.u32 4294901760, %v8804_v40  ;;  %8624 = vmatpush.msra.mxu1 %v15857_v61  ;;  %v18400_v40 = vld [vmem:[#allocation102_spill] sm:$0xff]  ;;  %v7519_v60 = vpop.f32.mrf.mxu1  ;;  %v7714_v3 = vpop.f32.mrf.mxu0 }
 0x798   : > { %8581 = vmatmul.f32.vlgmr.msra.gmra.mxu0 %v18337_v47  ;;  %8794 = vmatpush.msra.mxu3 %v8793_v12  ;;  %v16678_v11 = vsub.f32 %v4681_v42, %v16665_v59  ;;  %v4677_v41 = vor.u32 1.1754944e-38, %v4676_v38  ;;  %v16694_v50 = vand.u32 4294901760, %v4682_v14  ;;  %v4673_v45 = vsel %vm16684_vm12, %v16580_v51, %v4669_v13  ;;  %v7588_v49 = vpop.f32.mrf.mxu2  ;;  %v18406_v12 = vld [vmem:[#allocation95_spill] sm:$0xff]  ;;  %v18407_v42 = vld [vmem:[#allocation105_spill] sm:$0xff] }
 0x799   : > { %8826 = vmatpush.msrb.mxu0 %v18399_v0  ;;  %8677 = vmatpush.msra.mxu2 %v16471_v48  ;;  %v7407_v4 = vadd.f32 %v7406_v5, %v7342_v53  ;;  %vm4675_vm13 = vcmp.eq.f32.partialorder %v4674_v6, 8.507059e+37  ;;  %v18402_v22 = vand.u32 4294901760, %v18399_v0  ;;  %v18403_v5 = vld [vmem:[#allocation122_spill] sm:$0xff]  ;;  %v7715_v30 = vadd.f32 %v7714_v3, %v16489_v44  ;;  %v18410_v38 = vld [vmem:[#allocation113_spill] sm:$0xff] }
 0x79a   : > { %8800 = vmatpush.msra.mxu3 %v8799_v55  ;;  %v8688_v32 = vand.u32 4294901760, %v16678_v11  ;;  %8626 = vmatpush.msra.mxu1 %v18401_v10  ;;  %v4678_v51 = vsel %vm4675_vm13, %v4677_v41, %v4673_v45  ;;  %v18405_v57 = vand.u32 4294901760, %v18400_v40  ;;  %v16712_v34 = vsub.f32 %v4682_v14, %v16694_v50  ;;  %v18411_v14 = vld [vmem:[#allocation69_spill] sm:$0xff]  ;;  %v18414_v53 = vld [vmem:[#allocation118_spill] sm:$0xff]  ;;  %v18416_v41 = vld [vmem:[#allocation128_spill] sm:$0xff] }
 0x79b   : > { %8829 = vmatpush.msrb.mxu0 %v18400_v40  ;;  %8683 = vmatmul.f32.vlgmr.msra.gmra.mxu2 %v8682_v17  ;;  %v7520_v61 = vadd.f32 %v7519_v60, %v7407_v4  ;;  %v7645_v44 = vpop.f32.mrf.mxu3  ;;  %v4683_v21 = vmul.f32 %v18408_v62, %v4678_v51  ;;  %v18409_v1 = vand.u32 4294901760, %v18403_v5  ;;  %v18412_v13 = vand.u32 4294901760, %v18407_v42  ;;  %v18413_v6 = vld [vmem:[#allocation81_spill] sm:$0xff]  ;;  %v18417_v40 = vld [vmem:[#allocation124_spill] sm:$0xff]  ;;  %v18422_v51 = vld [vmem:[#allocation107_spill] sm:$0xff] }
 0x79c   : > { %8806 = vmatpush.msra.mxu3 %v8805_v46  ;;  %8953 = vmatpush.msrb.mxu2 %v18402_v22  ;;  %v8689_v19 = vsub.f32 %v16678_v11, %v8688_v32  ;;  %v18415_v33 = vand.u32 4294901760, %v18411_v14  ;;  %v18418_v3 = vand.u32 4294901760, %v18414_v53  ;;  %v18419_v22 = vld [vmem:[#allocation44_spill] sm:$0xff] }
 0x79d   : > { %8832 = vmatpush.msrb.mxu0 %v18403_v5  ;;  %8628 = vmatpush.msra.mxu1 %v18404_v63  ;;  %v7589_v39 = vadd.f32 %v7588_v49, %v7520_v61  ;;  %v16731_v17 = vand.u32 4294901760, %v4683_v21  ;;  %v18421_v63 = vand.u32 4294901760, %v18417_v40 }
 0x79e   : > { %8808 = vmatmul.f32.vlgmr.msra.gmra.mxu3 %v16555_v7  ;;  %8957 = vmatpush.msrb.mxu2 %v18405_v57  ;;  %v8690_v23 = vand.u32 4294901760, %v8689_v19  ;;  %v18424_v57 = vld [vmem:[#allocation119_spill] sm:$0xff] }
 0x79f   : > { %9032 = vmatpush.msrb.mxu3 %v18406_v12  ;;  %8835 = vmatpush.msrb.mxu0 %v18407_v42  ;;  %v16719_v55 = vadd.f32 %v7645_v44, %v7589_v39  ;;  %v7763_v46 = vpop.f32.mrf.mxu1  ;;  %v7718_v0 = vpop.f32.mrf.mxu0  ;;  %v16748_v5 = vsub.f32 %v4683_v21, %v16731_v17  ;;  %v18425_v42 = vand.u32 4294901760, %v18422_v51 }
 0x7a0   : > { %8630 = vmatmul.f32.vlgmr.msra.gmra.mxu1 %v18337_v47  ;;  %8585 = vmatmul.f32.gmra.mxu0 %v16122_v43  ;;  %v8696_v47 = vand.u32 4294901760, %v16712_v34  ;;  %v7764_v4 = vadd.f32 %v7763_v46, %v7715_v30  ;;  %v7719_v45 = vadd.f32 %v7718_v0, %v16583_v35  ;;  %v7816_v60 = vpop.f32.mrf.mxu2  ;;  %v18420_v30 = vld [vmem:[#allocation54_spill] sm:$0xff]  ;;  %v18431_v0 = vand.u32 4294901760, %v16452_v24 }
 0x7a1   : > { %8894 = vmatpush.msrb.mxu1 %v18406_v12  ;;  %8961 = vmatpush.msrb.mxu2 %v18409_v1  ;;  %v8704_v39 = vand.u32 4294901760, %v16748_v5 }
 0x7a2   : > { %9034 = vmatpush.msrb.mxu3 %v18410_v38  ;;  %8838 = vmatpush.msrb.mxu0 %v18411_v14  ;;  %v8697_v10 = vsub.f32 %v16712_v34, %v8696_v47  ;;  %v7817_v61 = vadd.f32 %v7816_v60, %v7764_v4 }
 0x7a3   : > { %8896 = vmatpush.msrb.mxu1 %v18410_v38  ;;  %8965 = vmatpush.msrb.mxu2 %v18412_v13  ;;  %v7941_v19 = vpop.f32.mrf.mxu3  ;;  %v8705_v21 = vsub.f32 %v16748_v5, %v8704_v39  ;;  %v18427_v38 = vand.u32 4294901760, %v18424_v57 }
 0x7a4   : > { %9036 = vmatpush.msrb.mxu3 %v18413_v6  ;;  %8841 = vmatpush.msrb.mxu0 %v18414_v53  ;;  %v16752_v35 = vadd.f32 %v7941_v19, %v7817_v61  ;;  %v8698_v49 = vand.u32 4294901760, %v8697_v10 }
 0x7a5   : > { %8691 = vmatmul.f32.gmra.mxu2 %v8690_v23  ;;  %8898 = vmatpush.msrb.mxu1 %v18413_v6 }
 0x7a6   : > { %8969 = vmatpush.msrb.mxu2 %v18415_v33  ;;  %9038 = vmatpush.msrb.mxu3 %v18416_v41 }
 0x7a7   : > { %8844 = vmatpush.msrb.mxu0 %v18417_v40  ;;  %8812 = vmatmul.f32.gmra.mxu3 %v16665_v59  ;;  %v7767_v12 = vpop.f32.mrf.mxu1  ;;  %v7722_v44 = vpop.f32.mrf.mxu0 }
 0x7a8   : > { %8900 = vmatpush.msrb.mxu1 %v18416_v41  ;;  %8973 = vmatpush.msrb.mxu2 %v18418_v3  ;;  %v7768_v23 = vadd.f32 %v7767_v12, %v7719_v45  ;;  %v7824_v62 = vpop.f32.mrf.mxu2  ;;  %v7723_v1 = vadd.f32 %v7722_v44, %v16671_v27  ;;  %v8706_v27 = vand.u32 4294901760, %v8705_v21 }
 0x7a9   : > { %9040 = vmatpush.msrb.mxu3 %v18419_v22  ;;  %8847 = vmatpush.msrb.mxu0 %v18420_v30 }
 0x7aa   : > { %8634 = vmatmul.f32.gmra.mxu1 %v16122_v43  ;;  %8589 = vmatmul.f32.gmra.mxu0 %v16249_v37  ;;  %v18423_v43 = vand.u32 4294901760, %v18420_v30 }
 0x7ab   : > { %8902 = vmatpush.msrb.mxu1 %v18419_v22  ;;  %8977 = vmatpush.msrb.mxu2 %v18421_v63  ;;  %v7945_v14 = vpop.f32.mrf.mxu3 }
 0x7ac   : > { %9042 = vmatpush.msrb.mxu3 %v16164_v15  ;;  %8850 = vmatpush.msrb.mxu0 %v18422_v51 }
 0x7ad   : > { %8904 = vmatpush.msrb.mxu1 %v16164_v15  ;;  %8981 = vmatpush.msrb.mxu2 %v18423_v43  ;;  %v18426_v15 = vld [vmem:[#allocation111_spill] sm:$0xff] }
 0x7ae   : > { %9044 = vmatpush.msrb.mxu3 %v16180_v20  ;;  %8853 = vmatpush.msrb.mxu0 %v18424_v57  ;;  %v18428_v6 = vand.u32 4294901760, %v18426_v15 }
 0x7af   : > { %8699 = vmatmul.f32.gmra.mxu2 %v8698_v49  ;;  %8906 = vmatpush.msrb.mxu1 %v16180_v20  ;;  %v7825_v20 = vadd.f32 %v7824_v62, %v7768_v23 }
 0x7b0   : > { %8985 = vmatpush.msrb.mxu2 %v18425_v42  ;;  %9046 = vmatpush.msrb.mxu3 %v16200_v26 }
 0x7b1   : > { %8856 = vmatpush.msrb.mxu0 %v18426_v15  ;;  %8816 = vmatmul.f32.gmra.mxu3 %v16694_v50  ;;  %v7946_v13 = vadd.f32 %v7945_v14, %v7825_v20  ;;  %v7726_v53 = vpop.f32.mrf.mxu0  ;;  %v7832_v33 = vpop.f32.mrf.mxu2 }
 0x7b2   : > { %8908 = vmatpush.msrb.mxu1 %v16200_v26  ;;  %8989 = vmatpush.msrb.mxu2 %v18427_v38  ;;  %v18429_v26 = vand.u32 4294901760, %v16411_v28 }
 0x7b3   : > { %9048 = vmatpush.msrb.mxu3 %v16231_v36  ;;  %8859 = vmatpush.msrb.mxu0 %v16411_v28 }
 0x7b4   : > { %8638 = vmatmul.f32.gmra.mxu1 %v16249_v37  ;;  %8593 = vmatmul.f32.gmra.mxu0 %v16377_v58  ;;  %v7771_v37 = vpop.f32.mrf.mxu1 }
 0x7b5   : > { %8910 = vmatpush.msrb.mxu1 %v16231_v36  ;;  %8993 = vmatpush.msrb.mxu2 %v18428_v6  ;;  %v18430_v36 = vand.u32 4294901760, %v16449_v18  ;;  %v7772_v46 = vadd.f32 %v7771_v37, %v7723_v1 }
 0x7b6   : > { %9050 = vmatpush.msrb.mxu3 %v16295_v56  ;;  %8862 = vmatpush.msrb.mxu0 %v16449_v18 }
 0x7b7   : > { %8912 = vmatpush.msrb.mxu1 %v16295_v56  ;;  %8997 = vmatpush.msrb.mxu2 %v18429_v26  ;;  %v7727_v56 = vadd.f32 %v7726_v53, %v16719_v55  ;;  %v7833_v28 = vadd.f32 %v7832_v33, %v7772_v46 }
 0x7b8   : > { %9052 = vmatpush.msrb.mxu3 %v16330_v9  ;;  %8865 = vmatpush.msrb.mxu0 %v16452_v24 }
 0x7b9   : > { %8707 = vmatmul.f32.gmra.mxu2 %v8706_v27  ;;  %8914 = vmatpush.msrb.mxu1 %v16330_v9  ;;  %v7949_v9 = vpop.f32.mrf.mxu3 }
 0x7ba   : > { %9001 = vmatpush.msrb.mxu2 %v18430_v36  ;;  %9054 = vmatpush.msrb.mxu3 %v16363_v52  ;;  %v7950_v18 = vadd.f32 %v7949_v9, %v7833_v28 }
 0x7bb   : > { %8868 = vmatpush.msrb.mxu0 %v16510_v16  ;;  %8820 = vmatmul.f32.gmra.mxu3 %v16731_v17  ;;  %v8007_v24 = vpop.f32.mrf.mxu0  ;;  %v7840_v16 = vpop.f32.mrf.mxu2 }
 0x7bc   : > { %8916 = vmatpush.msrb.mxu1 %v16363_v52  ;;  %9005 = vmatpush.msrb.mxu2 %v18431_v0  ;;  %v18432_v52 = vand.u32 4294901760, %v16524_v8 }
 0x7bd   : > { %9056 = vmatpush.msrb.mxu3 %v16401_v54  ;;  %8871 = vmatpush.msrb.mxu0 %v16524_v8  ;;  %v18433_v8 = vand.u32 4294901760, %v16568_v2 }
 0x7be   : > { %8642 = vmatmul.f32.gmra.mxu1 %v16377_v58  ;;  %8874 = vmatmul.f32.vlgmr.msrb.gmra.mxu0 %v16568_v2  ;;  %v7775_v58 = vpop.f32.mrf.mxu1 }
 0x7bf   : > { %8918 = vmatpush.msrb.mxu1 %v16401_v54  ;;  %9009 = vmatpush.msrb.mxu2 %v8797_v31  ;;  %v7776_v54 = vadd.f32 %v7775_v58, %v7727_v56 }
 0x7c0   : > { %9058 = vmatpush.msrb.mxu3 %v16413_v25 }
 0x7c1   : > { %8920 = vmatpush.msrb.mxu1 %v16413_v25  ;;  %9013 = vmatpush.msrb.mxu2 %v18432_v52  ;;  %v8008_v25 = vadd.f32 %v8007_v24, %v16752_v35  ;;  %v7841_v31 = vadd.f32 %v7840_v16, %v7776_v54 }
 0x7c2   : > { %9060 = vmatpush.msrb.mxu3 %v16458_v29  ;;  %9015 = vmatmul.f32.vlgmr.msrb.gmra.mxu2 %v16555_v7 }
 0x7c3   : > { %8922 = vmatpush.msrb.mxu1 %v16458_v29  ;;  %v7953_v29 = vpop.f32.mrf.mxu3 }
 0x7c4   : > { %9062 = vmatpush.msrb.mxu3 %v16471_v48  ;;  %v7954_v55 = vadd.f32 %v7953_v29, %v7841_v31 }
 0x7c5   : > { %8924 = vmatpush.msrb.mxu1 %v16471_v48  ;;  %9064 = vmatmul.f32.vlgmr.msrb.gmra.mxu3 %v16555_v7 }
 0x7c6   : > { %8928 = vmatmul.f32.vlgmr.msrb.gmra.mxu1 %v18433_v8  ;;  %8879 = vmatmul.f32.gmra.mxu0 %v16678_v11  ;;  %v8061_v4 = vpop.f32.mrf.mxu1  ;;  %v8012_v48 = vpop.f32.mrf.mxu0 }
 0x7c7   : > { %v8062_v7 = vadd.f32 %v8061_v4, %v8008_v25  ;;  %v8013_v41 = vadd.f32 %v8012_v48, %v7946_v13  ;;  %v8148_v2 = vpop.f32.mrf.mxu2 }
 0x7c9   : > { %v8149_v40 = vadd.f32 %v8148_v2, %v8062_v7 }
 0x7ca   : > { %9019 = vmatmul.f32.gmra.mxu2 %v16665_v59 }
 0x7cb   : > { %v8197_v10 = vpop.f32.mrf.mxu3 }
 0x7cc   : > { %v8198_v45 = vadd.f32 %v8197_v10, %v8149_v40 }
 0x7cd   : > { %9068 = vmatmul.f32.gmra.mxu3 %v16665_v59 }
 0x7ce   : > { %8934 = vmatmul.f32.gmra.mxu1 %v8688_v32  ;;  %8884 = vmatmul.f32.gmra.mxu0 %v16712_v34 }
 0x7cf   : > { %v8067_v59 = vpop.f32.mrf.mxu1 }
 0x7d0   : > { %v8017_v11 = vpop.f32.mrf.mxu0  ;;  %v8068_v32 = vadd.f32 %v8067_v59, %v8013_v41  ;;  %v8152_v60 = vpop.f32.mrf.mxu2 }
 0x7d1   : > { %v8018_v61 = vadd.f32 %v8017_v11, %v7950_v18 }
 0x7d2   : > { %9023 = vmatmul.f32.gmra.mxu2 %v16694_v50  ;;  %v8153_v3 = vadd.f32 %v8152_v60, %v8068_v32 }
 0x7d3   : > { %v8201_v22 = vpop.f32.mrf.mxu3 }
 0x7d4   : > { %v8202_v19 = vadd.f32 %v8201_v22, %v8153_v3 }
 0x7d5   : > { %9072 = vmatmul.f32.gmra.mxu3 %v16694_v50 }
 0x7d6   : > { %8940 = vmatmul.f32.gmra.mxu1 %v8696_v47  ;;  %8889 = vmatmul.f32.gmra.mxu0 %v16748_v5 }
 0x7da   : > { %9027 = vmatmul.f32.gmra.mxu2 %v16731_v17  ;;  %v8073_v50 = vpop.f32.mrf.mxu1 }
 0x7db   : > { %v8074_v47 = vadd.f32 %v8073_v50, %v8018_v61  ;;  %v8156_v30 = vpop.f32.mrf.mxu2 }
 0x7dc   : > { %v8022_v34 = vpop.f32.mrf.mxu0 }
 0x7dd   : > { %9076 = vmatmul.f32.gmra.mxu3 %v16731_v17  ;;  %v8023_v35 = vadd.f32 %v8022_v34, %v7954_v55  ;;  %v8157_v49 = vadd.f32 %v8156_v30, %v8074_v47 }
 0x7de   : > { %8946 = vmatmul.f32.gmra.mxu1 %v8704_v39  ;;  %v8205_v63 = vpop.f32.mrf.mxu3 }
 0x7df   : > { %v8206_v51 = vadd.f32 %v8205_v63, %v8157_v49 }
 0x7e6   : > { %v8079_v43 = vpop.f32.mrf.mxu1  ;;  %v8160_v42 = vpop.f32.mrf.mxu2 }
 0x7e7   : > { %v8080_v57 = vadd.f32 %v8079_v43, %v8023_v35  ;;  %v8250_v12 = vpop.f32.mrf.mxu0 }
 0x7e8   : > { %v8251_v52 = vadd.f32 %v8250_v12, %v8198_v45 }
 0x7e9   : > { %v8161_v44 = vadd.f32 %v8160_v42, %v8080_v57  ;;  %v8209_v23 = vpop.f32.mrf.mxu3 }
 0x7eb   : > { %v8210_v62 = vadd.f32 %v8209_v23, %v8161_v44 }
 0x7f1   : > { %v8258_v17 = vpop.f32.mrf.mxu0  ;;  %v8441_v21 = vpop.f32.mrf.mxu2 }
 0x7f2   : > { %v8375_v15 = vpop.f32.mrf.mxu1  ;;  %v8259_v25 = vadd.f32 %v8258_v17, %v8202_v19 }
 0x7f3   : > { %v8376_v54 = vadd.f32 %v8375_v15, %v8251_v52 }
 0x7f5   : > { %v8442_v24 = vadd.f32 %v8441_v21, %v8376_v54 }
 0x7f6   : > { %v8495_v5 = vpop.f32.mrf.mxu3 }
 0x7f7   : > { %v8496_v29 = vadd.f32 %v8495_v5, %v8442_v24 }
 0x7fa   : > { %v8379_v39 = vpop.f32.mrf.mxu1 }
 0x7fb   : > { %v8266_v1 = vpop.f32.mrf.mxu0  ;;  %v8380_v55 = vadd.f32 %v8379_v39, %v8259_v25 }
 0x7fc   : > { %v8446_v20 = vpop.f32.mrf.mxu2  ;;  %v8267_v2 = vadd.f32 %v8266_v1, %v8206_v51 }
 0x7fd   : > { %v8447_v7 = vadd.f32 %v8446_v20, %v8380_v55 }
 0x801   : > { %v8501_v38 = vpop.f32.mrf.mxu3 }
 0x802   : > { %v8383_v14 = vpop.f32.mrf.mxu1  ;;  %v8502_v10 = vadd.f32 %v8501_v38, %v8447_v7 }
 0x803   : > { %v8384_v59 = vadd.f32 %v8383_v14, %v8267_v2 }
 0x806   : > { %v8451_v27 = vpop.f32.mrf.mxu2 }
 0x807   : > { %v8274_v13 = vpop.f32.mrf.mxu0  ;;  %v8452_v3 = vadd.f32 %v8451_v27, %v8384_v59 }
 0x808   : > { %v8275_v50 = vadd.f32 %v8274_v13, %v8210_v62 }
 0x80b   : > { %v8387_v26 = vpop.f32.mrf.mxu1 }
 0x80c   : > { %v8388_v35 = vadd.f32 %v8387_v26, %v8275_v50 }
 0x80d   : > { %v8507_v6 = vpop.f32.mrf.mxu3 }
 0x80e   : > { %v8508_v30 = vadd.f32 %v8507_v6, %v8452_v3 }
 0x811   : > { %v8456_v36 = vpop.f32.mrf.mxu2 }
 0x812   : > { %v8457_v42 = vadd.f32 %v8456_v36, %v8388_v35 }
 0x815   : > { %v8582_v37 = vpop.f32.mrf.mxu0 }
 0x816   : > { %v8583_v48 = vadd.f32 %v8582_v37, %v8496_v29 }
 0x818   : > { %v8513_v53 = vpop.f32.mrf.mxu3 }
 0x819   : > { %v8514_v39 = vadd.f32 %v8513_v53, %v8457_v42 }
 0x81d   : > { %v8631_v46 = vpop.f32.mrf.mxu1  ;;  %v8586_v33 = vpop.f32.mrf.mxu0 }
 0x81e   : > { %v8684_v56 = vpop.f32.mrf.mxu2  ;;  %v8632_v41 = vadd.f32 %v8631_v46, %v8583_v48  ;;  %v8587_v60 = vadd.f32 %v8586_v33, %v8502_v10 }
 0x820   : > { %v8685_v11 = vadd.f32 %v8684_v56, %v8632_v41 }
 0x821   : > { %v8809_v28 = vpop.f32.mrf.mxu3 }
 0x822   : > { %v8810_v22 = vadd.f32 %v8809_v28, %v8685_v11 }
 0x827   : > { %v8635_v0 = vpop.f32.mrf.mxu1  ;;  %v8590_v9 = vpop.f32.mrf.mxu0 }
 0x828   : > { %v8692_v18 = vpop.f32.mrf.mxu2  ;;  %v8636_v19 = vadd.f32 %v8635_v0, %v8587_v60  ;;  %v8591_v51 = vadd.f32 %v8590_v9, %v8508_v30 }
 0x82a   : > { %v8813_v58 = vpop.f32.mrf.mxu3  ;;  %v8693_v49 = vadd.f32 %v8692_v18, %v8636_v19 }
 0x82c   : > { %v8814_v44 = vadd.f32 %v8813_v58, %v8693_v49 }
 0x831   : > { %v8639_v16 = vpop.f32.mrf.mxu1  ;;  %v8594_v8 = vpop.f32.mrf.mxu0 }
 0x832   : > { %v8700_v31 = vpop.f32.mrf.mxu2  ;;  %v8640_v23 = vadd.f32 %v8639_v16, %v8591_v51  ;;  %v8595_v38 = vadd.f32 %v8594_v8, %v8514_v39 }
 0x834   : > { %v8817_v4 = vpop.f32.mrf.mxu3  ;;  %v8701_v62 = vadd.f32 %v8700_v31, %v8640_v23 }
 0x836   : > { %v8818_v27 = vadd.f32 %v8817_v4, %v8701_v62 }
 0x83b   : > { %v8643_v40 = vpop.f32.mrf.mxu1  ;;  %v8875_v32 = vpop.f32.mrf.mxu0 }
 0x83c   : > { %v8708_v45 = vpop.f32.mrf.mxu2  ;;  %v8876_v34 = vadd.f32 %v8875_v32, %v8810_v22  ;;  %v8644_v6 = vadd.f32 %v8643_v40, %v8595_v38 }
 0x83e   : > { %v8821_v61 = vpop.f32.mrf.mxu3  ;;  %v8709_v33 = vadd.f32 %v8708_v45, %v8644_v6 }
 0x840   : > { %v8822_v18 = vadd.f32 %v8821_v61, %v8709_v33 }
 0x843   : > { %v8929_v47 = vpop.f32.mrf.mxu1  ;;  %v8880_v63 = vpop.f32.mrf.mxu0 }
 0x844   : > { %v8930_v43 = vadd.f32 %v8929_v47, %v8876_v34  ;;  %v8881_v21 = vadd.f32 %v8880_v63, %v8814_v44 }
 0x845   : > { %v9016_v57 = vpop.f32.mrf.mxu2 }
 0x846   : > { %v9017_v12 = vadd.f32 %v9016_v57, %v8930_v43 }
 0x848   : > { %v9065_v15 = vpop.f32.mrf.mxu3 }
 0x849   : > { %v9066_v17 = vadd.f32 %v9065_v15, %v9017_v12 }
 0x84b   : > { %9080 = vst [vmem:[#allocation10] sm:$0xff] %v9066_v17  ;;  %v8935_v5 = vpop.f32.mrf.mxu1  ;;  %v8885_v20 = vpop.f32.mrf.mxu0 }
 0x84c   : > { %v8936_v1 = vadd.f32 %v8935_v5, %v8881_v21  ;;  %v8886_v46 = vadd.f32 %v8885_v20, %v8818_v27 }
 0x84d   : > { %v9020_v14 = vpop.f32.mrf.mxu2 }
 0x84e   : > { %v9021_v13 = vadd.f32 %v9020_v14, %v8936_v1 }
 0x850   : > { %v9069_v26 = vpop.f32.mrf.mxu3 }
 0x851   : > { %v9070_v37 = vadd.f32 %v9069_v26, %v9021_v13 }
 0x853   : > { %9081 = vst [vmem:[#allocation10 + $0x8] sm:$0xff] %v9070_v37  ;;  %v8941_v36 = vpop.f32.mrf.mxu1  ;;  %v8890_v0 = vpop.f32.mrf.mxu0 }
 0x854   : > { %v8942_v56 = vadd.f32 %v8941_v36, %v8886_v46  ;;  %v8891_v58 = vadd.f32 %v8890_v0, %v8822_v18 }
 0x855   : > { %v9024_v28 = vpop.f32.mrf.mxu2 }
 0x856   : > { %v9025_v9 = vadd.f32 %v9024_v28, %v8942_v56 }
 0x858   : > { %v9073_v53 = vpop.f32.mrf.mxu3 }
 0x859   : > { %v9074_v52 = vadd.f32 %v9073_v53, %v9025_v9 }
 0x85b   : > { %9082 = vst [vmem:[#allocation10 + $0x10] sm:$0xff] %v9074_v52  ;;  %v8947_v54 = vpop.f32.mrf.mxu1 }
 0x85c   : > { %v8948_v24 = vadd.f32 %v8947_v54, %v8891_v58 }
 0x85d   : > { %v9028_v16 = vpop.f32.mrf.mxu2 }
 0x85e   : > { %v9029_v25 = vadd.f32 %v9028_v16, %v8948_v24 }
 0x860   : > { %v9077_v8 = vpop.f32.mrf.mxu3 }
 0x861   : > { %v9078_v31 = vadd.f32 %v9077_v8, %v9029_v25 }
 0x863   : > { %9083 = vst [vmem:[#allocation10 + $0x18] sm:$0xff] %v9078_v31 }
 0x864 PF: > { %p9397_p4 = scmp.eq.s32.totalorder %s9753_s25, 1  ;;  %s9666_s30 = smov [#allocation10]  }
 0x865   : > { %s9089_s26 = sshll.u32 %s9666_s30, 4  ;;  %s9091_s19 = sshll.u32 %s16867_s12, 4  ;;  %s9090_s26 = int_to_ptr.vmem [resolvable:$true] %s9089_s26  ;;  %s9092_s19 = int_to_ptr.hbm [resolvable:$true] %s9091_s19 }
 0x866   : > { %s9667_s20 = smov 128   ;;  %s9668_s11 = smov 8  }
 0x867   : > { %9378 = dma.vmem_to_hbm [thread:$0]  (%p9397_p4), %s9090_s26, 512, %s9092_s19, [#allocation6], %s9667_s20, %s9667_s20, %s9668_s11  }
 0x868   : > { %9636 = dma.done.wait (%p9397_p4), [#allocation6], 512  }
 0x869   : > { %9638 = vsyncadd (%p9397_p4), [#allocation6], 4294966784 }
 0x86a PF: > { %s18434_s16 = sld [smem:[#allocation14_spill]]  ;;  %p24_p5 = scmp.ge.s32.totalorder %s9781_s27, 4  }
 0x86b   : > { %s18435_s23 = sld [smem:[#allocation15_spill]]  ;;  %s18436_s21 = smov %s9645_s22 }
 0x86c   : > { %s18438_s24 = smov %s9781_s27  ;;  %26 = sbr.rel (!%p24_p5) target bundleno = 8 (0x8), region = 127 }
 0x870   : > { %s18437_s22 = smov %s18434_s16 }
 0x871   :  { %9108 = vsyncpa [#allocation5], 1 }
 0x872   :  { %9110 = vsyncpa [#allocation5 + $0x1], 1 }
 0x873   :  { %9111 = vsyncpa [#allocation8], 1 }
 0x874   :  { %9112 = vsyncpa [#allocation6], 1 }
 0x875   :  { %9114 = vsyncpa [#allocation6 + $0x1], 1 }

</bundles_post_ra>
